<compile_context>
chip_gen: v7x
topology: tpu7x:2x2x1
jax: 0.10.0
libtpu: 0.0.40
codegen_flags: <defaults>
</compile_context>

<pallas_src>
import functools

import jax
import jax.numpy as jnp
import numpy as np
from jax.experimental import pallas as pl
from jax.experimental.pallas import tpu as pltpu

EMB = 300            # semantic embedding dim
HID = 300            # LSTM hidden dim
HID_P = 384          # hidden dim padded to a lane multiple (3 * 128)
FC = 512             # fc width
VIS = 2048           # visual feature dim
RELATION_NUM = 51    # cfg.MODEL.RELATION_HEADS.RELATION_NUM
INSTANCE_NUM = 151   # cfg.MODEL.RELATION_HEADS.INSTANCE_NUM
REL = RELATION_NUM - 1       # 50 real predicate outputs
REL_P = 128                  # lane-padded predicate width (unmasked stores)
N_CLASSES = INSTANCE_NUM - 1 # 150 object classes (0-based)
NCP = 256                    # class axis padded for the one-hot gather matmul


def _round_up(x, m):
    return ((x + m - 1) // m) * m


def _pick_tile_n(n, target=256):
    """Adaptive pair-row tile: multiple of 64, capped at `target`, and aiming
    for >= 2 grid steps when N is large enough (v7x 2-TensorCore sharding)."""
    if n <= 0:
        return 64
    half = (n + 1) // 2
    return max(64, min(target, _round_up(half, 64)))


def _predicate_kernel(
    idx_ref, vis_ref,                # (tn, 2) i32, (tn, 2048) bf16
    cls_gates, w_hg, b_g,            # (NCP, 4*HID_P) bf16, (HID_P, 4*HID_P) bf16, (1, 4*HID_P) f32
    w_llstm, b_llstm,                # (HID_P, 512) bf16, (1, 512) f32
    w_lang, b_lang,                  # (512, 512) bf16, (1, 512) f32
    w_vis, b_vis,                    # (2048, 512) bf16, (1, 512) f32
    w_fc1_l, w_fc1_v, b_fc1,         # (512, 512) bf16 x2, (1, 512) f32
    w_fc2, b_fc2,                    # (512, REL_P) bf16, (1, REL_P) f32
    pred_ref, feat_ref,
):
    sig, tanh = jax.nn.sigmoid, jnp.tanh

    def dot(a, w_ref):               # bf16 x bf16 MXU matmul, f32 accumulation
        return jnp.dot(a.astype(jnp.bfloat16), w_ref[...],
                       preferred_element_type=jnp.float32)

    tn = idx_ref.shape[0]
    ncp = cls_gates.shape[0]

    # ---- semantic-embedding lookup fused with the LSTM input projection ----
    # Per-class gate pre-activations were precomputed on the host
    # (cls_gates[c] = Embed[c] @ [W_ii|W_if|W_ig|W_io]); the in-kernel gather
    # is a one-hot (tn, NCP) @ (NCP, 4*HID_P) MXU matmul (cheap vs real MACs).
    idx = idx_ref[...]                                                  # (tn, 2) i32
    class_iota = jax.lax.broadcasted_iota(jnp.int32, (tn, ncp), 1)
    oh_s = (idx[:, 0:1] == class_iota).astype(jnp.bfloat16)             # (tn, NCP)
    oh_o = (idx[:, 1:2] == class_iota).astype(jnp.bfloat16)
    gx_s = jnp.dot(oh_s, cls_gates[...], preferred_element_type=jnp.float32)
    gx_o = jnp.dot(oh_o, cls_gates[...], preferred_element_type=jnp.float32)
    bg = b_g[...]

    # ---- LSTM step 1 (subject token), h0 = c0 = 0 --------------------------
    g1s = gx_s + bg
    i0 = sig(g1s[:, 0 * HID_P:1 * HID_P])
    g0 = tanh(g1s[:, 2 * HID_P:3 * HID_P])
    o0 = sig(g1s[:, 3 * HID_P:4 * HID_P])
    c1 = i0 * g0                 # f0 * c0 == 0
    h1 = o0 * tanh(c1)

    # ---- LSTM step 2 (object token) -----------------------------------------
    g2 = gx_o + dot(h1, w_hg) + bg
    i1 = sig(g2[:, 0 * HID_P:1 * HID_P])
    f1 = sig(g2[:, 1 * HID_P:2 * HID_P])
    g1 = tanh(g2[:, 2 * HID_P:3 * HID_P])
    o1 = sig(g2[:, 3 * HID_P:4 * HID_P])
    c2 = f1 * c1 + i1 * g1
    h2 = o1 * tanh(c2)           # lstm_out[:, -1, :]  (lane-padded; pad lanes are 0)

    # ---- language / visual branches ------------------------------------------
    llstm = dot(h2, w_llstm) + b_llstm[...]
    lang = jnp.maximum(dot(llstm, w_lang) + b_lang[...], 0.0)
    vis = jnp.maximum(dot(vis_ref[...], w_vis) + b_vis[...], 0.0)

    # concat([lang, vis]) @ W_fc1  ==  lang @ W_fc1[:512] + vis @ W_fc1[512:]
    feat = jnp.maximum(
        dot(lang, w_fc1_l) + dot(vis, w_fc1_v) + b_fc1[...], 0.0)
    pred = sig(dot(feat, w_fc2) + b_fc2[...])

    feat_ref[...] = feat
    pred_ref[...] = pred


def make_params(key):
    """Deterministic synthetic f32 parameters matching the module's shapes."""
    ks = jax.random.split(key, 32)
    s = 0.05
    p = {}
    p["semantic_embed"] = jax.random.normal(ks[0], (N_CLASSES, EMB), jnp.float32) * s
    # LSTM (PyTorch gate order i, f, g, o), stored as (in, out) for x @ W.
    for n, name in enumerate(["i", "f", "g", "o"]):
        p[f"wi{name}"] = jax.random.normal(ks[1 + n], (EMB, HID), jnp.float32) * s
        p[f"wh{name}"] = jax.random.normal(ks[5 + n], (HID, HID), jnp.float32) * s
        b_ih = jax.random.normal(ks[9 + n], (HID,), jnp.float32) * s
        b_hh = jax.random.normal(ks[13 + n], (HID,), jnp.float32) * s
        p[f"b{name}"] = (b_ih + b_hh).reshape(1, HID)
    p["w_llstm"] = jax.random.normal(ks[17], (HID, FC), jnp.float32) * s
    p["b_llstm"] = jax.random.normal(ks[18], (1, FC), jnp.float32) * s
    p["w_lang"] = jax.random.normal(ks[19], (FC, FC), jnp.float32) * s
    p["b_lang"] = jax.random.normal(ks[20], (1, FC), jnp.float32) * s
    p["w_vis"] = jax.random.normal(ks[21], (VIS, FC), jnp.float32) * s
    p["b_vis"] = jax.random.normal(ks[22], (1, FC), jnp.float32) * s
    p["w_fc1_l"] = jax.random.normal(ks[23], (FC, FC), jnp.float32) * s
    p["w_fc1_v"] = jax.random.normal(ks[24], (FC, FC), jnp.float32) * s
    p["b_fc1"] = jax.random.normal(ks[25], (1, FC), jnp.float32) * s
    p["w_fc2"] = jax.random.normal(ks[26], (FC, REL), jnp.float32) * s
    p["b_fc2"] = jax.random.normal(ks[27], (1, REL), jnp.float32) * s
    return p


def prepare_kernel_params(p):
    """Fuse/pad weights and cast matmul weights to bf16.

    The static semantic-embedding table is pre-multiplied through the LSTM
    input projection (gather of a linear map of a fixed table == linear map of
    the gathered table), producing cls_gates so the kernel can gather with a
    one-hot MXU matmul instead of an XLA gather + x @ W matmul."""
    f2b = lambda x: x.astype(jnp.bfloat16)

    def pad_cols(w, to):
        return jnp.pad(w, ((0, 0), (0, to - w.shape[1])))

    def pad_rows(w, to):
        return jnp.pad(w, ((0, to - w.shape[0]), (0, 0)))

    kp = {}
    # Fused gate weights (order i, f, g, o), each gate padded to HID_P lanes
    # so in-kernel gate slices are 128-lane aligned.  Padded columns/rows are
    # zero, so padded hidden lanes stay exactly zero through both LSTM steps.
    w_xg = jnp.concatenate(
        [pad_cols(p[f"wi{g}"], HID_P) for g in "ifgo"], axis=1)         # (300, 1536)
    cls_gates = p["semantic_embed"] @ w_xg                              # (150, 1536) f32
    kp["cls_gates"] = f2b(pad_rows(cls_gates, NCP))                     # (256, 1536)
    w_hg = jnp.concatenate(
        [pad_cols(pad_rows(p[f"wh{g}"], HID_P), HID_P) for g in "ifgo"],
        axis=1)                                                         # (384, 1536)
    b_g = jnp.concatenate(
        [pad_cols(p[f"b{g}"], HID_P) for g in "ifgo"], axis=1)          # (1, 1536)
    kp["w_hg"] = f2b(w_hg)
    kp["b_g"] = b_g                                  # biases stay f32
    kp["w_llstm"] = f2b(pad_rows(p["w_llstm"], HID_P))
    kp["b_llstm"] = p["b_llstm"]
    kp["w_lang"] = f2b(p["w_lang"])
    kp["b_lang"] = p["b_lang"]
    kp["w_vis"] = f2b(p["w_vis"])
    kp["b_vis"] = p["b_vis"]
    kp["w_fc1_l"] = f2b(p["w_fc1_l"])
    kp["w_fc1_v"] = f2b(p["w_fc1_v"])
    kp["b_fc1"] = p["b_fc1"]
    kp["w_fc2"] = f2b(pad_cols(p["w_fc2"], REL_P))   # (512, 128)
    kp["b_fc2"] = pad_cols(p["b_fc2"], REL_P)        # (1, 128)
    return kp


def quantize_for_ref(p):
    """Round weight matrices through bf16 (same quantization the kernel uses)
    so the pure-JAX reference isolates the kernel's structural correctness."""
    q = dict(p)
    for k in p:
        if k.startswith("w") or k == "semantic_embed":
            q[k] = p[k].astype(jnp.bfloat16).astype(jnp.float32)
    return q


_KW_ORDER = [
    "cls_gates", "w_hg", "b_g",
    "w_llstm", "b_llstm",
    "w_lang", "b_lang",
    "w_vis", "b_vis",
    "w_fc1_l", "w_fc1_v", "b_fc1",
    "w_fc2", "b_fc2",
]


@functools.partial(jax.jit, static_argnames=("tile_override",))
def predicate_head_pallas(kparams, subobj_categories, visual_features,
                          tile_override=None):
    """subobj_categories: (N, 2) int32 of (sub_class-1, obj_class-1);
       visual_features:   (N, 2048) float32."""
    n = subobj_categories.shape[0]
    tile_n = int(tile_override) if tile_override is not None else _pick_tile_n(n)

    idx = subobj_categories.astype(jnp.int32)
    vis = visual_features.astype(jnp.bfloat16)

    # Pad the pair dimension to a multiple of the tile; padded rows (class 0,
    # zero visual features) are sliced off below.
    n_pad = _round_up(n, tile_n)
    pad = n_pad - n
    if pad:
        idx = jnp.pad(idx, ((0, pad), (0, 0)))
        vis = jnp.pad(vis, ((0, pad), (0, 0)))

    grid = (n_pad // tile_n,)
    weights = [kparams[k] for k in _KW_ORDER]

    data_specs = [
        pl.BlockSpec((tile_n, 2), lambda i: (i, 0)),      # class indices
        pl.BlockSpec((tile_n, VIS), lambda i: (i, 0)),    # visual features
    ]
    # Grid-invariant weights: constant index_map -> fetched once per core by
    # the pipeline; double-buffer copies (~6 MiB bf16) fit the VMEM budget.
    weight_specs = [
        pl.BlockSpec(w.shape, lambda i: (0, 0)) for w in weights
    ]

    out_shapes = (
        jax.ShapeDtypeStruct((n_pad, REL_P), jnp.float32),   # predicate (lane-padded)
        jax.ShapeDtypeStruct((n_pad, FC), jnp.float32),      # predicate_feature
    )
    out_specs = (
        pl.BlockSpec((tile_n, REL_P), lambda i: (i, 0)),
        pl.BlockSpec((tile_n, FC), lambda i: (i, 0)),
    )

    pred_pad, feat_pad = pl.pallas_call(
        _predicate_kernel,
        out_shape=out_shapes,
        grid_spec=pltpu.PrefetchScalarGridSpec(
            num_scalar_prefetch=0,
            grid=grid,
            in_specs=data_specs + weight_specs,
            out_specs=out_specs,
        ),
        compiler_params=pltpu.CompilerParams(
            dimension_semantics=("parallel",),        # independent pair tiles
            vmem_limit_bytes=48 * 1024 * 1024,        # valid on v7x's 64 MiB VMEM
        ),
    )(idx, vis, *weights)

    return pred_pad[:n, :REL], feat_pad[:n]


def predicate_head_ref(params, subobj_categories, visual_features):
    """Pure-JAX reference of the same math (unfused, f32) for correctness."""
    emb = params["semantic_embed"][subobj_categories]
    xs, xo = emb[:, 0, :], emb[:, 1, :]
    sig, tanh = jax.nn.sigmoid, jnp.tanh
    i0 = sig(xs @ params["wii"] + params["bi"])
    g0 = tanh(xs @ params["wig"] + params["bg"])
    o0 = sig(xs @ params["wio"] + params["bo"])
    c1 = i0 * g0
    h1 = o0 * tanh(c1)
    i1 = sig(xo @ params["wii"] + h1 @ params["whi"] + params["bi"])
    f1 = sig(xo @ params["wif"] + h1 @ params["whf"] + params["bf"])
    g1 = tanh(xo @ params["wig"] + h1 @ params["whg"] + params["bg"])
    o1 = sig(xo @ params["wio"] + h1 @ params["who"] + params["bo"])
    c2 = f1 * c1 + i1 * g1
    h2 = o1 * tanh(c2)
    llstm = h2 @ params["w_llstm"] + params["b_llstm"]
    lang = jax.nn.relu(llstm @ params["w_lang"] + params["b_lang"])
    vis = jax.nn.relu(visual_features @ params["w_vis"] + params["b_vis"])
    feat = jax.nn.relu(lang @ params["w_fc1_l"] + vis @ params["w_fc1_v"]
                       + params["b_fc1"])
    pred = sig(feat @ params["w_fc2"] + params["b_fc2"])
    return pred, feat


if __name__ == "__main__":
    key = jax.random.PRNGKey(0)
    kp, kc, kv = jax.random.split(key, 3)
    params = make_params(kp)
    kparams = prepare_kernel_params(params)

    # Two "images", 8 predicted pairs each (like len(pred_pair_instances)==2).
    pairs_per_image = [8, 8]
    n_total = sum(pairs_per_image)

    # pred_pair_{sub,obj}_classes - 1  (already shifted to 0-based here).
    subobj_categories = jax.random.randint(
        kc, (n_total, 2), 0, N_CLASSES, dtype=jnp.int32)
    # pred_pair_predicate_features (N, 2048).
    visual_features = jax.random.normal(kv, (n_total, VIS), jnp.float32)

    predicate, predicate_feature = predicate_head_pallas(
        kparams, subobj_categories, visual_features)
    jax.block_until_ready((predicate, predicate_feature))

    # Split back per image, mirroring the module's output lists.
    predicates, predicate_features = [], []
    off = 0
    for npairs in pairs_per_image:
        predicates.append(predicate[off:off + npairs])
        predicate_features.append(predicate_feature[off:off + npairs])
        off += npairs

    # Correctness check against a pure-JAX reference using the same bf16-
    # quantized weights (tolerance accounts for bf16 activation rounding on
    # the MXU operands in the kernel).
    ref_params = quantize_for_ref(params)
    ref_pred, ref_feat = predicate_head_ref(
        ref_params, subobj_categories, visual_features)
    np.testing.assert_allclose(np.asarray(predicate), np.asarray(ref_pred),
                               rtol=3e-2, atol=3e-2)
    np.testing.assert_allclose(np.asarray(predicate_feature),
                               np.asarray(ref_feat), rtol=3e-2, atol=3e-2)

    assert predicate.shape == (n_total, REL)
    assert predicate_feature.shape == (n_total, FC)
    print("KERNEL_OK")
</pallas_src>

<mosaic_0001>
module attributes {stable_mosaic.version = 11 : i64} {
  func.func @_predicate_kernel(%arg0: i32, %arg1: memref<64x2xi32, #tpu.memory_space<vmem>>, %arg2: memref<64x2048xbf16, #tpu.memory_space<vmem>>, %arg3: memref<256x1536xbf16, #tpu.memory_space<vmem>>, %arg4: memref<384x1536xbf16, #tpu.memory_space<vmem>>, %arg5: memref<1x1536xf32, #tpu.memory_space<vmem>>, %arg6: memref<384x512xbf16, #tpu.memory_space<vmem>>, %arg7: memref<1x512xf32, #tpu.memory_space<vmem>>, %arg8: memref<512x512xbf16, #tpu.memory_space<vmem>>, %arg9: memref<1x512xf32, #tpu.memory_space<vmem>>, %arg10: memref<2048x512xbf16, #tpu.memory_space<vmem>>, %arg11: memref<1x512xf32, #tpu.memory_space<vmem>>, %arg12: memref<512x512xbf16, #tpu.memory_space<vmem>>, %arg13: memref<512x512xbf16, #tpu.memory_space<vmem>>, %arg14: memref<1x512xf32, #tpu.memory_space<vmem>>, %arg15: memref<512x128xbf16, #tpu.memory_space<vmem>>, %arg16: memref<1x128xf32, #tpu.memory_space<vmem>>, %arg17: memref<64x128xf32, #tpu.memory_space<vmem>>, %arg18: memref<64x512xf32, #tpu.memory_space<vmem>>) attributes {dimension_semantics = [#tpu.dimension_semantics<parallel>], iteration_bounds = array<i64: 1>, scalar_prefetch = 0 : i64, scratch_operands = 0 : i64, tpu.core_type = #tpu.core_type<tc>, window_params = [{transform_indices = @transform_0, window_bounds = array<i64: 64, 2>}, {transform_indices = @transform_1, window_bounds = array<i64: 64, 2048>}, {pipeline_mode = #tpu.pipeline_mode<synchronous>, transform_indices = @transform_2, window_bounds = array<i64: 256, 1536>}, {pipeline_mode = #tpu.pipeline_mode<synchronous>, transform_indices = @transform_3, window_bounds = array<i64: 384, 1536>}, {pipeline_mode = #tpu.pipeline_mode<synchronous>, transform_indices = @transform_4, window_bounds = array<i64: 1, 1536>}, {pipeline_mode = #tpu.pipeline_mode<synchronous>, transform_indices = @transform_5, window_bounds = array<i64: 384, 512>}, {pipeline_mode = #tpu.pipeline_mode<synchronous>, transform_indices = @transform_6, window_bounds = array<i64: 1, 512>}, {pipeline_mode = #tpu.pipeline_mode<synchronous>, transform_indices = @transform_7, window_bounds = array<i64: 512, 512>}, {pipeline_mode = #tpu.pipeline_mode<synchronous>, transform_indices = @transform_8, window_bounds = array<i64: 1, 512>}, {pipeline_mode = #tpu.pipeline_mode<synchronous>, transform_indices = @transform_9, window_bounds = array<i64: 2048, 512>}, {pipeline_mode = #tpu.pipeline_mode<synchronous>, transform_indices = @transform_10, window_bounds = array<i64: 1, 512>}, {pipeline_mode = #tpu.pipeline_mode<synchronous>, transform_indices = @transform_11, window_bounds = array<i64: 512, 512>}, {pipeline_mode = #tpu.pipeline_mode<synchronous>, transform_indices = @transform_12, window_bounds = array<i64: 512, 512>}, {pipeline_mode = #tpu.pipeline_mode<synchronous>, transform_indices = @transform_13, window_bounds = array<i64: 1, 512>}, {pipeline_mode = #tpu.pipeline_mode<synchronous>, transform_indices = @transform_14, window_bounds = array<i64: 512, 128>}, {pipeline_mode = #tpu.pipeline_mode<synchronous>, transform_indices = @transform_15, window_bounds = array<i64: 1, 128>}, {transform_indices = @transform_16, window_bounds = array<i64: 64, 128>}, {transform_indices = @transform_17, window_bounds = array<i64: 64, 512>}]} {
    %c0 = arith.constant 0 : index
    %c0_0 = arith.constant 0 : index
    %0 = vector.load %arg1[%c0, %c0_0] : memref<64x2xi32, #tpu.memory_space<vmem>>, vector<64x2xi32>
    %1 = tpu.iota {dimensions = array<i32: 1>} : vector<64x256xi32>
    %2 = vector.extract_strided_slice %0 {offsets = [0, 0], sizes = [64, 1], strides = [1, 1]} : vector<64x2xi32> to vector<64x1xi32>
    %3 = vector.broadcast %2 : vector<64x1xi32> to vector<64x256xi32>
    %4 = arith.cmpi eq, %3, %1 : vector<64x256xi32>
    %5 = arith.extui %4 : vector<64x256xi1> to vector<64x256xi32>
    %6 = arith.sitofp %5 : vector<64x256xi32> to vector<64x256xf32>
    %7 = arith.truncf %6 : vector<64x256xf32> to vector<64x256xbf16>
    %8 = vector.extract_strided_slice %0 {offsets = [0, 1], sizes = [64, 1], strides = [1, 1]} : vector<64x2xi32> to vector<64x1xi32>
    %9 = vector.broadcast %8 : vector<64x1xi32> to vector<64x256xi32>
    %10 = arith.cmpi eq, %9, %1 : vector<64x256xi32>
    %11 = arith.extui %10 : vector<64x256xi1> to vector<64x256xi32>
    %12 = arith.sitofp %11 : vector<64x256xi32> to vector<64x256xf32>
    %13 = arith.truncf %12 : vector<64x256xf32> to vector<64x256xbf16>
    %c0_1 = arith.constant 0 : index
    %c0_2 = arith.constant 0 : index
    %14 = vector.load %arg3[%c0_1, %c0_2] : memref<256x1536xbf16, #tpu.memory_space<vmem>>, vector<256x1536xbf16>
    %cst = arith.constant dense<0.000000e+00> : vector<64x1536xf32>
    %15 = tpu.matmul %7, %14, %cst {dimension_numbers = #tpu.dot_dimension_numbers<[1], [0], [0], [1], [0, 0, 1, 1], [], []>} : vector<64x256xbf16>, vector<256x1536xbf16>, vector<64x1536xf32> -> vector<64x1536xf32>
    %c0_3 = arith.constant 0 : index
    %c0_4 = arith.constant 0 : index
    %16 = vector.load %arg3[%c0_3, %c0_4] : memref<256x1536xbf16, #tpu.memory_space<vmem>>, vector<256x1536xbf16>
    %cst_5 = arith.constant dense<0.000000e+00> : vector<64x1536xf32>
    %17 = tpu.matmul %13, %16, %cst_5 {dimension_numbers = #tpu.dot_dimension_numbers<[1], [0], [0], [1], [0, 0, 1, 1], [], []>} : vector<64x256xbf16>, vector<256x1536xbf16>, vector<64x1536xf32> -> vector<64x1536xf32>
    %c0_6 = arith.constant 0 : index
    %c0_7 = arith.constant 0 : index
    %18 = vector.load %arg5[%c0_6, %c0_7] : memref<1x1536xf32, #tpu.memory_space<vmem>>, vector<1x1536xf32>
    %19 = vector.broadcast %18 : vector<1x1536xf32> to vector<64x1536xf32>
    %20 = arith.addf %15, %19 : vector<64x1536xf32>
    %21 = vector.extract_strided_slice %20 {offsets = [0, 0], sizes = [64, 384], strides = [1, 1]} : vector<64x1536xf32> to vector<64x384xf32>
    %22 = arith.negf %21 : vector<64x384xf32>
    %23 = math.exp %22 : vector<64x384xf32>
    %cst_8 = arith.constant 1.000000e+00 : f32
    %24 = vector.broadcast %cst_8 : f32 to vector<64x384xf32>
    %25 = arith.addf %24, %23 : vector<64x384xf32>
    %26 = arith.divf %24, %25 : vector<64x384xf32>
    %27 = vector.extract_strided_slice %20 {offsets = [0, 768], sizes = [64, 384], strides = [1, 1]} : vector<64x1536xf32> to vector<64x384xf32>
    %28 = math.tanh %27 : vector<64x384xf32>
    %29 = vector.extract_strided_slice %20 {offsets = [0, 1152], sizes = [64, 384], strides = [1, 1]} : vector<64x1536xf32> to vector<64x384xf32>
    %30 = arith.negf %29 : vector<64x384xf32>
    %31 = math.exp %30 : vector<64x384xf32>
    %cst_9 = arith.constant 1.000000e+00 : f32
    %32 = vector.broadcast %cst_9 : f32 to vector<64x384xf32>
    %33 = arith.addf %32, %31 : vector<64x384xf32>
    %34 = arith.divf %32, %33 : vector<64x384xf32>
    %35 = arith.mulf %26, %28 : vector<64x384xf32>
    %36 = math.tanh %35 : vector<64x384xf32>
    %37 = arith.mulf %34, %36 : vector<64x384xf32>
    %38 = arith.truncf %37 : vector<64x384xf32> to vector<64x384xbf16>
    %c0_10 = arith.constant 0 : index
    %c0_11 = arith.constant 0 : index
    %39 = vector.load %arg4[%c0_10, %c0_11] : memref<384x1536xbf16, #tpu.memory_space<vmem>>, vector<384x1536xbf16>
    %cst_12 = arith.constant dense<0.000000e+00> : vector<64x1536xf32>
    %40 = tpu.matmul %38, %39, %cst_12 {dimension_numbers = #tpu.dot_dimension_numbers<[1], [0], [0], [1], [0, 0, 1, 1], [], []>} : vector<64x384xbf16>, vector<384x1536xbf16>, vector<64x1536xf32> -> vector<64x1536xf32>
    %41 = arith.addf %17, %40 : vector<64x1536xf32>
    %42 = vector.broadcast %18 : vector<1x1536xf32> to vector<64x1536xf32>
    %43 = arith.addf %41, %42 : vector<64x1536xf32>
    %44 = vector.extract_strided_slice %43 {offsets = [0, 0], sizes = [64, 384], strides = [1, 1]} : vector<64x1536xf32> to vector<64x384xf32>
    %45 = arith.negf %44 : vector<64x384xf32>
    %46 = math.exp %45 : vector<64x384xf32>
    %cst_13 = arith.constant 1.000000e+00 : f32
    %47 = vector.broadcast %cst_13 : f32 to vector<64x384xf32>
    %48 = arith.addf %47, %46 : vector<64x384xf32>
    %49 = arith.divf %47, %48 : vector<64x384xf32>
    %50 = vector.extract_strided_slice %43 {offsets = [0, 384], sizes = [64, 384], strides = [1, 1]} : vector<64x1536xf32> to vector<64x384xf32>
    %51 = arith.negf %50 : vector<64x384xf32>
    %52 = math.exp %51 : vector<64x384xf32>
    %cst_14 = arith.constant 1.000000e+00 : f32
    %53 = vector.broadcast %cst_14 : f32 to vector<64x384xf32>
    %54 = arith.addf %53, %52 : vector<64x384xf32>
    %55 = arith.divf %53, %54 : vector<64x384xf32>
    %56 = vector.extract_strided_slice %43 {offsets = [0, 768], sizes = [64, 384], strides = [1, 1]} : vector<64x1536xf32> to vector<64x384xf32>
    %57 = math.tanh %56 : vector<64x384xf32>
    %58 = vector.extract_strided_slice %43 {offsets = [0, 1152], sizes = [64, 384], strides = [1, 1]} : vector<64x1536xf32> to vector<64x384xf32>
    %59 = arith.negf %58 : vector<64x384xf32>
    %60 = math.exp %59 : vector<64x384xf32>
    %cst_15 = arith.constant 1.000000e+00 : f32
    %61 = vector.broadcast %cst_15 : f32 to vector<64x384xf32>
    %62 = arith.addf %61, %60 : vector<64x384xf32>
    %63 = arith.divf %61, %62 : vector<64x384xf32>
    %64 = arith.mulf %55, %35 : vector<64x384xf32>
    %65 = arith.mulf %49, %57 : vector<64x384xf32>
    %66 = arith.addf %64, %65 : vector<64x384xf32>
    %67 = math.tanh %66 : vector<64x384xf32>
    %68 = arith.mulf %63, %67 : vector<64x384xf32>
    %69 = arith.truncf %68 : vector<64x384xf32> to vector<64x384xbf16>
    %c0_16 = arith.constant 0 : index
    %c0_17 = arith.constant 0 : index
    %70 = vector.load %arg6[%c0_16, %c0_17] : memref<384x512xbf16, #tpu.memory_space<vmem>>, vector<384x512xbf16>
    %cst_18 = arith.constant dense<0.000000e+00> : vector<64x512xf32>
    %71 = tpu.matmul %69, %70, %cst_18 {dimension_numbers = #tpu.dot_dimension_numbers<[1], [0], [0], [1], [0, 0, 1, 1], [], []>} : vector<64x384xbf16>, vector<384x512xbf16>, vector<64x512xf32> -> vector<64x512xf32>
    %c0_19 = arith.constant 0 : index
    %c0_20 = arith.constant 0 : index
    %72 = vector.load %arg7[%c0_19, %c0_20] : memref<1x512xf32, #tpu.memory_space<vmem>>, vector<1x512xf32>
    %73 = vector.broadcast %72 : vector<1x512xf32> to vector<64x512xf32>
    %74 = arith.addf %71, %73 : vector<64x512xf32>
    %75 = arith.truncf %74 : vector<64x512xf32> to vector<64x512xbf16>
    %c0_21 = arith.constant 0 : index
    %c0_22 = arith.constant 0 : index
    %76 = vector.load %arg8[%c0_21, %c0_22] : memref<512x512xbf16, #tpu.memory_space<vmem>>, vector<512x512xbf16>
    %cst_23 = arith.constant dense<0.000000e+00> : vector<64x512xf32>
    %77 = tpu.matmul %75, %76, %cst_23 {dimension_numbers = #tpu.dot_dimension_numbers<[1], [0], [0], [1], [0, 0, 1, 1], [], []>} : vector<64x512xbf16>, vector<512x512xbf16>, vector<64x512xf32> -> vector<64x512xf32>
    %c0_24 = arith.constant 0 : index
    %c0_25 = arith.constant 0 : index
    %78 = vector.load %arg9[%c0_24, %c0_25] : memref<1x512xf32, #tpu.memory_space<vmem>>, vector<1x512xf32>
    %79 = vector.broadcast %78 : vector<1x512xf32> to vector<64x512xf32>
    %80 = arith.addf %77, %79 : vector<64x512xf32>
    %cst_26 = arith.constant 0.000000e+00 : f32
    %81 = vector.broadcast %cst_26 : f32 to vector<64x512xf32>
    %82 = arith.maximumf %80, %81 : vector<64x512xf32>
    %c0_27 = arith.constant 0 : index
    %c0_28 = arith.constant 0 : index
    %83 = vector.load %arg2[%c0_27, %c0_28] : memref<64x2048xbf16, #tpu.memory_space<vmem>>, vector<64x2048xbf16>
    %c0_29 = arith.constant 0 : index
    %c0_30 = arith.constant 0 : index
    %84 = vector.load %arg10[%c0_29, %c0_30] : memref<2048x512xbf16, #tpu.memory_space<vmem>>, vector<2048x512xbf16>
    %cst_31 = arith.constant dense<0.000000e+00> : vector<64x512xf32>
    %85 = tpu.matmul %83, %84, %cst_31 {dimension_numbers = #tpu.dot_dimension_numbers<[1], [0], [0], [1], [0, 0, 1, 1], [], []>} : vector<64x2048xbf16>, vector<2048x512xbf16>, vector<64x512xf32> -> vector<64x512xf32>
    %c0_32 = arith.constant 0 : index
    %c0_33 = arith.constant 0 : index
    %86 = vector.load %arg11[%c0_32, %c0_33] : memref<1x512xf32, #tpu.memory_space<vmem>>, vector<1x512xf32>
    %87 = vector.broadcast %86 : vector<1x512xf32> to vector<64x512xf32>
    %88 = arith.addf %85, %87 : vector<64x512xf32>
    %cst_34 = arith.constant 0.000000e+00 : f32
    %89 = vector.broadcast %cst_34 : f32 to vector<64x512xf32>
    %90 = arith.maximumf %88, %89 : vector<64x512xf32>
    %91 = arith.truncf %82 : vector<64x512xf32> to vector<64x512xbf16>
    %c0_35 = arith.constant 0 : index
    %c0_36 = arith.constant 0 : index
    %92 = vector.load %arg12[%c0_35, %c0_36] : memref<512x512xbf16, #tpu.memory_space<vmem>>, vector<512x512xbf16>
    %cst_37 = arith.constant dense<0.000000e+00> : vector<64x512xf32>
    %93 = tpu.matmul %91, %92, %cst_37 {dimension_numbers = #tpu.dot_dimension_numbers<[1], [0], [0], [1], [0, 0, 1, 1], [], []>} : vector<64x512xbf16>, vector<512x512xbf16>, vector<64x512xf32> -> vector<64x512xf32>
    %94 = arith.truncf %90 : vector<64x512xf32> to vector<64x512xbf16>
    %c0_38 = arith.constant 0 : index
    %c0_39 = arith.constant 0 : index
    %95 = vector.load %arg13[%c0_38, %c0_39] : memref<512x512xbf16, #tpu.memory_space<vmem>>, vector<512x512xbf16>
    %cst_40 = arith.constant dense<0.000000e+00> : vector<64x512xf32>
    %96 = tpu.matmul %94, %95, %cst_40 {dimension_numbers = #tpu.dot_dimension_numbers<[1], [0], [0], [1], [0, 0, 1, 1], [], []>} : vector<64x512xbf16>, vector<512x512xbf16>, vector<64x512xf32> -> vector<64x512xf32>
    %97 = arith.addf %93, %96 : vector<64x512xf32>
    %c0_41 = arith.constant 0 : index
    %c0_42 = arith.constant 0 : index
    %98 = vector.load %arg14[%c0_41, %c0_42] : memref<1x512xf32, #tpu.memory_space<vmem>>, vector<1x512xf32>
    %99 = vector.broadcast %98 : vector<1x512xf32> to vector<64x512xf32>
    %100 = arith.addf %97, %99 : vector<64x512xf32>
    %cst_43 = arith.constant 0.000000e+00 : f32
    %101 = vector.broadcast %cst_43 : f32 to vector<64x512xf32>
    %102 = arith.maximumf %100, %101 : vector<64x512xf32>
    %103 = arith.truncf %102 : vector<64x512xf32> to vector<64x512xbf16>
    %c0_44 = arith.constant 0 : index
    %c0_45 = arith.constant 0 : index
    %104 = vector.load %arg15[%c0_44, %c0_45] : memref<512x128xbf16, #tpu.memory_space<vmem>>, vector<512x128xbf16>
    %cst_46 = arith.constant dense<0.000000e+00> : vector<64x128xf32>
    %105 = tpu.matmul %103, %104, %cst_46 {dimension_numbers = #tpu.dot_dimension_numbers<[1], [0], [0], [1], [0, 0, 1, 1], [], []>} : vector<64x512xbf16>, vector<512x128xbf16>, vector<64x128xf32> -> vector<64x128xf32>
    %c0_47 = arith.constant 0 : index
    %c0_48 = arith.constant 0 : index
    %106 = vector.load %arg16[%c0_47, %c0_48] : memref<1x128xf32, #tpu.memory_space<vmem>>, vector<1x128xf32>
    %107 = vector.broadcast %106 : vector<1x128xf32> to vector<64x128xf32>
    %108 = arith.addf %105, %107 : vector<64x128xf32>
    %109 = arith.negf %108 : vector<64x128xf32>
    %110 = math.exp %109 : vector<64x128xf32>
    %cst_49 = arith.constant 1.000000e+00 : f32
    %111 = vector.broadcast %cst_49 : f32 to vector<64x128xf32>
    %112 = arith.addf %111, %110 : vector<64x128xf32>
    %113 = arith.divf %111, %112 : vector<64x128xf32>
    %c0_50 = arith.constant 0 : index
    %c0_51 = arith.constant 0 : index
    %114 = vector.load %arg18[%c0_50, %c0_51] : memref<64x512xf32, #tpu.memory_space<vmem>>, vector<64x512xf32>
    tpu.vector_store %arg18[%c0_50, %c0_51], %102 {strides = array<i32>} : memref<64x512xf32, #tpu.memory_space<vmem>>, vector<64x512xf32>,
    %c0_52 = arith.constant 0 : index
    %c0_53 = arith.constant 0 : index
    %115 = vector.load %arg17[%c0_52, %c0_53] : memref<64x128xf32, #tpu.memory_space<vmem>>, vector<64x128xf32>
    tpu.vector_store %arg17[%c0_52, %c0_53], %113 {strides = array<i32>} : memref<64x128xf32, #tpu.memory_space<vmem>>, vector<64x128xf32>,
    return
  }
  func.func @transform_0(%arg0: i32) -> (i32, i32) {
    %c0_i32 = arith.constant 0 : i32
    %c0_i32_0 = arith.constant 0 : i32
    return %arg0, %c0_i32 : i32, i32
  }
  func.func @transform_1(%arg0: i32) -> (i32, i32) {
    %c0_i32 = arith.constant 0 : i32
    %c0_i32_0 = arith.constant 0 : i32
    return %arg0, %c0_i32 : i32, i32
  }
  func.func @transform_2(%arg0: i32) -> (i32, i32) {
    %c0_i32 = arith.constant 0 : i32
    %c0_i32_0 = arith.constant 0 : i32
    %c0_i32_1 = arith.constant 0 : i32
    return %c0_i32, %c0_i32_0 : i32, i32
  }
  func.func @transform_3(%arg0: i32) -> (i32, i32) {
    %c0_i32 = arith.constant 0 : i32
    %c0_i32_0 = arith.constant 0 : i32
    %c0_i32_1 = arith.constant 0 : i32
    return %c0_i32, %c0_i32_0 : i32, i32
  }
  func.func @transform_4(%arg0: i32) -> (i32, i32) {
    %c0_i32 = arith.constant 0 : i32
    %c0_i32_0 = arith.constant 0 : i32
    %c0_i32_1 = arith.constant 0 : i32
    return %c0_i32, %c0_i32_0 : i32, i32
  }
  func.func @transform_5(%arg0: i32) -> (i32, i32) {
    %c0_i32 = arith.constant 0 : i32
    %c0_i32_0 = arith.constant 0 : i32
    %c0_i32_1 = arith.constant 0 : i32
    return %c0_i32, %c0_i32_0 : i32, i32
  }
  func.func @transform_6(%arg0: i32) -> (i32, i32) {
    %c0_i32 = arith.constant 0 : i32
    %c0_i32_0 = arith.constant 0 : i32
    %c0_i32_1 = arith.constant 0 : i32
    return %c0_i32, %c0_i32_0 : i32, i32
  }
  func.func @transform_7(%arg0: i32) -> (i32, i32) {
    %c0_i32 = arith.constant 0 : i32
    %c0_i32_0 = arith.constant 0 : i32
    %c0_i32_1 = arith.constant 0 : i32
    return %c0_i32, %c0_i32_0 : i32, i32
  }
  func.func @transform_8(%arg0: i32) -> (i32, i32) {
    %c0_i32 = arith.constant 0 : i32
    %c0_i32_0 = arith.constant 0 : i32
    %c0_i32_1 = arith.constant 0 : i32
    return %c0_i32, %c0_i32_0 : i32, i32
  }
  func.func @transform_9(%arg0: i32) -> (i32, i32) {
    %c0_i32 = arith.constant 0 : i32
    %c0_i32_0 = arith.constant 0 : i32
    %c0_i32_1 = arith.constant 0 : i32
    return %c0_i32, %c0_i32_0 : i32, i32
  }
  func.func @transform_10(%arg0: i32) -> (i32, i32) {
    %c0_i32 = arith.constant 0 : i32
    %c0_i32_0 = arith.constant 0 : i32
    %c0_i32_1 = arith.constant 0 : i32
    return %c0_i32, %c0_i32_0 : i32, i32
  }
  func.func @transform_11(%arg0: i32) -> (i32, i32) {
    %c0_i32 = arith.constant 0 : i32
    %c0_i32_0 = arith.constant 0 : i32
    %c0_i32_1 = arith.constant 0 : i32
    return %c0_i32, %c0_i32_0 : i32, i32
  }
  func.func @transform_12(%arg0: i32) -> (i32, i32) {
    %c0_i32 = arith.constant 0 : i32
    %c0_i32_0 = arith.constant 0 : i32
    %c0_i32_1 = arith.constant 0 : i32
    return %c0_i32, %c0_i32_0 : i32, i32
  }
  func.func @transform_13(%arg0: i32) -> (i32, i32) {
    %c0_i32 = arith.constant 0 : i32
    %c0_i32_0 = arith.constant 0 : i32
    %c0_i32_1 = arith.constant 0 : i32
    return %c0_i32, %c0_i32_0 : i32, i32
  }
  func.func @transform_14(%arg0: i32) -> (i32, i32) {
    %c0_i32 = arith.constant 0 : i32
    %c0_i32_0 = arith.constant 0 : i32
    %c0_i32_1 = arith.constant 0 : i32
    return %c0_i32, %c0_i32_0 : i32, i32
  }
  func.func @transform_15(%arg0: i32) -> (i32, i32) {
    %c0_i32 = arith.constant 0 : i32
    %c0_i32_0 = arith.constant 0 : i32
    %c0_i32_1 = arith.constant 0 : i32
    return %c0_i32, %c0_i32_0 : i32, i32
  }
  func.func @transform_16(%arg0: i32) -> (i32, i32) {
    %c0_i32 = arith.constant 0 : i32
    %c0_i32_0 = arith.constant 0 : i32
    return %arg0, %c0_i32 : i32, i32
  }
  func.func @transform_17(%arg0: i32) -> (i32, i32) {
    %c0_i32 = arith.constant 0 : i32
    %c0_i32_0 = arith.constant 0 : i32
    return %arg0, %c0_i32 : i32, i32
  }
}

</mosaic_0001>

<bundles_post_ra>
// kernel: predicate_head_pallas.1
= control target key start
LH: loop header
LB: loop body
LE: loop exit
PB: predicated region body
PF: predicated region fallthrough
CT: control target
= control target key end

     0   :  { %s24117_s0 = inlined_call_operand.vmem [shape: s32[64,2], index: 0, kind: input, shape index: {}]   ;;  %s24118_s1 = inlined_call_operand.vmem [shape: bf16[64,2048], index: 1, kind: input, shape index: {}]   ;;  %s24119_s2 = inlined_call_operand.hbm [shape: bf16[256,1536], index: 2, kind: input, shape index: {}]   ;;  %s24120_s3 = inlined_call_operand.hbm [shape: bf16[384,1536], index: 3, kind: input, shape index: {}]   ;;  %s24121_s4 = inlined_call_operand.hbm [shape: f32[1,1536], index: 4, kind: input, shape index: {}]   ;;  %s24122_s5 = inlined_call_operand.hbm [shape: bf16[384,512], index: 5, kind: input, shape index: {}]   ;;  %s24123_s6 = inlined_call_operand.hbm [shape: f32[1,512], index: 6, kind: input, shape index: {}]   ;;  %s24124_s7 = inlined_call_operand.hbm [shape: bf16[512,512], index: 7, kind: input, shape index: {}]   ;;  %s24125_s8 = inlined_call_operand.hbm [shape: f32[1,512], index: 8, kind: input, shape index: {}]   ;;  %s24126_s9 = inlined_call_operand.hbm [shape: bf16[2048,512], index: 9, kind: input, shape index: {}]   ;;  %s24127_s10 = inlined_call_operand.hbm [shape: f32[1,512], index: 10, kind: input, shape index: {}]   ;;  %s24128_s11 = inlined_call_operand.hbm [shape: bf16[512,512], index: 11, kind: input, shape index: {}]   ;;  %s24129_s12 = inlined_call_operand.hbm [shape: bf16[512,512], index: 12, kind: input, shape index: {}]   ;;  %s24130_s13 = inlined_call_operand.hbm [shape: f32[1,512], index: 13, kind: input, shape index: {}]   ;;  %s24131_s14 = inlined_call_operand.hbm [shape: bf16[512,128], index: 14, kind: input, shape index: {}]   ;;  %s24132_s15 = inlined_call_operand.hbm [shape: f32[1,128], index: 15, kind: input, shape index: {}]   ;;  %s24133_s16 = inlined_call_operand.vmem [shape: f32[64,128], index: 16, kind: output, shape index: {0}]   ;;  %s24134_s17 = inlined_call_operand.vmem [shape: f32[64,512], index: 17, kind: output, shape index: {1}]  }
   0x1   :  { %24172 = sst [smem:[#allocation62_spill]] %s24117_s0 }
   0x2   :  { %24173 = sst [smem:[#allocation63_spill]] %s24118_s1 }
   0x3   :  { %23 = vsyncpa [#allocation3], 0 }
   0x4   :  { %24 = vsyncpa [#allocation5], 0 }
   0x5   :  { %25 = vsyncpa [#allocation8], 0 }
   0x6   :  { %26 = vsyncpa [#allocation11], 0 }
   0x7   :  { %27 = vsyncpa [#allocation14], 0 }
   0x8   :  { %28 = vsyncpa [#allocation17], 0 }
   0x9   :  { %29 = vsyncpa [#allocation20], 0 }
   0xa   :  { %30 = vsyncpa [#allocation23], 0  ;;  %s21670_s24 = smov [#allocation4]   ;;  %s21671_s26 = smov [#allocation7]  }
   0xb   :  { %s52_s25 = sshll.u32 %s21670_s24, 4  ;;  %s74_s27 = sshll.u32 %s21671_s26, 4  ;;  %s53_s25 = int_to_ptr.vmem [resolvable:$true] %s52_s25  ;;  %s21783_s27 = int_to_ptr.vmem [resolvable:$true] %s74_s27 }
   0xc   :  { %s21346_s0 = scalar_lea.hbm %s24120_s3, 36864 }
   0xd   :  { %p21347_p0 = scmp.ne.s32.totalorder %s24120_s3, %s21346_s0  ;;  %p21350_p1 = scmp.lt.u32.totalorder %s21346_s0, %s24120_s3 }
   0xf   :  { %p21352_p2 = pnand %p21350_p1, %p21347_p0 }
  0x11   :  { %21355 = shalt.err (!%p21352_p2)
}
  0x12   :  { %s21356_s20 = scalar_lea.vmem %s53_s25, 36864  ;;  %p21361_p4 = scmp.lt.s32.totalorder %s53_s25, %s53_s25 }
  0x13   :  { %p21357_p3 = scmp.ne.s32.totalorder %s53_s25, %s21356_s20  ;;  %p21362_p5 = scmp.lt.s32.totalorder %s21356_s20, %s21356_s20 }
  0x15   :  { %p21363_p6 = por %p21362_p5, %p21361_p4 }
  0x17   :  { %p21364_p7 = pnand %p21363_p6, %p21357_p3 }
  0x19   :  { %21367 = shalt.err (!%p21364_p7)
}
  0x1a   :  { %s24137_s21 = smov 768   ;;  %s24138_s22 = smov 48  }
  0x1b   :  { %58 = dma.hbm_to_vmem [thread:$0]  %s24120_s3, 36864, %s53_s25, [#allocation5], %s24137_s21, %s24137_s21, %s24138_s22  }
  0x1c   :  { %s21368_s29 = scalar_lea.hbm %s24122_s5, 12288 }
  0x1d   :  { %p21369_p8 = scmp.ne.s32.totalorder %s24122_s5, %s21368_s29  ;;  %p21372_p9 = scmp.lt.u32.totalorder %s21368_s29, %s24122_s5 }
  0x1f   :  { %p21374_p10 = pnand %p21372_p9, %p21369_p8 }
  0x21   :  { %21377 = shalt.err (!%p21374_p10)
}
  0x22   :  { %s21378_s1 = scalar_lea.vmem %s21783_s27, 12288  ;;  %p21383_p12 = scmp.lt.s32.totalorder %s21783_s27, %s21783_s27 }
  0x23   :  { %p21379_p11 = scmp.ne.s32.totalorder %s21783_s27, %s21378_s1  ;;  %p21384_p13 = scmp.lt.s32.totalorder %s21378_s1, %s21378_s1 }
  0x25   :  { %p21385_p0 = por %p21384_p13, %p21383_p12 }
  0x27   :  { %p21386_p1 = pnand %p21385_p0, %p21379_p11 }
  0x29   :  { %21389 = shalt.err (!%p21386_p1)
}
  0x2a   :  { %s21674_s3 = smov 256   ;;  %s21675_s25 = smov 16  }
  0x2b   :  { %80 = dma.hbm_to_vmem [thread:$0]  %s24122_s5, 12288, %s21783_s27, [#allocation8], %s21674_s3, %s21674_s3, %s21675_s25  }
  0x2c   :  { %s21676_s24 = smov [#allocation10]   ;;  %s21677_s28 = smov [#allocation13]  }
  0x2d   :  { %s96_s26 = sshll.u32 %s21676_s24, 4  ;;  %s118_s29 = sshll.u32 %s21677_s28, 4  ;;  %s97_s26 = int_to_ptr.vmem [resolvable:$true] %s96_s26  ;;  %s21820_s29 = int_to_ptr.vmem [resolvable:$true] %s118_s29 }
  0x2e   :  { %s21390_s18 = scalar_lea.hbm %s24124_s7, 16384 }
  0x2f   :  { %p21391_p2 = scmp.ne.s32.totalorder %s24124_s7, %s21390_s18  ;;  %p21394_p3 = scmp.lt.u32.totalorder %s21390_s18, %s24124_s7 }
  0x31   :  { %p21396_p4 = pnand %p21394_p3, %p21391_p2 }
  0x33   :  { %21399 = shalt.err (!%p21396_p4)
}
  0x34   :  { %s21400_s5 = scalar_lea.vmem %s97_s26, 16384  ;;  %p21405_p6 = scmp.lt.s32.totalorder %s97_s26, %s97_s26 }
  0x35   :  { %p21401_p5 = scmp.ne.s32.totalorder %s97_s26, %s21400_s5  ;;  %p21406_p7 = scmp.lt.s32.totalorder %s21400_s5, %s21400_s5 }
  0x37   :  { %p21407_p8 = por %p21406_p7, %p21405_p6 }
  0x39   :  { %p21408_p9 = pnand %p21407_p8, %p21401_p5 }
  0x3b   :  { %21411 = shalt.err (!%p21408_p9)
}
  0x3c   :  { %102 = dma.hbm_to_vmem [thread:$0]  %s24124_s7, 16384, %s97_s26, [#allocation11], %s21674_s3, %s21674_s3, %s21675_s25  }
  0x3d   :  { %s21412_s21 = scalar_lea.hbm %s24126_s9, 65536 }
  0x3e   :  { %p21413_p10 = scmp.ne.s32.totalorder %s24126_s9, %s21412_s21  ;;  %p21416_p11 = scmp.lt.u32.totalorder %s21412_s21, %s24126_s9 }
  0x40   :  { %p21418_p12 = pnand %p21416_p11, %p21413_p10 }
  0x42   :  { %21421 = shalt.err (!%p21418_p12)
}
  0x43   :  { %s21422_s18 = scalar_lea.vmem %s21820_s29, 65536  ;;  %p21427_p0 = scmp.lt.s32.totalorder %s21820_s29, %s21820_s29 }
  0x44   :  { %p21423_p13 = scmp.ne.s32.totalorder %s21820_s29, %s21422_s18  ;;  %p21428_p1 = scmp.lt.s32.totalorder %s21422_s18, %s21422_s18 }
  0x46   :  { %p21429_p2 = por %p21428_p1, %p21427_p0 }
  0x48   :  { %p21430_p3 = pnand %p21429_p2, %p21423_p13 }
  0x4a   :  { %21433 = shalt.err (!%p21430_p3)
}
  0x4b   :  { %124 = dma.hbm_to_vmem [thread:$0]  %s24126_s9, 65536, %s21820_s29, [#allocation14], %s21674_s3, %s21674_s3, %s21675_s25  }
  0x4c   :  { %s21678_s19 = smov [#allocation16]   ;;  %s21679_s5 = smov [#allocation19]  }
  0x4d   :  { %s140_s1 = sshll.u32 %s21678_s19, 4  ;;  %s165_s27 = sshll.u32 %s21679_s5, 4  ;;  %s141_s1 = int_to_ptr.vmem [resolvable:$true] %s140_s1  ;;  %s166_s27 = int_to_ptr.vmem [resolvable:$true] %s165_s27 }
  0x4e   :  { %s21434_s24 = scalar_lea.hbm %s24128_s11, 16384 }
  0x4f   :  { %p21435_p4 = scmp.ne.s32.totalorder %s24128_s11, %s21434_s24  ;;  %p21438_p5 = scmp.lt.u32.totalorder %s21434_s24, %s24128_s11 }
  0x51   :  { %p21440_p6 = pnand %p21438_p5, %p21435_p4 }
  0x53   :  { %21443 = shalt.err (!%p21440_p6)
}
  0x54   :  { %s21444_s9 = scalar_lea.vmem %s141_s1, 16384  ;;  %p21449_p8 = scmp.lt.s32.totalorder %s141_s1, %s141_s1 }
  0x55   :  { %p21445_p7 = scmp.ne.s32.totalorder %s141_s1, %s21444_s9  ;;  %p21450_p9 = scmp.lt.s32.totalorder %s21444_s9, %s21444_s9 }
  0x57   :  { %p21451_p10 = por %p21450_p9, %p21449_p8 }
  0x59   :  { %p21452_p11 = pnand %p21451_p10, %p21445_p7 }
  0x5b   :  { %21455 = shalt.err (!%p21452_p11)
}
  0x5c   :  { %146 = dma.hbm_to_vmem [thread:$0]  %s24128_s11, 16384, %s141_s1, [#allocation17], %s21674_s3, %s21674_s3, %s21675_s25  }
  0x5d   :  { %s21456_s26 = scalar_lea.hbm %s24130_s13, 64 }
  0x5e   :  { %p21457_p12 = scmp.ne.s32.totalorder %s24130_s13, %s21456_s26  ;;  %p21460_p13 = scmp.lt.u32.totalorder %s21456_s26, %s24130_s13 }
  0x60   :  { %p21462_p0 = pnand %p21460_p13, %p21457_p12 }
  0x62   :  { %21465 = shalt.err (!%p21462_p0)
}
  0x63   :  { %s21466_s24 = scalar_lea.vmem %s166_s27, 64  ;;  %p21471_p2 = scmp.lt.s32.totalorder %s166_s27, %s166_s27 }
  0x64   :  { %p21467_p1 = scmp.ne.s32.totalorder %s166_s27, %s21466_s24  ;;  %p21472_p3 = scmp.lt.s32.totalorder %s21466_s24, %s21466_s24 }
  0x66   :  { %p21473_p4 = por %p21472_p3, %p21471_p2 }
  0x68   :  { %p21474_p5 = pnand %p21473_p4, %p21467_p1 }
  0x6a   :  { %21477 = shalt.err (!%p21474_p5)
}
  0x6b   :  { %168 = dma.hbm_to_vmem [thread:$0]  %s24130_s13, 64, %s166_s27, [#allocation20]  }
  0x6c   :  { %s21680_s21 = smov [#allocation2]   ;;  %s21681_s28 = smov [#allocation6]  }
  0x6d   :  { %s40_s22 = sshll.u32 %s21680_s21, 4  ;;  %s65_s0 = sshll.u32 %s21681_s28, 4  ;;  %s41_s22 = int_to_ptr.vmem [resolvable:$true] %s40_s22  ;;  %s66_s0 = int_to_ptr.vmem [resolvable:$true] %s65_s0 }
  0x6e   :  { %s21478_s30 = scalar_lea.hbm %s24119_s2, 24576 }
  0x6f   :  { %p21479_p6 = scmp.ne.s32.totalorder %s24119_s2, %s21478_s30  ;;  %p21482_p7 = scmp.lt.u32.totalorder %s21478_s30, %s24119_s2 }
  0x71   :  { %p21484_p8 = pnand %p21482_p7, %p21479_p6 }
  0x73   :  { %21487 = shalt.err (!%p21484_p8)
}
  0x74   :  { %s21488_s13 = scalar_lea.vmem %s41_s22, 24576  ;;  %p21493_p10 = scmp.lt.s32.totalorder %s41_s22, %s41_s22 }
  0x75   :  { %p21489_p9 = scmp.ne.s32.totalorder %s41_s22, %s21488_s13  ;;  %p21494_p11 = scmp.lt.s32.totalorder %s21488_s13, %s21488_s13 }
  0x77   :  { %p21495_p12 = por %p21494_p11, %p21493_p10 }
  0x79   :  { %p21496_p13 = pnand %p21495_p12, %p21489_p9 }
  0x7b   :  { %21499 = shalt.err (!%p21496_p13)
}
  0x7c   :  { %s24174_s27 = smov 48   ;;  %s24175_s5 = smov 768  }
  0x7d   :  { %46 = dma.hbm_to_vmem [thread:$0]  %s24119_s2, 24576, %s41_s22, [#allocation3], %s24175_s5, %s24175_s5, %s24174_s27  }
  0x7e   :  { %s21500_s1 = scalar_lea.hbm %s24121_s4, 192 }
  0x7f   :  { %p21501_p0 = scmp.ne.s32.totalorder %s24121_s4, %s21500_s1  ;;  %p21504_p1 = scmp.lt.u32.totalorder %s21500_s1, %s24121_s4 }
  0x81   :  { %p21506_p2 = pnand %p21504_p1, %p21501_p0 }
  0x83   :  { %21509 = shalt.err (!%p21506_p2)
}
  0x84   :  { %s21510_s30 = scalar_lea.vmem %s66_s0, 192  ;;  %p21515_p4 = scmp.lt.s32.totalorder %s66_s0, %s66_s0 }
  0x85   :  { %p21511_p3 = scmp.ne.s32.totalorder %s66_s0, %s21510_s30  ;;  %p21516_p5 = scmp.lt.s32.totalorder %s21510_s30, %s21510_s30 }
  0x87   :  { %p21517_p6 = por %p21516_p5, %p21515_p4 }
  0x89   :  { %p21518_p7 = pnand %p21517_p6, %p21511_p3 }
  0x8b   :  { %21521 = shalt.err (!%p21518_p7)
}
  0x8c   :  { %68 = dma.hbm_to_vmem [thread:$0]  %s24121_s4, 192, %s66_s0, [#allocation5]  }
  0x8d   :  { %s21682_s18 = smov [#allocation9]   ;;  %s21683_s26 = smov [#allocation12]  }
  0x8e   :  { %s87_s7 = sshll.u32 %s21682_s18, 4  ;;  %s109_s19 = sshll.u32 %s21683_s26, 4  ;;  %s88_s7 = int_to_ptr.vmem [resolvable:$true] %s87_s7  ;;  %s110_s19 = int_to_ptr.vmem [resolvable:$true] %s109_s19 }
  0x8f   :  { %s21522_s5 = scalar_lea.hbm %s24123_s6, 64 }
  0x90   :  { %p21523_p8 = scmp.ne.s32.totalorder %s24123_s6, %s21522_s5  ;;  %p21526_p9 = scmp.lt.u32.totalorder %s21522_s5, %s24123_s6 }
  0x92   :  { %p21528_p10 = pnand %p21526_p9, %p21523_p8 }
  0x94   :  { %21531 = shalt.err (!%p21528_p10)
}
  0x95   :  { %s21532_s4 = scalar_lea.vmem %s88_s7, 64  ;;  %p21537_p12 = scmp.lt.s32.totalorder %s88_s7, %s88_s7 }
  0x96   :  { %p21533_p11 = scmp.ne.s32.totalorder %s88_s7, %s21532_s4  ;;  %p21538_p13 = scmp.lt.s32.totalorder %s21532_s4, %s21532_s4 }
  0x98   :  { %p21539_p0 = por %p21538_p13, %p21537_p12 }
  0x9a   :  { %p21540_p1 = pnand %p21539_p0, %p21533_p11 }
  0x9c   :  { %21543 = shalt.err (!%p21540_p1)
}
  0x9d   :  { %90 = dma.hbm_to_vmem [thread:$0]  %s24123_s6, 64, %s88_s7, [#allocation8]  }
  0x9e   :  { %s21544_s9 = scalar_lea.hbm %s24125_s8, 64 }
  0x9f   :  { %p21545_p2 = scmp.ne.s32.totalorder %s24125_s8, %s21544_s9  ;;  %p21548_p3 = scmp.lt.u32.totalorder %s21544_s9, %s24125_s8 }
  0xa1   :  { %p21550_p4 = pnand %p21548_p3, %p21545_p2 }
  0xa3   :  { %21553 = shalt.err (!%p21550_p4)
}
  0xa4   :  { %s21554_s18 = scalar_lea.vmem %s110_s19, 64  ;;  %p21559_p6 = scmp.lt.s32.totalorder %s110_s19, %s110_s19 }
  0xa5   :  { %p21555_p5 = scmp.ne.s32.totalorder %s110_s19, %s21554_s18  ;;  %p21560_p7 = scmp.lt.s32.totalorder %s21554_s18, %s21554_s18 }
  0xa7   :  { %p21561_p8 = por %p21560_p7, %p21559_p6 }
  0xa9   :  { %p21562_p9 = pnand %p21561_p8, %p21555_p5 }
  0xab   :  { %21565 = shalt.err (!%p21562_p9)
}
  0xac   :  { %112 = dma.hbm_to_vmem [thread:$0]  %s24125_s8, 64, %s110_s19, [#allocation11]  }
  0xad   :  { %s21684_s26 = smov [#allocation15]   ;;  %s21685_s27 = smov [#allocation18]  }
  0xae   :  { %s131_s13 = sshll.u32 %s21684_s26, 4  ;;  %s152_s5 = sshll.u32 %s21685_s27, 4  ;;  %s132_s13 = int_to_ptr.vmem [resolvable:$true] %s131_s13  ;;  %s21935_s5 = int_to_ptr.vmem [resolvable:$true] %s152_s5 }
  0xaf   :  { %s21566_s24 = scalar_lea.hbm %s24127_s10, 64 }
  0xb0   :  { %p21567_p10 = scmp.ne.s32.totalorder %s24127_s10, %s21566_s24  ;;  %p21570_p11 = scmp.lt.u32.totalorder %s21566_s24, %s24127_s10 }
  0xb2   :  { %p21572_p12 = pnand %p21570_p11, %p21567_p10 }
  0xb4   :  { %21575 = shalt.err (!%p21572_p12)
}
  0xb5   :  { %s21576_s8 = scalar_lea.vmem %s132_s13, 64  ;;  %p21581_p0 = scmp.lt.s32.totalorder %s132_s13, %s132_s13 }
  0xb6   :  { %p21577_p13 = scmp.ne.s32.totalorder %s132_s13, %s21576_s8  ;;  %p21582_p1 = scmp.lt.s32.totalorder %s21576_s8, %s21576_s8 }
  0xb8   :  { %p21583_p2 = por %p21582_p1, %p21581_p0 }
  0xba   :  { %p21584_p3 = pnand %p21583_p2, %p21577_p13 }
  0xbc   :  { %21587 = shalt.err (!%p21584_p3)
}
  0xbd   :  { %134 = dma.hbm_to_vmem [thread:$0]  %s24127_s10, 64, %s132_s13, [#allocation14]  }
  0xbe   :  { %s21588_s29 = scalar_lea.hbm %s24129_s12, 16384 }
  0xbf   :  { %p21589_p4 = scmp.ne.s32.totalorder %s24129_s12, %s21588_s29  ;;  %p21592_p5 = scmp.lt.u32.totalorder %s21588_s29, %s24129_s12 }
  0xc1   :  { %p21594_p6 = pnand %p21592_p5, %p21589_p4 }
  0xc3   :  { %21597 = shalt.err (!%p21594_p6)
}
  0xc4   :  { %s21598_s6 = scalar_lea.vmem %s21935_s5, 16384  ;;  %p21603_p8 = scmp.lt.s32.totalorder %s21935_s5, %s21935_s5 }
  0xc5   :  { %p21599_p7 = scmp.ne.s32.totalorder %s21935_s5, %s21598_s6  ;;  %p21604_p9 = scmp.lt.s32.totalorder %s21598_s6, %s21598_s6 }
  0xc7   :  { %p21605_p10 = por %p21604_p9, %p21603_p8 }
  0xc9   :  { %p21606_p11 = pnand %p21605_p10, %p21599_p7 }
  0xcb   :  { %21609 = shalt.err (!%p21606_p11)
}
  0xcc   :  { %158 = dma.hbm_to_vmem [thread:$0]  %s24129_s12, 16384, %s21935_s5, [#allocation17], %s21674_s3, %s21674_s3, %s21675_s25  }
  0xcd   :  { %s21686_s26 = smov [#allocation21]   ;;  %s21610_s23 = scalar_lea.hbm %s24131_s14, 4096 }
  0xce   :  { %s174_s13 = sshll.u32 %s21686_s26, 4  ;;  %p21611_p12 = scmp.ne.s32.totalorder %s24131_s14, %s21610_s23  ;;  %s175_s13 = int_to_ptr.vmem [resolvable:$true] %s174_s13 }
  0xcf   :  { %p21614_p13 = scmp.lt.u32.totalorder %s21610_s23, %s24131_s14 }
  0xd1   :  { %p21616_p0 = pnand %p21614_p13, %p21611_p12 }
  0xd3   :  { %21619 = shalt.err (!%p21616_p0)
}
  0xd4   :  { %s21620_s1 = scalar_lea.vmem %s175_s13, 4096  ;;  %p21625_p2 = scmp.lt.s32.totalorder %s175_s13, %s175_s13 }
  0xd5   :  { %p21621_p1 = scmp.ne.s32.totalorder %s175_s13, %s21620_s1  ;;  %p21626_p3 = scmp.lt.s32.totalorder %s21620_s1, %s21620_s1 }
  0xd7   :  { %p21627_p4 = por %p21626_p3, %p21625_p2 }
  0xd9   :  { %p21628_p5 = pnand %p21627_p4, %p21621_p1 }
  0xdb   :  { %21631 = shalt.err (!%p21628_p5)
}
  0xdc   :  { %s21687_s12 = smov 64   ;;  %s21688_s3 = smov 4  }
  0xdd   :  { %180 = dma.hbm_to_vmem [thread:$0]  %s24131_s14, 4096, %s175_s13, [#allocation20], %s21687_s12, %s21687_s12, %s21688_s3  }
  0xde   :  { %s21689_s8 = smov [#allocation22]   ;;  %s21632_s9 = scalar_lea.hbm %s24132_s15, 16 }
  0xdf   :  { %s187_s19 = sshll.u32 %s21689_s8, 4  ;;  %p21633_p6 = scmp.ne.s32.totalorder %s24132_s15, %s21632_s9  ;;  %s188_s19 = int_to_ptr.vmem [resolvable:$true] %s187_s19 }
  0xe0   :  { %p21636_p7 = scmp.lt.u32.totalorder %s21632_s9, %s24132_s15 }
  0xe2   :  { %p21638_p8 = pnand %p21636_p7, %p21633_p6 }
  0xe4   :  { %21641 = shalt.err (!%p21638_p8)
}
  0xe5   :  { %s21642_s18 = scalar_lea.vmem %s188_s19, 16  ;;  %s21646_s14 = scalar_lea.vmem %s188_s19, 32 }
  0xe6   :  { %p21643_p9 = scmp.ne.s32.totalorder %s188_s19, %s21642_s18  ;;  %p21647_p10 = scmp.lt.s32.totalorder %s188_s19, %s188_s19 }
  0xe7   :  { %p21648_p11 = scmp.lt.s32.totalorder %s21646_s14, %s21642_s18 }
  0xe9   :  { %p21649_p12 = por %p21648_p11, %p21647_p10 }
  0xeb   :  { %p21650_p13 = pnand %p21649_p12, %p21643_p9 }
  0xed   :  { %21653 = shalt.err (!%p21650_p13)
}
  0xee   :  { %190 = dma.hbm_to_vmem [thread:$0]  %s24132_s15, 16, %s188_s19, [#allocation23]  }
  0xef   :  { %21654 = dma.done.wait [#allocation3], 24576  }
  0xf0   :  { %21655 = vsyncadd [#allocation3], 4294942720 }
  0xf1   :  { %21656 = dma.done.wait [#allocation5], 37056  }
  0xf2   :  { %21657 = vsyncadd [#allocation5], 4294930240 }
  0xf3   :  { %21658 = dma.done.wait [#allocation8], 12352  }
  0xf4   :  { %21659 = vsyncadd [#allocation8], 4294954944 }
  0xf5   :  { %21660 = dma.done.wait [#allocation11], 16448  }
  0xf6   :  { %21661 = vsyncadd [#allocation11], 4294950848 }
  0xf7   :  { %21662 = dma.done.wait [#allocation14], 65600  }
  0xf8   :  { %21663 = vsyncadd [#allocation14], 4294901696 }
  0xf9   :  { %21664 = dma.done.wait [#allocation17], 32768  }
  0xfa   :  { %21665 = vsyncadd [#allocation17], 4294934528 }
  0xfb   :  { %21666 = dma.done.wait [#allocation20], 4160  }
  0xfc   :  { %21667 = vsyncadd [#allocation20], 4294963136 }
  0xfd   :  { %21668 = dma.done.wait [#allocation23], 16  }
  0xfe   :  { %21669 = vsyncadd [#allocation23], 4294967280  ;;  %v24141_v0 = vmov 0   ;;  %s24176_s26 = sld [smem:[#allocation62_spill]]  ;;  %v18233_v5 = vld [vmem:[#allocation2 + $0x4] ss:$48 sps:$4 sm:$0xff]  }
  0xff   :  { %18230 = vset.pattern.permute.xlu1 %v24141_v0  ;;  %18229 = vset.pattern.permute.xlu0 %v24141_v0  ;;  %v18235_v8 = vld [vmem:[#allocation2 + $0xc] ss:$48 sps:$4 sm:$0xff]   ;;  %v18237_v9 = vld [vmem:[#allocation2] ss:$48 sps:$4 sm:$0xff]   ;;  %v18238_v10 = vld [vmem:[#allocation2 + $0x8] ss:$48 sps:$4 sm:$0xff]  }
 0x100   :  { %1461 = vmatprep.subr.bf16.mxu0 %v18233_v5  ;;  %1534 = vmatprep.subr.bf16.mxu1 %v18235_v8  ;;  %v18239_v11 = vld [vmem:[#allocation2 + $0x64] ss:$48 sps:$4 sm:$0xff]   ;;  %v18241_v12 = vld [vmem:[#allocation2 + $0x6c] ss:$48 sps:$4 sm:$0xff]   ;;  %v18243_v13 = vld [vmem:[#allocation2 + $0x60] ss:$48 sps:$4 sm:$0xff]  }
 0x101   :  { %1462 = vmatpush1.bf16.msra.mxu0 %v18237_v9  ;;  %1535 = vmatpush1.bf16.msra.mxu1 %v18238_v10  ;;  %v18244_v14 = vld [vmem:[#allocation2 + $0x68] ss:$48 sps:$4 sm:$0xff]   ;;  %v18245_v16 = vld [vmem:[#allocation2 + $0xc4] ss:$48 sps:$4 sm:$0xff]   ;;  %v18247_v17 = vld [vmem:[#allocation2 + $0xcc] ss:$48 sps:$4 sm:$0xff]  }
 0x102   :  { %1463 = vmatprep.subr.bf16.mxu0 %v18239_v11  ;;  %1536 = vmatprep.subr.bf16.mxu1 %v18241_v12  ;;  %v18249_v19 = vld [vmem:[#allocation2 + $0xc0] ss:$48 sps:$4 sm:$0xff]   ;;  %v18250_v20 = vld [vmem:[#allocation2 + $0xc8] ss:$48 sps:$4 sm:$0xff]   ;;  %v18251_v21 = vld [vmem:[#allocation2 + $0x124] ss:$48 sps:$4 sm:$0xff]   ;;  %v242_v12 = vlaneseq }
 0x103   :  { %v18253_v22 = vld [vmem:[#allocation2 + $0x12c] ss:$48 sps:$4 sm:$0xff]   ;;  %v18255_v23 = vld [vmem:[#allocation2 + $0x120] ss:$48 sps:$4 sm:$0xff]   ;;  %v18256_v24 = vld [vmem:[#allocation2 + $0x128] ss:$48 sps:$4 sm:$0xff]  }
 0x104   :  { %v236_v1 = vld [vmem:[%s24176_s26 + $0x10] sm:$0xff]  ;;  %v234_v2 = vld [vmem:[%s24176_s26] sm:$0xff]  ;;  %v237_v3 = vld [vmem:[%s24176_s26 + $0x18] sm:$0xff]  ;;  %s24272_s23 = sld [smem:[#allocation63_spill]] }
 0x105   :  { %252 = vperm.xlu1 %18230, %v236_v1   ;;  %246 = vperm.xlu0 %18229, %v234_v2   ;;  %v235_v4 = vld [vmem:[%s24176_s26 + $0x8] sm:$0xff]  ;;  %v238_v7 = vld [vmem:[%s24176_s26 + $0x20] sm:$0xff]  ;;  %v241_v15 = vld [vmem:[%s24176_s26 + $0x38] sm:$0xff] }
 0x106   :  { %v239_v6 = vld [vmem:[%s24176_s26 + $0x28] sm:$0xff]  ;;  %v240_v18 = vld [vmem:[%s24176_s26 + $0x30] sm:$0xff]  ;;  %1464 = vmatpush1.bf16.msra.mxu0 %v18243_v13  ;;  %1537 = vmatpush1.bf16.msra.mxu1 %v18244_v14  ;;  %v22020_v13 = vand.u32 127, %v242_v12 }
 0x107   :  { %1465 = vmatprep.subr.bf16.mxu0 %v18245_v16  ;;  %1538 = vmatprep.subr.bf16.mxu1 %v18247_v17  ;;  %v18257_v25 = vld [vmem:[#allocation2 + $0x184] ss:$48 sps:$4 sm:$0xff]   ;;  %v18259_v26 = vld [vmem:[#allocation2 + $0x18c] ss:$48 sps:$4 sm:$0xff]   ;;  %v18261_v27 = vld [vmem:[#allocation2 + $0x180] ss:$48 sps:$4 sm:$0xff]  }
 0x108   :  { %v18262_v28 = vld [vmem:[#allocation2 + $0x188] ss:$48 sps:$4 sm:$0xff]   ;;  %v18263_v29 = vld [vmem:[#allocation2 + $0x1e4] ss:$48 sps:$4 sm:$0xff]   ;;  %v18265_v30 = vld [vmem:[#allocation2 + $0x1ec] ss:$48 sps:$4 sm:$0xff]  }
 0x109   :  { %255 = vperm.xlu1 %18230, %v237_v3   ;;  %249 = vperm.xlu0 %18229, %v235_v4   ;;  %v18267_v31 = vld [vmem:[#allocation2 + $0x1e0] ss:$48 sps:$4 sm:$0xff]   ;;  %v18268_v32 = vld [vmem:[#allocation2 + $0x1e8] ss:$48 sps:$4 sm:$0xff]   ;;  %v18269_v33 = vld [vmem:[#allocation2 + $0x244] ss:$48 sps:$4 sm:$0xff]  }
 0x10a   :  { %1466 = vmatpush1.bf16.msra.mxu0 %v18249_v19  ;;  %1539 = vmatpush1.bf16.msra.mxu1 %v18250_v20  ;;  %v18271_v34 = vld [vmem:[#allocation2 + $0x24c] ss:$48 sps:$4 sm:$0xff]   ;;  %v18273_v35 = vld [vmem:[#allocation2 + $0x240] ss:$48 sps:$4 sm:$0xff]   ;;  %v18274_v36 = vld [vmem:[#allocation2 + $0x248] ss:$48 sps:$4 sm:$0xff]  }
 0x10b   :  { %1467 = vmatprep.subr.bf16.mxu0 %v18251_v21  ;;  %1540 = vmatprep.subr.bf16.mxu1 %v18253_v22  ;;  %v18275_v37 = vld [vmem:[#allocation2 + $0x2a4] ss:$48 sps:$4 sm:$0xff]   ;;  %v18277_v38 = vld [vmem:[#allocation2 + $0x2ac] ss:$48 sps:$4 sm:$0xff]   ;;  %v18279_v39 = vld [vmem:[#allocation2 + $0x2a0] ss:$48 sps:$4 sm:$0xff]  }
 0x10c   :  { %v18280_v40 = vld [vmem:[#allocation2 + $0x2a8] ss:$48 sps:$4 sm:$0xff]   ;;  %v18281_v41 = vld [vmem:[#allocation2 + $0x304] ss:$48 sps:$4 sm:$0xff]   ;;  %v18283_v42 = vld [vmem:[#allocation2 + $0x30c] ss:$48 sps:$4 sm:$0xff]  }
 0x10d   :  { %261 = vperm.xlu1 %18230, %v239_v6   ;;  %258 = vperm.xlu0 %18229, %v238_v7   ;;  %v18285_v43 = vld [vmem:[#allocation2 + $0x300] ss:$48 sps:$4 sm:$0xff]   ;;  %v18286_v44 = vld [vmem:[#allocation2 + $0x308] ss:$48 sps:$4 sm:$0xff]   ;;  %v18287_v45 = vld [vmem:[#allocation2 + $0x364] ss:$48 sps:$4 sm:$0xff]  }
 0x10e   :  { %1468 = vmatpush1.bf16.msra.mxu0 %v18255_v23  ;;  %1541 = vmatpush1.bf16.msra.mxu1 %v18256_v24  ;;  %v18289_v46 = vld [vmem:[#allocation2 + $0x36c] ss:$48 sps:$4 sm:$0xff]   ;;  %v18291_v47 = vld [vmem:[#allocation2 + $0x360] ss:$48 sps:$4 sm:$0xff]   ;;  %v18292_v48 = vld [vmem:[#allocation2 + $0x368] ss:$48 sps:$4 sm:$0xff]  }
 0x10f   :  { %1469 = vmatprep.subr.bf16.mxu0 %v18257_v25  ;;  %1542 = vmatprep.subr.bf16.mxu1 %v18259_v26  ;;  %v18293_v49 = vld [vmem:[#allocation2 + $0x3c4] ss:$48 sps:$4 sm:$0xff]   ;;  %v18295_v50 = vld [vmem:[#allocation2 + $0x3cc] ss:$48 sps:$4 sm:$0xff]   ;;  %v18297_v51 = vld [vmem:[#allocation2 + $0x3c0] ss:$48 sps:$4 sm:$0xff]  }
 0x110   :  { %v18298_v52 = vld [vmem:[#allocation2 + $0x3c8] ss:$48 sps:$4 sm:$0xff]   ;;  %v18299_v53 = vld [vmem:[#allocation2 + $0x424] ss:$48 sps:$4 sm:$0xff]   ;;  %v18301_v54 = vld [vmem:[#allocation2 + $0x42c] ss:$48 sps:$4 sm:$0xff]  }
 0x111   :  { %267 = vperm.xlu1 %18230, %v241_v15   ;;  %264 = vperm.xlu0 %18229, %v240_v18   ;;  %v18303_v55 = vld [vmem:[#allocation2 + $0x420] ss:$48 sps:$4 sm:$0xff]   ;;  %v18304_v56 = vld [vmem:[#allocation2 + $0x428] ss:$48 sps:$4 sm:$0xff]   ;;  %v18305_v57 = vld [vmem:[#allocation2 + $0x484] ss:$48 sps:$4 sm:$0xff]  }
 0x112   :  { %1470 = vmatpush1.bf16.msra.mxu0 %v18261_v27  ;;  %1543 = vmatpush1.bf16.msra.mxu1 %v18262_v28  ;;  %v18307_v58 = vld [vmem:[#allocation2 + $0x48c] ss:$48 sps:$4 sm:$0xff]   ;;  %v18309_v59 = vld [vmem:[#allocation2 + $0x480] ss:$48 sps:$4 sm:$0xff]   ;;  %v18310_v60 = vld [vmem:[#allocation2 + $0x488] ss:$48 sps:$4 sm:$0xff]  }
 0x113   :  { %1471 = vmatprep.subr.bf16.mxu0 %v18263_v29  ;;  %1544 = vmatprep.subr.bf16.mxu1 %v18265_v30  ;;  %v18311_v61 = vld [vmem:[#allocation2 + $0x4e4] ss:$48 sps:$4 sm:$0xff]   ;;  %v18313_v62 = vld [vmem:[#allocation2 + $0x4ec] ss:$48 sps:$4 sm:$0xff]   ;;  %v18315_v63 = vld [vmem:[#allocation2 + $0x4e0] ss:$48 sps:$4 sm:$0xff]  }
 0x114   :  { %v18316_v1 = vld [vmem:[#allocation2 + $0x4e8] ss:$48 sps:$4 sm:$0xff]   ;;  %v18317_v2 = vld [vmem:[#allocation2 + $0x544] ss:$48 sps:$4 sm:$0xff]   ;;  %v18319_v3 = vld [vmem:[#allocation2 + $0x54c] ss:$48 sps:$4 sm:$0xff]  }
 0x115   :  { %v18321_v4 = vld [vmem:[#allocation2 + $0x540] ss:$48 sps:$4 sm:$0xff]   ;;  %v18322_v5 = vld [vmem:[#allocation2 + $0x548] ss:$48 sps:$4 sm:$0xff]   ;;  %v18323_v6 = vld [vmem:[#allocation2 + $0x5a4] ss:$48 sps:$4 sm:$0xff]  }
 0x116   :  { %1472 = vmatpush1.bf16.msra.mxu0 %v18267_v31  ;;  %1545 = vmatpush1.bf16.msra.mxu1 %v18268_v32  ;;  %v18325_v7 = vld [vmem:[#allocation2 + $0x5ac] ss:$48 sps:$4 sm:$0xff]   ;;  %v18327_v8 = vld [vmem:[#allocation2 + $0x5a0] ss:$48 sps:$4 sm:$0xff]   ;;  %v18328_v9 = vld [vmem:[#allocation2 + $0x5a8] ss:$48 sps:$4 sm:$0xff]  }
 0x117   :  { %1473 = vmatprep.subr.bf16.mxu0 %v18269_v33  ;;  %1546 = vmatprep.subr.bf16.mxu1 %v18271_v34  ;;  %v18331_v10 = vld [vmem:[#allocation2 + $0x1c] ss:$48 sps:$4 sm:$0xff]   ;;  %v18334_v11 = vld [vmem:[#allocation2 + $0x24] ss:$48 sps:$4 sm:$0xff]   ;;  %v22023_v16 = vadd.s32 128, %v22020_v13 }
 0x118   :  { %v18329_v19 = vld [vmem:[#allocation2 + $0x18] ss:$48 sps:$4 sm:$0xff]   ;;  %v18332_v20 = vld [vmem:[#allocation2 + $0x20] ss:$48 sps:$4 sm:$0xff]   ;;  %v18337_v21 = vld [vmem:[#allocation2 + $0x7c] ss:$48 sps:$4 sm:$0xff]  }
 0x119   :  { %v18340_v22 = vld [vmem:[#allocation2 + $0x84] ss:$48 sps:$4 sm:$0xff]   ;;  %v24139_v27 = vmov 1.0|1.0   ;;  %v18335_v28 = vld [vmem:[#allocation2 + $0x78] ss:$48 sps:$4 sm:$0xff]  }
 0x11a   :  { %1474 = vmatpush1.bf16.msra.mxu0 %v18273_v35  ;;  %1547 = vmatpush1.bf16.msra.mxu1 %v18274_v36  ;;  %v18338_v29 = vld [vmem:[#allocation2 + $0x80] ss:$48 sps:$4 sm:$0xff]   ;;  %v18343_v31 = vld [vmem:[#allocation2 + $0xdc] ss:$48 sps:$4 sm:$0xff]   ;;  %v18346_v32 = vld [vmem:[#allocation2 + $0xe4] ss:$48 sps:$4 sm:$0xff]  }
 0x11b   :  { %1475 = vmatprep.subr.bf16.mxu0 %v18275_v37  ;;  %1548 = vmatprep.subr.bf16.mxu1 %v18277_v38  ;;  %v18341_v35 = vld [vmem:[#allocation2 + $0xd8] ss:$48 sps:$4 sm:$0xff]   ;;  %v18344_v36 = vld [vmem:[#allocation2 + $0xe0] ss:$48 sps:$4 sm:$0xff]   ;;  %v18475_v26 = vld [vmem:[#allocation4 + $0x4] ss:$48 sps:$4 sm:$0xff]  }
 0x11c   :  { %v18461_v23 = vld [vmem:[#allocation2 + $0x4a8] ss:$48 sps:$4 sm:$0xff]   ;;  %v18478_v30 = vld [vmem:[#allocation4 + $0xc] ss:$48 sps:$4 sm:$0xff]   ;;  %v18473_v37 = vld [vmem:[#allocation4] ss:$48 sps:$4 sm:$0xff]  }
 0x11e   :  { %1476 = vmatpush1.bf16.msra.mxu0 %v18279_v39  ;;  %1549 = vmatpush1.bf16.msra.mxu1 %v18280_v40  ;;  %v18349_v39 = vld [vmem:[#allocation2 + $0x13c] ss:$48 sps:$4 sm:$0xff]   ;;  %v18352_v40 = vld [vmem:[#allocation2 + $0x144] ss:$48 sps:$4 sm:$0xff]  }
 0x11f   :  { %1477 = vmatprep.subr.bf16.mxu0 %v18281_v41  ;;  %1550 = vmatprep.subr.bf16.mxu1 %v18283_v42  ;;  %v18347_v42 = vld [vmem:[#allocation2 + $0x138] ss:$48 sps:$4 sm:$0xff]  }
 0x122   :  { %1478 = vmatpush1.bf16.msra.mxu0 %v18285_v43  ;;  %1551 = vmatpush1.bf16.msra.mxu1 %v18286_v44  ;;  %v18350_v43 = vld [vmem:[#allocation2 + $0x140] ss:$48 sps:$4 sm:$0xff]   ;;  %v18355_v44 = vld [vmem:[#allocation2 + $0x19c] ss:$48 sps:$4 sm:$0xff]  }
 0x123   :  { %1479 = vmatprep.subr.bf16.mxu0 %v18287_v45  ;;  %1552 = vmatprep.subr.bf16.mxu1 %v18289_v46  ;;  %v18358_v45 = vld [vmem:[#allocation2 + $0x1a4] ss:$48 sps:$4 sm:$0xff]  }
 0x126   :  { %1480 = vmatpush1.bf16.msra.mxu0 %v18291_v47  ;;  %1553 = vmatpush1.bf16.msra.mxu1 %v18292_v48  ;;  %v18353_v47 = vld [vmem:[#allocation2 + $0x198] ss:$48 sps:$4 sm:$0xff]   ;;  %v18356_v48 = vld [vmem:[#allocation2 + $0x1a0] ss:$48 sps:$4 sm:$0xff]  }
 0x127   :  { %1481 = vmatprep.subr.bf16.mxu0 %v18293_v49  ;;  %1554 = vmatprep.subr.bf16.mxu1 %v18295_v50  ;;  %v18361_v49 = vld [vmem:[#allocation2 + $0x1fc] ss:$48 sps:$4 sm:$0xff]   ;;  %v18364_v50 = vld [vmem:[#allocation2 + $0x204] ss:$48 sps:$4 sm:$0xff]  }
 0x12a   :  { %1482 = vmatpush1.bf16.msra.mxu0 %v18297_v51  ;;  %1555 = vmatpush1.bf16.msra.mxu1 %v18298_v52  ;;  %v18359_v52 = vld [vmem:[#allocation2 + $0x1f8] ss:$48 sps:$4 sm:$0xff]  }
 0x12b   :  { %1483 = vmatprep.subr.bf16.mxu0 %v18299_v53  ;;  %1556 = vmatprep.subr.bf16.mxu1 %v18301_v54  ;;  %v18362_v53 = vld [vmem:[#allocation2 + $0x200] ss:$48 sps:$4 sm:$0xff]   ;;  %v18367_v54 = vld [vmem:[#allocation2 + $0x25c] ss:$48 sps:$4 sm:$0xff]  }
 0x12e   :  { %1484 = vmatpush1.bf16.msra.mxu0 %v18303_v55  ;;  %1557 = vmatpush1.bf16.msra.mxu1 %v18304_v56  ;;  %v18370_v55 = vld [vmem:[#allocation2 + $0x264] ss:$48 sps:$4 sm:$0xff]   ;;  %v18365_v56 = vld [vmem:[#allocation2 + $0x258] ss:$48 sps:$4 sm:$0xff]  }
 0x12f   :  { %1485 = vmatprep.subr.bf16.mxu0 %v18305_v57  ;;  %1558 = vmatprep.subr.bf16.mxu1 %v18307_v58  ;;  %v18368_v57 = vld [vmem:[#allocation2 + $0x260] ss:$48 sps:$4 sm:$0xff]   ;;  %v18373_v58 = vld [vmem:[#allocation2 + $0x2bc] ss:$48 sps:$4 sm:$0xff]  }
 0x132   :  { %1486 = vmatpush1.bf16.msra.mxu0 %v18309_v59  ;;  %1559 = vmatpush1.bf16.msra.mxu1 %v18310_v60  ;;  %v18376_v59 = vld [vmem:[#allocation2 + $0x2c4] ss:$48 sps:$4 sm:$0xff]   ;;  %v18371_v60 = vld [vmem:[#allocation2 + $0x2b8] ss:$48 sps:$4 sm:$0xff]  }
 0x133   :  { %1487 = vmatprep.subr.bf16.mxu0 %v18311_v61  ;;  %1560 = vmatprep.subr.bf16.mxu1 %v18313_v62  ;;  %v18374_v61 = vld [vmem:[#allocation2 + $0x2c0] ss:$48 sps:$4 sm:$0xff]   ;;  %v18379_v62 = vld [vmem:[#allocation2 + $0x31c] ss:$48 sps:$4 sm:$0xff]  }
 0x136   :  { %1488 = vmatpush1.bf16.msra.mxu0 %v18315_v63  ;;  %1561 = vmatpush1.bf16.msra.mxu1 %v18316_v1  ;;  %v18382_v63 = vld [vmem:[#allocation2 + $0x324] ss:$48 sps:$4 sm:$0xff]   ;;  %v18377_v1 = vld [vmem:[#allocation2 + $0x318] ss:$48 sps:$4 sm:$0xff]  }
 0x137   :  { %1489 = vmatprep.subr.bf16.mxu0 %v18317_v2  ;;  %1562 = vmatprep.subr.bf16.mxu1 %v18319_v3  ;;  %v18380_v2 = vld [vmem:[#allocation2 + $0x320] ss:$48 sps:$4 sm:$0xff]   ;;  %v18385_v3 = vld [vmem:[#allocation2 + $0x37c] ss:$48 sps:$4 sm:$0xff]  }
 0x13a   :  { %1490 = vmatpush1.bf16.msra.mxu0 %v18321_v4  ;;  %1563 = vmatpush1.bf16.msra.mxu1 %v18322_v5  ;;  %v18388_v4 = vld [vmem:[#allocation2 + $0x384] ss:$48 sps:$4 sm:$0xff]   ;;  %v18383_v5 = vld [vmem:[#allocation2 + $0x378] ss:$48 sps:$4 sm:$0xff]  }
 0x13b   :  { %1491 = vmatprep.subr.bf16.mxu0 %v18323_v6  ;;  %1564 = vmatprep.subr.bf16.mxu1 %v18325_v7  ;;  %v18386_v6 = vld [vmem:[#allocation2 + $0x380] ss:$48 sps:$4 sm:$0xff]   ;;  %v18391_v7 = vld [vmem:[#allocation2 + $0x3dc] ss:$48 sps:$4 sm:$0xff]  }
 0x13e   :  { %1492 = vmatpush1.bf16.msra.mxu0 %v18327_v8  ;;  %1565 = vmatpush1.bf16.msra.mxu1 %v18328_v9  ;;  %v18394_v8 = vld [vmem:[#allocation2 + $0x3e4] ss:$48 sps:$4 sm:$0xff]   ;;  %v18389_v9 = vld [vmem:[#allocation2 + $0x3d8] ss:$48 sps:$4 sm:$0xff]  }
 0x13f   :  { %1599 = vmatprep.subr.bf16.mxu0 %v18331_v10  ;;  %1672 = vmatprep.subr.bf16.mxu1 %v18334_v11  ;;  %v18392_v10 = vld [vmem:[#allocation2 + $0x3e0] ss:$48 sps:$4 sm:$0xff]   ;;  %v18397_v11 = vld [vmem:[#allocation2 + $0x43c] ss:$48 sps:$4 sm:$0xff]  }
 0x184   :  { %v253_v14 = vpop.permute.xlu1 %252  ;;  %v247_v15 = vpop.permute.xlu0 %246 }
 0x185   :  { %vm274_vm2 = vcmp.eq.s32.totalorder %v253_v14, %v22023_v16  ;;  %vm270_vm3 = vcmp.eq.s32.totalorder %v247_v15, %v22023_v16  ;;  %vm269_vm5 = vcmp.eq.s32.totalorder %v247_v15, %v22020_v13  ;;  %vm273_vm9 = vcmp.eq.s32.totalorder %v253_v14, %v22020_v13  ;;  %v18400_v14 = vld [vmem:[#allocation2 + $0x444] ss:$48 sps:$4 sm:$0xff]   ;;  %v18395_v15 = vld [vmem:[#allocation2 + $0x438] ss:$48 sps:$4 sm:$0xff]  }
 0x188   :  { %v256_v17 = vpop.permute.xlu1 %255  ;;  %v250_v18 = vpop.permute.xlu0 %249 }
 0x189   :  { %vm272_vm0 = vcmp.eq.s32.totalorder %v250_v18, %v22023_v16  ;;  %vm271_vm1 = vcmp.eq.s32.totalorder %v250_v18, %v22020_v13  ;;  %vm276_vm4 = vcmp.eq.s32.totalorder %v256_v17, %v22023_v16  ;;  %vm275_vm10 = vcmp.eq.s32.totalorder %v256_v17, %v22020_v13  ;;  %v18398_v17 = vld [vmem:[#allocation2 + $0x440] ss:$48 sps:$4 sm:$0xff]   ;;  %v18403_v18 = vld [vmem:[#allocation2 + $0x49c] ss:$48 sps:$4 sm:$0xff]  }
 0x18a   :  { %vm22031_vm6 = vmpackc.low %vm272_vm0, %vm270_vm3 }
 0x18b   :  { %vm22035_vm7 = vmpackc.low %vm271_vm1, %vm269_vm5  ;;  %15742 = vmatprep.mubr.msk.bf16.mxu0 %vm22031_vm6, %v24139_v27  ;;  %15758 = vmatprep.mubr.msk.bf16.mxu1 %vm22031_vm6, %v24139_v27 }
 0x18c   :  { %v262_v24 = vpop.permute.xlu1 %261  ;;  %v259_v25 = vpop.permute.xlu0 %258  ;;  %vm22045_vm8 = vmpackc.low %vm276_vm4, %vm274_vm2  ;;  %15744 = vmatmul.mubr.msk.bf16.vlgmr.msra.gmra.mrb[0].mxu0 %vm22035_vm7, %v24139_v27  ;;  %15760 = vmatmul.mubr.msk.bf16.vlgmr.msra.gmra.mrb[0].mxu1 %vm22035_vm7, %v24139_v27 }
 0x18d   :  { %1600 = vmatpush1.bf16.msra.mxu0 %v18329_v19  ;;  %1673 = vmatpush1.bf16.msra.mxu1 %v18332_v20  ;;  %vm280_vm11 = vcmp.eq.s32.totalorder %v262_v24, %v22023_v16  ;;  %vm278_vm12 = vcmp.eq.s32.totalorder %v259_v25, %v22023_v16  ;;  %vm22062_vm13 = vmpackc.low %vm275_vm10, %vm273_vm9  ;;  %vm279_vm14 = vcmp.eq.s32.totalorder %v262_v24, %v22020_v13  ;;  %v18406_v19 = vld [vmem:[#allocation2 + $0x4a4] ss:$48 sps:$4 sm:$0xff]   ;;  %v18401_v20 = vld [vmem:[#allocation2 + $0x498] ss:$48 sps:$4 sm:$0xff]  }
 0x18e   :  { %1601 = vmatprep.subr.bf16.mxu0 %v18337_v21  ;;  %1674 = vmatprep.subr.bf16.mxu1 %v18340_v22  ;;  %vm277_vm15 = vcmp.eq.s32.totalorder %v259_v25, %v22020_v13  ;;  %vm22071_vm0 = vmpackc.low %vm280_vm11, %vm278_vm12  ;;  %v18404_v21 = vld [vmem:[#allocation2 + $0x4a0] ss:$48 sps:$4 sm:$0xff]   ;;  %v18409_v22 = vld [vmem:[#allocation2 + $0x4fc] ss:$48 sps:$4 sm:$0xff]  }
 0x18f   :  { %15746 = vmatprep.mubr.msk.bf16.mxu0 %vm22045_vm8, %v24139_v27  ;;  %15762 = vmatprep.mubr.msk.bf16.mxu1 %vm22045_vm8, %v24139_v27  ;;  %vm22077_vm3 = vmpackc.low %vm279_vm14, %vm277_vm15  ;;  %v18412_v24 = vld [vmem:[#allocation2 + $0x504] ss:$48 sps:$4 sm:$0xff]   ;;  %v18407_v25 = vld [vmem:[#allocation2 + $0x4f8] ss:$48 sps:$4 sm:$0xff]  }
 0x190   :  { %v268_v33 = vpop.permute.xlu1 %267  ;;  %v265_v34 = vpop.permute.xlu0 %264 }
 0x191   :  { %1602 = vmatpush1.bf16.msra.mxu0 %v18335_v28  ;;  %1675 = vmatpush1.bf16.msra.mxu1 %v18338_v29  ;;  %vm284_vm1 = vcmp.eq.s32.totalorder %v268_v33, %v22023_v16  ;;  %vm282_vm2 = vcmp.eq.s32.totalorder %v265_v34, %v22023_v16  ;;  %vm283_vm5 = vcmp.eq.s32.totalorder %v268_v33, %v22020_v13  ;;  %v18410_v28 = vld [vmem:[#allocation2 + $0x500] ss:$48 sps:$4 sm:$0xff]   ;;  %v18415_v29 = vld [vmem:[#allocation2 + $0x55c] ss:$48 sps:$4 sm:$0xff]  }
 0x192   :  { %1603 = vmatprep.subr.bf16.mxu0 %v18343_v31  ;;  %1676 = vmatprep.subr.bf16.mxu1 %v18346_v32  ;;  %vm22087_vm4 = vmpackc.low %vm284_vm1, %vm282_vm2  ;;  %vm281_vm9 = vcmp.eq.s32.totalorder %v265_v34, %v22020_v13  ;;  %v18418_v31 = vld [vmem:[#allocation2 + $0x564] ss:$48 sps:$4 sm:$0xff]   ;;  %v18413_v32 = vld [vmem:[#allocation2 + $0x558] ss:$48 sps:$4 sm:$0xff]  }
 0x193   :  { %vm22099_vm10 = vmpackc.low %vm283_vm5, %vm281_vm9  ;;  %v18416_v33 = vld [vmem:[#allocation2 + $0x560] ss:$48 sps:$4 sm:$0xff]   ;;  %v18421_v34 = vld [vmem:[#allocation2 + $0x5bc] ss:$48 sps:$4 sm:$0xff]  }
 0x194   :  { %15748 = vmatmul.mubr.msk.bf16.gmra.mrb[4].mxu0 %vm22062_vm13, %v24139_v27  ;;  %15764 = vmatmul.mubr.msk.bf16.gmra.mrb[4].mxu1 %vm22062_vm13, %v24139_v27 }
 0x195   :  { %1604 = vmatpush1.bf16.msra.mxu0 %v18341_v35  ;;  %1677 = vmatpush1.bf16.msra.mxu1 %v18344_v36  ;;  %v18424_v35 = vld [vmem:[#allocation2 + $0x5c4] ss:$48 sps:$4 sm:$0xff]   ;;  %v18419_v36 = vld [vmem:[#allocation2 + $0x5b8] ss:$48 sps:$4 sm:$0xff]  }
 0x196   :  { %15750 = vmatprep.mubr.msk.bf16.mxu0 %vm22071_vm0, %v24139_v27  ;;  %15766 = vmatprep.mubr.msk.bf16.mxu1 %vm22071_vm0, %v24139_v27 }
 0x197   :  { %1605 = vmatprep.subr.bf16.mxu0 %v18349_v39  ;;  %1678 = vmatprep.subr.bf16.mxu1 %v18352_v40  ;;  %v18422_v39 = vld [vmem:[#allocation2 + $0x5c0] ss:$48 sps:$4 sm:$0xff]   ;;  %v18427_v40 = vld [vmem:[#allocation2 + $0x2c] ss:$48 sps:$4 sm:$0xff]  }
 0x199   :  { %1606 = vmatpush1.bf16.msra.mxu0 %v18347_v42  ;;  %1679 = vmatpush1.bf16.msra.mxu1 %v18350_v43  ;;  %v18425_v42 = vld [vmem:[#allocation2 + $0x28] ss:$48 sps:$4 sm:$0xff]   ;;  %v18430_v43 = vld [vmem:[#allocation2 + $0x8c] ss:$48 sps:$4 sm:$0xff]  }
 0x19a   :  { %1607 = vmatprep.subr.bf16.mxu0 %v18355_v44  ;;  %1680 = vmatprep.subr.bf16.mxu1 %v18358_v45  ;;  %v18428_v44 = vld [vmem:[#allocation2 + $0x88] ss:$48 sps:$4 sm:$0xff]   ;;  %v18433_v45 = vld [vmem:[#allocation2 + $0xec] ss:$48 sps:$4 sm:$0xff]  }
 0x19c   :  { %15752 = vmatmul.mubr.msk.bf16.gmra.mrb[8].mxu0 %vm22077_vm3, %v24139_v27  ;;  %15768 = vmatmul.mubr.msk.bf16.gmra.mrb[8].mxu1 %vm22077_vm3, %v24139_v27 }
 0x19d   :  { %1608 = vmatpush1.bf16.msra.mxu0 %v18353_v47  ;;  %1681 = vmatpush1.bf16.msra.mxu1 %v18356_v48  ;;  %v18431_v47 = vld [vmem:[#allocation2 + $0xe8] ss:$48 sps:$4 sm:$0xff]   ;;  %v18436_v48 = vld [vmem:[#allocation2 + $0x14c] ss:$48 sps:$4 sm:$0xff]  }
 0x19e   :  { %15754 = vmatprep.mubr.msk.bf16.mxu0 %vm22087_vm4, %v24139_v27  ;;  %15770 = vmatprep.mubr.msk.bf16.mxu1 %vm22087_vm4, %v24139_v27 }
 0x19f   :  { %1609 = vmatprep.subr.bf16.mxu0 %v18361_v49  ;;  %1682 = vmatprep.subr.bf16.mxu1 %v18364_v50  ;;  %v18434_v49 = vld [vmem:[#allocation2 + $0x148] ss:$48 sps:$4 sm:$0xff]   ;;  %v18439_v50 = vld [vmem:[#allocation2 + $0x1ac] ss:$48 sps:$4 sm:$0xff]  }
 0x1a1   :  { %1610 = vmatpush1.bf16.msra.mxu0 %v18359_v52  ;;  %1683 = vmatpush1.bf16.msra.mxu1 %v18362_v53  ;;  %v18437_v52 = vld [vmem:[#allocation2 + $0x1a8] ss:$48 sps:$4 sm:$0xff]   ;;  %v18442_v53 = vld [vmem:[#allocation2 + $0x20c] ss:$48 sps:$4 sm:$0xff]  }
 0x1a2   :  { %1611 = vmatprep.subr.bf16.mxu0 %v18367_v54  ;;  %1684 = vmatprep.subr.bf16.mxu1 %v18370_v55  ;;  %v18440_v54 = vld [vmem:[#allocation2 + $0x208] ss:$48 sps:$4 sm:$0xff]   ;;  %v18445_v55 = vld [vmem:[#allocation2 + $0x26c] ss:$48 sps:$4 sm:$0xff]  }
 0x1a4   :  { %15756 = vmatmul.mubr.msk.bf16.gmra.mrb[12].mxu0 %vm22099_vm10, %v24139_v27  ;;  %15772 = vmatmul.mubr.msk.bf16.gmra.mrb[12].mxu1 %vm22099_vm10, %v24139_v27 }
 0x1a5   :  { %1612 = vmatpush1.bf16.msra.mxu0 %v18365_v56  ;;  %1685 = vmatpush1.bf16.msra.mxu1 %v18368_v57  ;;  %v18443_v56 = vld [vmem:[#allocation2 + $0x268] ss:$48 sps:$4 sm:$0xff]   ;;  %v18448_v57 = vld [vmem:[#allocation2 + $0x2cc] ss:$48 sps:$4 sm:$0xff]  }
 0x1a6   :  { %15774 = vmatprep.mubr.msk.bf16.mxu0 %vm22031_vm6, %v24139_v27  ;;  %15790 = vmatprep.mubr.msk.bf16.mxu1 %vm22031_vm6, %v24139_v27 }
 0x1a7   :  { %1613 = vmatprep.subr.bf16.mxu0 %v18373_v58  ;;  %1686 = vmatprep.subr.bf16.mxu1 %v18376_v59  ;;  %v18446_v58 = vld [vmem:[#allocation2 + $0x2c8] ss:$48 sps:$4 sm:$0xff]   ;;  %v18451_v59 = vld [vmem:[#allocation2 + $0x32c] ss:$48 sps:$4 sm:$0xff]  }
 0x1a9   :  { %1614 = vmatpush1.bf16.msra.mxu0 %v18371_v60  ;;  %1687 = vmatpush1.bf16.msra.mxu1 %v18374_v61  ;;  %v18449_v60 = vld [vmem:[#allocation2 + $0x328] ss:$48 sps:$4 sm:$0xff]   ;;  %v18454_v61 = vld [vmem:[#allocation2 + $0x38c] ss:$48 sps:$4 sm:$0xff]  }
 0x1aa   :  { %1615 = vmatprep.subr.bf16.mxu0 %v18379_v62  ;;  %1688 = vmatprep.subr.bf16.mxu1 %v18382_v63  ;;  %v18452_v62 = vld [vmem:[#allocation2 + $0x388] ss:$48 sps:$4 sm:$0xff]   ;;  %v18457_v63 = vld [vmem:[#allocation2 + $0x3ec] ss:$48 sps:$4 sm:$0xff]  }
 0x1ad   :  { %1616 = vmatpush1.bf16.msra.mxu0 %v18377_v1  ;;  %1689 = vmatpush1.bf16.msra.mxu1 %v18380_v2  ;;  %v18455_v1 = vld [vmem:[#allocation2 + $0x3e8] ss:$48 sps:$4 sm:$0xff]   ;;  %v18460_v2 = vld [vmem:[#allocation2 + $0x44c] ss:$48 sps:$4 sm:$0xff]  }
 0x1ae   :  { %1617 = vmatprep.subr.bf16.mxu0 %v18385_v3  ;;  %1690 = vmatprep.subr.bf16.mxu1 %v18388_v4  ;;  %v18458_v3 = vld [vmem:[#allocation2 + $0x448] ss:$48 sps:$4 sm:$0xff]   ;;  %v18463_v4 = vld [vmem:[#allocation2 + $0x4ac] ss:$48 sps:$4 sm:$0xff]  }
 0x1b1   :  { %1618 = vmatpush1.bf16.msra.mxu0 %v18383_v5  ;;  %1691 = vmatpush1.bf16.msra.mxu1 %v18386_v6  ;;  %v18466_v5 = vld [vmem:[#allocation2 + $0x50c] ss:$48 sps:$4 sm:$0xff]   ;;  %v18464_v6 = vld [vmem:[#allocation2 + $0x508] ss:$48 sps:$4 sm:$0xff]  }
 0x1b2   :  { %1619 = vmatprep.subr.bf16.mxu0 %v18391_v7  ;;  %1692 = vmatprep.subr.bf16.mxu1 %v18394_v8  ;;  %v18469_v7 = vld [vmem:[#allocation2 + $0x56c] ss:$48 sps:$4 sm:$0xff]   ;;  %v18467_v8 = vld [vmem:[#allocation2 + $0x568] ss:$48 sps:$4 sm:$0xff]  }
 0x1b5   :  { %1620 = vmatpush1.bf16.msra.mxu0 %v18389_v9  ;;  %1693 = vmatpush1.bf16.msra.mxu1 %v18392_v10  ;;  %v18472_v9 = vld [vmem:[#allocation2 + $0x5cc] ss:$48 sps:$4 sm:$0xff]   ;;  %v18470_v10 = vld [vmem:[#allocation2 + $0x5c8] ss:$48 sps:$4 sm:$0xff]  }
 0x1b6   :  { %1621 = vmatprep.subr.bf16.mxu0 %v18397_v11  ;;  %1694 = vmatprep.subr.bf16.mxu1 %v18400_v14  ;;  %v18476_v11 = vld [vmem:[#allocation4 + $0x8] ss:$48 sps:$4 sm:$0xff]  }
 0x1b9   :  { %1622 = vmatpush1.bf16.msra.mxu0 %v18395_v15  ;;  %1695 = vmatpush1.bf16.msra.mxu1 %v18398_v17 }
 0x1ba   :  { %1623 = vmatprep.subr.bf16.mxu0 %v18403_v18  ;;  %1696 = vmatprep.subr.bf16.mxu1 %v18406_v19  ;;  %v18481_v18 = vld [vmem:[#allocation4 + $0x64] ss:$48 sps:$4 sm:$0xff]   ;;  %v18484_v19 = vld [vmem:[#allocation4 + $0x6c] ss:$48 sps:$4 sm:$0xff]  }
 0x1bd   :  { %1624 = vmatpush1.bf16.msra.mxu0 %v18401_v20  ;;  %1697 = vmatpush1.bf16.msra.mxu1 %v18404_v21  ;;  %v22200_v21 = vshrl.u32 %v242_v12, 7 }
 0x1be   :  { %1625 = vmatprep.subr.bf16.mxu0 %v18409_v22  ;;  %1698 = vmatprep.subr.bf16.mxu1 %v18412_v24  ;;  %v18479_v22 = vld [vmem:[#allocation4 + $0x60] ss:$48 sps:$4 sm:$0xff]   ;;  %v18482_v24 = vld [vmem:[#allocation4 + $0x68] ss:$48 sps:$4 sm:$0xff]  }
 0x1bf   :  { %v22212_v12 = vsub.s32 2, %v22200_v21 }
 0x1c1   :  { %1626 = vmatpush1.bf16.msra.mxu0 %v18407_v25  ;;  %1699 = vmatpush1.bf16.msra.mxu1 %v18410_v28  ;;  %v18487_v25 = vld [vmem:[#allocation4 + $0xc4] ss:$48 sps:$4 sm:$0xff]   ;;  %v18490_v28 = vld [vmem:[#allocation4 + $0xcc] ss:$48 sps:$4 sm:$0xff]   ;;  %24194 = vst [vmem:[#allocation33_spill] sm:$0xff] %v22212_v12 }
 0x1c2   :  { %1627 = vmatprep.subr.bf16.mxu0 %v18415_v29  ;;  %1700 = vmatprep.subr.bf16.mxu1 %v18418_v31  ;;  %v22202_v29 = vld [vmem:[#allocation6] sm:$0xff] }
 0x1c3   :  { %v18485_v31 = vld [vmem:[#allocation4 + $0xc0] ss:$48 sps:$4 sm:$0xff]  }
 0x1c5   :  { %1628 = vmatpush1.bf16.msra.mxu0 %v18413_v32  ;;  %1701 = vmatpush1.bf16.msra.mxu1 %v18416_v33  ;;  %v18488_v32 = vld [vmem:[#allocation4 + $0xc8] ss:$48 sps:$4 sm:$0xff]   ;;  %v22205_v33 = vsub.s32 0, %v22200_v21 }
 0x1c6   :  { %1629 = vmatprep.subr.bf16.mxu0 %v18421_v34  ;;  %1702 = vmatprep.subr.bf16.mxu1 %v18424_v35 }
 0x1c7   :  { %24193 = vst [vmem:[#allocation32_spill] sm:$0xff] %v22205_v33 }
 0x1c9   :  { %1630 = vmatpush1.bf16.msra.mxu0 %v18419_v36  ;;  %1703 = vmatpush1.bf16.msra.mxu1 %v18422_v39 }
 0x1ca   :  { %1745 = vmatprep.subr.bf16.mxu0 %v18427_v40  ;;  %3942 = vmatprep.subr.bf16.mxu1 %v18475_v26  ;;  %v18508_v26 = vld [vmem:[#allocation4 + $0x1ec] ss:$48 sps:$4 sm:$0xff]  }
 0x1cc   :  { %15776 = vmatmul.mubr.msk.bf16.vlgmr.msra.gmra.mrb[16].mxu0 %vm22035_vm7, %v24139_v27  ;;  %15792 = vmatmul.mubr.msk.bf16.vlgmr.msra.gmra.mrb[16].mxu1 %vm22035_vm7, %v24139_v27 }
 0x1cd   :  { %15778 = vmatprep.mubr.msk.bf16.mxu0 %vm22045_vm8, %v24139_v27  ;;  %15794 = vmatprep.mubr.msk.bf16.mxu1 %vm22045_vm8, %v24139_v27 }
 0x1ce   :  { %1746 = vmatpush1.bf16.msra.mxu0 %v18425_v42  ;;  %3943 = vmatpush1.bf16.msra.mxu1 %v18473_v37  ;;  %v18509_v37 = vld [vmem:[#allocation4 + $0x240] ss:$48 sps:$4 sm:$0xff]  }
 0x1cf   :  { %1747 = vmatprep.subr.bf16.mxu0 %v18430_v43  ;;  %3944 = vmatprep.subr.bf16.mxu1 %v18481_v18  ;;  %v18493_v43 = vld [vmem:[#allocation4 + $0x124] ss:$48 sps:$4 sm:$0xff]  }
 0x1d2   :  { %1748 = vmatpush1.bf16.msra.mxu0 %v18428_v44  ;;  %3945 = vmatpush1.bf16.msra.mxu1 %v18479_v22  ;;  %v18496_v44 = vld [vmem:[#allocation4 + $0x12c] ss:$48 sps:$4 sm:$0xff]  }
 0x1d3   :  { %1749 = vmatprep.subr.bf16.mxu0 %v18433_v45  ;;  %3946 = vmatprep.subr.bf16.mxu1 %v18487_v25  ;;  %v22221_v45 = vsub.s32 1, %v22200_v21 }
 0x1d4   :  { %15780 = vmatmul.mubr.msk.bf16.gmra.mrb[20].mxu0 %vm22062_vm13, %v24139_v27  ;;  %15796 = vmatmul.mubr.msk.bf16.gmra.mrb[20].mxu1 %vm22062_vm13, %v24139_v27 }
 0x1d5   :  { %15782 = vmatprep.mubr.msk.bf16.mxu0 %vm22071_vm0, %v24139_v27  ;;  %15798 = vmatprep.mubr.msk.bf16.mxu1 %vm22071_vm0, %v24139_v27  ;;  %24195 = vst [vmem:[#allocation34_spill] sm:$0xff] %v22221_v45 }
 0x1d6   :  { %1750 = vmatpush1.bf16.msra.mxu0 %v18431_v47  ;;  %3947 = vmatpush1.bf16.msra.mxu1 %v18485_v31 }
 0x1d7   :  { %1751 = vmatprep.subr.bf16.mxu0 %v18436_v48  ;;  %3948 = vmatprep.subr.bf16.mxu1 %v18493_v43 }
 0x1da   :  { %1752 = vmatpush1.bf16.msra.mxu0 %v18434_v49  ;;  %v22227_v49 = vrot.slane %v22202_v29, %v22205_v33 }
 0x1db   :  { %1753 = vmatprep.subr.bf16.mxu0 %v18439_v50  ;;  %v18491_v50 = vld [vmem:[#allocation4 + $0x120] ss:$48 sps:$4 sm:$0xff]  }
 0x1dc   :  { %15784 = vmatmul.mubr.msk.bf16.gmra.mrb[24].mxu0 %vm22077_vm3, %v24139_v27  ;;  %15800 = vmatmul.mubr.msk.bf16.gmra.mrb[24].mxu1 %vm22077_vm3, %v24139_v27 }
 0x1dd   :  { %15786 = vmatprep.mubr.msk.bf16.mxu0 %vm22087_vm4, %v24139_v27  ;;  %15802 = vmatprep.mubr.msk.bf16.mxu1 %vm22087_vm4, %v24139_v27 }
 0x1de   :  { %1754 = vmatpush1.bf16.msra.mxu0 %v18437_v52  ;;  %v18494_v52 = vld [vmem:[#allocation4 + $0x128] ss:$48 sps:$4 sm:$0xff]   ;;  %3949 = vmatpush1.bf16.msra.mxu1 %v18491_v50 }
 0x1df   :  { %1755 = vmatprep.subr.bf16.mxu0 %v18442_v53  ;;  %v22231_v53 = vrot.slane %v22202_v29, %v22212_v12 }
 0x1e2   :  { %1756 = vmatpush1.bf16.msra.mxu0 %v18440_v54  ;;  %v18499_v54 = vld [vmem:[#allocation4 + $0x184] ss:$48 sps:$4 sm:$0xff]  }
 0x1e3   :  { %1757 = vmatprep.subr.bf16.mxu0 %v18445_v55  ;;  %v18502_v55 = vld [vmem:[#allocation4 + $0x18c] ss:$48 sps:$4 sm:$0xff]   ;;  %3950 = vmatprep.subr.bf16.mxu1 %v18499_v54 }
 0x1e4   :  { %15788 = vmatmul.mubr.msk.bf16.gmra.mrb[28].mxu0 %vm22099_vm10, %v24139_v27  ;;  %15804 = vmatmul.mubr.msk.bf16.gmra.mrb[28].mxu1 %vm22099_vm10, %v24139_v27 }
 0x1e5   :  { %15806 = vmatprep.mubr.msk.bf16.mxu0 %vm22031_vm6, %v24139_v27 }
 0x1e6   :  { %1758 = vmatpush1.bf16.msra.mxu0 %v18443_v56  ;;  %v22235_v56 = vrot.slane %v22202_v29, %v22221_v45 }
 0x1e7   :  { %1759 = vmatprep.subr.bf16.mxu0 %v18448_v57  ;;  %v18497_v57 = vld [vmem:[#allocation4 + $0x180] ss:$48 sps:$4 sm:$0xff]  }
 0x1e8   :  { %3951 = vmatpush1.bf16.msra.mxu1 %v18497_v57 }
 0x1ea   :  { %1760 = vmatpush1.bf16.msra.mxu0 %v18446_v58  ;;  %v18500_v58 = vld [vmem:[#allocation4 + $0x188] ss:$48 sps:$4 sm:$0xff]  }
 0x1eb   :  { %1761 = vmatprep.subr.bf16.mxu0 %v18451_v59 }
 0x1ee   :  { %1762 = vmatpush1.bf16.msra.mxu0 %v18449_v60 }
 0x1ef   :  { %1763 = vmatprep.subr.bf16.mxu0 %v18454_v61 }
 0x1f2   :  { %1764 = vmatpush1.bf16.msra.mxu0 %v18452_v62 }
 0x1f3   :  { %1765 = vmatprep.subr.bf16.mxu0 %v18457_v63 }
 0x1f6   :  { %1766 = vmatpush1.bf16.msra.mxu0 %v18455_v1 }
 0x1f7   :  { %1767 = vmatprep.subr.bf16.mxu0 %v18460_v2 }
 0x1fa   :  { %1768 = vmatpush1.bf16.msra.mxu0 %v18458_v3 }
 0x1fb   :  { %1769 = vmatprep.subr.bf16.mxu0 %v18463_v4  ;;  %v18505_v4 = vld [vmem:[#allocation4 + $0x1e4] ss:$48 sps:$4 sm:$0xff]  }
 0x1fc   :  { %3952 = vmatprep.subr.bf16.mxu1 %v18505_v4 }
 0x1fe   :  { %1770 = vmatpush1.bf16.msra.mxu0 %v18461_v23 }
 0x1ff   :  { %1771 = vmatprep.subr.bf16.mxu0 %v18466_v5 }
 0x202   :  { %1772 = vmatpush1.bf16.msra.mxu0 %v18464_v6 }
 0x203   :  { %1773 = vmatprep.subr.bf16.mxu0 %v18469_v7 }
 0x206   :  { %1774 = vmatpush1.bf16.msra.mxu0 %v18467_v8 }
 0x207   :  { %1775 = vmatprep.subr.bf16.mxu0 %v18472_v9  ;;  %v18503_v9 = vld [vmem:[#allocation4 + $0x1e0] ss:$48 sps:$4 sm:$0xff]  }
 0x208   :  { %3953 = vmatpush1.bf16.msra.mxu1 %v18503_v9 }
 0x20a   :  { %1776 = vmatpush1.bf16.msra.mxu0 %v18470_v10  ;;  %v18506_v10 = vld [vmem:[#allocation4 + $0x1e8] ss:$48 sps:$4 sm:$0xff]  }
 0x20b   :  { %4088 = vmatprep.subr.bf16.mxu0 %v18478_v30 }
 0x20d   :  { %15808 = vmatmul.mubr.msk.bf16.vlgmr.msra.gmra.mrb[32].mxu0 %vm22035_vm7, %v24139_v27 }
 0x20e   :  { %15810 = vmatprep.mubr.msk.bf16.mxu0 %vm22045_vm8, %v24139_v27  ;;  %4089 = vmatpush1.bf16.msra.mxu0 %v18476_v11  ;;  %v18511_v11 = vld [vmem:[#allocation4 + $0x244] ss:$48 sps:$4 sm:$0xff]  }
 0x20f   :  { %4090 = vmatprep.subr.bf16.mxu0 %v18484_v19  ;;  %3954 = vmatprep.subr.bf16.mxu1 %v18511_v11  ;;  %v18538_v11 = vld [vmem:[#allocation4 + $0x3cc] ss:$48 sps:$4 sm:$0xff]  }
 0x210   :  { %3955 = vmatpush1.bf16.msra.mxu1 %v18509_v37  ;;  %v18535_v37 = vld [vmem:[#allocation4 + $0x3c4] ss:$48 sps:$4 sm:$0xff]  }
 0x212   :  { %4091 = vmatpush1.bf16.msra.mxu0 %v18482_v24 }
 0x213   :  { %4092 = vmatprep.subr.bf16.mxu0 %v18490_v28 }
 0x215   :  { %15812 = vmatmul.mubr.msk.bf16.gmra.mrb[36].mxu0 %vm22062_vm13, %v24139_v27 }
 0x216   :  { %15814 = vmatprep.mubr.msk.bf16.mxu0 %vm22071_vm0, %v24139_v27  ;;  %4093 = vmatpush1.bf16.msra.mxu0 %v18488_v32  ;;  %v18517_v32 = vld [vmem:[#allocation4 + $0x2a4] ss:$48 sps:$4 sm:$0xff]  }
 0x217   :  { %4094 = vmatprep.subr.bf16.mxu0 %v18496_v44  ;;  %3956 = vmatprep.subr.bf16.mxu1 %v18517_v32 }
 0x21a   :  { %4095 = vmatpush1.bf16.msra.mxu0 %v18494_v52 }
 0x21b   :  { %4096 = vmatprep.subr.bf16.mxu0 %v18502_v55  ;;  %v18520_v55 = vld [vmem:[#allocation4 + $0x2ac] ss:$48 sps:$4 sm:$0xff]  }
 0x21d   :  { %15816 = vmatmul.mubr.msk.bf16.gmra.mrb[40].mxu0 %vm22077_vm3, %v24139_v27 }
 0x21e   :  { %15818 = vmatprep.mubr.msk.bf16.mxu0 %vm22087_vm4, %v24139_v27  ;;  %4097 = vmatpush1.bf16.msra.mxu0 %v18500_v58  ;;  %v18526_v58 = vld [vmem:[#allocation4 + $0x30c] ss:$48 sps:$4 sm:$0xff]  }
 0x21f   :  { %4098 = vmatprep.subr.bf16.mxu0 %v18508_v26 }
 0x222   :  { %4099 = vmatpush1.bf16.msra.mxu0 %v18506_v10 }
 0x225   :  { %15820 = vmatmul.mubr.msk.bf16.gmra.mrb[44].mxu0 %vm22099_vm10, %v24139_v27 }
 0x25f   :  { %v1495_v14 = vpop.f32.mrb[0].mxu0  ;;  %v1568_v15 = vpop.f32.mrb[0].mxu1 }
 0x260   :  { %v22193_v38 = vpop.f32.mrb[1].mxu0  ;;  %v1570_v41 = vpop.f32.mrb[1].mxu1  ;;  %v1496_v59 = vadd.f32 %v1495_v14, %v22227_v49  ;;  %v1569_v1 = vadd.f32 %v1568_v15, %v22231_v53 }
 0x261   :  { %v1499_v17 = vpop.f32.mrb[2].mxu0  ;;  %v22195_v46 = vpop.f32.mrb[2].mxu1  ;;  %v1498_v23 = vadd.f32 %v22193_v38, %v22235_v56  ;;  %v18512_v38 = vld [vmem:[#allocation4 + $0x248] ss:$48 sps:$4 sm:$0xff]  }
 0x262   :  { %v22197_v51 = vpop.f32.mrb[3].mxu0  ;;  %v1573_v20 = vpop.f32.mrb[3].mxu1  ;;  %v1500_v5 = vadd.f32 %v1499_v17, %v22227_v49  ;;  %v15821_v7 = vmul.f32 -1.442695, %v1496_v59  ;;  %v15823_v30 = vmul.f32 -1.442695, %v1569_v1  ;;  %v1572_v41 = vadd.f32 %v22195_v46, %v22231_v53 }
 0x263   :  { %v15822_v14 = vmul.f32 -1.442695, %v1498_v23  ;;  %v1502_v17 = vadd.f32 %v22197_v51, %v22235_v56  ;;  %v18514_v20 = vld [vmem:[#allocation4 + $0x24c] ss:$48 sps:$4 sm:$0xff]   ;;  %v18515_v46 = vld [vmem:[#allocation4 + $0x2a0] ss:$48 sps:$4 sm:$0xff]  }
 0x264   :  { %v15824_v15 = vmul.f32 -1.442695, %v1500_v5  ;;  %20473 = vpow2.f32 %v15821_v7  ;;  %4100 = vmatprep.subr.bf16.mxu0 %v18514_v20  ;;  %3957 = vmatpush1.bf16.msra.mxu1 %v18515_v46  ;;  %v18524_v1 = vld [vmem:[#allocation4 + $0x308] ss:$48 sps:$4 sm:$0xff]   ;;  %v18532_v23 = vld [vmem:[#allocation4 + $0x36c] ss:$48 sps:$4 sm:$0xff]  }
 0x265   :  { %20475 = vpow2.f32 %v15823_v30  ;;  %v15825_v44 = vmul.f32 -1.442695, %v1502_v17  ;;  %4101 = vmatpush1.bf16.msra.mxu0 %v18512_v38  ;;  %v18527_v7 = vld [vmem:[#allocation4 + $0x360] ss:$48 sps:$4 sm:$0xff]   ;;  %v18536_v38 = vld [vmem:[#allocation4 + $0x3c8] ss:$48 sps:$4 sm:$0xff]  }
 0x266   :  { %20477 = vpow2.f32 %v15822_v14  ;;  %4102 = vmatprep.subr.bf16.mxu0 %v18520_v55  ;;  %v18541_v46 = vld [vmem:[#allocation4 + $0x424] ss:$48 sps:$4 sm:$0xff]  }
 0x267   :  { %v22207_v34 = vpop.f32.mrb[4].mxu0  ;;  %v22209_v35 = vpop.f32.mrb[4].mxu1  ;;  %20479 = vpow2.f32 %v15824_v15 }
 0x268   :  { %v22214_v36 = vpop.f32.mrb[5].mxu0  ;;  %v1578_v39 = vpop.f32.mrb[5].mxu1  ;;  %v1506_v22 = vadd.f32 %v22207_v34, %v22227_v49  ;;  %v1577_v28 = vadd.f32 %v22209_v35, %v22231_v53  ;;  %v18518_v35 = vld [vmem:[#allocation4 + $0x2a8] ss:$48 sps:$4 sm:$0xff]  }
 0x269   :  { %v22216_v40 = vpop.f32.mrb[6].mxu0  ;;  %v22218_v42 = vpop.f32.mrb[6].mxu1  ;;  %v15826_v39 = vmul.f32 -1.442695, %v1572_v41  ;;  %v1508_v43 = vadd.f32 %v22214_v36, %v22235_v56  ;;  %v18523_v36 = vld [vmem:[#allocation4 + $0x304] ss:$48 sps:$4 sm:$0xff]   ;;  %4103 = vmatpush1.bf16.msra.mxu0 %v18518_v35 }
 0x26a   :  { %v22223_v47 = vpop.f32.mrb[7].mxu0  ;;  %v1581_v48 = vpop.f32.mrb[7].mxu1  ;;  %v15827_v52 = vmul.f32 -1.442695, %v1506_v22  ;;  %v1580_v54 = vadd.f32 %v22218_v42, %v22231_v53  ;;  %v15829_v57 = vmul.f32 -1.442695, %v1577_v28  ;;  %3958 = vmatprep.subr.bf16.mxu1 %v18523_v36  ;;  %4104 = vmatprep.subr.bf16.mxu0 %v18526_v58 }
 0x26b   :  { %v1510_v48 = vadd.f32 %v22216_v40, %v22227_v49  ;;  %20481 = vpow2.f32 %v15826_v39  ;;  %v15828_v59 = vmul.f32 -1.442695, %v1508_v43  ;;  %v18529_v42 = vld [vmem:[#allocation4 + $0x364] ss:$48 sps:$4 sm:$0xff]   ;;  %v1512_v10 = vadd.f32 %v22223_v47, %v22235_v56  ;;  %v18533_v41 = vld [vmem:[#allocation4 + $0x3c0] ss:$48 sps:$4 sm:$0xff]  }
 0x26c   :  { %20483 = vpow2.f32 %v15825_v44  ;;  %v15832_v4 = vmul.f32 -1.442695, %v1580_v54  ;;  %v18542_v39 = vld [vmem:[#allocation4 + $0x428] ss:$48 sps:$4 sm:$0xff]   ;;  %v18544_v43 = vld [vmem:[#allocation4 + $0x42c] ss:$48 sps:$4 sm:$0xff]  }
 0x26d   :  { %v15830_v40 = vmul.f32 -1.442695, %v1510_v48  ;;  %20485 = vpow2.f32 %v15827_v52  ;;  %4105 = vmatpush1.bf16.msra.mxu0 %v18524_v1  ;;  %v15831_v20 = vmul.f32 -1.442695, %v1512_v10  ;;  %v18553_v10 = vld [vmem:[#allocation4 + $0x4e4] ss:$48 sps:$4 sm:$0xff]  }
 0x26e   :  { %20487 = vpow2.f32 %v15829_v57  ;;  %v20474_v5 = vpop.eup %20473  ;;  %4106 = vmatprep.subr.bf16.mxu0 %v18532_v23 }
 0x26f   :  { %v22238_v60 = vpop.f32.mrb[8].mxu0  ;;  %v22240_v61 = vpop.f32.mrb[8].mxu1  ;;  %20489 = vpow2.f32 %v15828_v59  ;;  %v1890_v30 = vadd.f32 1.0, %v20474_v5  ;;  %v18547_v59 = vld [vmem:[#allocation4 + $0x484] ss:$48 sps:$4 sm:$0xff]  }
 0x270   :  { %v22242_v62 = vpop.f32.mrb[9].mxu0  ;;  %v1586_v63 = vpop.f32.mrb[9].mxu1  ;;  %20491 = vpow2.f32 %v15830_v40  ;;  %v1516_v26 = vadd.f32 %v22238_v60, %v22227_v49  ;;  %v18539_v60 = vld [vmem:[#allocation4 + $0x420] ss:$48 sps:$4 sm:$0xff]  }
 0x271   :  { %v22245_v2 = vpop.f32.mrb[10].mxu0  ;;  %v22247_v3 = vpop.f32.mrb[10].mxu1  ;;  %v18521_v63 = vld [vmem:[#allocation4 + $0x300] ss:$48 sps:$4 sm:$0xff]   ;;  %20493 = vpow2.f32 %v15832_v4  ;;  %v1518_v52 = vadd.f32 %v22242_v62, %v22235_v56  ;;  %v18548_v62 = vld [vmem:[#allocation4 + $0x488] ss:$48 sps:$4 sm:$0xff]  }
 0x272   :  { %v22252_v6 = vpop.f32.mrb[11].mxu0  ;;  %v1589_v8 = vpop.f32.mrb[11].mxu1  ;;  %3959 = vmatpush1.bf16.msra.mxu1 %v18521_v63  ;;  %v15833_v22 = vmul.f32 -1.442695, %v1516_v26  ;;  %20495 = vrcp.f32 %v1890_v30  ;;  %v1520_v57 = vadd.f32 %v22245_v2, %v22227_v49  ;;  %v18550_v63 = vld [vmem:[#allocation4 + $0x48c] ss:$48 sps:$4 sm:$0xff]   ;;  %v1588_v5 = vadd.f32 %v22247_v3, %v22231_v53 }
 0x273   :  { %v18530_v8 = vld [vmem:[#allocation4 + $0x368] ss:$48 sps:$4 sm:$0xff]   ;;  %v20476_v9 = vpop.eup %20475  ;;  %3960 = vmatprep.subr.bf16.mxu1 %v18529_v42  ;;  %v18545_v4 = vld [vmem:[#allocation4 + $0x480] ss:$48 sps:$4 sm:$0xff]   ;;  %v15834_v23 = vmul.f32 -1.442695, %v1518_v52 }
 0x274   :  { %v20478_v14 = vpop.eup %20477  ;;  %v1892_v15 = vadd.f32 1.0, %v20476_v9  ;;  %4107 = vmatpush1.bf16.msra.mxu0 %v18530_v8  ;;  %v1522_v8 = vadd.f32 %v22252_v6, %v22235_v56  ;;  %v18556_v26 = vld [vmem:[#allocation4 + $0x4ec] ss:$48 sps:$4 sm:$0xff]   ;;  %v18551_v30 = vld [vmem:[#allocation4 + $0x4e0] ss:$48 sps:$4 sm:$0xff]  }
 0x275   :  { %v20480_v17 = vpop.eup %20479  ;;  %4108 = vmatprep.subr.bf16.mxu0 %v18538_v11  ;;  %v1891_v32 = vadd.f32 1.0, %v20478_v14  ;;  %v15838_v3 = vmul.f32 -1.442695, %v1588_v5  ;;  %v18565_v52 = vld [vmem:[#allocation4 + $0x5a4] ss:$48 sps:$4 sm:$0xff]  }
 0x276   :  { %3961 = vmatpush1.bf16.msra.mxu1 %v18527_v7  ;;  %v20482_v47 = vpop.eup %20481  ;;  %20497 = vrcp.f32 %v1892_v15  ;;  %v1893_v48 = vadd.f32 1.0, %v20480_v17  ;;  %v15836_v7 = vmul.f32 -1.442695, %v1520_v57  ;;  %v15837_v6 = vmul.f32 -1.442695, %v1522_v8 }
 0x277   :  { %v22258_v18 = vpop.f32.mrb[12].mxu0  ;;  %v22260_v19 = vpop.f32.mrb[12].mxu1  ;;  %3962 = vmatprep.subr.bf16.mxu1 %v18535_v37  ;;  %v1895_v35 = vadd.f32 1.0, %v20482_v47  ;;  %20499 = vpow2.f32 %v15831_v20  ;;  %v18554_v37 = vld [vmem:[#allocation4 + $0x4e8] ss:$48 sps:$4 sm:$0xff]  }
 0x278   :  { %v22264_v24 = vpop.f32.mrb[13].mxu0  ;;  %v1594_v25 = vpop.f32.mrb[13].mxu1  ;;  %4109 = vmatpush1.bf16.msra.mxu0 %v18536_v38  ;;  %20501 = vpow2.f32 %v15833_v22  ;;  %v1526_v14 = vadd.f32 %v22258_v18, %v22227_v49  ;;  %v18559_v17 = vld [vmem:[#allocation4 + $0x544] ss:$48 sps:$4 sm:$0xff]   ;;  %v18562_v20 = vld [vmem:[#allocation4 + $0x54c] ss:$48 sps:$4 sm:$0xff]  }
 0x279   :  { %v22268_v51 = vpop.f32.mrb[14].mxu0  ;;  %v22270_v31 = vpop.f32.mrb[14].mxu1  ;;  %v1585_v25 = vadd.f32 %v22240_v61, %v22231_v53  ;;  %4110 = vmatprep.subr.bf16.mxu0 %v18544_v43  ;;  %20503 = vrcp.f32 %v1891_v32  ;;  %v627_v22 = vsub.s32 6, %v22200_v21  ;;  %v18557_v18 = vld [vmem:[#allocation4 + $0x540] ss:$48 sps:$4 sm:$0xff]   ;;  %v631_v32 = vsub.s32 7, %v22200_v21 }
 0x27a   :  { %v22274_v34 = vpop.f32.mrb[15].mxu0  ;;  %v1597_v50 = vpop.f32.mrb[15].mxu1  ;;  %3963 = vmatpush1.bf16.msra.mxu1 %v18533_v41  ;;  %20505 = vrcp.f32 %v1893_v48  ;;  %v1593_v41 = vadd.f32 %v22260_v19, %v22231_v53  ;;  %v22307_v19 = vld [vmem:[#allocation6 + $0x8] sm:$0xf]  ;;  %v1530_v48 = vadd.f32 %v22268_v51, %v22227_v49  ;;  %v18574_v5 = vld [vmem:[#allocation4 + $0x60c] ss:$48 sps:$4 sm:$0xff]  }
 0x27b   :  { %v20484_v28 = vpop.eup %20483  ;;  %3964 = vmatprep.subr.bf16.mxu1 %v18541_v46  ;;  %v15835_v55 = vmul.f32 -1.442695, %v1585_v25  ;;  %20507 = vrcp.f32 %v1895_v35  ;;  %v18560_v25 = vld [vmem:[#allocation4 + $0x548] ss:$48 sps:$4 sm:$0xff]   ;;  %v15839_v46 = vmul.f32 -1.442695, %v1526_v14 }
 0x27c   :  { %v20486_v44 = vpop.eup %20485  ;;  %v1894_v54 = vadd.f32 1.0, %v20484_v28  ;;  %4111 = vmatpush1.bf16.msra.mxu0 %v18542_v39  ;;  %v1528_v28 = vadd.f32 %v22264_v24, %v22235_v56  ;;  %v1596_v24 = vadd.f32 %v22270_v31, %v22231_v53  ;;  %v18566_v57 = vld [vmem:[#allocation4 + $0x5a8] ss:$48 sps:$4 sm:$0xff]   ;;  %v22325_v31 = vrot.slane %v22202_v29, %v627_v22 }
 0x27d   :  { %v20488_v50 = vpop.eup %20487  ;;  %v1896_v58 = vadd.f32 1.0, %v20486_v44  ;;  %4112 = vmatprep.subr.bf16.mxu0 %v18550_v63  ;;  %v15841_v44 = vmul.f32 -1.442695, %v1593_v41  ;;  %v22329_v63 = vrot.slane %v22307_v19, %v22205_v33 }
 0x27e   :  { %v20490_v61 = vpop.eup %20489  ;;  %3965 = vmatpush1.bf16.msra.mxu1 %v18539_v60  ;;  %v1898_v1 = vadd.f32 1.0, %v20488_v50  ;;  %20509 = vrcp.f32 %v1894_v54  ;;  %v15840_v51 = vmul.f32 -1.442695, %v1528_v28 }
 0x27f   :  { %v20492_v36 = vpop.eup %20491  ;;  %v1897_v42 = vadd.f32 1.0, %v20490_v61  ;;  %3966 = vmatprep.subr.bf16.mxu1 %v18547_v59  ;;  %20511 = vrcp.f32 %v1896_v58  ;;  %v18568_v61 = vld [vmem:[#allocation4 + $0x5ac] ss:$48 sps:$4 sm:$0xff]   ;;  %v15842_v59 = vmul.f32 -1.442695, %v1530_v48  ;;  %24196 = vst [vmem:[#allocation35_spill] sm:$0xff] %v22329_v63 }
 0x280   :  { %v20494_v40 = vpop.eup %20493  ;;  %v1899_v2 = vadd.f32 1.0, %v20492_v36  ;;  %20513 = vrcp.f32 %v1898_v1  ;;  %4113 = vmatpush1.bf16.msra.mxu0 %v18548_v62  ;;  %v15844_v1 = vmul.f32 -1.442695, %v1596_v24  ;;  %v22338_v62 = vrot.slane %v22307_v19, %v22221_v45 }
 0x281   :  { %v1901_v9 = vadd.f32 1.0, %v20494_v40  ;;  %v22294_v11 = vpop.eup %20495  ;;  %20515 = vrcp.f32 %v1897_v42  ;;  %4114 = vmatprep.subr.bf16.mxu0 %v18556_v26  ;;  %v18571_v42 = vld [vmem:[#allocation4 + $0x604] ss:$48 sps:$4 sm:$0xff]  }
 0x282   :  { %3967 = vmatpush1.bf16.msra.mxu1 %v18545_v4  ;;  %v22298_v15 = vpop.eup %20497  ;;  %20517 = vrcp.f32 %v1899_v2  ;;  %v22334_v4 = vrot.slane %v22202_v29, %v631_v32  ;;  %24197 = vst [vmem:[#allocation36_spill] sm:$0xff] %v22338_v62 }
 0x283   :  { %3968 = vmatprep.subr.bf16.mxu1 %v18553_v10  ;;  %v20500_v38 = vpop.eup %20499  ;;  %20519 = vrcp.f32 %v1901_v9 }
 0x284   :  { %v20502_v47 = vpop.eup %20501  ;;  %20521 = vpow2.f32 %v15835_v55  ;;  %4115 = vmatpush1.bf16.msra.mxu0 %v18554_v37  ;;  %v1900_v43 = vadd.f32 1.0, %v20500_v38  ;;  %v18563_v55 = vld [vmem:[#allocation4 + $0x5a0] ss:$48 sps:$4 sm:$0xff]  }
 0x285   :  { %v22303_v60 = vpop.eup %20503  ;;  %20523 = vpow2.f32 %v15834_v23  ;;  %4116 = vmatprep.subr.bf16.mxu0 %v18562_v20  ;;  %v1902_v35 = vadd.f32 1.0, %v20502_v47 }
 0x286   :  { %3969 = vmatpush1.bf16.msra.mxu1 %v18551_v30  ;;  %v22310_v39 = vpop.eup %20505  ;;  %20525 = vpow2.f32 %v15836_v7 }
 0x287   :  { %3970 = vmatprep.subr.bf16.mxu1 %v18559_v17  ;;  %v22314_v50 = vpop.eup %20507  ;;  %20527 = vpow2.f32 %v15838_v3 }
 0x288   :  { %v22318_v54 = vpop.eup %20509  ;;  %20529 = vpow2.f32 %v15837_v6  ;;  %4117 = vmatpush1.bf16.msra.mxu0 %v18560_v25 }
 0x289   :  { %v22320_v36 = vpop.eup %20511  ;;  %20531 = vpow2.f32 %v15839_v46  ;;  %4118 = vmatprep.subr.bf16.mxu0 %v18568_v61 }
 0x28a   :  { %3971 = vmatpush1.bf16.msra.mxu1 %v18557_v18  ;;  %v22322_v58 = vpop.eup %20513  ;;  %20533 = vrcp.f32 %v1900_v43 }
 0x28b   :  { %3972 = vmatprep.subr.bf16.mxu1 %v18565_v52  ;;  %v22331_v40 = vpop.eup %20515  ;;  %20535 = vrcp.f32 %v1902_v35 }
 0x28c   :  { %v22340_v23 = vpop.eup %20517  ;;  %20537 = vpow2.f32 %v15841_v44  ;;  %4119 = vmatpush1.bf16.msra.mxu0 %v18566_v57  ;;  %v1532_v44 = vadd.f32 %v22274_v34, %v22235_v56 }
 0x28d   :  { %v22342_v2 = vpop.eup %20519  ;;  %20539 = vpow2.f32 %v15840_v51  ;;  %4161 = vmatprep.subr.bf16.mxu0 %v18574_v5 }
 0x28e   :  { %3973 = vmatpush1.bf16.msra.mxu1 %v18563_v55  ;;  %v20522_v9 = vpop.eup %20521  ;;  %20541 = vpow2.f32 %v15842_v59 }
 0x28f   :  { %4015 = vmatprep.subr.bf16.mxu1 %v18571_v42  ;;  %v20524_v37 = vpop.eup %20523  ;;  %20543 = vpow2.f32 %v15844_v1  ;;  %v15843_v42 = vmul.f32 -1.442695, %v1532_v44 }
 0x290   :  { %v20526_v38 = vpop.eup %20525 }
 0x291   :  { %v20528_v22 = vpop.eup %20527 }
 0x292   :  { %v22351_v28 = vpop.eup %20529 }
 0x293   :  { %v22354_v43 = vpop.eup %20531 }
 0x294   :  { %v22358_v35 = vpop.eup %20533 }
 0x295   :  { %v22360_v24 = vpop.eup %20535 }
 0x296   :  { %v22362_v55 = vpop.eup %20537 }
 0x297   :  { %v22366_v34 = vpop.eup %20539 }
 0x29f   :  { %v1633_v7 = vpop.f32.mrb[16].mxu0  ;;  %v1706_v8 = vpop.f32.mrb[16].mxu1 }
 0x2a0   :  { %v1634_v29 = vadd.f32 %v1633_v7, %v22325_v31  ;;  %v1707_v10 = vadd.f32 %v1706_v8, %v22329_v63  ;;  %v1635_v26 = vpop.f32.mrb[17].mxu0  ;;  %v1708_v30 = vpop.f32.mrb[17].mxu1 }
 0x2a1   :  { %v1636_v3 = vadd.f32 %v1635_v26, %v22334_v4  ;;  %v1709_v14 = vadd.f32 %v1708_v30, %v22338_v62  ;;  %v1637_v6 = vpop.f32.mrb[18].mxu0  ;;  %v1710_v41 = vpop.f32.mrb[18].mxu1 }
 0x2a2   :  { %20545 = vtanh.f32 %v1634_v29  ;;  %v1638_v17 = vadd.f32 %v1637_v6, %v22325_v31  ;;  %v1639_v20 = vpop.f32.mrb[19].mxu0  ;;  %v1712_v47 = vpop.f32.mrb[19].mxu1  ;;  %v1711_v25 = vadd.f32 %v1710_v41, %v22329_v63  ;;  %v1903_v41 = vadd.f32 1.0, %v20524_v37 }
 0x2a3   :  { %20547 = vtanh.f32 %v1707_v10  ;;  %v15845_v18 = vmul.f32 -1.442695, %v1709_v14  ;;  %v1713_v46 = vadd.f32 %v1712_v47, %v22338_v62  ;;  %v1640_v32 = vadd.f32 %v1639_v20, %v22334_v4  ;;  %v22371_v29 = vpop.eup %20541 }
 0x2a4   :  { %20549 = vtanh.f32 %v1636_v3  ;;  %v22376_v3 = vpop.eup %20543  ;;  %v1904_v14 = vadd.f32 1.0, %v20522_v9  ;;  %v1905_v20 = vadd.f32 1.0, %v20526_v38 }
 0x2a5   :  { %20551 = vpow2.f32 %v15845_v18  ;;  %v15848_v48 = vmul.f32 -1.442695, %v1713_v46 }
 0x2a6   :  { %20553 = vtanh.f32 %v1638_v17 }
 0x2a7   :  { %20555 = vtanh.f32 %v1711_v25  ;;  %v1643_v52 = vpop.f32.mrb[20].mxu0  ;;  %v1716_v61 = vpop.f32.mrb[20].mxu1  ;;  %v1907_v25 = vadd.f32 1.0, %v20528_v22 }
 0x2a8   :  { %20557 = vtanh.f32 %v1640_v32  ;;  %v1644_v57 = vadd.f32 %v1643_v52, %v22325_v31  ;;  %v1717_v51 = vadd.f32 %v1716_v61, %v22329_v63  ;;  %v1645_v59 = vpop.f32.mrb[21].mxu0  ;;  %v1718_v1 = vpop.f32.mrb[21].mxu1 }
 0x2a9   :  { %20559 = vpow2.f32 %v15848_v48  ;;  %v1646_v5 = vadd.f32 %v1645_v59, %v22334_v4  ;;  %v1647_v7 = vpop.f32.mrb[22].mxu0  ;;  %v22369_v8 = vpop.f32.mrb[22].mxu1  ;;  %v1719_v52 = vadd.f32 %v1718_v1, %v22338_v62  ;;  %v1906_v1 = vadd.f32 1.0, %v22351_v28 }
 0x2aa   :  { %20561 = vtanh.f32 %v1644_v57  ;;  %v1648_v10 = vadd.f32 %v1647_v7, %v22325_v31  ;;  %v22374_v26 = vpop.f32.mrb[23].mxu0  ;;  %v1722_v30 = vpop.f32.mrb[23].mxu1  ;;  %v1910_v28 = vadd.f32 1.0, %v22362_v55 }
 0x2ab   :  { %20563 = vtanh.f32 %v1717_v51 }
 0x2ac   :  { %v20546_v6 = vpop.eup %20545  ;;  %20565 = vtanh.f32 %v1646_v5 }
 0x2ad   :  { %v20548_v17 = vpop.eup %20547  ;;  %20567 = vpow2.f32 %v15843_v42  ;;  %v22379_v47 = vmul.f32 %v20546_v6, %v22294_v11  ;;  %v15851_v6 = vmul.f32 -1.442695, %v1719_v52 }
 0x2ae   :  { %v20550_v18 = vpop.eup %20549  ;;  %v22382_v46 = vmul.f32 %v20548_v17, %v22298_v15  ;;  %20569 = vtanh.f32 %v1648_v10  ;;  %v1908_v17 = vadd.f32 1.0, %v22354_v43 }
 0x2af   :  { %v20552_v32 = vpop.eup %20551  ;;  %20571 = vrcp.f32 %v1904_v14  ;;  %v22385_v9 = vmul.f32 %v20550_v18, %v22303_v60  ;;  %v1653_v44 = vpop.f32.mrb[24].mxu0 }
 0x2b0   :  { %24198 = vst [vmem:[#allocation37_spill] sm:$0xff] %v22382_v46  ;;  %v1726_v37 = vpop.f32.mrb[24].mxu1  ;;  %v20554_v48 = vpop.eup %20553  ;;  %20573 = vrcp.f32 %v1903_v41  ;;  %v2058_v38 = vadd.f32 1.0, %v20552_v32 }
 0x2b1   :  { %v1655_v11 = vpop.f32.mrb[25].mxu0  ;;  %v1728_v61 = vpop.f32.mrb[25].mxu1  ;;  %20575 = vrcp.f32 %v1905_v20  ;;  %v22389_v15 = vmul.f32 %v20554_v48, %v22310_v39 }
 0x2b2   :  { %v20556_v57 = vpop.eup %20555  ;;  %v1657_v22 = vpop.f32.mrb[26].mxu0  ;;  %20577 = vrcp.f32 %v1907_v25 }
 0x2b3   :  { %v22391_v51 = vpop.f32.mrb[26].mxu1  ;;  %v20558_v59 = vpop.eup %20557  ;;  %v22394_v60 = vmul.f32 %v20556_v57, %v22314_v50  ;;  %20579 = vtanh.f32 %v22379_v47  ;;  %v1658_v27 = vadd.f32 %v1657_v22, %v22325_v31 }
 0x2b4   :  { %v22396_v42 = vpop.f32.mrb[27].mxu0  ;;  %v1732_v5 = vpop.f32.mrb[27].mxu1  ;;  %v22401_v10 = vmul.f32 %v20558_v59, %v22318_v54  ;;  %20581 = vrcp.f32 %v2058_v38  ;;  %v1723_v54 = vadd.f32 %v1722_v30, %v22338_v62 }
 0x2b5   :  { %24199 = vst [vmem:[#allocation38_spill] sm:$0xff] %v22394_v60  ;;  %v20560_v7 = vpop.eup %20559  ;;  %20583 = vtanh.f32 %v22389_v15 }
 0x2b6   :  { %v20562_v39 = vpop.eup %20561  ;;  %v2061_v14 = vadd.f32 1.0, %v20560_v7 }
 0x2b7   :  { %v20564_v41 = vpop.eup %20563  ;;  %v22406_v50 = vmul.f32 %v20562_v39, %v22320_v36  ;;  %v1663_v43 = vpop.f32.mrb[28].mxu0  ;;  %v1721_v36 = vadd.f32 %v22369_v8, %v22329_v63  ;;  %v15854_v8 = vmul.f32 -1.442695, %v1723_v54  ;;  %v1733_v54 = vadd.f32 %v1732_v5, %v22338_v62 }
 0x2b8   :  { %v20566_v20 = vpop.eup %20565  ;;  %20585 = vrcp.f32 %v2061_v14  ;;  %v22410_v18 = vmul.f32 %v20564_v41, %v22322_v58  ;;  %v1736_v48 = vpop.f32.mrb[28].mxu1  ;;  %v1727_v41 = vadd.f32 %v1726_v37, %v22329_v63 }
 0x2b9   :  { %v22413_v25 = vpop.eup %20567  ;;  %20587 = vrcp.f32 %v1906_v1  ;;  %v22416_v32 = vmul.f32 %v20566_v20, %v22331_v40  ;;  %v22420_v55 = vpop.f32.mrb[29].mxu0  ;;  %v1650_v40 = vadd.f32 %v22374_v26, %v22334_v4  ;;  %v1729_v1 = vadd.f32 %v1728_v61, %v22338_v62 }
 0x2ba   :  { %24200 = vst [vmem:[#allocation39_spill] sm:$0xff] %v22410_v18  ;;  %v20570_v38 = vpop.eup %20569  ;;  %20589 = vpow2.f32 %v15851_v6  ;;  %v22422_v52 = vpop.f32.mrb[29].mxu1  ;;  %v1656_v20 = vadd.f32 %v1655_v11, %v22334_v4  ;;  %v1660_v11 = vadd.f32 %v22396_v42, %v22334_v4 }
 0x2bb   :  { %v22424_v58 = vpop.eup %20571  ;;  %20591 = vrcp.f32 %v1908_v17  ;;  %v22427_v30 = vmul.f32 %v20570_v38, %v22340_v23  ;;  %v22431_v57 = vpop.f32.mrb[30].mxu0  ;;  %v1654_v23 = vadd.f32 %v1653_v44, %v22325_v31  ;;  %v15857_v61 = vmul.f32 -1.442695, %v1729_v1 }
 0x2bc   :  { %v22433_v59 = vpop.f32.mrb[30].mxu1  ;;  %v22435_v7 = vpop.eup %20573  ;;  %20593 = vrcp.f32 %v1910_v28  ;;  %v1731_v44 = vadd.f32 %v22391_v51, %v22329_v63  ;;  %v1664_v1 = vadd.f32 %v1663_v43, %v22325_v31  ;;  %v1737_v51 = vadd.f32 %v1736_v48, %v22329_v63 }
 0x2bd   :  { %v22438_v39 = vpop.f32.mrb[31].mxu0  ;;  %v22440_v14 = vpop.f32.mrb[31].mxu1  ;;  %20595 = vtanh.f32 %v22406_v50  ;;  %v1909_v48 = vadd.f32 1.0, %v22366_v34 }
 0x2be   :  { %v20576_v6 = vpop.eup %20575  ;;  %20597 = vtanh.f32 %v1721_v36 }
 0x2bf   :  { %v20578_v26 = vpop.eup %20577  ;;  %20599 = vtanh.f32 %v1650_v40 }
 0x2c0   :  { %v20580_v17 = vpop.eup %20579  ;;  %20601 = vpow2.f32 %v15854_v8  ;;  %v15860_v8 = vmul.f32 -1.442695, %v1733_v54 }
 0x2c1   :  { %v20582_v28 = vpop.eup %20581  ;;  %20603 = vtanh.f32 %v1654_v23 }
 0x2c2   :  { %v20584_v38 = vpop.eup %20583  ;;  %20605 = vtanh.f32 %v1727_v41  ;;  %v2178_v37 = vmul.f32 %v20582_v28, %v20580_v17 }
 0x2c3   :  { %v20586_v0 = vpop.eup %20585  ;;  %20607 = vtanh.f32 %v1656_v20 }
 0x2c4   :  { %v20588_v36 = vpop.eup %20587  ;;  %v2181_v45 = vmul.f32 %v20586_v0, %v20584_v38  ;;  %20609 = vpow2.f32 %v15857_v61 }
 0x2c5   :  { %v20590_v40 = vpop.eup %20589  ;;  %20611 = vtanh.f32 %v1658_v27 }
 0x2c6   :  { %v20592_v5 = vpop.eup %20591  ;;  %v22453_v22 = vpack.c.bf16 %v2181_v45, %v2178_v37  ;;  %20613 = vtanh.f32 %v1731_v44  ;;  %v2064_v17 = vadd.f32 1.0, %v20590_v40 }
 0x2c7   :  { %v20594_v23 = vpop.eup %20593  ;;  %20615 = vtanh.f32 %v1660_v11 }
 0x2c8   :  { %v20596_v41 = vpop.eup %20595  ;;  %20617 = vpow2.f32 %v15860_v8 }
 0x2c9   :  { %v20598_v0 = vpop.eup %20597  ;;  %20619 = vtanh.f32 %v1664_v1 }
 0x2ca   :  { %v20600_v20 = vpop.eup %20599  ;;  %v22457_v42 = vmul.f32 %v20598_v0, %v22342_v2  ;;  %20621 = vtanh.f32 %v1737_v51  ;;  %v1911_v2 = vadd.f32 1.0, %v22371_v29  ;;  %v1739_v29 = vadd.f32 %v22422_v52, %v22338_v62 }
 0x2cb   :  { %v20602_v28 = vpop.eup %20601  ;;  %v22460_v27 = vmul.f32 %v20600_v20, %v22358_v35  ;;  %20623 = vrcp.f32 %v2064_v17  ;;  %v1912_v0 = vadd.f32 1.0, %v22413_v25  ;;  %v1666_v52 = vadd.f32 %v22420_v55, %v22334_v4 }
 0x2cc   :  { %24201 = vst [vmem:[#allocation40_spill] sm:$0xff] %v22457_v42  ;;  %v20604_v45 = vpop.eup %20603  ;;  %v2067_v43 = vadd.f32 1.0, %v20602_v28  ;;  %20625 = vtanh.f32 %v22427_v30  ;;  %v1668_v25 = vadd.f32 %v22431_v57, %v22325_v31 }
 0x2cd   :  { %v20606_v61 = vpop.eup %20605  ;;  %v22465_v54 = vmul.f32 %v20604_v45, %v22360_v24  ;;  %v15863_v45 = vmul.f32 -1.442695, %v1739_v29 }
 0x2ce   :  { %v20608_v38 = vpop.eup %20607  ;;  %20627 = vrcp.f32 %v2067_v43  ;;  %v22469_v44 = vmul.f32 %v20606_v61, %v22424_v58  ;;  %v1913_v58 = vadd.f32 1.0, %v22376_v3 }
 0x2cf   :  { %v20610_v35 = vpop.eup %20609  ;;  %v22472_v37 = vmul.f32 %v20608_v38, %v22435_v7  ;;  %20629 = vrcp.f32 %v1909_v48 }
 0x2d0   :  { %24202 = vst [vmem:[#allocation41_spill] sm:$0xff] %v22469_v44  ;;  %v20612_v11 = vpop.eup %20611  ;;  %v2070_v40 = vadd.f32 1.0, %v20610_v35  ;;  %20631 = vrcp.f32 %v1911_v2 }
 0x2d1   :  { %v20614_v8 = vpop.eup %20613  ;;  %v22474_v34 = vmul.f32 %v20612_v11, %v20576_v6  ;;  %20633 = vtanh.f32 %v22465_v54  ;;  %v22503_v11 = vsub.s32 3, %v22200_v21 }
 0x2d2   :  { %v20616_v1 = vpop.eup %20615  ;;  %v22476_v24 = vmul.f32 %v20614_v8, %v20578_v26  ;;  %20635 = vrcp.f32 %v2070_v40 }
 0x2d3   :  { %v20618_v51 = vpop.eup %20617  ;;  %v22482_v7 = vmul.f32 %v20616_v1, %v20588_v36  ;;  %20637 = vtanh.f32 %v22474_v34  ;;  %v1743_v36 = vadd.f32 %v22440_v14, %v22338_v62  ;;  %24206 = vst [vmem:[#allocation45_spill] sm:$0xff] %v22503_v11 }
 0x2d4   :  { %24203 = vst [vmem:[#allocation42_spill] sm:$0xff] %v22476_v24  ;;  %v20620_v17 = vpop.eup %20619  ;;  %v2073_v6 = vadd.f32 1.0, %v20618_v51  ;;  %v22511_v51 = vrot.slane %v22307_v19, %v22503_v11 }
 0x2d5   :  { %24204 = vst [vmem:[#allocation43_spill] sm:$0xff] %v22482_v7  ;;  %v20622_v20 = vpop.eup %20621  ;;  %v22486_v26 = vmul.f32 %v20620_v17, %v20592_v5  ;;  %v1741_v5 = vadd.f32 %v22433_v59, %v22329_v63  ;;  %v15866_v38 = vmul.f32 -1.442695, %v1743_v36 }
 0x2d6   :  { %v20624_v28 = vpop.eup %20623  ;;  %20639 = vrcp.f32 %v2073_v6  ;;  %v22490_v3 = vmul.f32 %v20622_v20, %v20594_v23  ;;  %v1670_v23 = vadd.f32 %v22438_v39, %v22334_v4  ;;  %v22507_v39 = vrot.slane %v22307_v19, %v22212_v12  ;;  %24208 = vst [vmem:[#allocation47_spill] sm:$0xff] %v22511_v51 }
 0x2d7   :  { %v20626_v43 = vpop.eup %20625  ;;  %20641 = vrcp.f32 %v1913_v58  ;;  %v2184_v48 = vmul.f32 %v20624_v28, %v20596_v41 }
 0x2d8   :  { %24205 = vst [vmem:[#allocation44_spill] sm:$0xff] %v22490_v3  ;;  %v20628_v61 = vpop.eup %20627  ;;  %20643 = vrcp.f32 %v1912_v0  ;;  %24207 = vst [vmem:[#allocation46_spill] sm:$0xff] %v22507_v39 }
 0x2d9   :  { %v2187_v55 = vmul.f32 %v20628_v61, %v20626_v43  ;;  %20645 = vtanh.f32 %v1666_v52  ;;  %v20630_v2 = vpop.eup %20629 }
 0x2da   :  { %20647 = vpow2.f32 %v15863_v45  ;;  %v20632_v35 = vpop.eup %20631 }
 0x2db   :  { %20649 = vtanh.f32 %v1668_v25  ;;  %v22500_v14 = vpack.c.bf16 %v2187_v55, %v2184_v48  ;;  %v20634_v57 = vpop.eup %20633 }
 0x2dc   :  { %20651 = vtanh.f32 %v1741_v5  ;;  %v20636_v59 = vpop.eup %20635 }
 0x2dd   :  { %20653 = vtanh.f32 %v1670_v23  ;;  %v20638_v41 = vpop.eup %20637  ;;  %v2190_v1 = vmul.f32 %v20636_v59, %v20634_v57 }
 0x2de   :  { %20655 = vpow2.f32 %v15866_v38 }
 0x2df   :  { %20657 = vtanh.f32 %v22382_v46 }
 0x2e0   :  { %v20640_v40 = vpop.eup %20639  ;;  %20659 = vtanh.f32 %v22385_v9  ;;  %v1779_v0 = vpop.f32.mrb[32].mxu0 }
 0x2e1   :  { %v20642_v8 = vpop.eup %20641  ;;  %v2193_v29 = vmul.f32 %v20640_v40, %v20638_v41  ;;  %20661 = vtanh.f32 %v22394_v60  ;;  %v1780_v28 = vadd.f32 %v1779_v0, %v22507_v39  ;;  %v1781_v45 = vpop.f32.mrb[33].mxu0 }
 0x2e2   :  { %v20644_v58 = vpop.eup %20643  ;;  %20663 = vtanh.f32 %v22401_v10  ;;  %v1782_v43 = vadd.f32 %v1781_v45, %v22511_v51  ;;  %v1783_v25 = vpop.f32.mrb[34].mxu0 }
 0x2e3   :  { %v20646_v17 = vpop.eup %20645  ;;  %v22515_v6 = vpack.c.bf16 %v2193_v29, %v2190_v1  ;;  %20665 = vtanh.f32 %v22410_v18  ;;  %v1784_v48 = vadd.f32 %v1783_v25, %v22507_v39  ;;  %v1785_v55 = vpop.f32.mrb[35].mxu0  ;;  %v15846_v41 = vmul.f32 -1.442695, %v1780_v28 }
 0x2e4   :  { %v20648_v20 = vpop.eup %20647  ;;  %v22518_v52 = vmul.f32 %v20646_v17, %v20630_v2  ;;  %20667 = vtanh.f32 %v22416_v32  ;;  %v1786_v2 = vadd.f32 %v1785_v55, %v22511_v51 }
 0x2e5   :  { %v20650_v36 = vpop.eup %20649  ;;  %v2076_v19 = vadd.f32 1.0, %v20648_v20  ;;  %20669 = vtanh.f32 %v22486_v26  ;;  %v15849_v1 = vmul.f32 -1.442695, %v1784_v48 }
 0x2e6   :  { %24209 = vst [vmem:[#allocation48_spill] sm:$0xff] %v22518_v52  ;;  %v20652_v61 = vpop.eup %20651  ;;  %v22524_v5 = vmul.f32 %v20650_v36, %v20632_v35  ;;  %v15847_v35 = vmul.f32 -1.442695, %v1782_v43  ;;  %v15850_v29 = vmul.f32 -1.442695, %v1786_v2 }
 0x2e7   :  { %v20654_v23 = vpop.eup %20653  ;;  %v22528_v38 = vmul.f32 %v20652_v61, %v20642_v8  ;;  %20671 = vrcp.f32 %v2076_v19 }
 0x2e8   :  { %24210 = vst [vmem:[#allocation49_spill] sm:$0xff] %v22524_v5  ;;  %v20656_v57 = vpop.eup %20655  ;;  %v22532_v59 = vmul.f32 %v20654_v23, %v20644_v58  ;;  %20673 = vtanh.f32 %v22524_v5  ;;  %v1789_v17 = vpop.f32.mrb[36].mxu0  ;;  %v18985_v5 = vld [vmem:[#allocation7 + $0xa4] ss:$16 sps:$4 sm:$0xff]  }
 0x2e9   :  { %24211 = vst [vmem:[#allocation50_spill] sm:$0xff] %v22528_v38  ;;  %v2079_v40 = vadd.f32 1.0, %v20656_v57  ;;  %v22535_v0 = vpop.eup %20657  ;;  %v1790_v8 = vadd.f32 %v1789_v17, %v22507_v39  ;;  %v1791_v20 = vpop.f32.mrb[37].mxu0 }
 0x2ea   :  { %24212 = vst [vmem:[#allocation51_spill] sm:$0xff] %v22532_v59  ;;  %v22538_v45 = vpop.eup %20659  ;;  %v1792_v58 = vadd.f32 %v1791_v20, %v22511_v51  ;;  %v1793_v28 = vpop.f32.mrb[38].mxu0 }
 0x2eb   :  { %20675 = vrcp.f32 %v2079_v40  ;;  %v22541_v36 = vpop.eup %20661  ;;  %v15852_v19 = vmul.f32 -1.442695, %v1790_v8  ;;  %v1794_v43 = vadd.f32 %v1793_v28, %v22507_v39  ;;  %v1795_v25 = vpop.f32.mrb[39].mxu0 }
 0x2ec   :  { %20677 = vpow2.f32 %v15846_v41  ;;  %v22544_v61 = vpop.eup %20663  ;;  %v15853_v48 = vmul.f32 -1.442695, %v1792_v58  ;;  %v1796_v55 = vadd.f32 %v1795_v25, %v22511_v51 }
 0x2ed   :  { %20679 = vpow2.f32 %v15847_v35  ;;  %v22547_v23 = vpop.eup %20665  ;;  %v15855_v2 = vmul.f32 -1.442695, %v1794_v43 }
 0x2ee   :  { %20681 = vpow2.f32 %v15849_v1  ;;  %v22549_v57 = vpop.eup %20667  ;;  %v15856_v41 = vmul.f32 -1.442695, %v1796_v55 }
 0x2ef   :  { %20683 = vpow2.f32 %v15850_v29  ;;  %v20670_v40 = vpop.eup %20669 }
 0x2f0   :  { %20685 = vpow2.f32 %v15852_v19  ;;  %v1799_v1 = vpop.f32.mrb[40].mxu0 }
 0x2f1   :  { %20687 = vpow2.f32 %v15853_v48  ;;  %v20672_v35 = vpop.eup %20671  ;;  %v1800_v29 = vadd.f32 %v1799_v1, %v22507_v39  ;;  %v1801_v8 = vpop.f32.mrb[41].mxu0 }
 0x2f2   :  { %20689 = vpow2.f32 %v15855_v2  ;;  %v20674_v17 = vpop.eup %20673  ;;  %v1803_v58 = vpop.f32.mrb[42].mxu0  ;;  %v2196_v19 = vmul.f32 %v20672_v35, %v20670_v40  ;;  %v1802_v1 = vadd.f32 %v1801_v8, %v22511_v51 }
 0x2f3   :  { %20691 = vpow2.f32 %v15856_v41  ;;  %v15858_v25 = vmul.f32 -1.442695, %v1800_v29  ;;  %v1805_v48 = vpop.f32.mrb[43].mxu0  ;;  %v1804_v35 = vadd.f32 %v1803_v58, %v22507_v39 }
 0x2f4   :  { %20693 = vtanh.f32 %v22457_v42  ;;  %v15859_v8 = vmul.f32 -1.442695, %v1802_v1 }
 0x2f5   :  { %v20676_v20 = vpop.eup %20675  ;;  %20695 = vtanh.f32 %v22460_v27 }
 0x2f6   :  { %v20678_v28 = vpop.eup %20677  ;;  %20697 = vtanh.f32 %v22469_v44  ;;  %v2199_v43 = vmul.f32 %v20676_v20, %v20674_v17  ;;  %v1806_v20 = vadd.f32 %v1805_v48, %v22511_v51  ;;  %v15861_v44 = vmul.f32 -1.442695, %v1804_v35 }
 0x2f7   :  { %v20680_v55 = vpop.eup %20679  ;;  %20699 = vtanh.f32 %v22472_v37  ;;  %v2059_v2 = vadd.f32 1.0, %v20678_v28 }
 0x2f8   :  { %v20682_v41 = vpop.eup %20681  ;;  %v2060_v12 = vadd.f32 1.0, %v20680_v55  ;;  %20701 = vpow2.f32 %v15858_v25  ;;  %v22557_v33 = vpack.c.bf16 %v2199_v43, %v2196_v19  ;;  %v1809_v28 = vpop.f32.mrb[44].mxu0  ;;  %v15862_v46 = vmul.f32 -1.442695, %v1806_v20 }
 0x2f9   :  { %v20684_v42 = vpop.eup %20683  ;;  %20703 = vrcp.f32 %v2059_v2  ;;  %v2062_v18 = vadd.f32 1.0, %v20682_v41  ;;  %v1810_v19 = vadd.f32 %v1809_v28, %v22507_v39  ;;  %v1811_v43 = vpop.f32.mrb[45].mxu0 }
 0x2fa   :  { %v20686_v60 = vpop.eup %20685  ;;  %20705 = vrcp.f32 %v2060_v12  ;;  %v2063_v40 = vadd.f32 1.0, %v20684_v42  ;;  %v1813_v12 = vpop.f32.mrb[46].mxu0 }
 0x2fb   :  { %v20688_v17 = vpop.eup %20687  ;;  %20707 = vrcp.f32 %v2062_v18  ;;  %v2065_v29 = vadd.f32 1.0, %v20686_v60  ;;  %v1812_v60 = vadd.f32 %v1811_v43, %v22511_v51  ;;  %v1815_v18 = vpop.f32.mrb[47].mxu0 }
 0x2fc   :  { %v20690_v55 = vpop.eup %20689  ;;  %20709 = vrcp.f32 %v2063_v40  ;;  %v2066_v25 = vadd.f32 1.0, %v20688_v17  ;;  %v1814_v40 = vadd.f32 %v1813_v12, %v22507_v39  ;;  %v15864_v17 = vmul.f32 -1.442695, %v1810_v19 }
 0x2fd   :  { %v20692_v2 = vpop.eup %20691  ;;  %20711 = vrcp.f32 %v2065_v29  ;;  %v2068_v41 = vadd.f32 1.0, %v20690_v55  ;;  %v1816_v29 = vadd.f32 %v1815_v18, %v22511_v51  ;;  %v15865_v35 = vmul.f32 -1.442695, %v1812_v60 }
 0x2fe   :  { %v20694_v42 = vpop.eup %20693  ;;  %20713 = vrcp.f32 %v2066_v25  ;;  %v2069_v58 = vadd.f32 1.0, %v20692_v2  ;;  %v15867_v43 = vmul.f32 -1.442695, %v1814_v40 }
 0x2ff   :  { %v20696_v48 = vpop.eup %20695  ;;  %20715 = vrcp.f32 %v2068_v41  ;;  %v15868_v20 = vmul.f32 -1.442695, %v1816_v29 }
 0x300   :  { %v22564_v1 = vpop.eup %20697  ;;  %20717 = vrcp.f32 %v2069_v58 }
 0x301   :  { %v22567_v28 = vpop.eup %20699  ;;  %20719 = vpow2.f32 %v15859_v8 }
 0x302   :  { %v20702_v55 = vpop.eup %20701  ;;  %20721 = vpow2.f32 %v15861_v44 }
 0x303   :  { %v20704_v25 = vpop.eup %20703  ;;  %20723 = vpow2.f32 %v15862_v46  ;;  %v18569_v46 = vld [vmem:[#allocation4 + $0x600] ss:$48 sps:$4 sm:$0xff]  }
 0x304   :  { %v20706_v2 = vpop.eup %20705  ;;  %20725 = vpow2.f32 %v15864_v17  ;;  %v2179_v19 = vmul.f32 %v20704_v25, %v22538_v45  ;;  %v18572_v17 = vld [vmem:[#allocation4 + $0x608] ss:$48 sps:$4 sm:$0xff]   ;;  %v18577_v45 = vld [vmem:[#allocation4 + $0x664] ss:$48 sps:$4 sm:$0xff]   ;;  %v18580_v25 = vld [vmem:[#allocation4 + $0x66c] ss:$48 sps:$4 sm:$0xff]  }
 0x305   :  { %v20708_v41 = vpop.eup %20707  ;;  %20727 = vtanh.f32 %v22476_v24  ;;  %v2180_v8 = vmul.f32 %v20706_v2, %v22535_v0  ;;  %v2071_v24 = vadd.f32 1.0, %v20702_v55  ;;  %v18578_v2 = vld [vmem:[#allocation4 + $0x668] ss:$48 sps:$4 sm:$0xff]  }
 0x306   :  { %v20710_v12 = vpop.eup %20709  ;;  %v2182_v58 = vmul.f32 %v20708_v41, %v22544_v61  ;;  %20729 = vpow2.f32 %v15865_v35 }
 0x307   :  { %v20712_v18 = vpop.eup %20711  ;;  %v2183_v44 = vmul.f32 %v20710_v12, %v22541_v36  ;;  %20731 = vpow2.f32 %v15867_v43  ;;  %v18575_v43 = vld [vmem:[#allocation4 + $0x660] ss:$48 sps:$4 sm:$0xff]   ;;  %v18583_v12 = vld [vmem:[#allocation4 + $0x6c4] ss:$48 sps:$4 sm:$0xff]  }
 0x308   :  { %v20714_v60 = vpop.eup %20713  ;;  %20733 = vpow2.f32 %v15868_v20  ;;  %v22574_v40 = vpack.c.bf16 %v2182_v58, %v2179_v19  ;;  %v2185_v0 = vmul.f32 %v20712_v18, %v22549_v57  ;;  %v18586_v19 = vld [vmem:[#allocation4 + $0x6cc] ss:$48 sps:$4 sm:$0xff]  }
 0x309   :  { %v20716_v29 = vpop.eup %20715  ;;  %20735 = vtanh.f32 %v22482_v7  ;;  %v22577_v61 = vpack.c.bf16 %v2183_v44, %v2180_v8  ;;  %v2186_v55 = vmul.f32 %v20714_v60, %v22547_v23 }
 0x30a   :  { %v20718_v35 = vpop.eup %20717  ;;  %20737 = vtanh.f32 %v22490_v3  ;;  %v2188_v36 = vmul.f32 %v20716_v29, %v20696_v48  ;;  %3974 = vmatprep.mubr.bf16.mxu1 %v22574_v40  ;;  %4120 = vmatprep.mubr.bf16.mxu0 %v22574_v40  ;;  %v18584_v29 = vld [vmem:[#allocation4 + $0x6c8] ss:$48 sps:$4 sm:$0xff]   ;;  %v18607_v3 = vld [vmem:[#allocation4 + $0x844] ss:$48 sps:$4 sm:$0xff]  }
 0x30b   :  { %v20720_v20 = vpop.eup %20719  ;;  %20739 = vtanh.f32 %v22518_v52  ;;  %v2189_v41 = vmul.f32 %v20718_v35, %v20694_v42  ;;  %3975 = vmatmul.mubr.bf16.vlgmr.msra.gmra.mrb[32].mxu1 %v22453_v22  ;;  %4121 = vmatmul.mubr.bf16.vlgmr.msra.gmra.mrb[48].mxu0 %v22453_v22  ;;  %v18589_v35 = vld [vmem:[#allocation4 + $0x724] ss:$48 sps:$4 sm:$0xff]  }
 0x30c   :  { %v20722_v57 = vpop.eup %20721  ;;  %20741 = vtanh.f32 %v22528_v38  ;;  %v2072_v48 = vadd.f32 1.0, %v20720_v20  ;;  %4016 = vmatpush1.bf16.msra.mxu1 %v18569_v46  ;;  %4162 = vmatpush1.bf16.msra.mxu0 %v18572_v17  ;;  %v22588_v58 = vpack.c.bf16 %v2188_v36, %v2185_v0  ;;  %v18592_v0 = vld [vmem:[#allocation4 + $0x72c] ss:$48 sps:$4 sm:$0xff]  }
 0x30d   :  { %v20724_v18 = vpop.eup %20723  ;;  %20743 = vrcp.f32 %v2071_v24  ;;  %v2074_v8 = vadd.f32 1.0, %v20722_v57  ;;  %4017 = vmatprep.subr.bf16.mxu1 %v18577_v45  ;;  %4163 = vmatprep.subr.bf16.mxu0 %v18580_v25  ;;  %v22590_v23 = vpack.c.bf16 %v2189_v41, %v2186_v55  ;;  %v18581_v24 = vld [vmem:[#allocation4 + $0x6c0] ss:$48 sps:$4 sm:$0xff]   ;;  %v18590_v41 = vld [vmem:[#allocation4 + $0x728] ss:$48 sps:$4 sm:$0xff]  }
 0x30e   :  { %v20726_v42 = vpop.eup %20725  ;;  %20745 = vrcp.f32 %v2072_v48  ;;  %v2075_v44 = vadd.f32 1.0, %v20724_v18  ;;  %3984 = vmatprep.mubr.bf16.mxu1 %v22588_v58  ;;  %4130 = vmatprep.mubr.bf16.mxu0 %v22588_v58  ;;  %v18587_v55 = vld [vmem:[#allocation4 + $0x720] ss:$48 sps:$4 sm:$0xff]  }
 0x30f   :  { %v20728_v60 = vpop.eup %20727  ;;  %20747 = vrcp.f32 %v2074_v8  ;;  %v2077_v46 = vadd.f32 1.0, %v20726_v42 }
 0x310   :  { %v20730_v17 = vpop.eup %20729  ;;  %20749 = vrcp.f32 %v2075_v44  ;;  %4018 = vmatpush1.bf16.msra.mxu1 %v18575_v43  ;;  %4164 = vmatpush1.bf16.msra.mxu0 %v18578_v2  ;;  %v18595_v43 = vld [vmem:[#allocation4 + $0x784] ss:$48 sps:$4 sm:$0xff]   ;;  %v18598_v2 = vld [vmem:[#allocation4 + $0x78c] ss:$48 sps:$4 sm:$0xff]   ;;  %v18593_v44 = vld [vmem:[#allocation4 + $0x780] ss:$48 sps:$4 sm:$0xff]  }
 0x311   :  { %v20732_v45 = vpop.eup %20731  ;;  %20751 = vtanh.f32 %v22532_v59  ;;  %v2078_v25 = vadd.f32 1.0, %v20730_v17  ;;  %4019 = vmatprep.subr.bf16.mxu1 %v18583_v12  ;;  %4165 = vmatprep.subr.bf16.mxu0 %v18586_v19 }
 0x312   :  { %v20734_v36 = vpop.eup %20733  ;;  %20753 = vrcp.f32 %v2077_v46  ;;  %v2080_v20 = vadd.f32 1.0, %v20732_v45  ;;  %v18596_v46 = vld [vmem:[#allocation4 + $0x788] ss:$48 sps:$4 sm:$0xff]   ;;  %v18601_v45 = vld [vmem:[#allocation4 + $0x7e4] ss:$48 sps:$4 sm:$0xff]  }
 0x313   :  { %v20736_v57 = vpop.eup %20735  ;;  %20755 = vrcp.f32 %v2078_v25  ;;  %v2081_v48 = vadd.f32 1.0, %v20734_v36  ;;  %3985 = vmatmul.mubr.bf16.gmra.mrb[36].mxu1 %v22500_v14  ;;  %4131 = vmatmul.mubr.bf16.gmra.mrb[52].mxu0 %v22500_v14  ;;  %v18604_v25 = vld [vmem:[#allocation4 + $0x7ec] ss:$48 sps:$4 sm:$0xff]  }
 0x314   :  { %v20738_v18 = vpop.eup %20737  ;;  %20757 = vrcp.f32 %v2080_v20  ;;  %4020 = vmatpush1.bf16.msra.mxu1 %v18581_v24  ;;  %4166 = vmatpush1.bf16.msra.mxu0 %v18584_v29  ;;  %v18599_v20 = vld [vmem:[#allocation4 + $0x7e0] ss:$48 sps:$4 sm:$0xff]  }
 0x315   :  { %v20740_v12 = vpop.eup %20739  ;;  %20759 = vrcp.f32 %v2081_v48  ;;  %4021 = vmatprep.subr.bf16.mxu1 %v18589_v35  ;;  %4167 = vmatprep.subr.bf16.mxu0 %v18592_v0  ;;  %v18602_v48 = vld [vmem:[#allocation4 + $0x7e8] ss:$48 sps:$4 sm:$0xff]  }
 0x316   :  { %v20742_v19 = vpop.eup %20741 }
 0x317   :  { %v20744_v8 = vpop.eup %20743 }
 0x318   :  { %v20746_v42 = vpop.eup %20745  ;;  %4022 = vmatpush1.bf16.msra.mxu1 %v18587_v55  ;;  %4168 = vmatpush1.bf16.msra.mxu0 %v18590_v41  ;;  %v2191_v24 = vmul.f32 %v20744_v8, %v22567_v28  ;;  %v18610_v55 = vld [vmem:[#allocation4 + $0x84c] ss:$48 sps:$4 sm:$0xff]  }
 0x319   :  { %v20748_v17 = vpop.eup %20747  ;;  %4023 = vmatprep.subr.bf16.mxu1 %v18595_v43  ;;  %4169 = vmatprep.subr.bf16.mxu0 %v18598_v2  ;;  %v2192_v0 = vmul.f32 %v20746_v42, %v22564_v1 }
 0x31a   :  { %v20750_v36 = vpop.eup %20749  ;;  %v2194_v29 = vmul.f32 %v20748_v17, %v20736_v57  ;;  %v18613_v17 = vld [vmem:[#allocation4 + $0x8a4] ss:$48 sps:$4 sm:$0xff]  }
 0x31b   :  { %v20752_v35 = vpop.eup %20751  ;;  %v2195_v38 = vmul.f32 %v20750_v36, %v20728_v60  ;;  %v18614_v36 = vld [vmem:[#allocation4 + $0x8a8] ss:$48 sps:$4 sm:$0xff]  }
 0x31c   :  { %v20754_v41 = vpop.eup %20753  ;;  %v22599_v59 = vpack.c.bf16 %v2194_v29, %v2191_v24  ;;  %4024 = vmatpush1.bf16.msra.mxu1 %v18593_v44  ;;  %4170 = vmatpush1.bf16.msra.mxu0 %v18596_v46  ;;  %v18605_v44 = vld [vmem:[#allocation4 + $0x840] ss:$48 sps:$4 sm:$0xff]   ;;  %v18608_v46 = vld [vmem:[#allocation4 + $0x848] ss:$48 sps:$4 sm:$0xff]   ;;  %v21692_v24 = vmov 1  }
 0x31d   :  { %v20756_v43 = vpop.eup %20755  ;;  %4025 = vmatprep.subr.bf16.mxu1 %v18601_v45  ;;  %4171 = vmatprep.subr.bf16.mxu0 %v18604_v25  ;;  %v22601_v2 = vpack.c.bf16 %v2195_v38, %v2192_v0  ;;  %v2197_v1 = vmul.f32 %v20754_v41, %v20740_v12  ;;  %v18616_v45 = vld [vmem:[#allocation4 + $0x8ac] ss:$48 sps:$4 sm:$0xff]   ;;  %v18611_v25 = vld [vmem:[#allocation4 + $0x8a0] ss:$48 sps:$4 sm:$0xff]   ;;  %v18625_v41 = vld [vmem:[#allocation4 + $0x74] ss:$48 sps:$4 sm:$0xff]  }
 0x31e   :  { %v20758_v28 = vpop.eup %20757  ;;  %3994 = vmatprep.mubr.bf16.mxu1 %v22599_v59  ;;  %4140 = vmatprep.mubr.bf16.mxu0 %v22599_v59  ;;  %v2198_v8 = vmul.f32 %v20756_v43, %v20738_v18  ;;  %v18619_v18 = vld [vmem:[#allocation4 + $0x14] ss:$48 sps:$4 sm:$0xff]   ;;  %v18628_v43 = vld [vmem:[#allocation4 + $0x7c] ss:$48 sps:$4 sm:$0xff]  }
 0x31f   :  { %v20760_v57 = vpop.eup %20759  ;;  %v2200_v60 = vmul.f32 %v20758_v28, %v20752_v35  ;;  %3995 = vmatmul.mubr.bf16.gmra.mrb[40].mxu1 %v22515_v6  ;;  %4141 = vmatmul.mubr.bf16.gmra.mrb[56].mxu0 %v22515_v6  ;;  %v21178_v29 = vld [vmem:[%s24176_s26] sm:$0xff]  ;;  %v18620_v35 = vld [vmem:[#allocation4 + $0x18] ss:$48 sps:$4 sm:$0xff]   ;;  %v21179_v0 = vld [vmem:[%s24176_s26 + $0x10] sm:$0xff] }
 0x320   :  { %v2201_v42 = vmul.f32 %v20760_v57, %v20742_v19  ;;  %4026 = vmatpush1.bf16.msra.mxu1 %v18599_v20  ;;  %4172 = vmatpush1.bf16.msra.mxu0 %v18602_v48  ;;  %v18622_v19 = vld [vmem:[#allocation4 + $0x1c] ss:$48 sps:$4 sm:$0xff]   ;;  %v24213_v20 = vmov 0   ;;  %v18617_v48 = vld [vmem:[#allocation4 + $0x10] ss:$48 sps:$4 sm:$0xff]  }
 0x321   :  { %v22607_v38 = vpack.c.bf16 %v2200_v60, %v2197_v1  ;;  %4027 = vmatprep.subr.bf16.mxu1 %v18607_v3  ;;  %4173 = vmatprep.subr.bf16.mxu0 %v18610_v55  ;;  %v21177_v3 = vld [vmem:[%s24176_s26 + $0x8] sm:$0xff]  ;;  %v21180_v55 = vld [vmem:[%s24176_s26 + $0x18] sm:$0xff]  ;;  %v18623_v28 = vld [vmem:[#allocation4 + $0x70] ss:$48 sps:$4 sm:$0xff]  }
 0x322   :  { %v22609_v12 = vpack.c.bf16 %v2201_v42, %v2198_v8  ;;  %18232 = vset.pattern.permute.xlu1 %v21692_v24  ;;  %18231 = vset.pattern.permute.xlu0 %v21692_v24  ;;  %v18626_v57 = vld [vmem:[#allocation4 + $0x78] ss:$48 sps:$4 sm:$0xff]   ;;  %v18631_v1 = vld [vmem:[#allocation4 + $0xd4] ss:$48 sps:$4 sm:$0xff]   ;;  %v18634_v60 = vld [vmem:[#allocation4 + $0xdc] ss:$48 sps:$4 sm:$0xff]  }
 0x323   :  { %4004 = vmatprep.mubr.bf16.mxu1 %v22607_v38  ;;  %4150 = vmatprep.mubr.bf16.mxu0 %v22607_v38  ;;  %v18629_v8 = vld [vmem:[#allocation4 + $0xd0] ss:$48 sps:$4 sm:$0xff]   ;;  %v18632_v42 = vld [vmem:[#allocation4 + $0xd8] ss:$48 sps:$4 sm:$0xff]   ;;  %v18643_v24 = vld [vmem:[#allocation4 + $0x194] ss:$48 sps:$4 sm:$0xff]  }
 0x324   :  { %4028 = vmatpush1.bf16.msra.mxu1 %v18605_v44  ;;  %4174 = vmatpush1.bf16.msra.mxu0 %v18608_v46  ;;  %v21181_v44 = vld [vmem:[%s24176_s26 + $0x20] sm:$0xff]  ;;  %v21182_v46 = vld [vmem:[%s24176_s26 + $0x28] sm:$0xff] }
 0x325   :  { %4029 = vmatprep.subr.bf16.mxu1 %v18613_v17  ;;  %4175 = vmatprep.subr.bf16.mxu0 %v18616_v45  ;;  %v18637_v17 = vld [vmem:[#allocation4 + $0x134] ss:$48 sps:$4 sm:$0xff]   ;;  %v18640_v45 = vld [vmem:[#allocation4 + $0x13c] ss:$48 sps:$4 sm:$0xff]  }
 0x326   :  { %329 = vperm.xlu1 %18232, %v21177_v3   ;;  %326 = vperm.xlu0 %18231, %v21178_v29   ;;  %v18644_v3 = vld [vmem:[#allocation4 + $0x198] ss:$48 sps:$4 sm:$0xff]   ;;  %v21183_v29 = vld [vmem:[%s24176_s26 + $0x30] sm:$0xff] }
 0x327   :  { %4005 = vmatmul.mubr.bf16.gmra.mrb[44].mxu1 %v22557_v33  ;;  %4151 = vmatmul.mubr.bf16.gmra.mrb[60].mxu0 %v22557_v33 }
 0x328   :  { %4030 = vmatpush1.bf16.msra.mxu1 %v18611_v25  ;;  %4176 = vmatpush1.bf16.msra.mxu0 %v18614_v36  ;;  %v18635_v25 = vld [vmem:[#allocation4 + $0x130] ss:$48 sps:$4 sm:$0xff]   ;;  %v18638_v36 = vld [vmem:[#allocation4 + $0x138] ss:$48 sps:$4 sm:$0xff]  }
 0x329   :  { %4047 = vmatprep.mubr.bf16.mxu1 %v24213_v20  ;;  %4193 = vmatprep.mubr.bf16.mxu0 %v24213_v20 }
 0x32a   :  { %4234 = vmatprep.subr.bf16.mxu1 %v18619_v18  ;;  %4380 = vmatprep.subr.bf16.mxu0 %v18622_v19  ;;  %v18646_v18 = vld [vmem:[#allocation4 + $0x19c] ss:$48 sps:$4 sm:$0xff]   ;;  %v18641_v19 = vld [vmem:[#allocation4 + $0x190] ss:$48 sps:$4 sm:$0xff]  }
 0x32b   :  { %332 = vperm.xlu1 %18232, %v21179_v0   ;;  %335 = vperm.xlu0 %18231, %v21180_v55   ;;  %v18652_v0 = vld [vmem:[#allocation4 + $0x1fc] ss:$48 sps:$4 sm:$0xff]   ;;  %v18647_v55 = vld [vmem:[#allocation4 + $0x1f0] ss:$48 sps:$4 sm:$0xff]  }
 0x32f   :  { %4048 = vmatmul.mubr.bf16.vlgmr.msra.gmra.mrb[32].mxu1 %v22577_v61  ;;  %4194 = vmatmul.mubr.bf16.vlgmr.msra.gmra.mrb[48].mxu0 %v22577_v61 }
 0x330   :  { %4235 = vmatpush1.bf16.msra.mxu1 %v18617_v48  ;;  %4381 = vmatpush1.bf16.msra.mxu0 %v18620_v35  ;;  %v21184_v48 = vld [vmem:[%s24176_s26 + $0x38] sm:$0xff]  ;;  %v18649_v35 = vld [vmem:[#allocation4 + $0x1f4] ss:$48 sps:$4 sm:$0xff]  }
 0x331   :  { %4236 = vmatprep.subr.bf16.mxu1 %v18625_v41  ;;  %4382 = vmatprep.subr.bf16.mxu0 %v18628_v43  ;;  %v18650_v41 = vld [vmem:[#allocation4 + $0x1f8] ss:$48 sps:$4 sm:$0xff]   ;;  %v18655_v43 = vld [vmem:[#allocation4 + $0x254] ss:$48 sps:$4 sm:$0xff]  }
 0x332   :  { %4057 = vmatprep.mubr.bf16.mxu1 %v24213_v20  ;;  %4203 = vmatprep.mubr.bf16.mxu0 %v24213_v20 }
 0x333   :  { %338 = vperm.xlu1 %18232, %v21181_v44   ;;  %341 = vperm.xlu0 %18231, %v21182_v46   ;;  %v18664_v44 = vld [vmem:[#allocation4 + $0x2bc] ss:$48 sps:$4 sm:$0xff]   ;;  %v18667_v46 = vld [vmem:[#allocation4 + $0x314] ss:$48 sps:$4 sm:$0xff]  }
 0x334   :  { %4237 = vmatpush1.bf16.msra.mxu1 %v18623_v28  ;;  %4383 = vmatpush1.bf16.msra.mxu0 %v18626_v57  ;;  %v18658_v28 = vld [vmem:[#allocation4 + $0x25c] ss:$48 sps:$4 sm:$0xff]   ;;  %v18653_v57 = vld [vmem:[#allocation4 + $0x250] ss:$48 sps:$4 sm:$0xff]  }
 0x335   :  { %4238 = vmatprep.subr.bf16.mxu1 %v18631_v1  ;;  %4384 = vmatprep.subr.bf16.mxu0 %v18634_v60  ;;  %v18656_v1 = vld [vmem:[#allocation4 + $0x258] ss:$48 sps:$4 sm:$0xff]   ;;  %v18661_v60 = vld [vmem:[#allocation4 + $0x2b4] ss:$48 sps:$4 sm:$0xff]  }
 0x337   :  { %4058 = vmatmul.mubr.bf16.gmra.mrb[36].mxu1 %v22590_v23  ;;  %4204 = vmatmul.mubr.bf16.gmra.mrb[52].mxu0 %v22590_v23 }
 0x338   :  { %4239 = vmatpush1.bf16.msra.mxu1 %v18629_v8  ;;  %4385 = vmatpush1.bf16.msra.mxu0 %v18632_v42  ;;  %v18659_v8 = vld [vmem:[#allocation4 + $0x2b0] ss:$48 sps:$4 sm:$0xff]   ;;  %v18662_v42 = vld [vmem:[#allocation4 + $0x2b8] ss:$48 sps:$4 sm:$0xff]  }
 0x339   :  { %4240 = vmatprep.subr.bf16.mxu1 %v18637_v17  ;;  %4386 = vmatprep.subr.bf16.mxu0 %v18640_v45  ;;  %v18670_v17 = vld [vmem:[#allocation4 + $0x31c] ss:$48 sps:$4 sm:$0xff]   ;;  %v18665_v45 = vld [vmem:[#allocation4 + $0x310] ss:$48 sps:$4 sm:$0xff]  }
 0x33a   :  { %4067 = vmatprep.mubr.bf16.mxu1 %v24213_v20  ;;  %4213 = vmatprep.mubr.bf16.mxu0 %v24213_v20 }
 0x33b   :  { %344 = vperm.xlu1 %18232, %v21183_v29   ;;  %347 = vperm.xlu0 %18231, %v21184_v48   ;;  %v18682_v29 = vld [vmem:[#allocation4 + $0x3dc] ss:$48 sps:$4 sm:$0xff]   ;;  %v18677_v48 = vld [vmem:[#allocation4 + $0x3d0] ss:$48 sps:$4 sm:$0xff]  }
 0x33c   :  { %4241 = vmatpush1.bf16.msra.mxu1 %v18635_v25  ;;  %4387 = vmatpush1.bf16.msra.mxu0 %v18638_v36  ;;  %v18668_v25 = vld [vmem:[#allocation4 + $0x318] ss:$48 sps:$4 sm:$0xff]   ;;  %v18673_v36 = vld [vmem:[#allocation4 + $0x374] ss:$48 sps:$4 sm:$0xff]  }
 0x33d   :  { %4242 = vmatprep.subr.bf16.mxu1 %v18643_v24  ;;  %4388 = vmatprep.subr.bf16.mxu0 %v18646_v18  ;;  %v18676_v24 = vld [vmem:[#allocation4 + $0x37c] ss:$48 sps:$4 sm:$0xff]   ;;  %v18671_v18 = vld [vmem:[#allocation4 + $0x370] ss:$48 sps:$4 sm:$0xff]  }
 0x33f   :  { %4068 = vmatmul.mubr.bf16.gmra.mrb[40].mxu1 %v22601_v2  ;;  %4214 = vmatmul.mubr.bf16.gmra.mrb[56].mxu0 %v22601_v2 }
 0x340   :  { %4243 = vmatpush1.bf16.msra.mxu1 %v18641_v19  ;;  %4389 = vmatpush1.bf16.msra.mxu0 %v18644_v3  ;;  %v18674_v19 = vld [vmem:[#allocation4 + $0x378] ss:$48 sps:$4 sm:$0xff]   ;;  %v18679_v3 = vld [vmem:[#allocation4 + $0x3d4] ss:$48 sps:$4 sm:$0xff]  }
 0x341   :  { %4244 = vmatprep.subr.bf16.mxu1 %v18649_v35  ;;  %4390 = vmatprep.subr.bf16.mxu0 %v18652_v0  ;;  %v18680_v35 = vld [vmem:[#allocation4 + $0x3d8] ss:$48 sps:$4 sm:$0xff]   ;;  %v18685_v0 = vld [vmem:[#allocation4 + $0x434] ss:$48 sps:$4 sm:$0xff]  }
 0x342   :  { %4077 = vmatprep.mubr.bf16.mxu1 %v24213_v20  ;;  %4223 = vmatprep.mubr.bf16.mxu0 %v24213_v20 }
 0x344   :  { %4245 = vmatpush1.bf16.msra.mxu1 %v18647_v55  ;;  %4391 = vmatpush1.bf16.msra.mxu0 %v18650_v41  ;;  %v18688_v55 = vld [vmem:[#allocation4 + $0x43c] ss:$48 sps:$4 sm:$0xff]   ;;  %v18683_v41 = vld [vmem:[#allocation4 + $0x430] ss:$48 sps:$4 sm:$0xff]  }
 0x345   :  { %4246 = vmatprep.subr.bf16.mxu1 %v18655_v43  ;;  %4392 = vmatprep.subr.bf16.mxu0 %v18658_v28  ;;  %v18686_v43 = vld [vmem:[#allocation4 + $0x438] ss:$48 sps:$4 sm:$0xff]   ;;  %v18691_v28 = vld [vmem:[#allocation4 + $0x494] ss:$48 sps:$4 sm:$0xff]  }
 0x347   :  { %4078 = vmatmul.mubr.bf16.gmra.mrb[44].mxu1 %v22609_v12  ;;  %4224 = vmatmul.mubr.bf16.gmra.mrb[60].mxu0 %v22609_v12 }
 0x348   :  { %4247 = vmatpush1.bf16.msra.mxu1 %v18653_v57  ;;  %4393 = vmatpush1.bf16.msra.mxu0 %v18656_v1  ;;  %v18694_v57 = vld [vmem:[#allocation4 + $0x49c] ss:$48 sps:$4 sm:$0xff]   ;;  %v18689_v1 = vld [vmem:[#allocation4 + $0x490] ss:$48 sps:$4 sm:$0xff]  }
 0x349   :  { %4266 = vmatprep.mubr.bf16.mxu1 %v22574_v40  ;;  %4412 = vmatprep.mubr.bf16.mxu0 %v22574_v40 }
 0x34a   :  { %4248 = vmatprep.subr.bf16.mxu1 %v18661_v60  ;;  %4394 = vmatprep.subr.bf16.mxu0 %v18664_v44  ;;  %v18692_v60 = vld [vmem:[#allocation4 + $0x498] ss:$48 sps:$4 sm:$0xff]   ;;  %v18695_v44 = vld [vmem:[#allocation4 + $0x4f0] ss:$48 sps:$4 sm:$0xff]  }
 0x34c   :  { %4249 = vmatpush1.bf16.msra.mxu1 %v18659_v8  ;;  %4395 = vmatpush1.bf16.msra.mxu0 %v18662_v42  ;;  %v18697_v8 = vld [vmem:[#allocation4 + $0x4f4] ss:$48 sps:$4 sm:$0xff]   ;;  %v18700_v42 = vld [vmem:[#allocation4 + $0x4fc] ss:$48 sps:$4 sm:$0xff]  }
 0x34d   :  { %4250 = vmatprep.subr.bf16.mxu1 %v18667_v46  ;;  %4396 = vmatprep.subr.bf16.mxu0 %v18670_v17  ;;  %v18698_v46 = vld [vmem:[#allocation4 + $0x4f8] ss:$48 sps:$4 sm:$0xff]   ;;  %v18703_v17 = vld [vmem:[#allocation4 + $0x554] ss:$48 sps:$4 sm:$0xff]  }
 0x350   :  { %4251 = vmatpush1.bf16.msra.mxu1 %v18665_v45  ;;  %4397 = vmatpush1.bf16.msra.mxu0 %v18668_v25  ;;  %v18706_v45 = vld [vmem:[#allocation4 + $0x55c] ss:$48 sps:$4 sm:$0xff]   ;;  %v18701_v25 = vld [vmem:[#allocation4 + $0x550] ss:$48 sps:$4 sm:$0xff]  }
 0x351   :  { %4252 = vmatprep.subr.bf16.mxu1 %v18673_v36  ;;  %4398 = vmatprep.subr.bf16.mxu0 %v18676_v24  ;;  %v18704_v36 = vld [vmem:[#allocation4 + $0x558] ss:$48 sps:$4 sm:$0xff]   ;;  %v18709_v24 = vld [vmem:[#allocation4 + $0x5b4] ss:$48 sps:$4 sm:$0xff]  }
 0x354   :  { %4253 = vmatpush1.bf16.msra.mxu1 %v18671_v18  ;;  %4399 = vmatpush1.bf16.msra.mxu0 %v18674_v19  ;;  %v18712_v18 = vld [vmem:[#allocation4 + $0x5bc] ss:$48 sps:$4 sm:$0xff]   ;;  %v18707_v19 = vld [vmem:[#allocation4 + $0x5b0] ss:$48 sps:$4 sm:$0xff]  }
 0x355   :  { %4254 = vmatprep.subr.bf16.mxu1 %v18679_v3  ;;  %4400 = vmatprep.subr.bf16.mxu0 %v18682_v29  ;;  %v18710_v3 = vld [vmem:[#allocation4 + $0x5b8] ss:$48 sps:$4 sm:$0xff]   ;;  %v18715_v29 = vld [vmem:[#allocation4 + $0x614] ss:$48 sps:$4 sm:$0xff]  }
 0x358   :  { %4255 = vmatpush1.bf16.msra.mxu1 %v18677_v48  ;;  %4401 = vmatpush1.bf16.msra.mxu0 %v18680_v35  ;;  %v18718_v48 = vld [vmem:[#allocation4 + $0x61c] ss:$48 sps:$4 sm:$0xff]   ;;  %v18713_v35 = vld [vmem:[#allocation4 + $0x610] ss:$48 sps:$4 sm:$0xff]  }
 0x359   :  { %4256 = vmatprep.subr.bf16.mxu1 %v18685_v0  ;;  %4402 = vmatprep.subr.bf16.mxu0 %v18688_v55  ;;  %v18716_v0 = vld [vmem:[#allocation4 + $0x618] ss:$48 sps:$4 sm:$0xff]   ;;  %v18721_v55 = vld [vmem:[#allocation4 + $0x674] ss:$48 sps:$4 sm:$0xff]  }
 0x35c   :  { %4257 = vmatpush1.bf16.msra.mxu1 %v18683_v41  ;;  %4403 = vmatpush1.bf16.msra.mxu0 %v18686_v43  ;;  %v18724_v41 = vld [vmem:[#allocation4 + $0x67c] ss:$48 sps:$4 sm:$0xff]   ;;  %v18719_v43 = vld [vmem:[#allocation4 + $0x670] ss:$48 sps:$4 sm:$0xff]  }
 0x35d   :  { %4258 = vmatprep.subr.bf16.mxu1 %v18691_v28  ;;  %4404 = vmatprep.subr.bf16.mxu0 %v18694_v57  ;;  %v18722_v28 = vld [vmem:[#allocation4 + $0x678] ss:$48 sps:$4 sm:$0xff]   ;;  %v18727_v57 = vld [vmem:[#allocation4 + $0x6d4] ss:$48 sps:$4 sm:$0xff]  }
 0x360   :  { %4259 = vmatpush1.bf16.msra.mxu1 %v18689_v1  ;;  %4405 = vmatpush1.bf16.msra.mxu0 %v18692_v60  ;;  %v18730_v1 = vld [vmem:[#allocation4 + $0x6dc] ss:$48 sps:$4 sm:$0xff]   ;;  %v18725_v60 = vld [vmem:[#allocation4 + $0x6d0] ss:$48 sps:$4 sm:$0xff]  }
 0x361   :  { %4260 = vmatprep.subr.bf16.mxu1 %v18697_v8  ;;  %4406 = vmatprep.subr.bf16.mxu0 %v18700_v42  ;;  %v18728_v8 = vld [vmem:[#allocation4 + $0x6d8] ss:$48 sps:$4 sm:$0xff]   ;;  %v18733_v42 = vld [vmem:[#allocation4 + $0x734] ss:$48 sps:$4 sm:$0xff]  }
 0x364   :  { %4261 = vmatpush1.bf16.msra.mxu1 %v18695_v44  ;;  %4407 = vmatpush1.bf16.msra.mxu0 %v18698_v46  ;;  %v18736_v44 = vld [vmem:[#allocation4 + $0x73c] ss:$48 sps:$4 sm:$0xff]   ;;  %v18731_v46 = vld [vmem:[#allocation4 + $0x730] ss:$48 sps:$4 sm:$0xff]  }
 0x365   :  { %4262 = vmatprep.subr.bf16.mxu1 %v18703_v17  ;;  %4408 = vmatprep.subr.bf16.mxu0 %v18706_v45  ;;  %v18734_v17 = vld [vmem:[#allocation4 + $0x738] ss:$48 sps:$4 sm:$0xff]   ;;  %v18739_v45 = vld [vmem:[#allocation4 + $0x794] ss:$48 sps:$4 sm:$0xff]  }
 0x368   :  { %4263 = vmatpush1.bf16.msra.mxu1 %v18701_v25  ;;  %4409 = vmatpush1.bf16.msra.mxu0 %v18704_v36  ;;  %v18742_v25 = vld [vmem:[#allocation4 + $0x79c] ss:$48 sps:$4 sm:$0xff]   ;;  %v18737_v36 = vld [vmem:[#allocation4 + $0x790] ss:$48 sps:$4 sm:$0xff]  }
 0x369   :  { %4264 = vmatprep.subr.bf16.mxu1 %v18709_v24  ;;  %4410 = vmatprep.subr.bf16.mxu0 %v18712_v18  ;;  %v18740_v24 = vld [vmem:[#allocation4 + $0x798] ss:$48 sps:$4 sm:$0xff]   ;;  %v18745_v18 = vld [vmem:[#allocation4 + $0x7f4] ss:$48 sps:$4 sm:$0xff]  }
 0x36c   :  { %4265 = vmatpush1.bf16.msra.mxu1 %v18707_v19  ;;  %4411 = vmatpush1.bf16.msra.mxu0 %v18710_v3  ;;  %v18748_v19 = vld [vmem:[#allocation4 + $0x7fc] ss:$48 sps:$4 sm:$0xff]   ;;  %v18743_v3 = vld [vmem:[#allocation4 + $0x7f0] ss:$48 sps:$4 sm:$0xff]  }
 0x36d   :  { %4307 = vmatprep.subr.bf16.mxu1 %v18715_v29  ;;  %4453 = vmatprep.subr.bf16.mxu0 %v18718_v48  ;;  %v18746_v29 = vld [vmem:[#allocation4 + $0x7f8] ss:$48 sps:$4 sm:$0xff]   ;;  %v18751_v48 = vld [vmem:[#allocation4 + $0x854] ss:$48 sps:$4 sm:$0xff]  }
 0x36f   :  { %4267 = vmatmul.mubr.bf16.vlgmr.msra.gmra.mrb[48].mxu1 %v22453_v22  ;;  %4413 = vmatmul.mubr.bf16.vlgmr.msra.gmra.mrb[64].mxu0 %v22453_v22 }
 0x370   :  { %4276 = vmatprep.mubr.bf16.mxu1 %v22588_v58  ;;  %4308 = vmatpush1.bf16.msra.mxu1 %v18713_v35  ;;  %v18754_v35 = vld [vmem:[#allocation4 + $0x85c] ss:$48 sps:$4 sm:$0xff]  }
 0x371   :  { %4422 = vmatprep.mubr.bf16.mxu0 %v22588_v58  ;;  %4454 = vmatpush1.bf16.msra.mxu0 %v18716_v0  ;;  %v18749_v0 = vld [vmem:[#allocation4 + $0x850] ss:$48 sps:$4 sm:$0xff]  }
 0x372   :  { %4309 = vmatprep.subr.bf16.mxu1 %v18721_v55  ;;  %4455 = vmatprep.subr.bf16.mxu0 %v18724_v41  ;;  %v18752_v55 = vld [vmem:[#allocation4 + $0x858] ss:$48 sps:$4 sm:$0xff]   ;;  %v18757_v41 = vld [vmem:[#allocation4 + $0x8b4] ss:$48 sps:$4 sm:$0xff]  }
 0x374   :  { %4310 = vmatpush1.bf16.msra.mxu1 %v18719_v43  ;;  %v18760_v43 = vld [vmem:[#allocation4 + $0x8bc] ss:$48 sps:$4 sm:$0xff]  }
 0x375   :  { %4456 = vmatpush1.bf16.msra.mxu0 %v18722_v28  ;;  %4311 = vmatprep.subr.bf16.mxu1 %v18727_v57  ;;  %v18755_v28 = vld [vmem:[#allocation4 + $0x8b0] ss:$48 sps:$4 sm:$0xff]   ;;  %v18758_v57 = vld [vmem:[#allocation4 + $0x8b8] ss:$48 sps:$4 sm:$0xff]  }
 0x376   :  { %4457 = vmatprep.subr.bf16.mxu0 %v18730_v1  ;;  %v18763_v1 = vld [vmem:[#allocation4 + $0x24] ss:$48 sps:$4 sm:$0xff]  }
 0x377   :  { %4277 = vmatmul.mubr.bf16.gmra.mrb[52].mxu1 %v22500_v14  ;;  %4423 = vmatmul.mubr.bf16.gmra.mrb[68].mxu0 %v22500_v14 }
 0x378   :  { %4286 = vmatprep.mubr.bf16.mxu1 %v22599_v59  ;;  %4312 = vmatpush1.bf16.msra.mxu1 %v18725_v60  ;;  %v18766_v60 = vld [vmem:[#allocation4 + $0x2c] ss:$48 sps:$4 sm:$0xff]  }
 0x379   :  { %4432 = vmatprep.mubr.bf16.mxu0 %v22599_v59  ;;  %4458 = vmatpush1.bf16.msra.mxu0 %v18728_v8  ;;  %v18761_v8 = vld [vmem:[#allocation4 + $0x20] ss:$48 sps:$4 sm:$0xff]  }
 0x37a   :  { %4313 = vmatprep.subr.bf16.mxu1 %v18733_v42  ;;  %4459 = vmatprep.subr.bf16.mxu0 %v18736_v44  ;;  %v18764_v42 = vld [vmem:[#allocation4 + $0x28] ss:$48 sps:$4 sm:$0xff]   ;;  %v18769_v44 = vld [vmem:[#allocation4 + $0x84] ss:$48 sps:$4 sm:$0xff]  }
 0x37c   :  { %4314 = vmatpush1.bf16.msra.mxu1 %v18731_v46  ;;  %v18772_v46 = vld [vmem:[#allocation4 + $0x8c] ss:$48 sps:$4 sm:$0xff]  }
 0x37d   :  { %4460 = vmatpush1.bf16.msra.mxu0 %v18734_v17  ;;  %4315 = vmatprep.subr.bf16.mxu1 %v18739_v45  ;;  %v18767_v17 = vld [vmem:[#allocation4 + $0x80] ss:$48 sps:$4 sm:$0xff]   ;;  %v18770_v45 = vld [vmem:[#allocation4 + $0x88] ss:$48 sps:$4 sm:$0xff]  }
 0x37e   :  { %4461 = vmatprep.subr.bf16.mxu0 %v18742_v25  ;;  %v18775_v25 = vld [vmem:[#allocation4 + $0xe4] ss:$48 sps:$4 sm:$0xff]  }
 0x37f   :  { %4287 = vmatmul.mubr.bf16.gmra.mrb[56].mxu1 %v22515_v6  ;;  %4433 = vmatmul.mubr.bf16.gmra.mrb[72].mxu0 %v22515_v6 }
 0x380   :  { %4296 = vmatprep.mubr.bf16.mxu1 %v22607_v38  ;;  %4316 = vmatpush1.bf16.msra.mxu1 %v18737_v36  ;;  %v18778_v36 = vld [vmem:[#allocation4 + $0xec] ss:$48 sps:$4 sm:$0xff]  }
 0x381   :  { %4442 = vmatprep.mubr.bf16.mxu0 %v22607_v38  ;;  %4462 = vmatpush1.bf16.msra.mxu0 %v18740_v24  ;;  %v18773_v24 = vld [vmem:[#allocation4 + $0xe0] ss:$48 sps:$4 sm:$0xff]  }
 0x382   :  { %4317 = vmatprep.subr.bf16.mxu1 %v18745_v18  ;;  %4463 = vmatprep.subr.bf16.mxu0 %v18748_v19  ;;  %v18776_v18 = vld [vmem:[#allocation4 + $0xe8] ss:$48 sps:$4 sm:$0xff]   ;;  %v18781_v19 = vld [vmem:[#allocation4 + $0x144] ss:$48 sps:$4 sm:$0xff]  }
 0x384   :  { %4318 = vmatpush1.bf16.msra.mxu1 %v18743_v3  ;;  %v18784_v3 = vld [vmem:[#allocation4 + $0x14c] ss:$48 sps:$4 sm:$0xff]  }
 0x385   :  { %4464 = vmatpush1.bf16.msra.mxu0 %v18746_v29  ;;  %4319 = vmatprep.subr.bf16.mxu1 %v18751_v48  ;;  %v18779_v29 = vld [vmem:[#allocation4 + $0x140] ss:$48 sps:$4 sm:$0xff]   ;;  %v18782_v48 = vld [vmem:[#allocation4 + $0x148] ss:$48 sps:$4 sm:$0xff]  }
 0x386   :  { %4465 = vmatprep.subr.bf16.mxu0 %v18754_v35  ;;  %v18787_v35 = vld [vmem:[#allocation4 + $0x1a4] ss:$48 sps:$4 sm:$0xff]  }
 0x387   :  { %4297 = vmatmul.mubr.bf16.gmra.mrb[60].mxu1 %v22557_v33  ;;  %4443 = vmatmul.mubr.bf16.gmra.mrb[76].mxu0 %v22557_v33 }
 0x388   :  { %4320 = vmatpush1.bf16.msra.mxu1 %v18749_v0  ;;  %4339 = vmatprep.mubr.bf16.mxu1 %v24213_v20  ;;  %v18790_v0 = vld [vmem:[#allocation4 + $0x1ac] ss:$48 sps:$4 sm:$0xff]  }
 0x389   :  { %4466 = vmatpush1.bf16.msra.mxu0 %v18752_v55  ;;  %4321 = vmatprep.subr.bf16.mxu1 %v18757_v41  ;;  %v18785_v55 = vld [vmem:[#allocation4 + $0x1a0] ss:$48 sps:$4 sm:$0xff]   ;;  %v18788_v41 = vld [vmem:[#allocation4 + $0x1a8] ss:$48 sps:$4 sm:$0xff]  }
 0x38a   :  { %4467 = vmatprep.subr.bf16.mxu0 %v18760_v43  ;;  %4485 = vmatprep.mubr.bf16.mxu0 %v24213_v20  ;;  %v18793_v43 = vld [vmem:[#allocation4 + $0x204] ss:$48 sps:$4 sm:$0xff]  }
 0x38c   :  { %4322 = vmatpush1.bf16.msra.mxu1 %v18755_v28  ;;  %v18796_v28 = vld [vmem:[#allocation4 + $0x20c] ss:$48 sps:$4 sm:$0xff]  }
 0x38d   :  { %4468 = vmatpush1.bf16.msra.mxu0 %v18758_v57  ;;  %4526 = vmatprep.subr.bf16.mxu1 %v18763_v1  ;;  %v18791_v57 = vld [vmem:[#allocation4 + $0x200] ss:$48 sps:$4 sm:$0xff]   ;;  %v18794_v1 = vld [vmem:[#allocation4 + $0x208] ss:$48 sps:$4 sm:$0xff]  }
 0x38e   :  { %4672 = vmatprep.subr.bf16.mxu0 %v18766_v60  ;;  %v18799_v60 = vld [vmem:[#allocation4 + $0x264] ss:$48 sps:$4 sm:$0xff]  }
 0x38f   :  { %4340 = vmatmul.mubr.bf16.vlgmr.msra.gmra.mrb[48].mxu1 %v22577_v61 }
 0x390   :  { %4486 = vmatmul.mubr.bf16.vlgmr.msra.gmra.mrb[64].mxu0 %v22577_v61  ;;  %4527 = vmatpush1.bf16.msra.mxu1 %v18761_v8  ;;  %v18802_v8 = vld [vmem:[#allocation4 + $0x26c] ss:$48 sps:$4 sm:$0xff]  }
 0x391   :  { %4673 = vmatpush1.bf16.msra.mxu0 %v18764_v42  ;;  %4528 = vmatprep.subr.bf16.mxu1 %v18769_v44  ;;  %v18797_v42 = vld [vmem:[#allocation4 + $0x260] ss:$48 sps:$4 sm:$0xff]   ;;  %v18800_v44 = vld [vmem:[#allocation4 + $0x268] ss:$48 sps:$4 sm:$0xff]  }
 0x392   :  { %4674 = vmatprep.subr.bf16.mxu0 %v18772_v46  ;;  %4349 = vmatprep.mubr.bf16.mxu1 %v24213_v20  ;;  %v18805_v46 = vld [vmem:[#allocation4 + $0x2c4] ss:$48 sps:$4 sm:$0xff]  }
 0x393   :  { %4495 = vmatprep.mubr.bf16.mxu0 %v24213_v20 }
 0x394   :  { %4529 = vmatpush1.bf16.msra.mxu1 %v18767_v17  ;;  %v18808_v17 = vld [vmem:[#allocation4 + $0x2cc] ss:$48 sps:$4 sm:$0xff]  }
 0x395   :  { %4675 = vmatpush1.bf16.msra.mxu0 %v18770_v45  ;;  %4530 = vmatprep.subr.bf16.mxu1 %v18775_v25  ;;  %v18803_v45 = vld [vmem:[#allocation4 + $0x2c0] ss:$48 sps:$4 sm:$0xff]   ;;  %v18806_v25 = vld [vmem:[#allocation4 + $0x2c8] ss:$48 sps:$4 sm:$0xff]  }
 0x396   :  { %4676 = vmatprep.subr.bf16.mxu0 %v18778_v36  ;;  %v18811_v36 = vld [vmem:[#allocation4 + $0x324] ss:$48 sps:$4 sm:$0xff]  }
 0x397   :  { %4350 = vmatmul.mubr.bf16.gmra.mrb[52].mxu1 %v22590_v23 }
 0x398   :  { %4496 = vmatmul.mubr.bf16.gmra.mrb[68].mxu0 %v22590_v23  ;;  %4531 = vmatpush1.bf16.msra.mxu1 %v18773_v24  ;;  %v18814_v24 = vld [vmem:[#allocation4 + $0x32c] ss:$48 sps:$4 sm:$0xff]  }
 0x399   :  { %4677 = vmatpush1.bf16.msra.mxu0 %v18776_v18  ;;  %4532 = vmatprep.subr.bf16.mxu1 %v18781_v19  ;;  %v18809_v18 = vld [vmem:[#allocation4 + $0x320] ss:$48 sps:$4 sm:$0xff]   ;;  %v18812_v19 = vld [vmem:[#allocation4 + $0x328] ss:$48 sps:$4 sm:$0xff]  }
 0x39a   :  { %4678 = vmatprep.subr.bf16.mxu0 %v18784_v3  ;;  %4359 = vmatprep.mubr.bf16.mxu1 %v24213_v20  ;;  %v18817_v3 = vld [vmem:[#allocation4 + $0x384] ss:$48 sps:$4 sm:$0xff]  }
 0x39b   :  { %4505 = vmatprep.mubr.bf16.mxu0 %v24213_v20 }
 0x39c   :  { %4533 = vmatpush1.bf16.msra.mxu1 %v18779_v29  ;;  %v18820_v29 = vld [vmem:[#allocation4 + $0x38c] ss:$48 sps:$4 sm:$0xff]  }
 0x39d   :  { %4679 = vmatpush1.bf16.msra.mxu0 %v18782_v48  ;;  %4534 = vmatprep.subr.bf16.mxu1 %v18787_v35  ;;  %v18815_v48 = vld [vmem:[#allocation4 + $0x380] ss:$48 sps:$4 sm:$0xff]   ;;  %v18818_v35 = vld [vmem:[#allocation4 + $0x388] ss:$48 sps:$4 sm:$0xff]  }
 0x39e   :  { %4680 = vmatprep.subr.bf16.mxu0 %v18790_v0  ;;  %v18823_v0 = vld [vmem:[#allocation4 + $0x3e4] ss:$48 sps:$4 sm:$0xff]  }
 0x39f   :  { %4360 = vmatmul.mubr.bf16.gmra.mrb[56].mxu1 %v22601_v2 }
 0x3a0   :  { %4506 = vmatmul.mubr.bf16.gmra.mrb[72].mxu0 %v22601_v2  ;;  %4535 = vmatpush1.bf16.msra.mxu1 %v18785_v55  ;;  %v18826_v55 = vld [vmem:[#allocation4 + $0x3ec] ss:$48 sps:$4 sm:$0xff]  }
 0x3a1   :  { %4681 = vmatpush1.bf16.msra.mxu0 %v18788_v41  ;;  %4536 = vmatprep.subr.bf16.mxu1 %v18793_v43  ;;  %v18821_v41 = vld [vmem:[#allocation4 + $0x3e0] ss:$48 sps:$4 sm:$0xff]   ;;  %v18829_v43 = vld [vmem:[#allocation4 + $0x444] ss:$48 sps:$4 sm:$0xff]  }
 0x3a2   :  { %4682 = vmatprep.subr.bf16.mxu0 %v18796_v28  ;;  %4369 = vmatprep.mubr.bf16.mxu1 %v24213_v20  ;;  %v18832_v28 = vld [vmem:[#allocation4 + $0x44c] ss:$48 sps:$4 sm:$0xff]  }
 0x3a3   :  { %4515 = vmatprep.mubr.bf16.mxu0 %v24213_v20 }
 0x3a4   :  { %4537 = vmatpush1.bf16.msra.mxu1 %v18791_v57  ;;  %v18827_v57 = vld [vmem:[#allocation4 + $0x440] ss:$48 sps:$4 sm:$0xff]  }
 0x3a5   :  { %4683 = vmatpush1.bf16.msra.mxu0 %v18794_v1  ;;  %4538 = vmatprep.subr.bf16.mxu1 %v18799_v60  ;;  %v18830_v1 = vld [vmem:[#allocation4 + $0x448] ss:$48 sps:$4 sm:$0xff]   ;;  %v18835_v60 = vld [vmem:[#allocation4 + $0x4a4] ss:$48 sps:$4 sm:$0xff]  }
 0x3a6   :  { %4684 = vmatprep.subr.bf16.mxu0 %v18802_v8  ;;  %v18838_v8 = vld [vmem:[#allocation4 + $0x4ac] ss:$48 sps:$4 sm:$0xff]  }
 0x3a7   :  { %4370 = vmatmul.mubr.bf16.gmra.mrb[60].mxu1 %v22609_v12 }
 0x3a8   :  { %4516 = vmatmul.mubr.bf16.gmra.mrb[76].mxu0 %v22609_v12  ;;  %4539 = vmatpush1.bf16.msra.mxu1 %v18797_v42  ;;  %v18833_v42 = vld [vmem:[#allocation4 + $0x4a0] ss:$48 sps:$4 sm:$0xff]  }
 0x3a9   :  { %4558 = vmatprep.mubr.bf16.mxu1 %v22574_v40  ;;  %4685 = vmatpush1.bf16.msra.mxu0 %v18800_v44  ;;  %v18836_v44 = vld [vmem:[#allocation4 + $0x4a8] ss:$48 sps:$4 sm:$0xff]  }
 0x3aa   :  { %4704 = vmatprep.mubr.bf16.mxu0 %v22574_v40  ;;  %4540 = vmatprep.subr.bf16.mxu1 %v18805_v46  ;;  %v18824_v40 = vld [vmem:[#allocation4 + $0x3e8] ss:$48 sps:$4 sm:$0xff]   ;;  %v18841_v46 = vld [vmem:[#allocation4 + $0x504] ss:$48 sps:$4 sm:$0xff]  }
 0x3ab   :  { %4686 = vmatprep.subr.bf16.mxu0 %v18808_v17  ;;  %v18844_v17 = vld [vmem:[#allocation4 + $0x50c] ss:$48 sps:$4 sm:$0xff]  }
 0x3ac   :  { %4541 = vmatpush1.bf16.msra.mxu1 %v18803_v45  ;;  %v18839_v45 = vld [vmem:[#allocation4 + $0x500] ss:$48 sps:$4 sm:$0xff]  }
 0x3ad   :  { %4687 = vmatpush1.bf16.msra.mxu0 %v18806_v25  ;;  %4542 = vmatprep.subr.bf16.mxu1 %v18811_v36  ;;  %v18842_v25 = vld [vmem:[#allocation4 + $0x508] ss:$48 sps:$4 sm:$0xff]   ;;  %v18847_v36 = vld [vmem:[#allocation4 + $0x564] ss:$48 sps:$4 sm:$0xff]  }
 0x3ae   :  { %4688 = vmatprep.subr.bf16.mxu0 %v18814_v24  ;;  %v18850_v24 = vld [vmem:[#allocation4 + $0x56c] ss:$48 sps:$4 sm:$0xff]  }
 0x3b0   :  { %4543 = vmatpush1.bf16.msra.mxu1 %v18809_v18  ;;  %v18845_v18 = vld [vmem:[#allocation4 + $0x560] ss:$48 sps:$4 sm:$0xff]  }
 0x3b1   :  { %4689 = vmatpush1.bf16.msra.mxu0 %v18812_v19  ;;  %4544 = vmatprep.subr.bf16.mxu1 %v18817_v3  ;;  %v18848_v19 = vld [vmem:[#allocation4 + $0x568] ss:$48 sps:$4 sm:$0xff]   ;;  %v18853_v3 = vld [vmem:[#allocation4 + $0x5c4] ss:$48 sps:$4 sm:$0xff]  }
 0x3b2   :  { %4690 = vmatprep.subr.bf16.mxu0 %v18820_v29  ;;  %v18856_v29 = vld [vmem:[#allocation4 + $0x5cc] ss:$48 sps:$4 sm:$0xff]  }
 0x3b4   :  { %4545 = vmatpush1.bf16.msra.mxu1 %v18815_v48  ;;  %v18851_v48 = vld [vmem:[#allocation4 + $0x5c0] ss:$48 sps:$4 sm:$0xff]  }
 0x3b5   :  { %4691 = vmatpush1.bf16.msra.mxu0 %v18818_v35  ;;  %4546 = vmatprep.subr.bf16.mxu1 %v18823_v0  ;;  %v18854_v35 = vld [vmem:[#allocation4 + $0x5c8] ss:$48 sps:$4 sm:$0xff]   ;;  %v18859_v0 = vld [vmem:[#allocation4 + $0x624] ss:$48 sps:$4 sm:$0xff]  }
 0x3b6   :  { %4692 = vmatprep.subr.bf16.mxu0 %v18826_v55  ;;  %v18862_v55 = vld [vmem:[#allocation4 + $0x62c] ss:$48 sps:$4 sm:$0xff]  }
 0x3b8   :  { %4547 = vmatpush1.bf16.msra.mxu1 %v18821_v41  ;;  %v18857_v41 = vld [vmem:[#allocation4 + $0x620] ss:$48 sps:$4 sm:$0xff]  }
 0x3b9   :  { %4693 = vmatpush1.bf16.msra.mxu0 %v18824_v40  ;;  %4548 = vmatprep.subr.bf16.mxu1 %v18829_v43  ;;  %v18860_v40 = vld [vmem:[#allocation4 + $0x628] ss:$48 sps:$4 sm:$0xff]   ;;  %v18865_v43 = vld [vmem:[#allocation4 + $0x684] ss:$48 sps:$4 sm:$0xff]  }
 0x3ba   :  { %4694 = vmatprep.subr.bf16.mxu0 %v18832_v28  ;;  %v18868_v28 = vld [vmem:[#allocation4 + $0x68c] ss:$48 sps:$4 sm:$0xff]  }
 0x3bc   :  { %4549 = vmatpush1.bf16.msra.mxu1 %v18827_v57  ;;  %v18863_v57 = vld [vmem:[#allocation4 + $0x680] ss:$48 sps:$4 sm:$0xff]  }
 0x3bd   :  { %4695 = vmatpush1.bf16.msra.mxu0 %v18830_v1  ;;  %4550 = vmatprep.subr.bf16.mxu1 %v18835_v60  ;;  %v18866_v1 = vld [vmem:[#allocation4 + $0x688] ss:$48 sps:$4 sm:$0xff]   ;;  %v18871_v60 = vld [vmem:[#allocation4 + $0x6e4] ss:$48 sps:$4 sm:$0xff]  }
 0x3be   :  { %4696 = vmatprep.subr.bf16.mxu0 %v18838_v8  ;;  %v18874_v8 = vld [vmem:[#allocation4 + $0x6ec] ss:$48 sps:$4 sm:$0xff]  }
 0x3c0   :  { %4551 = vmatpush1.bf16.msra.mxu1 %v18833_v42  ;;  %v18869_v42 = vld [vmem:[#allocation4 + $0x6e0] ss:$48 sps:$4 sm:$0xff]  }
 0x3c1   :  { %4697 = vmatpush1.bf16.msra.mxu0 %v18836_v44  ;;  %4552 = vmatprep.subr.bf16.mxu1 %v18841_v46  ;;  %v18872_v44 = vld [vmem:[#allocation4 + $0x6e8] ss:$48 sps:$4 sm:$0xff]   ;;  %v18877_v46 = vld [vmem:[#allocation4 + $0x744] ss:$48 sps:$4 sm:$0xff]  }
 0x3c2   :  { %4698 = vmatprep.subr.bf16.mxu0 %v18844_v17  ;;  %v18878_v17 = vld [vmem:[#allocation4 + $0x748] ss:$48 sps:$4 sm:$0xff]  }
 0x3c4   :  { %4553 = vmatpush1.bf16.msra.mxu1 %v18839_v45  ;;  %v18883_v45 = vld [vmem:[#allocation4 + $0x7a4] ss:$48 sps:$4 sm:$0xff]  }
 0x3c5   :  { %4699 = vmatpush1.bf16.msra.mxu0 %v18842_v25  ;;  %4554 = vmatprep.subr.bf16.mxu1 %v18847_v36  ;;  %v18886_v25 = vld [vmem:[#allocation4 + $0x7ac] ss:$48 sps:$4 sm:$0xff]   ;;  %v18881_v36 = vld [vmem:[#allocation4 + $0x7a0] ss:$48 sps:$4 sm:$0xff]  }
 0x3c6   :  { %4700 = vmatprep.subr.bf16.mxu0 %v18850_v24  ;;  %v18884_v24 = vld [vmem:[#allocation4 + $0x7a8] ss:$48 sps:$4 sm:$0xff]  }
 0x3c8   :  { %4555 = vmatpush1.bf16.msra.mxu1 %v18845_v18  ;;  %v18889_v18 = vld [vmem:[#allocation4 + $0x804] ss:$48 sps:$4 sm:$0xff]  }
 0x3c9   :  { %4701 = vmatpush1.bf16.msra.mxu0 %v18848_v19  ;;  %4556 = vmatprep.subr.bf16.mxu1 %v18853_v3  ;;  %v18890_v19 = vld [vmem:[#allocation4 + $0x808] ss:$48 sps:$4 sm:$0xff]   ;;  %v18895_v3 = vld [vmem:[#allocation4 + $0x864] ss:$48 sps:$4 sm:$0xff]  }
 0x3ca   :  { %4702 = vmatprep.subr.bf16.mxu0 %v18856_v29  ;;  %v18898_v29 = vld [vmem:[#allocation4 + $0x86c] ss:$48 sps:$4 sm:$0xff]  }
 0x3cc   :  { %4557 = vmatpush1.bf16.msra.mxu1 %v18851_v48  ;;  %v18893_v48 = vld [vmem:[#allocation4 + $0x860] ss:$48 sps:$4 sm:$0xff]  }
 0x3cd   :  { %4703 = vmatpush1.bf16.msra.mxu0 %v18854_v35  ;;  %4599 = vmatprep.subr.bf16.mxu1 %v18859_v0  ;;  %v18896_v35 = vld [vmem:[#allocation4 + $0x868] ss:$48 sps:$4 sm:$0xff]   ;;  %v18901_v0 = vld [vmem:[#allocation4 + $0x8c4] ss:$48 sps:$4 sm:$0xff]  }
 0x3ce   :  { %4745 = vmatprep.subr.bf16.mxu0 %v18862_v55  ;;  %v18902_v55 = vld [vmem:[#allocation4 + $0x8c8] ss:$48 sps:$4 sm:$0xff]  }
 0x3cf   :  { %4559 = vmatmul.mubr.bf16.vlgmr.msra.gmra.mrb[64].mxu1 %v22453_v22 }
 0x3d0   :  { %4705 = vmatmul.mubr.bf16.vlgmr.msra.gmra.mrb[80].mxu0 %v22453_v22  ;;  %4568 = vmatprep.mubr.bf16.mxu1 %v22588_v58  ;;  %v18880_v22 = vld [vmem:[#allocation4 + $0x74c] ss:$48 sps:$4 sm:$0xff]  }
 0x3d1   :  { %4600 = vmatpush1.bf16.msra.mxu1 %v18857_v41  ;;  %4714 = vmatprep.mubr.bf16.mxu0 %v22588_v58  ;;  %v18875_v58 = vld [vmem:[#allocation4 + $0x740] ss:$48 sps:$4 sm:$0xff]   ;;  %v21185_v41 = vld [vmem:[#allocation2 + $0x4] ss:$48 sps:$4 sm:$0xff]  }
 0x3d2   :  { %4746 = vmatpush1.bf16.msra.mxu0 %v18860_v40  ;;  %4601 = vmatprep.subr.bf16.mxu1 %v18865_v43  ;;  %v21186_v40 = vld [vmem:[#allocation2 + $0xc] ss:$48 sps:$4 sm:$0xff]   ;;  %v21188_v43 = vld [vmem:[#allocation2 + $0x8] ss:$48 sps:$4 sm:$0xff]  }
 0x3d3   :  { %4747 = vmatprep.subr.bf16.mxu0 %v18868_v28  ;;  %v21189_v28 = vld [vmem:[#allocation2 + $0x64] ss:$48 sps:$4 sm:$0xff]  }
 0x3d5   :  { %4602 = vmatpush1.bf16.msra.mxu1 %v18863_v57  ;;  %v21190_v57 = vld [vmem:[#allocation2 + $0x6c] ss:$48 sps:$4 sm:$0xff]  }
 0x3d6   :  { %4748 = vmatpush1.bf16.msra.mxu0 %v18866_v1  ;;  %4603 = vmatprep.subr.bf16.mxu1 %v18871_v60  ;;  %v21191_v1 = vld [vmem:[#allocation2 + $0x60] ss:$48 sps:$4 sm:$0xff]   ;;  %v21192_v60 = vld [vmem:[#allocation2 + $0x68] ss:$48 sps:$4 sm:$0xff]  }
 0x3d7   :  { %4569 = vmatmul.mubr.bf16.gmra.mrb[68].mxu1 %v22500_v14  ;;  %4749 = vmatprep.subr.bf16.mxu0 %v18874_v8  ;;  %v21193_v8 = vld [vmem:[#allocation2 + $0xc4] ss:$48 sps:$4 sm:$0xff]  }
 0x3d8   :  { %4715 = vmatmul.mubr.bf16.gmra.mrb[84].mxu0 %v22500_v14  ;;  %4578 = vmatprep.mubr.bf16.mxu1 %v22599_v59  ;;  %v18892_v14 = vld [vmem:[#allocation4 + $0x80c] ss:$48 sps:$4 sm:$0xff]  }
 0x3d9   :  { %4604 = vmatpush1.bf16.msra.mxu1 %v18869_v42  ;;  %4724 = vmatprep.mubr.bf16.mxu0 %v22599_v59  ;;  %v18887_v59 = vld [vmem:[#allocation4 + $0x800] ss:$48 sps:$4 sm:$0xff]   ;;  %v21194_v42 = vld [vmem:[#allocation2 + $0xcc] ss:$48 sps:$4 sm:$0xff]  }
 0x3da   :  { %4750 = vmatpush1.bf16.msra.mxu0 %v18872_v44  ;;  %4605 = vmatprep.subr.bf16.mxu1 %v18877_v46  ;;  %v21196_v44 = vld [vmem:[#allocation2 + $0xc8] ss:$48 sps:$4 sm:$0xff]   ;;  %v21197_v46 = vld [vmem:[#allocation2 + $0x124] ss:$48 sps:$4 sm:$0xff]  }
 0x3db   :  { %4751 = vmatprep.subr.bf16.mxu0 %v18880_v22  ;;  %v21198_v22 = vld [vmem:[#allocation2 + $0x12c] ss:$48 sps:$4 sm:$0xff]  }
 0x3dd   :  { %4606 = vmatpush1.bf16.msra.mxu1 %v18875_v58  ;;  %v21199_v58 = vld [vmem:[#allocation2 + $0x120] ss:$48 sps:$4 sm:$0xff]  }
 0x3de   :  { %4752 = vmatpush1.bf16.msra.mxu0 %v18878_v17  ;;  %4607 = vmatprep.subr.bf16.mxu1 %v18883_v45  ;;  %v21200_v17 = vld [vmem:[#allocation2 + $0x128] ss:$48 sps:$4 sm:$0xff]   ;;  %v21201_v45 = vld [vmem:[#allocation2 + $0x184] ss:$48 sps:$4 sm:$0xff]  }
 0x3df   :  { %4579 = vmatmul.mubr.bf16.gmra.mrb[72].mxu1 %v22515_v6  ;;  %4753 = vmatprep.subr.bf16.mxu0 %v18886_v25  ;;  %v21202_v25 = vld [vmem:[#allocation2 + $0x18c] ss:$48 sps:$4 sm:$0xff]  }
 0x3e0   :  { %4725 = vmatmul.mubr.bf16.gmra.mrb[88].mxu0 %v22515_v6  ;;  %4588 = vmatprep.mubr.bf16.mxu1 %v22607_v38  ;;  %v18904_v6 = vld [vmem:[#allocation4 + $0x8cc] ss:$48 sps:$4 sm:$0xff]  }
 0x3e1   :  { %4608 = vmatpush1.bf16.msra.mxu1 %v18881_v36  ;;  %4734 = vmatprep.mubr.bf16.mxu0 %v22607_v38  ;;  %v18899_v38 = vld [vmem:[#allocation4 + $0x8c0] ss:$48 sps:$4 sm:$0xff]   ;;  %v21204_v36 = vld [vmem:[#allocation2 + $0x188] ss:$48 sps:$4 sm:$0xff]  }
 0x3e2   :  { %4754 = vmatpush1.bf16.msra.mxu0 %v18884_v24  ;;  %4609 = vmatprep.subr.bf16.mxu1 %v18889_v18  ;;  %v21205_v24 = vld [vmem:[#allocation2 + $0x1e4] ss:$48 sps:$4 sm:$0xff]   ;;  %v21206_v18 = vld [vmem:[#allocation2 + $0x1ec] ss:$48 sps:$4 sm:$0xff]  }
 0x3e3   :  { %4755 = vmatprep.subr.bf16.mxu0 %v18892_v14  ;;  %v22717_v14 = vpop.permute.xlu1 %329 }
 0x3e4   :  { %vm352_vm6 = vcmp.eq.s32.totalorder %v22717_v14, %v22023_v16  ;;  %vm351_vm11 = vcmp.eq.s32.totalorder %v22717_v14, %v22020_v13  ;;  %v21247_v14 = vld [vmem:[#allocation2 + $0x5a0] ss:$48 sps:$4 sm:$0xff]  }
 0x3e5   :  { %4610 = vmatpush1.bf16.msra.mxu1 %v18887_v59  ;;  %v22719_v59 = vpop.permute.xlu0 %326 }
 0x3e6   :  { %4756 = vmatpush1.bf16.msra.mxu0 %v18890_v19  ;;  %4611 = vmatprep.subr.bf16.mxu1 %v18895_v3  ;;  %v21207_v19 = vld [vmem:[#allocation2 + $0x1e0] ss:$48 sps:$4 sm:$0xff]   ;;  %vm350_vm7 = vcmp.eq.s32.totalorder %v22719_v59, %v22023_v16  ;;  %v21209_v3 = vld [vmem:[#allocation2 + $0x244] ss:$48 sps:$4 sm:$0xff]   ;;  %vm349_vm12 = vcmp.eq.s32.totalorder %v22719_v59, %v22020_v13 }
 0x3e7   :  { %4589 = vmatmul.mubr.bf16.gmra.mrb[76].mxu1 %v22557_v33  ;;  %4757 = vmatprep.subr.bf16.mxu0 %v18898_v29  ;;  %v21210_v29 = vld [vmem:[#allocation2 + $0x24c] ss:$48 sps:$4 sm:$0xff]   ;;  %vm22726_vm8 = vmpackc.low %vm352_vm6, %vm350_vm7 }
 0x3e8   :  { %4735 = vmatmul.mubr.bf16.gmra.mrb[92].mxu0 %v22557_v33  ;;  %4631 = vmatprep.mubr.bf16.mxu1 %v24213_v20  ;;  %v21187_v33 = vld [vmem:[#allocation2] ss:$48 sps:$4 sm:$0xff]   ;;  %vm22743_vm15 = vmpackc.low %vm351_vm11, %vm349_vm12 }
 0x3e9   :  { %4612 = vmatpush1.bf16.msra.mxu1 %v18893_v48  ;;  %4777 = vmatprep.mubr.bf16.mxu0 %v24213_v20  ;;  %v21317_v48 = vld [vmem:[#allocation2 + $0x384] ss:$48 sps:$4 sm:$0xff]  }
 0x3ea   :  { %4758 = vmatpush1.bf16.msra.mxu0 %v18896_v35  ;;  %4613 = vmatprep.subr.bf16.mxu1 %v18901_v0  ;;  %v21211_v35 = vld [vmem:[#allocation2 + $0x240] ss:$48 sps:$4 sm:$0xff]   ;;  %v21212_v0 = vld [vmem:[#allocation2 + $0x248] ss:$48 sps:$4 sm:$0xff]  }
 0x3eb   :  { %4759 = vmatprep.subr.bf16.mxu0 %v18904_v6  ;;  %v21213_v6 = vld [vmem:[#allocation2 + $0x2a4] ss:$48 sps:$4 sm:$0xff]  }
 0x3ed   :  { %4614 = vmatpush1.bf16.msra.mxu1 %v18899_v38  ;;  %v21214_v38 = vld [vmem:[#allocation2 + $0x2ac] ss:$48 sps:$4 sm:$0xff]  }
 0x3ee   :  { %4760 = vmatpush1.bf16.msra.mxu0 %v18902_v55  ;;  %4978 = vmatprep.subr.bf16.mxu1 %v21185_v41  ;;  %v24216_v55 = vmov 1.0|1.0   ;;  %v21215_v41 = vld [vmem:[#allocation2 + $0x2a0] ss:$48 sps:$4 sm:$0xff]  }
 0x3ef   :  { %5051 = vmatprep.subr.bf16.mxu0 %v21186_v40  ;;  %v21216_v40 = vld [vmem:[#allocation2 + $0x2a8] ss:$48 sps:$4 sm:$0xff]  }
 0x3f0   :  { %4632 = vmatmul.mubr.bf16.vlgmr.msra.gmra.mrb[64].mxu1 %v22577_v61 }
 0x3f1   :  { %4778 = vmatmul.mubr.bf16.vlgmr.msra.gmra.mrb[80].mxu0 %v22577_v61  ;;  %4979 = vmatpush1.bf16.msra.mxu1 %v21187_v33  ;;  %v21195_v61 = vld [vmem:[#allocation2 + $0xc0] ss:$48 sps:$4 sm:$0xff]   ;;  %v21218_v33 = vld [vmem:[#allocation2 + $0x30c] ss:$48 sps:$4 sm:$0xff]  }
 0x3f2   :  { %5052 = vmatpush1.bf16.msra.mxu0 %v21188_v43  ;;  %4980 = vmatprep.subr.bf16.mxu1 %v21189_v28  ;;  %v21219_v43 = vld [vmem:[#allocation2 + $0x300] ss:$48 sps:$4 sm:$0xff]   ;;  %v21220_v28 = vld [vmem:[#allocation2 + $0x308] ss:$48 sps:$4 sm:$0xff]  }
 0x3f3   :  { %5053 = vmatprep.subr.bf16.mxu0 %v21190_v57  ;;  %4641 = vmatprep.mubr.bf16.mxu1 %v24213_v20  ;;  %v21221_v57 = vld [vmem:[#allocation2 + $0x364] ss:$48 sps:$4 sm:$0xff]  }
 0x3f4   :  { %4787 = vmatprep.mubr.bf16.mxu0 %v24213_v20 }
 0x3f5   :  { %4981 = vmatpush1.bf16.msra.mxu1 %v21191_v1  ;;  %v21222_v1 = vld [vmem:[#allocation2 + $0x36c] ss:$48 sps:$4 sm:$0xff]  }
 0x3f6   :  { %5054 = vmatpush1.bf16.msra.mxu0 %v21192_v60  ;;  %4982 = vmatprep.subr.bf16.mxu1 %v21193_v8  ;;  %v21223_v60 = vld [vmem:[#allocation2 + $0x360] ss:$48 sps:$4 sm:$0xff]   ;;  %v21224_v8 = vld [vmem:[#allocation2 + $0x368] ss:$48 sps:$4 sm:$0xff]  }
 0x3f7   :  { %5055 = vmatprep.subr.bf16.mxu0 %v21194_v42  ;;  %v21225_v42 = vld [vmem:[#allocation2 + $0x3c4] ss:$48 sps:$4 sm:$0xff]  }
 0x3f8   :  { %4642 = vmatmul.mubr.bf16.gmra.mrb[68].mxu1 %v22590_v23 }
 0x3f9   :  { %4788 = vmatmul.mubr.bf16.gmra.mrb[84].mxu0 %v22590_v23  ;;  %4983 = vmatpush1.bf16.msra.mxu1 %v21195_v61  ;;  %v21203_v23 = vld [vmem:[#allocation2 + $0x180] ss:$48 sps:$4 sm:$0xff]   ;;  %v21226_v61 = vld [vmem:[#allocation2 + $0x3cc] ss:$48 sps:$4 sm:$0xff]  }
 0x3fa   :  { %5056 = vmatpush1.bf16.msra.mxu0 %v21196_v44  ;;  %4984 = vmatprep.subr.bf16.mxu1 %v21197_v46  ;;  %v21227_v44 = vld [vmem:[#allocation2 + $0x3c0] ss:$48 sps:$4 sm:$0xff]   ;;  %v21228_v46 = vld [vmem:[#allocation2 + $0x3c8] ss:$48 sps:$4 sm:$0xff]  }
 0x3fb   :  { %5057 = vmatprep.subr.bf16.mxu0 %v21198_v22  ;;  %4651 = vmatprep.mubr.bf16.mxu1 %v24213_v20  ;;  %v21229_v22 = vld [vmem:[#allocation2 + $0x424] ss:$48 sps:$4 sm:$0xff]  }
 0x3fc   :  { %4797 = vmatprep.mubr.bf16.mxu0 %v24213_v20 }
 0x3fd   :  { %4985 = vmatpush1.bf16.msra.mxu1 %v21199_v58  ;;  %v21230_v58 = vld [vmem:[#allocation2 + $0x42c] ss:$48 sps:$4 sm:$0xff]  }
 0x3fe   :  { %5058 = vmatpush1.bf16.msra.mxu0 %v21200_v17  ;;  %4986 = vmatprep.subr.bf16.mxu1 %v21201_v45  ;;  %v21231_v17 = vld [vmem:[#allocation2 + $0x420] ss:$48 sps:$4 sm:$0xff]   ;;  %v21232_v45 = vld [vmem:[#allocation2 + $0x428] ss:$48 sps:$4 sm:$0xff]  }
 0x3ff   :  { %5059 = vmatprep.subr.bf16.mxu0 %v21202_v25  ;;  %v21233_v25 = vld [vmem:[#allocation2 + $0x484] ss:$48 sps:$4 sm:$0xff]  }
 0x400   :  { %4652 = vmatmul.mubr.bf16.gmra.mrb[72].mxu1 %v22601_v2 }
 0x401   :  { %4798 = vmatmul.mubr.bf16.gmra.mrb[88].mxu0 %v22601_v2  ;;  %4987 = vmatpush1.bf16.msra.mxu1 %v21203_v23  ;;  %v21208_v2 = vld [vmem:[#allocation2 + $0x1e8] ss:$48 sps:$4 sm:$0xff]   ;;  %v21234_v23 = vld [vmem:[#allocation2 + $0x48c] ss:$48 sps:$4 sm:$0xff]  }
 0x402   :  { %5060 = vmatpush1.bf16.msra.mxu0 %v21204_v36  ;;  %4988 = vmatprep.subr.bf16.mxu1 %v21205_v24  ;;  %v21235_v36 = vld [vmem:[#allocation2 + $0x480] ss:$48 sps:$4 sm:$0xff]   ;;  %v21236_v24 = vld [vmem:[#allocation2 + $0x488] ss:$48 sps:$4 sm:$0xff]  }
 0x403   :  { %5061 = vmatprep.subr.bf16.mxu0 %v21206_v18  ;;  %4661 = vmatprep.mubr.bf16.mxu1 %v24213_v20  ;;  %v21237_v18 = vld [vmem:[#allocation2 + $0x4e4] ss:$48 sps:$4 sm:$0xff]  }
 0x404   :  { %4807 = vmatprep.mubr.bf16.mxu0 %v24213_v20  ;;  %v18982_v20 = vld [vmem:[#allocation7 + $0x8c] ss:$16 sps:$4 sm:$0xff]  }
 0x405   :  { %4989 = vmatpush1.bf16.msra.mxu1 %v21207_v19  ;;  %v21238_v19 = vld [vmem:[#allocation2 + $0x4ec] ss:$48 sps:$4 sm:$0xff]  }
 0x406   :  { %5062 = vmatpush1.bf16.msra.mxu0 %v21208_v2  ;;  %4990 = vmatprep.subr.bf16.mxu1 %v21209_v3  ;;  %v21239_v2 = vld [vmem:[#allocation2 + $0x4e0] ss:$48 sps:$4 sm:$0xff]   ;;  %v21240_v3 = vld [vmem:[#allocation2 + $0x4e8] ss:$48 sps:$4 sm:$0xff]  }
 0x407   :  { %5063 = vmatprep.subr.bf16.mxu0 %v21210_v29  ;;  %v21241_v29 = vld [vmem:[#allocation2 + $0x544] ss:$48 sps:$4 sm:$0xff]  }
 0x408   :  { %4662 = vmatmul.mubr.bf16.gmra.mrb[76].mxu1 %v22609_v12 }
 0x409   :  { %4808 = vmatmul.mubr.bf16.gmra.mrb[92].mxu0 %v22609_v12  ;;  %4991 = vmatpush1.bf16.msra.mxu1 %v21211_v35  ;;  %v21217_v12 = vld [vmem:[#allocation2 + $0x304] ss:$48 sps:$4 sm:$0xff]   ;;  %v21242_v35 = vld [vmem:[#allocation2 + $0x54c] ss:$48 sps:$4 sm:$0xff]  }
 0x40a   :  { %5064 = vmatpush1.bf16.msra.mxu0 %v21212_v0  ;;  %4992 = vmatprep.subr.bf16.mxu1 %v21213_v6  ;;  %v21243_v0 = vld [vmem:[#allocation2 + $0x540] ss:$48 sps:$4 sm:$0xff]   ;;  %v333_v6 = vpop.permute.xlu1 %332 }
 0x40b   :  { %5065 = vmatprep.subr.bf16.mxu0 %v21214_v38  ;;  %16190 = vmatprep.mubr.msk.bf16.mxu1 %vm22726_vm8, %v24216_v55  ;;  %v336_v38 = vpop.permute.xlu0 %335  ;;  %vm354_vm13 = vcmp.eq.s32.totalorder %v333_v6, %v22023_v16  ;;  %vm353_vm1 = vcmp.eq.s32.totalorder %v333_v6, %v22020_v13  ;;  %v21256_v6 = vld [vmem:[#allocation2 + $0x138] ss:$48 sps:$4 sm:$0xff]  }
 0x40c   :  { %16206 = vmatprep.mubr.msk.bf16.mxu0 %vm22726_vm8, %v24216_v55  ;;  %vm356_vm14 = vcmp.eq.s32.totalorder %v336_v38, %v22023_v16  ;;  %vm355_vm2 = vcmp.eq.s32.totalorder %v336_v38, %v22020_v13  ;;  %v18922_v38 = vld [vmem:[#allocation2 + $0x1f4] ss:$48 sps:$4 sm:$0xff]  }
 0x40d   :  { %4993 = vmatpush1.bf16.msra.mxu1 %v21215_v41  ;;  %v21244_v41 = vld [vmem:[#allocation2 + $0x548] ss:$48 sps:$4 sm:$0xff]   ;;  %vm22747_vm0 = vmpackc.low %vm356_vm14, %vm354_vm13 }
 0x40e   :  { %5066 = vmatpush1.bf16.msra.mxu0 %v21216_v40  ;;  %4994 = vmatprep.subr.bf16.mxu1 %v21217_v12  ;;  %v21245_v40 = vld [vmem:[#allocation2 + $0x5a4] ss:$48 sps:$4 sm:$0xff]   ;;  %vm22767_vm5 = vmpackc.low %vm355_vm2, %vm353_vm1 }
 0x40f   :  { %5067 = vmatprep.subr.bf16.mxu0 %v21218_v33  ;;  %v18907_v12 = vld [vmem:[#allocation2 + $0x14] ss:$48 sps:$4 sm:$0xff]   ;;  %v21246_v33 = vld [vmem:[#allocation2 + $0x5ac] ss:$48 sps:$4 sm:$0xff]  }
 0x411   :  { %4995 = vmatpush1.bf16.msra.mxu1 %v21219_v43 }
 0x412   :  { %5068 = vmatpush1.bf16.msra.mxu0 %v21220_v28  ;;  %4996 = vmatprep.subr.bf16.mxu1 %v21221_v57  ;;  %v21248_v28 = vld [vmem:[#allocation2 + $0x5a8] ss:$48 sps:$4 sm:$0xff]   ;;  %v18905_v57 = vld [vmem:[#allocation2 + $0x10] ss:$48 sps:$4 sm:$0xff]  }
 0x413   :  { %5069 = vmatprep.subr.bf16.mxu0 %v21222_v1  ;;  %v21249_v1 = vld [vmem:[#allocation2 + $0x1c] ss:$48 sps:$4 sm:$0xff]  }
 0x415   :  { %4997 = vmatpush1.bf16.msra.mxu1 %v21223_v60  ;;  %v18910_v60 = vld [vmem:[#allocation2 + $0x74] ss:$48 sps:$4 sm:$0xff]  }
 0x416   :  { %5070 = vmatpush1.bf16.msra.mxu0 %v21224_v8  ;;  %4998 = vmatprep.subr.bf16.mxu1 %v21225_v42  ;;  %v18908_v8 = vld [vmem:[#allocation2 + $0x70] ss:$48 sps:$4 sm:$0xff]   ;;  %v21250_v42 = vld [vmem:[#allocation2 + $0x18] ss:$48 sps:$4 sm:$0xff]  }
 0x417   :  { %5071 = vmatprep.subr.bf16.mxu0 %v21226_v61  ;;  %v18913_v61 = vld [vmem:[#allocation2 + $0xd4] ss:$48 sps:$4 sm:$0xff]  }
 0x419   :  { %4999 = vmatpush1.bf16.msra.mxu1 %v21227_v44  ;;  %v339_v44 = vpop.permute.xlu1 %338 }
 0x41a   :  { %5072 = vmatpush1.bf16.msra.mxu0 %v21228_v46  ;;  %5000 = vmatprep.subr.bf16.mxu1 %v21229_v22  ;;  %v342_v46 = vpop.permute.xlu0 %341  ;;  %v21251_v22 = vld [vmem:[#allocation2 + $0x7c] ss:$48 sps:$4 sm:$0xff]   ;;  %vm358_vm3 = vcmp.eq.s32.totalorder %v339_v44, %v22023_v16  ;;  %vm357_vm10 = vcmp.eq.s32.totalorder %v339_v44, %v22020_v13 }
 0x41b   :  { %5073 = vmatprep.subr.bf16.mxu0 %v21230_v58  ;;  %vm360_vm4 = vcmp.eq.s32.totalorder %v342_v46, %v22023_v16  ;;  %v18911_v58 = vld [vmem:[#allocation2 + $0xd0] ss:$48 sps:$4 sm:$0xff]   ;;  %vm359_vm6 = vcmp.eq.s32.totalorder %v342_v46, %v22020_v13  ;;  %v21263_v44 = vld [vmem:[#allocation2 + $0x2bc] ss:$48 sps:$4 sm:$0xff]  }
 0x41c   :  { %vm22771_vm9 = vmpackc.low %vm360_vm4, %vm358_vm3  ;;  %v18929_v46 = vld [vmem:[#allocation2 + $0x310] ss:$48 sps:$4 sm:$0xff]  }
 0x41d   :  { %5001 = vmatpush1.bf16.msra.mxu1 %v21231_v17  ;;  %vm22791_vm12 = vmpackc.low %vm359_vm6, %vm357_vm10 }
 0x41e   :  { %5074 = vmatpush1.bf16.msra.mxu0 %v21232_v45  ;;  %5002 = vmatprep.subr.bf16.mxu1 %v21233_v25  ;;  %v21252_v45 = vld [vmem:[#allocation2 + $0x78] ss:$48 sps:$4 sm:$0xff]   ;;  %v18916_v25 = vld [vmem:[#allocation2 + $0x134] ss:$48 sps:$4 sm:$0xff]  }
 0x41f   :  { %5075 = vmatprep.subr.bf16.mxu0 %v21234_v23  ;;  %v22919_v23 = vld [vmem:[#allocation6] sm:$0xff] }
 0x421   :  { %5003 = vmatpush1.bf16.msra.mxu1 %v21235_v36  ;;  %v21253_v36 = vld [vmem:[#allocation2 + $0xdc] ss:$48 sps:$4 sm:$0xff]  }
 0x422   :  { %5076 = vmatpush1.bf16.msra.mxu0 %v21236_v24  ;;  %5004 = vmatprep.subr.bf16.mxu1 %v21237_v18  ;;  %v345_v24 = vpop.permute.xlu1 %344  ;;  %v348_v18 = vpop.permute.xlu0 %347 }
 0x423   :  { %5077 = vmatprep.subr.bf16.mxu0 %v21238_v19  ;;  %v18914_v19 = vld [vmem:[#allocation2 + $0x130] ss:$48 sps:$4 sm:$0xff]   ;;  %vm362_vm7 = vcmp.eq.s32.totalorder %v345_v24, %v22023_v16  ;;  %vm364_vm11 = vcmp.eq.s32.totalorder %v348_v18, %v22023_v16  ;;  %vm361_vm14 = vcmp.eq.s32.totalorder %v345_v24, %v22020_v13  ;;  %vm363_vm1 = vcmp.eq.s32.totalorder %v348_v18, %v22020_v13  ;;  %v18937_v24 = vld [vmem:[#allocation2 + $0x3d4] ss:$48 sps:$4 sm:$0xff]   ;;  %v21267_v18 = vld [vmem:[#allocation2 + $0x37c] ss:$48 sps:$4 sm:$0xff]  }
 0x424   :  { %vm22795_vm13 = vmpackc.low %vm364_vm11, %vm362_vm7  ;;  %v18920_v16 = vld [vmem:[#allocation2 + $0x1f0] ss:$48 sps:$4 sm:$0xff]  }
 0x425   :  { %5005 = vmatpush1.bf16.msra.mxu1 %v21239_v2  ;;  %v21254_v2 = vld [vmem:[#allocation2 + $0xd8] ss:$48 sps:$4 sm:$0xff]   ;;  %vm22813_vm2 = vmpackc.low %vm363_vm1, %vm361_vm14  ;;  %v18926_v13 = vld [vmem:[#allocation2 + $0x2b0] ss:$48 sps:$4 sm:$0xff]  }
 0x426   :  { %5078 = vmatpush1.bf16.msra.mxu0 %v21240_v3  ;;  %5006 = vmatprep.subr.bf16.mxu1 %v21241_v29  ;;  %v18919_v3 = vld [vmem:[#allocation2 + $0x194] ss:$48 sps:$4 sm:$0xff]   ;;  %v21255_v29 = vld [vmem:[#allocation2 + $0x13c] ss:$48 sps:$4 sm:$0xff]  }
 0x427   :  { %5079 = vmatprep.subr.bf16.mxu0 %v21242_v35  ;;  %v18917_v35 = vld [vmem:[#allocation2 + $0x190] ss:$48 sps:$4 sm:$0xff]  }
 0x429   :  { %5007 = vmatpush1.bf16.msra.mxu1 %v21243_v0  ;;  %v22923_v0 = vrot.slane %v22919_v23, %v22503_v11  ;;  %v18980_v11 = vld [vmem:[#allocation7 + $0x88] ss:$16 sps:$4 sm:$0xff]  }
 0x42a   :  { %5080 = vmatpush1.bf16.msra.mxu0 %v21244_v41  ;;  %5008 = vmatprep.subr.bf16.mxu1 %v21245_v40  ;;  %v21257_v40 = vld [vmem:[#allocation2 + $0x19c] ss:$48 sps:$4 sm:$0xff]  }
 0x42b   :  { %5081 = vmatprep.subr.bf16.mxu0 %v21246_v33  ;;  %v18925_v33 = vld [vmem:[#allocation2 + $0x254] ss:$48 sps:$4 sm:$0xff]  }
 0x42d   :  { %5009 = vmatpush1.bf16.msra.mxu1 %v21247_v14  ;;  %v21259_v14 = vld [vmem:[#allocation2 + $0x1fc] ss:$48 sps:$4 sm:$0xff]  }
 0x42e   :  { %5082 = vmatpush1.bf16.msra.mxu0 %v21248_v28  ;;  %5124 = vmatprep.subr.bf16.mxu1 %v18907_v12  ;;  %v21258_v12 = vld [vmem:[#allocation2 + $0x198] ss:$48 sps:$4 sm:$0xff]   ;;  %v18923_v28 = vld [vmem:[#allocation2 + $0x250] ss:$48 sps:$4 sm:$0xff]  }
 0x42f   :  { %5197 = vmatprep.subr.bf16.mxu0 %v21249_v1  ;;  %v21260_v1 = vld [vmem:[#allocation2 + $0x1f8] ss:$48 sps:$4 sm:$0xff]  }
 0x430   :  { %16192 = vmatmul.mubr.msk.bf16.vlgmr.msra.gmra.mrb[32].mxu1 %vm22743_vm15, %v24216_v55 }
 0x431   :  { %16208 = vmatmul.mubr.msk.bf16.vlgmr.msra.gmra.mrb[48].mxu0 %vm22743_vm15, %v24216_v55  ;;  %16194 = vmatprep.mubr.msk.bf16.mxu1 %vm22747_vm0, %v24216_v55 }
 0x432   :  { %16210 = vmatprep.mubr.msk.bf16.mxu0 %vm22747_vm0, %v24216_v55  ;;  %5125 = vmatpush1.bf16.msra.mxu1 %v18905_v57 }
 0x433   :  { %5198 = vmatpush1.bf16.msra.mxu0 %v21250_v42  ;;  %5126 = vmatprep.subr.bf16.mxu1 %v18910_v60  ;;  %v18928_v60 = vld [vmem:[#allocation2 + $0x2b4] ss:$48 sps:$4 sm:$0xff]   ;;  %v21262_v42 = vld [vmem:[#allocation2 + $0x258] ss:$48 sps:$4 sm:$0xff]  }
 0x434   :  { %5199 = vmatprep.subr.bf16.mxu0 %v21251_v22  ;;  %v21264_v22 = vld [vmem:[#allocation2 + $0x2b8] ss:$48 sps:$4 sm:$0xff]  }
 0x436   :  { %5127 = vmatpush1.bf16.msra.mxu1 %v18908_v8  ;;  %v21261_v8 = vld [vmem:[#allocation2 + $0x25c] ss:$48 sps:$4 sm:$0xff]  }
 0x437   :  { %5200 = vmatpush1.bf16.msra.mxu0 %v21252_v45  ;;  %5128 = vmatprep.subr.bf16.mxu1 %v18913_v61  ;;  %v18931_v61 = vld [vmem:[#allocation2 + $0x314] ss:$48 sps:$4 sm:$0xff]   ;;  %v21265_v45 = vld [vmem:[#allocation2 + $0x31c] ss:$48 sps:$4 sm:$0xff]  }
 0x438   :  { %16196 = vmatmul.mubr.msk.bf16.gmra.mrb[36].mxu1 %vm22767_vm5, %v24216_v55  ;;  %5201 = vmatprep.subr.bf16.mxu0 %v21253_v36  ;;  %v21266_v36 = vld [vmem:[#allocation2 + $0x318] ss:$48 sps:$4 sm:$0xff]  }
 0x439   :  { %16212 = vmatmul.mubr.msk.bf16.gmra.mrb[52].mxu0 %vm22767_vm5, %v24216_v55  ;;  %16198 = vmatprep.mubr.msk.bf16.mxu1 %vm22771_vm9, %v24216_v55 }
 0x43a   :  { %16214 = vmatprep.mubr.msk.bf16.mxu0 %vm22771_vm9, %v24216_v55  ;;  %5129 = vmatpush1.bf16.msra.mxu1 %v18911_v58  ;;  %v18934_v58 = vld [vmem:[#allocation2 + $0x374] ss:$48 sps:$4 sm:$0xff]  }
 0x43b   :  { %5202 = vmatpush1.bf16.msra.mxu0 %v21254_v2  ;;  %5130 = vmatprep.subr.bf16.mxu1 %v18916_v25  ;;  %v18932_v25 = vld [vmem:[#allocation2 + $0x370] ss:$48 sps:$4 sm:$0xff]   ;;  %v21268_v2 = vld [vmem:[#allocation2 + $0x378] ss:$48 sps:$4 sm:$0xff]  }
 0x43c   :  { %5203 = vmatprep.subr.bf16.mxu0 %v21255_v29  ;;  %v21269_v29 = vld [vmem:[#allocation2 + $0x3dc] ss:$48 sps:$4 sm:$0xff]  }
 0x43e   :  { %5131 = vmatpush1.bf16.msra.mxu1 %v18914_v19  ;;  %v18935_v19 = vld [vmem:[#allocation2 + $0x3d0] ss:$48 sps:$4 sm:$0xff]  }
 0x43f   :  { %5204 = vmatpush1.bf16.msra.mxu0 %v21256_v6  ;;  %5132 = vmatprep.subr.bf16.mxu1 %v18919_v3  ;;  %v18940_v3 = vld [vmem:[#allocation2 + $0x434] ss:$48 sps:$4 sm:$0xff]   ;;  %v21270_v6 = vld [vmem:[#allocation2 + $0x3d8] ss:$48 sps:$4 sm:$0xff]  }
 0x440   :  { %16200 = vmatmul.mubr.msk.bf16.gmra.mrb[40].mxu1 %vm22791_vm12, %v24216_v55  ;;  %5205 = vmatprep.subr.bf16.mxu0 %v21257_v40  ;;  %v21271_v40 = vld [vmem:[#allocation2 + $0x43c] ss:$48 sps:$4 sm:$0xff]  }
 0x441   :  { %16216 = vmatmul.mubr.msk.bf16.gmra.mrb[56].mxu0 %vm22791_vm12, %v24216_v55  ;;  %16202 = vmatprep.mubr.msk.bf16.mxu1 %vm22795_vm13, %v24216_v55 }
 0x442   :  { %16218 = vmatprep.mubr.msk.bf16.mxu0 %vm22795_vm13, %v24216_v55  ;;  %5133 = vmatpush1.bf16.msra.mxu1 %v18917_v35  ;;  %v18938_v35 = vld [vmem:[#allocation2 + $0x430] ss:$48 sps:$4 sm:$0xff]  }
 0x443   :  { %5206 = vmatpush1.bf16.msra.mxu0 %v21258_v12  ;;  %5134 = vmatprep.subr.bf16.mxu1 %v18922_v38  ;;  %v18943_v38 = vld [vmem:[#allocation2 + $0x494] ss:$48 sps:$4 sm:$0xff]   ;;  %v21272_v12 = vld [vmem:[#allocation2 + $0x438] ss:$48 sps:$4 sm:$0xff]  }
 0x444   :  { %5207 = vmatprep.subr.bf16.mxu0 %v21259_v14  ;;  %v21273_v14 = vld [vmem:[#allocation2 + $0x49c] ss:$48 sps:$4 sm:$0xff]  }
 0x446   :  { %5135 = vmatpush1.bf16.msra.mxu1 %v18920_v16  ;;  %v18941_v16 = vld [vmem:[#allocation2 + $0x490] ss:$48 sps:$4 sm:$0xff]  }
 0x447   :  { %5208 = vmatpush1.bf16.msra.mxu0 %v21260_v1  ;;  %5136 = vmatprep.subr.bf16.mxu1 %v18925_v33  ;;  %v18946_v33 = vld [vmem:[#allocation2 + $0x4f4] ss:$48 sps:$4 sm:$0xff]   ;;  %v21274_v1 = vld [vmem:[#allocation2 + $0x498] ss:$48 sps:$4 sm:$0xff]  }
 0x448   :  { %16204 = vmatmul.mubr.msk.bf16.gmra.mrb[44].mxu1 %vm22813_vm2, %v24216_v55  ;;  %5209 = vmatprep.subr.bf16.mxu0 %v21261_v8  ;;  %v21275_v8 = vld [vmem:[#allocation2 + $0x4fc] ss:$48 sps:$4 sm:$0xff]  }
 0x449   :  { %16220 = vmatmul.mubr.msk.bf16.gmra.mrb[60].mxu0 %vm22813_vm2, %v24216_v55  ;;  %16222 = vmatprep.mubr.msk.bf16.mxu1 %vm22726_vm8, %v24216_v55 }
 0x44a   :  { %5137 = vmatpush1.bf16.msra.mxu1 %v18923_v28  ;;  %16238 = vmatprep.mubr.msk.bf16.mxu0 %vm22726_vm8, %v24216_v55  ;;  %v18944_v28 = vld [vmem:[#allocation2 + $0x4f0] ss:$48 sps:$4 sm:$0xff]  }
 0x44b   :  { %5210 = vmatpush1.bf16.msra.mxu0 %v21262_v42  ;;  %5138 = vmatprep.subr.bf16.mxu1 %v18928_v60  ;;  %v18949_v60 = vld [vmem:[#allocation2 + $0x554] ss:$48 sps:$4 sm:$0xff]   ;;  %v21276_v42 = vld [vmem:[#allocation2 + $0x4f8] ss:$48 sps:$4 sm:$0xff]  }
 0x44c   :  { %5211 = vmatprep.subr.bf16.mxu0 %v21263_v44  ;;  %v21277_v44 = vld [vmem:[#allocation2 + $0x55c] ss:$48 sps:$4 sm:$0xff]  }
 0x44e   :  { %5139 = vmatpush1.bf16.msra.mxu1 %v18926_v13  ;;  %v18947_v13 = vld [vmem:[#allocation2 + $0x550] ss:$48 sps:$4 sm:$0xff]  }
 0x44f   :  { %5212 = vmatpush1.bf16.msra.mxu0 %v21264_v22  ;;  %5140 = vmatprep.subr.bf16.mxu1 %v18931_v61  ;;  %v18952_v61 = vld [vmem:[#allocation2 + $0x5b4] ss:$48 sps:$4 sm:$0xff]   ;;  %v21278_v22 = vld [vmem:[#allocation2 + $0x558] ss:$48 sps:$4 sm:$0xff]  }
 0x450   :  { %5213 = vmatprep.subr.bf16.mxu0 %v21265_v45  ;;  %v21280_v45 = vld [vmem:[#allocation2 + $0x5b8] ss:$48 sps:$4 sm:$0xff]  }
 0x452   :  { %5141 = vmatpush1.bf16.msra.mxu1 %v18929_v46  ;;  %v18950_v46 = vld [vmem:[#allocation2 + $0x5b0] ss:$48 sps:$4 sm:$0xff]  }
 0x453   :  { %5214 = vmatpush1.bf16.msra.mxu0 %v21266_v36  ;;  %5142 = vmatprep.subr.bf16.mxu1 %v18934_v58  ;;  %v21279_v58 = vld [vmem:[#allocation2 + $0x5bc] ss:$48 sps:$4 sm:$0xff]  }
 0x454   :  { %5215 = vmatprep.subr.bf16.mxu0 %v21267_v18  ;;  %v21282_v36 = vld [vmem:[#allocation2 + $0x2c] ss:$48 sps:$4 sm:$0xff]   ;;  %v21284_v18 = vld [vmem:[#allocation2 + $0x28] ss:$48 sps:$4 sm:$0xff]  }
 0x456   :  { %5143 = vmatpush1.bf16.msra.mxu1 %v18932_v25  ;;  %v21281_v25 = vld [vmem:[#allocation2 + $0x24] ss:$48 sps:$4 sm:$0xff]  }
 0x457   :  { %5216 = vmatpush1.bf16.msra.mxu0 %v21268_v2  ;;  %5144 = vmatprep.subr.bf16.mxu1 %v18937_v24  ;;  %v21283_v24 = vld [vmem:[#allocation2 + $0x20] ss:$48 sps:$4 sm:$0xff]   ;;  %v21286_v2 = vld [vmem:[#allocation2 + $0x8c] ss:$48 sps:$4 sm:$0xff]  }
 0x458   :  { %5217 = vmatprep.subr.bf16.mxu0 %v21269_v29  ;;  %v21288_v29 = vld [vmem:[#allocation2 + $0x88] ss:$48 sps:$4 sm:$0xff]  }
 0x45a   :  { %5145 = vmatpush1.bf16.msra.mxu1 %v18935_v19  ;;  %v21285_v19 = vld [vmem:[#allocation2 + $0x84] ss:$48 sps:$4 sm:$0xff]  }
 0x45b   :  { %5218 = vmatpush1.bf16.msra.mxu0 %v21270_v6  ;;  %5146 = vmatprep.subr.bf16.mxu1 %v18940_v3  ;;  %v21287_v3 = vld [vmem:[#allocation2 + $0x80] ss:$48 sps:$4 sm:$0xff]   ;;  %v21290_v6 = vld [vmem:[#allocation2 + $0xec] ss:$48 sps:$4 sm:$0xff]  }
 0x45c   :  { %5219 = vmatprep.subr.bf16.mxu0 %v21271_v40  ;;  %v21292_v40 = vld [vmem:[#allocation2 + $0xe8] ss:$48 sps:$4 sm:$0xff]  }
 0x45e   :  { %5147 = vmatpush1.bf16.msra.mxu1 %v18938_v35  ;;  %v21289_v35 = vld [vmem:[#allocation2 + $0xe4] ss:$48 sps:$4 sm:$0xff]  }
 0x45f   :  { %5220 = vmatpush1.bf16.msra.mxu0 %v21272_v12  ;;  %5148 = vmatprep.subr.bf16.mxu1 %v18943_v38  ;;  %v21291_v38 = vld [vmem:[#allocation2 + $0xe0] ss:$48 sps:$4 sm:$0xff]   ;;  %v21294_v12 = vld [vmem:[#allocation2 + $0x14c] ss:$48 sps:$4 sm:$0xff]  }
 0x460   :  { %5221 = vmatprep.subr.bf16.mxu0 %v21273_v14  ;;  %v21296_v14 = vld [vmem:[#allocation2 + $0x148] ss:$48 sps:$4 sm:$0xff]  }
 0x462   :  { %5149 = vmatpush1.bf16.msra.mxu1 %v18941_v16  ;;  %v21293_v16 = vld [vmem:[#allocation2 + $0x144] ss:$48 sps:$4 sm:$0xff]  }
 0x463   :  { %5222 = vmatpush1.bf16.msra.mxu0 %v21274_v1  ;;  %5150 = vmatprep.subr.bf16.mxu1 %v18946_v33  ;;  %v21295_v33 = vld [vmem:[#allocation2 + $0x140] ss:$48 sps:$4 sm:$0xff]   ;;  %v21298_v1 = vld [vmem:[#allocation2 + $0x1ac] ss:$48 sps:$4 sm:$0xff]  }
 0x464   :  { %5223 = vmatprep.subr.bf16.mxu0 %v21275_v8  ;;  %v21300_v8 = vld [vmem:[#allocation2 + $0x1a8] ss:$48 sps:$4 sm:$0xff]  }
 0x466   :  { %5151 = vmatpush1.bf16.msra.mxu1 %v18944_v28  ;;  %v21297_v28 = vld [vmem:[#allocation2 + $0x1a4] ss:$48 sps:$4 sm:$0xff]  }
 0x467   :  { %5224 = vmatpush1.bf16.msra.mxu0 %v21276_v42  ;;  %5152 = vmatprep.subr.bf16.mxu1 %v18949_v60  ;;  %v21299_v60 = vld [vmem:[#allocation2 + $0x1a0] ss:$48 sps:$4 sm:$0xff]   ;;  %v21302_v42 = vld [vmem:[#allocation2 + $0x20c] ss:$48 sps:$4 sm:$0xff]  }
 0x468   :  { %5225 = vmatprep.subr.bf16.mxu0 %v21277_v44  ;;  %v21304_v44 = vld [vmem:[#allocation2 + $0x208] ss:$48 sps:$4 sm:$0xff]  }
 0x46a   :  { %5153 = vmatpush1.bf16.msra.mxu1 %v18947_v13  ;;  %v21301_v13 = vld [vmem:[#allocation2 + $0x204] ss:$48 sps:$4 sm:$0xff]  }
 0x46b   :  { %5226 = vmatpush1.bf16.msra.mxu0 %v21278_v22  ;;  %5154 = vmatprep.subr.bf16.mxu1 %v18952_v61  ;;  %v21303_v61 = vld [vmem:[#allocation2 + $0x200] ss:$48 sps:$4 sm:$0xff]   ;;  %v21306_v22 = vld [vmem:[#allocation2 + $0x26c] ss:$48 sps:$4 sm:$0xff]  }
 0x46c   :  { %5227 = vmatprep.subr.bf16.mxu0 %v21279_v58  ;;  %v21307_v58 = vld [vmem:[#allocation2 + $0x260] ss:$48 sps:$4 sm:$0xff]  }
 0x46e   :  { %5155 = vmatpush1.bf16.msra.mxu1 %v18950_v46  ;;  %v21305_v46 = vld [vmem:[#allocation2 + $0x264] ss:$48 sps:$4 sm:$0xff]  }
 0x46f   :  { %5228 = vmatpush1.bf16.msra.mxu0 %v21280_v45  ;;  %5270 = vmatprep.subr.bf16.mxu1 %v21281_v25  ;;  %v21308_v45 = vld [vmem:[#allocation2 + $0x268] ss:$48 sps:$4 sm:$0xff]   ;;  %v21309_v25 = vld [vmem:[#allocation2 + $0x2c4] ss:$48 sps:$4 sm:$0xff]  }
 0x470   :  { %5343 = vmatprep.subr.bf16.mxu0 %v21282_v36  ;;  %v21310_v36 = vld [vmem:[#allocation2 + $0x2cc] ss:$48 sps:$4 sm:$0xff]  }
 0x471   :  { %16224 = vmatmul.mubr.msk.bf16.vlgmr.msra.gmra.mrb[48].mxu1 %vm22743_vm15, %v24216_v55 }
 0x472   :  { %16240 = vmatmul.mubr.msk.bf16.vlgmr.msra.gmra.mrb[64].mxu0 %vm22743_vm15, %v24216_v55  ;;  %16226 = vmatprep.mubr.msk.bf16.mxu1 %vm22747_vm0, %v24216_v55 }
 0x473   :  { %16242 = vmatprep.mubr.msk.bf16.mxu0 %vm22747_vm0, %v24216_v55  ;;  %5271 = vmatpush1.bf16.msra.mxu1 %v21283_v24  ;;  %v21311_v24 = vld [vmem:[#allocation2 + $0x2c0] ss:$48 sps:$4 sm:$0xff]  }
 0x474   :  { %5344 = vmatpush1.bf16.msra.mxu0 %v21284_v18  ;;  %5272 = vmatprep.subr.bf16.mxu1 %v21285_v19  ;;  %v21312_v18 = vld [vmem:[#allocation2 + $0x2c8] ss:$48 sps:$4 sm:$0xff]   ;;  %v21313_v19 = vld [vmem:[#allocation2 + $0x324] ss:$48 sps:$4 sm:$0xff]  }
 0x475   :  { %5345 = vmatprep.subr.bf16.mxu0 %v21286_v2  ;;  %v21314_v2 = vld [vmem:[#allocation2 + $0x32c] ss:$48 sps:$4 sm:$0xff]  }
 0x477   :  { %5273 = vmatpush1.bf16.msra.mxu1 %v21287_v3  ;;  %v21315_v3 = vld [vmem:[#allocation2 + $0x320] ss:$48 sps:$4 sm:$0xff]  }
 0x478   :  { %5346 = vmatpush1.bf16.msra.mxu0 %v21288_v29  ;;  %5274 = vmatprep.subr.bf16.mxu1 %v21289_v35  ;;  %v21316_v29 = vld [vmem:[#allocation2 + $0x328] ss:$48 sps:$4 sm:$0xff]   ;;  %v21318_v35 = vld [vmem:[#allocation2 + $0x38c] ss:$48 sps:$4 sm:$0xff]  }
 0x479   :  { %16228 = vmatmul.mubr.msk.bf16.gmra.mrb[52].mxu1 %vm22767_vm5, %v24216_v55  ;;  %5347 = vmatprep.subr.bf16.mxu0 %v21290_v6  ;;  %v21319_v6 = vld [vmem:[#allocation2 + $0x380] ss:$48 sps:$4 sm:$0xff]  }
 0x47a   :  { %16244 = vmatmul.mubr.msk.bf16.gmra.mrb[68].mxu0 %vm22767_vm5, %v24216_v55  ;;  %16230 = vmatprep.mubr.msk.bf16.mxu1 %vm22771_vm9, %v24216_v55 }
 0x47b   :  { %16246 = vmatprep.mubr.msk.bf16.mxu0 %vm22771_vm9, %v24216_v55  ;;  %5275 = vmatpush1.bf16.msra.mxu1 %v21291_v38  ;;  %v21320_v38 = vld [vmem:[#allocation2 + $0x388] ss:$48 sps:$4 sm:$0xff]  }
 0x47c   :  { %5348 = vmatpush1.bf16.msra.mxu0 %v21292_v40  ;;  %5276 = vmatprep.subr.bf16.mxu1 %v21293_v16  ;;  %v21321_v40 = vld [vmem:[#allocation2 + $0x3e4] ss:$48 sps:$4 sm:$0xff]   ;;  %v21322_v16 = vld [vmem:[#allocation2 + $0x3ec] ss:$48 sps:$4 sm:$0xff]  }
 0x47d   :  { %5349 = vmatprep.subr.bf16.mxu0 %v21294_v12  ;;  %v21323_v12 = vld [vmem:[#allocation2 + $0x3e0] ss:$48 sps:$4 sm:$0xff]  }
 0x47f   :  { %5277 = vmatpush1.bf16.msra.mxu1 %v21295_v33  ;;  %v21324_v33 = vld [vmem:[#allocation2 + $0x3e8] ss:$48 sps:$4 sm:$0xff]  }
 0x480   :  { %5350 = vmatpush1.bf16.msra.mxu0 %v21296_v14  ;;  %5278 = vmatprep.subr.bf16.mxu1 %v21297_v28  ;;  %v21325_v14 = vld [vmem:[#allocation2 + $0x444] ss:$48 sps:$4 sm:$0xff]   ;;  %v21326_v28 = vld [vmem:[#allocation2 + $0x44c] ss:$48 sps:$4 sm:$0xff]  }
 0x481   :  { %16232 = vmatmul.mubr.msk.bf16.gmra.mrb[56].mxu1 %vm22791_vm12, %v24216_v55  ;;  %5351 = vmatprep.subr.bf16.mxu0 %v21298_v1  ;;  %v21327_v1 = vld [vmem:[#allocation2 + $0x440] ss:$48 sps:$4 sm:$0xff]  }
 0x482   :  { %16248 = vmatmul.mubr.msk.bf16.gmra.mrb[72].mxu0 %vm22791_vm12, %v24216_v55  ;;  %16234 = vmatprep.mubr.msk.bf16.mxu1 %vm22795_vm13, %v24216_v55 }
 0x483   :  { %16250 = vmatprep.mubr.msk.bf16.mxu0 %vm22795_vm13, %v24216_v55  ;;  %5279 = vmatpush1.bf16.msra.mxu1 %v21299_v60  ;;  %v21328_v60 = vld [vmem:[#allocation2 + $0x448] ss:$48 sps:$4 sm:$0xff]  }
 0x484   :  { %5352 = vmatpush1.bf16.msra.mxu0 %v21300_v8  ;;  %5280 = vmatprep.subr.bf16.mxu1 %v21301_v13  ;;  %v21329_v8 = vld [vmem:[#allocation2 + $0x4a4] ss:$48 sps:$4 sm:$0xff]   ;;  %v21330_v13 = vld [vmem:[#allocation2 + $0x4ac] ss:$48 sps:$4 sm:$0xff]  }
 0x485   :  { %5353 = vmatprep.subr.bf16.mxu0 %v21302_v42  ;;  %v21331_v42 = vld [vmem:[#allocation2 + $0x4a0] ss:$48 sps:$4 sm:$0xff]  }
 0x487   :  { %5281 = vmatpush1.bf16.msra.mxu1 %v21303_v61  ;;  %v21332_v61 = vld [vmem:[#allocation2 + $0x4a8] ss:$48 sps:$4 sm:$0xff]  }
 0x488   :  { %5354 = vmatpush1.bf16.msra.mxu0 %v21304_v44  ;;  %5282 = vmatprep.subr.bf16.mxu1 %v21305_v46  ;;  %v21333_v44 = vld [vmem:[#allocation2 + $0x504] ss:$48 sps:$4 sm:$0xff]   ;;  %v21334_v46 = vld [vmem:[#allocation2 + $0x50c] ss:$48 sps:$4 sm:$0xff]  }
 0x489   :  { %16236 = vmatmul.mubr.msk.bf16.gmra.mrb[60].mxu1 %vm22813_vm2, %v24216_v55  ;;  %5355 = vmatprep.subr.bf16.mxu0 %v21306_v22  ;;  %v21335_v22 = vld [vmem:[#allocation2 + $0x500] ss:$48 sps:$4 sm:$0xff]  }
 0x48a   :  { %16252 = vmatmul.mubr.msk.bf16.gmra.mrb[76].mxu0 %vm22813_vm2, %v24216_v55  ;;  %16254 = vmatprep.mubr.msk.bf16.mxu1 %vm22726_vm8, %v24216_v55 }
 0x48b   :  { %5283 = vmatpush1.bf16.msra.mxu1 %v21307_v58  ;;  %16270 = vmatprep.mubr.msk.bf16.mxu0 %vm22726_vm8, %v24216_v55  ;;  %v21336_v58 = vld [vmem:[#allocation2 + $0x508] ss:$48 sps:$4 sm:$0xff]  }
 0x48c   :  { %5356 = vmatpush1.bf16.msra.mxu0 %v21308_v45  ;;  %5284 = vmatprep.subr.bf16.mxu1 %v21309_v25  ;;  %v21337_v45 = vld [vmem:[#allocation2 + $0x564] ss:$48 sps:$4 sm:$0xff]   ;;  %v21338_v25 = vld [vmem:[#allocation2 + $0x56c] ss:$48 sps:$4 sm:$0xff]  }
 0x48d   :  { %5357 = vmatprep.subr.bf16.mxu0 %v21310_v36  ;;  %v21339_v36 = vld [vmem:[#allocation2 + $0x560] ss:$48 sps:$4 sm:$0xff]  }
 0x48f   :  { %5285 = vmatpush1.bf16.msra.mxu1 %v21311_v24  ;;  %v21340_v24 = vld [vmem:[#allocation2 + $0x568] ss:$48 sps:$4 sm:$0xff]  }
 0x490   :  { %5358 = vmatpush1.bf16.msra.mxu0 %v21312_v18  ;;  %5286 = vmatprep.subr.bf16.mxu1 %v21313_v19  ;;  %v21341_v18 = vld [vmem:[#allocation2 + $0x5c4] ss:$48 sps:$4 sm:$0xff]   ;;  %v21342_v19 = vld [vmem:[#allocation2 + $0x5cc] ss:$48 sps:$4 sm:$0xff]  }
 0x491   :  { %5359 = vmatprep.subr.bf16.mxu0 %v21314_v2  ;;  %v21343_v2 = vld [vmem:[#allocation2 + $0x5c0] ss:$48 sps:$4 sm:$0xff]  }
 0x493   :  { %5287 = vmatpush1.bf16.msra.mxu1 %v21315_v3  ;;  %v21344_v3 = vld [vmem:[#allocation2 + $0x5c8] ss:$48 sps:$4 sm:$0xff]  }
 0x494   :  { %5360 = vmatpush1.bf16.msra.mxu0 %v21316_v29  ;;  %5288 = vmatprep.subr.bf16.mxu1 %v21317_v48 }
 0x495   :  { %5361 = vmatprep.subr.bf16.mxu0 %v21318_v35 }
 0x497   :  { %5289 = vmatpush1.bf16.msra.mxu1 %v21319_v6 }
 0x498   :  { %5362 = vmatpush1.bf16.msra.mxu0 %v21320_v38  ;;  %5290 = vmatprep.subr.bf16.mxu1 %v21321_v40 }
 0x499   :  { %5363 = vmatprep.subr.bf16.mxu0 %v21322_v16  ;;  %v18955_v16 = vld [vmem:[#allocation7 + $0x4] ss:$16 sps:$4 sm:$0xff]  }
 0x49b   :  { %5291 = vmatpush1.bf16.msra.mxu1 %v21323_v12 }
 0x49c   :  { %5364 = vmatpush1.bf16.msra.mxu0 %v21324_v33  ;;  %5292 = vmatprep.subr.bf16.mxu1 %v21325_v14  ;;  %v18953_v14 = vld [vmem:[#allocation7] ss:$16 sps:$4 sm:$0xff]  }
 0x49d   :  { %5365 = vmatprep.subr.bf16.mxu0 %v21326_v28  ;;  %v18956_v28 = vld [vmem:[#allocation7 + $0x8] ss:$16 sps:$4 sm:$0xff]  }
 0x49f   :  { %5293 = vmatpush1.bf16.msra.mxu1 %v21327_v1 }
 0x4a0   :  { %5366 = vmatpush1.bf16.msra.mxu0 %v21328_v60  ;;  %5294 = vmatprep.subr.bf16.mxu1 %v21329_v8 }
 0x4a1   :  { %5367 = vmatprep.subr.bf16.mxu0 %v21330_v13  ;;  %v18958_v13 = vld [vmem:[#allocation7 + $0xc] ss:$16 sps:$4 sm:$0xff]  }
 0x4a3   :  { %5295 = vmatpush1.bf16.msra.mxu1 %v21331_v42 }
 0x4a4   :  { %5368 = vmatpush1.bf16.msra.mxu0 %v21332_v61  ;;  %5296 = vmatprep.subr.bf16.mxu1 %v21333_v44 }
 0x4a5   :  { %5369 = vmatprep.subr.bf16.mxu0 %v21334_v46 }
 0x4a7   :  { %5297 = vmatpush1.bf16.msra.mxu1 %v21335_v22 }
 0x4a8   :  { %5370 = vmatpush1.bf16.msra.mxu0 %v21336_v58  ;;  %5298 = vmatprep.subr.bf16.mxu1 %v21337_v45 }
 0x4a9   :  { %5371 = vmatprep.subr.bf16.mxu0 %v21338_v25 }
 0x4ab   :  { %5299 = vmatpush1.bf16.msra.mxu1 %v21339_v36  ;;  %v18961_v36 = vld [vmem:[#allocation7 + $0x24] ss:$16 sps:$4 sm:$0xff]  }
 0x4ac   :  { %5372 = vmatpush1.bf16.msra.mxu0 %v21340_v24  ;;  %5300 = vmatprep.subr.bf16.mxu1 %v21341_v18  ;;  %v18964_v24 = vld [vmem:[#allocation7 + $0x2c] ss:$16 sps:$4 sm:$0xff]  }
 0x4ad   :  { %5373 = vmatprep.subr.bf16.mxu0 %v21342_v19 }
 0x4af   :  { %5301 = vmatpush1.bf16.msra.mxu1 %v21343_v2 }
 0x4b0   :  { %5374 = vmatpush1.bf16.msra.mxu0 %v21344_v3  ;;  %6698 = vmatprep.subr.bf16.mxu1 %v18955_v16 }
 0x4b1   :  { %6844 = vmatprep.subr.bf16.mxu0 %v18958_v13 }
 0x4b2   :  { %16256 = vmatmul.mubr.msk.bf16.vlgmr.msra.gmra.mrb[64].mxu1 %vm22743_vm15, %v24216_v55 }
 0x4b3   :  { %16272 = vmatmul.mubr.msk.bf16.vlgmr.msra.gmra.mrb[80].mxu0 %vm22743_vm15, %v24216_v55  ;;  %16258 = vmatprep.mubr.msk.bf16.mxu1 %vm22747_vm0, %v24216_v55 }
 0x4b4   :  { %16274 = vmatprep.mubr.msk.bf16.mxu0 %vm22747_vm0, %v24216_v55  ;;  %6699 = vmatpush1.bf16.msra.mxu1 %v18953_v14 }
 0x4b5   :  { %6845 = vmatpush1.bf16.msra.mxu0 %v18956_v28  ;;  %6700 = vmatprep.subr.bf16.mxu1 %v18961_v36 }
 0x4b6   :  { %6846 = vmatprep.subr.bf16.mxu0 %v18964_v24 }
 0x4ba   :  { %16260 = vmatmul.mubr.msk.bf16.gmra.mrb[68].mxu1 %vm22767_vm5, %v24216_v55 }
 0x4bb   :  { %16276 = vmatmul.mubr.msk.bf16.gmra.mrb[84].mxu0 %vm22767_vm5, %v24216_v55  ;;  %16262 = vmatprep.mubr.msk.bf16.mxu1 %vm22771_vm9, %v24216_v55 }
 0x4bc   :  { %16278 = vmatprep.mubr.msk.bf16.mxu0 %vm22771_vm9, %v24216_v55 }
 0x4c2   :  { %16264 = vmatmul.mubr.msk.bf16.gmra.mrb[72].mxu1 %vm22791_vm12, %v24216_v55 }
 0x4c3   :  { %16280 = vmatmul.mubr.msk.bf16.gmra.mrb[88].mxu0 %vm22791_vm12, %v24216_v55  ;;  %16266 = vmatprep.mubr.msk.bf16.mxu1 %vm22795_vm13, %v24216_v55 }
 0x4c4   :  { %16282 = vmatprep.mubr.msk.bf16.mxu0 %vm22795_vm13, %v24216_v55 }
 0x4ca   :  { %16268 = vmatmul.mubr.msk.bf16.gmra.mrb[76].mxu1 %vm22813_vm2, %v24216_v55 }
 0x4cb   :  { %16284 = vmatmul.mubr.msk.bf16.gmra.mrb[92].mxu0 %vm22813_vm2, %v24216_v55 }
 0x503   :  { %v5012_v43 = vpop.f32.mrb[32].mxu1 }
 0x504   :  { %v5085_v59 = vpop.f32.mrb[48].mxu0  ;;  %v5014_v17 = vpop.f32.mrb[33].mxu1  ;;  %v5416_v48 = vadd.f32 %v5012_v43, %v22227_v49  ;;  %v18959_v43 = vld [vmem:[#allocation7 + $0x20] ss:$16 sps:$4 sm:$0xff]  }
 0x505   :  { %v5087_v29 = vpop.f32.mrb[49].mxu0  ;;  %v5016_v41 = vpop.f32.mrb[34].mxu1  ;;  %v5418_v38 = vadd.f32 %v5085_v59, %v22231_v53  ;;  %v5417_v55 = vadd.f32 %v5014_v17, %v22235_v56  ;;  %6701 = vmatpush1.bf16.msra.mxu1 %v18959_v43 }
 0x506   :  { %v5089_v35 = vpop.f32.mrb[50].mxu0  ;;  %v5018_v6 = vpop.f32.mrb[35].mxu1  ;;  %v5419_v57 = vadd.f32 %v5087_v29, %v22923_v0  ;;  %v16285_v12 = vmul.f32 -1.442695, %v5416_v48  ;;  %v5428_v33 = vadd.f32 %v5016_v41, %v22227_v49  ;;  %v18962_v41 = vld [vmem:[#allocation7 + $0x28] ss:$16 sps:$4 sm:$0xff]  }
 0x507   :  { %v5091_v40 = vpop.f32.mrb[51].mxu0  ;;  %v16287_v1 = vmul.f32 -1.442695, %v5418_v38  ;;  %v5430_v60 = vadd.f32 %v5089_v35, %v22231_v53  ;;  %v16286_v42 = vmul.f32 -1.442695, %v5417_v55  ;;  %v5429_v44 = vadd.f32 %v5018_v6, %v22235_v56  ;;  %6847 = vmatpush1.bf16.msra.mxu0 %v18962_v41 }
 0x508   :  { %v16309_v61 = vmul.f32 -1.442695, %v5419_v57  ;;  %v5431_v58 = vadd.f32 %v5091_v40, %v22923_v0  ;;  %20761 = vpow2.f32 %v16285_v12  ;;  %v16288_v18 = vmul.f32 -1.442695, %v5428_v33  ;;  %v18967_v35 = vld [vmem:[#allocation7 + $0x44] ss:$16 sps:$4 sm:$0xff]  }
 0x509   :  { %20763 = vpow2.f32 %v16287_v1  ;;  %v16290_v59 = vmul.f32 -1.442695, %v5430_v60  ;;  %v16289_v29 = vmul.f32 -1.442695, %v5429_v44  ;;  %v18970_v6 = vld [vmem:[#allocation7 + $0x4c] ss:$16 sps:$4 sm:$0xff]   ;;  %6702 = vmatprep.subr.bf16.mxu1 %v18967_v35 }
 0x50a   :  { %20765 = vpow2.f32 %v16286_v42  ;;  %v16312_v48 = vmul.f32 -1.442695, %v5431_v58  ;;  %v18965_v40 = vld [vmem:[#allocation7 + $0x40] ss:$16 sps:$4 sm:$0xff]   ;;  %v18968_v55 = vld [vmem:[#allocation7 + $0x48] ss:$16 sps:$4 sm:$0xff]   ;;  %6848 = vmatprep.subr.bf16.mxu0 %v18970_v6 }
 0x50b   :  { %v5022_v8 = vpop.f32.mrb[36].mxu1  ;;  %20767 = vpow2.f32 %v16309_v61  ;;  %6703 = vmatpush1.bf16.msra.mxu1 %v18965_v40  ;;  %v18973_v60 = vld [vmem:[#allocation7 + $0x64] ss:$16 sps:$4 sm:$0xff]   ;;  %6849 = vmatpush1.bf16.msra.mxu0 %v18968_v55  ;;  %v18971_v58 = vld [vmem:[#allocation7 + $0x60] ss:$16 sps:$4 sm:$0xff]  }
 0x50c   :  { %v5095_v46 = vpop.f32.mrb[52].mxu0  ;;  %v5024_v22 = vpop.f32.mrb[37].mxu1  ;;  %v5440_v19 = vadd.f32 %v5022_v8, %v22227_v49  ;;  %20769 = vpow2.f32 %v16288_v18  ;;  %6704 = vmatprep.subr.bf16.mxu1 %v18973_v60  ;;  %v18974_v18 = vld [vmem:[#allocation7 + $0x68] ss:$16 sps:$4 sm:$0xff]   ;;  %v18979_v60 = vld [vmem:[#allocation7 + $0x84] ss:$16 sps:$4 sm:$0xff]  }
 0x50d   :  { %v5097_v45 = vpop.f32.mrb[53].mxu0  ;;  %v5026_v25 = vpop.f32.mrb[38].mxu1  ;;  %20771 = vpow2.f32 %v16290_v59  ;;  %v5442_v57 = vadd.f32 %v5095_v46, %v22231_v53  ;;  %v5441_v14 = vadd.f32 %v5024_v22, %v22235_v56 }
 0x50e   :  { %v22934_v2 = vpop.f32.mrb[54].mxu0  ;;  %v22936_v3 = vpop.f32.mrb[39].mxu1  ;;  %v16291_v38 = vmul.f32 -1.442695, %v5440_v19  ;;  %20773 = vpow2.f32 %v16289_v29  ;;  %v5443_v8 = vadd.f32 %v5097_v45, %v22923_v0  ;;  %v5452_v44 = vadd.f32 %v5026_v25, %v22227_v49  ;;  %v18976_v19 = vld [vmem:[#allocation7 + $0x6c] ss:$16 sps:$4 sm:$0xff]  }
 0x50f   :  { %v22938_v17 = vpop.f32.mrb[55].mxu0  ;;  %20775 = vpow2.f32 %v16312_v48  ;;  %v16293_v61 = vmul.f32 -1.442695, %v5442_v57  ;;  %v16292_v24 = vmul.f32 -1.442695, %v5441_v14  ;;  %6705 = vmatpush1.bf16.msra.mxu1 %v18971_v58  ;;  %6850 = vmatprep.subr.bf16.mxu0 %v18976_v19 }
 0x510   :  { %20777 = vpow2.f32 %v16291_v38  ;;  %v16315_v59 = vmul.f32 -1.442695, %v5443_v8  ;;  %v16294_v29 = vmul.f32 -1.442695, %v5452_v44  ;;  %6851 = vmatpush1.bf16.msra.mxu0 %v18974_v18  ;;  %v18977_v38 = vld [vmem:[#allocation7 + $0x80] ss:$16 sps:$4 sm:$0xff]   ;;  %6706 = vmatprep.subr.bf16.mxu1 %v18979_v60 }
 0x511   :  { %20779 = vpow2.f32 %v16293_v61  ;;  %6852 = vmatprep.subr.bf16.mxu0 %v18982_v20  ;;  %v18994_v60 = vld [vmem:[#allocation7 + $0xcc] ss:$16 sps:$4 sm:$0xff]  }
 0x512   :  { %v20762_v22 = vpop.eup %20761  ;;  %20781 = vpow2.f32 %v16292_v24 }
 0x513   :  { %v22941_v16 = vpop.f32.mrb[40].mxu1  ;;  %v20764_v36 = vpop.eup %20763  ;;  %v5584_v25 = vadd.f32 1.0, %v20762_v22  ;;  %20783 = vpow2.f32 %v16315_v59  ;;  %6707 = vmatpush1.bf16.msra.mxu1 %v18977_v38  ;;  %v18983_v59 = vld [vmem:[#allocation7 + $0xa0] ss:$16 sps:$4 sm:$0xff]   ;;  %v5455_v38 = vadd.f32 %v22938_v17, %v22923_v0 }
 0x514   :  { %v22943_v12 = vpop.f32.mrb[56].mxu0  ;;  %v22945_v33 = vpop.f32.mrb[41].mxu1  ;;  %v5586_v55 = vadd.f32 1.0, %v20764_v36  ;;  %20785 = vpow2.f32 %v16294_v29  ;;  %v18988_v29 = vld [vmem:[#allocation7 + $0xac] ss:$16 sps:$4 sm:$0xff]   ;;  %6853 = vmatpush1.bf16.msra.mxu0 %v18980_v11  ;;  %6708 = vmatprep.subr.bf16.mxu1 %v18985_v5  ;;  %v5464_v20 = vadd.f32 %v22941_v16, %v22227_v49 }
 0x515   :  { %v22948_v28 = vpop.f32.mrb[57].mxu0  ;;  %v22950_v1 = vpop.f32.mrb[42].mxu1  ;;  %20787 = vrcp.f32 %v5584_v25  ;;  %6854 = vmatprep.subr.bf16.mxu0 %v18988_v29  ;;  %v16318_v11 = vmul.f32 -1.442695, %v5455_v38  ;;  %v5466_v5 = vadd.f32 %v22943_v12, %v22231_v53  ;;  %v18995_v16 = vld [vmem:[#allocation7 + $0xe0] ss:$16 sps:$4 sm:$0xff]  }
 0x516   :  { %v22953_v13 = vpop.f32.mrb[58].mxu0  ;;  %v22955_v42 = vpop.f32.mrb[43].mxu1  ;;  %20789 = vrcp.f32 %v5586_v55  ;;  %v18991_v55 = vld [vmem:[#allocation7 + $0xc4] ss:$16 sps:$4 sm:$0xff]   ;;  %v5476_v38 = vadd.f32 %v22950_v1, %v22227_v49 }
 0x517   :  { %v22958_v46 = vpop.f32.mrb[59].mxu0  ;;  %v20766_v43 = vpop.eup %20765  ;;  %6709 = vmatpush1.bf16.msra.mxu1 %v18983_v59  ;;  %v16297_v59 = vmul.f32 -1.442695, %v5464_v20  ;;  %v19003_v12 = vld [vmem:[#allocation7 + $0x104] ss:$16 sps:$4 sm:$0xff]   ;;  %v5477_v1 = vadd.f32 %v22955_v42, %v22235_v56 }
 0x518   :  { %v20768_v45 = vpop.eup %20767  ;;  %v5585_v61 = vadd.f32 1.0, %v20766_v43  ;;  %v5454_v43 = vadd.f32 %v22934_v2, %v22231_v53  ;;  %v18989_v2 = vld [vmem:[#allocation7 + $0xc0] ss:$16 sps:$4 sm:$0xff]   ;;  %6710 = vmatprep.subr.bf16.mxu1 %v18991_v55 }
 0x519   :  { %v20770_v48 = vpop.eup %20769  ;;  %v5728_v19 = vadd.f32 1.0, %v20768_v45  ;;  %v5453_v45 = vadd.f32 %v22936_v3, %v22235_v56 }
 0x51a   :  { %v20772_v40 = vpop.eup %20771  ;;  %v5587_v24 = vadd.f32 1.0, %v20770_v48  ;;  %20791 = vrcp.f32 %v5585_v61  ;;  %v16296_v3 = vmul.f32 -1.442695, %v5454_v43  ;;  %v18997_v61 = vld [vmem:[#allocation7 + $0xe4] ss:$16 sps:$4 sm:$0xff]  }
 0x51b   :  { %v22960_v41 = vpop.f32.mrb[44].mxu1  ;;  %v20774_v8 = vpop.eup %20773  ;;  %v5589_v52 = vadd.f32 1.0, %v20772_v40  ;;  %20793 = vrcp.f32 %v5728_v19  ;;  %v18986_v40 = vld [vmem:[#allocation7 + $0xa8] ss:$16 sps:$4 sm:$0xff]   ;;  %6711 = vmatpush1.bf16.msra.mxu1 %v18989_v2 }
 0x51c   :  { %v22962_v35 = vpop.f32.mrb[60].mxu0  ;;  %v22964_v6 = vpop.f32.mrb[45].mxu1  ;;  %v5588_v51 = vadd.f32 1.0, %v20774_v8  ;;  %20795 = vrcp.f32 %v5587_v24  ;;  %6855 = vmatpush1.bf16.msra.mxu0 %v18986_v40  ;;  %v18992_v19 = vld [vmem:[#allocation7 + $0xc8] ss:$16 sps:$4 sm:$0xff]   ;;  %6712 = vmatprep.subr.bf16.mxu1 %v18997_v61  ;;  %v5488_v42 = vadd.f32 %v22960_v41, %v22227_v49 }
 0x51d   :  { %v22966_v57 = vpop.f32.mrb[61].mxu0  ;;  %v22968_v14 = vpop.f32.mrb[46].mxu1  ;;  %20797 = vrcp.f32 %v5589_v52  ;;  %v5465_v52 = vadd.f32 %v22945_v33, %v22235_v56  ;;  %6856 = vmatprep.subr.bf16.mxu0 %v18994_v60  ;;  %v16299_v33 = vmul.f32 -1.442695, %v5466_v5  ;;  %v18998_v40 = vld [vmem:[#allocation7 + $0xe8] ss:$16 sps:$4 sm:$0xff]  }
 0x51e   :  { %v22970_v44 = vpop.f32.mrb[62].mxu0  ;;  %v22972_v22 = vpop.f32.mrb[47].mxu1  ;;  %20799 = vrcp.f32 %v5588_v51  ;;  %v19000_v51 = vld [vmem:[#allocation7 + $0xec] ss:$16 sps:$4 sm:$0xff]   ;;  %v19001_v60 = vld [vmem:[#allocation7 + $0x100] ss:$16 sps:$4 sm:$0xff]  }
 0x51f   :  { %v20776_v58 = vpop.eup %20775  ;;  %v22974_v18 = vpop.f32.mrb[63].mxu0  ;;  %v16298_v55 = vmul.f32 -1.442695, %v5465_v52  ;;  %6713 = vmatpush1.bf16.msra.mxu1 %v18995_v16  ;;  %v19009_v61 = vld [vmem:[#allocation7 + $0x124] ss:$16 sps:$4 sm:$0xff]  }
 0x520   :  { %v20778_v36 = vpop.eup %20777  ;;  %v5731_v25 = vadd.f32 1.0, %v20776_v58  ;;  %v16295_v58 = vmul.f32 -1.442695, %v5453_v45  ;;  %v5467_v45 = vadd.f32 %v22948_v28, %v22923_v0  ;;  %6857 = vmatpush1.bf16.msra.mxu0 %v18992_v19  ;;  %v5478_v28 = vadd.f32 %v22953_v13, %v22231_v53  ;;  %6714 = vmatprep.subr.bf16.mxu1 %v19003_v12  ;;  %v19004_v19 = vld [vmem:[#allocation7 + $0x108] ss:$16 sps:$4 sm:$0xff]  }
 0x521   :  { %v5590_v48 = vadd.f32 1.0, %v20778_v36  ;;  %v20780_v8 = vpop.eup %20779  ;;  %6858 = vmatprep.subr.bf16.mxu0 %v19000_v51  ;;  %v5479_v13 = vadd.f32 %v22958_v46, %v22923_v0  ;;  %v16300_v5 = vmul.f32 -1.442695, %v5476_v38  ;;  %v19007_v16 = vld [vmem:[#allocation7 + $0x120] ss:$16 sps:$4 sm:$0xff]  }
 0x522   :  { %v20782_v17 = vpop.eup %20781  ;;  %20801 = vrcp.f32 %v5731_v25  ;;  %v5592_v24 = vadd.f32 1.0, %v20780_v8  ;;  %v19006_v8 = vld [vmem:[#allocation7 + $0x10c] ss:$16 sps:$4 sm:$0xff]   ;;  %v16321_v20 = vmul.f32 -1.442695, %v5467_v45 }
 0x523   :  { %v20784_v36 = vpop.eup %20783  ;;  %20803 = vrcp.f32 %v5590_v48  ;;  %v5591_v25 = vadd.f32 1.0, %v20782_v17  ;;  %v16302_v52 = vmul.f32 -1.442695, %v5478_v28  ;;  %6715 = vmatpush1.bf16.msra.mxu1 %v19001_v60  ;;  %v16301_v46 = vmul.f32 -1.442695, %v5477_v1 }
 0x524   :  { %v20786_v43 = vpop.eup %20785  ;;  %20805 = vpow2.f32 %v16296_v3  ;;  %v5734_v17 = vadd.f32 1.0, %v20784_v36  ;;  %6859 = vmatpush1.bf16.msra.mxu0 %v18998_v40  ;;  %v19012_v36 = vld [vmem:[#allocation7 + $0x12c] ss:$16 sps:$4 sm:$0xff]   ;;  %6716 = vmatprep.subr.bf16.mxu1 %v19009_v61  ;;  %v19015_v45 = vld [vmem:[#allocation7 + $0x144] ss:$16 sps:$4 sm:$0xff]  }
 0x525   :  { %v22990_v29 = vpop.eup %20787  ;;  %20807 = vpow2.f32 %v16295_v58  ;;  %6860 = vmatprep.subr.bf16.mxu0 %v19006_v8  ;;  %v5593_v38 = vadd.f32 1.0, %v20786_v43  ;;  %v19010_v41 = vld [vmem:[#allocation7 + $0x128] ss:$16 sps:$4 sm:$0xff]   ;;  %v19013_v28 = vld [vmem:[#allocation7 + $0x140] ss:$16 sps:$4 sm:$0xff]  }
 0x526   :  { %v22992_v48 = vpop.eup %20789  ;;  %20809 = vpow2.f32 %v16318_v11  ;;  %v19018_v60 = vld [vmem:[#allocation7 + $0x14c] ss:$16 sps:$4 sm:$0xff]   ;;  %v19021_v1 = vld [vmem:[#allocation7 + $0x164] ss:$16 sps:$4 sm:$0xff]  }
 0x527   :  { %24231 = vst [vmem:[#allocation52_spill] sm:$0xff] %v22992_v48  ;;  %v22996_v2 = vpop.eup %20791  ;;  %20811 = vrcp.f32 %v5592_v24  ;;  %6717 = vmatpush1.bf16.msra.mxu1 %v19007_v16  ;;  %v19024_v16 = vld [vmem:[#allocation7 + $0x16c] ss:$16 sps:$4 sm:$0xff]  }
 0x528   :  { %v23000_v3 = vpop.eup %20793  ;;  %20813 = vpow2.f32 %v16297_v59  ;;  %v5490_v59 = vadd.f32 %v22962_v35, %v22231_v53  ;;  %6861 = vmatpush1.bf16.msra.mxu0 %v19004_v19  ;;  %6718 = vmatprep.subr.bf16.mxu1 %v19015_v45  ;;  %v19016_v19 = vld [vmem:[#allocation7 + $0x148] ss:$16 sps:$4 sm:$0xff]  }
 0x529   :  { %v23004_v58 = vpop.eup %20795  ;;  %20815 = vrcp.f32 %v5591_v25  ;;  %v16324_v25 = vmul.f32 -1.442695, %v5479_v13  ;;  %6862 = vmatprep.subr.bf16.mxu0 %v19012_v36 }
 0x52a   :  { %v23008_v11 = vpop.eup %20797  ;;  %20817 = vpow2.f32 %v16299_v33  ;;  %v16305_v35 = vmul.f32 -1.442695, %v5490_v59  ;;  %v19027_v59 = vld [vmem:[#allocation7 + $0x184] ss:$16 sps:$4 sm:$0xff]  }
 0x52b   :  { %24232 = vst [vmem:[#allocation53_spill] sm:$0xff] %v23008_v11  ;;  %v23010_v24 = vpop.eup %20799  ;;  %20819 = vpow2.f32 %v16298_v55  ;;  %v16303_v55 = vmul.f32 -1.442695, %v5488_v42  ;;  %6719 = vmatpush1.bf16.msra.mxu1 %v19013_v28  ;;  %v19025_v28 = vld [vmem:[#allocation7 + $0x180] ss:$16 sps:$4 sm:$0xff]  }
 0x52c   :  { %v23014_v51 = vpop.eup %20801  ;;  %20821 = vpow2.f32 %v16321_v20  ;;  %v5489_v20 = vadd.f32 %v22964_v6, %v22235_v56  ;;  %6863 = vmatpush1.bf16.msra.mxu0 %v19010_v41  ;;  %v19019_v6 = vld [vmem:[#allocation7 + $0x160] ss:$16 sps:$4 sm:$0xff]   ;;  %6720 = vmatprep.subr.bf16.mxu1 %v19021_v1  ;;  %v19022_v41 = vld [vmem:[#allocation7 + $0x168] ss:$16 sps:$4 sm:$0xff]  }
 0x52d   :  { %v23018_v12 = vpop.eup %20803  ;;  %20823 = vrcp.f32 %v5734_v17  ;;  %6864 = vmatprep.subr.bf16.mxu0 %v19018_v60  ;;  %v19030_v60 = vld [vmem:[#allocation7 + $0x18c] ss:$16 sps:$4 sm:$0xff]  }
 0x52e   :  { %v20806_v33 = vpop.eup %20805  ;;  %20825 = vpow2.f32 %v16300_v5  ;;  %v5491_v5 = vadd.f32 %v22966_v57, %v22923_v0 }
 0x52f   :  { %v20808_v40 = vpop.eup %20807  ;;  %20827 = vpow2.f32 %v16302_v52  ;;  %v5595_v43 = vadd.f32 1.0, %v20806_v33  ;;  %6721 = vmatpush1.bf16.msra.mxu1 %v19019_v6  ;;  %v19036_v6 = vld [vmem:[#allocation7 + $0x1ac] ss:$16 sps:$4 sm:$0xff]  }
 0x530   :  { %v20810_v8 = vpop.eup %20809  ;;  %20829 = vpow2.f32 %v16301_v46  ;;  %v5594_v13 = vadd.f32 1.0, %v20808_v40  ;;  %v16304_v46 = vmul.f32 -1.442695, %v5489_v20  ;;  %v16327_v57 = vmul.f32 -1.442695, %v5491_v5  ;;  %6865 = vmatpush1.bf16.msra.mxu0 %v19016_v19  ;;  %6722 = vmatprep.subr.bf16.mxu1 %v19027_v59 }
 0x531   :  { %v23022_v61 = vpop.eup %20811  ;;  %20831 = vpow2.f32 %v16324_v25  ;;  %v5737_v42 = vadd.f32 1.0, %v20810_v8  ;;  %6866 = vmatprep.subr.bf16.mxu0 %v19024_v16  ;;  %v19033_v20 = vld [vmem:[#allocation7 + $0x1a4] ss:$16 sps:$4 sm:$0xff]  }
 0x532   :  { %24233 = vst [vmem:[#allocation54_spill] sm:$0xff] %v23022_v61  ;;  %v20814_v17 = vpop.eup %20813  ;;  %20833 = vrcp.f32 %v5593_v38  ;;  %v5500_v38 = vadd.f32 %v22968_v14, %v22227_v49  ;;  %v619_v14 = vsub.s32 4, %v22200_v21 }
 0x533   :  { %v23026_v52 = vpop.eup %20815  ;;  %20835 = vpow2.f32 %v16303_v55  ;;  %v5596_v25 = vadd.f32 1.0, %v20814_v17  ;;  %6723 = vmatpush1.bf16.msra.mxu1 %v19025_v28 }
 0x534   :  { %v20818_v36 = vpop.eup %20817  ;;  %20837 = vpow2.f32 %v16305_v35  ;;  %v16306_v49 = vmul.f32 -1.442695, %v5500_v38  ;;  %6867 = vmatpush1.bf16.msra.mxu0 %v19022_v41  ;;  %6724 = vmatprep.subr.bf16.mxu1 %v19033_v20  ;;  %v5501_v38 = vadd.f32 %v22972_v22, %v22235_v56  ;;  %v23040_v41 = vrot.slane %v22919_v23, %v619_v14 }
 0x535   :  { %v20820_v45 = vpop.eup %20819  ;;  %20839 = vrcp.f32 %v5595_v43  ;;  %v5598_v55 = vadd.f32 1.0, %v20818_v36  ;;  %6868 = vmatprep.subr.bf16.mxu0 %v19030_v60  ;;  %v19042_v60 = vld [vmem:[#allocation7 + $0x1cc] ss:$16 sps:$4 sm:$0xff]   ;;  %v5503_v56 = vadd.f32 %v22974_v18, %v22923_v0  ;;  %v623_v14 = vsub.s32 5, %v22200_v21 }
 0x536   :  { %v20822_v33 = vpop.eup %20821  ;;  %20841 = vrcp.f32 %v5594_v13  ;;  %v5597_v35 = vadd.f32 1.0, %v20820_v45  ;;  %v19028_v13 = vld [vmem:[#allocation7 + $0x188] ss:$16 sps:$4 sm:$0xff]   ;;  %v19048_v21 = vld [vmem:[#allocation7 + $0x1ec] ss:$16 sps:$4 sm:$0xff]  }
 0x537   :  { %v23030_v40 = vpop.eup %20823  ;;  %20843 = vrcp.f32 %v5737_v42  ;;  %v5740_v43 = vadd.f32 1.0, %v20822_v33  ;;  %v19031_v42 = vld [vmem:[#allocation7 + $0x1a0] ss:$16 sps:$4 sm:$0xff]  }
 0x538   :  { %v20826_v8 = vpop.eup %20825  ;;  %20845 = vpow2.f32 %v16304_v46  ;;  %v5502_v46 = vadd.f32 %v22970_v44, %v22231_v53  ;;  %6869 = vmatpush1.bf16.msra.mxu0 %v19028_v13  ;;  %6725 = vmatpush1.bf16.msra.mxu1 %v19031_v42  ;;  %v19037_v44 = vld [vmem:[#allocation7 + $0x1c0] ss:$16 sps:$4 sm:$0xff]  }
 0x539   :  { %v20828_v1 = vpop.eup %20827  ;;  %20847 = vrcp.f32 %v5596_v25  ;;  %v5599_v19 = vadd.f32 1.0, %v20826_v8  ;;  %v19039_v25 = vld [vmem:[#allocation7 + $0x1c4] ss:$16 sps:$4 sm:$0xff]   ;;  %6870 = vmatprep.subr.bf16.mxu0 %v19036_v6  ;;  %v16307_v6 = vmul.f32 -1.442695, %v5501_v38 }
 0x53a   :  { %v20830_v17 = vpop.eup %20829  ;;  %20849 = vpow2.f32 %v16327_v57  ;;  %v5601_v36 = vadd.f32 1.0, %v20828_v1  ;;  %v16308_v20 = vmul.f32 -1.442695, %v5502_v46  ;;  %6726 = vmatprep.subr.bf16.mxu1 %v19039_v25  ;;  %v19040_v46 = vld [vmem:[#allocation7 + $0x1c8] ss:$16 sps:$4 sm:$0xff]  }
 0x53b   :  { %v20832_v5 = vpop.eup %20831  ;;  %20851 = vrcp.f32 %v5598_v55  ;;  %v5600_v45 = vadd.f32 1.0, %v20830_v17  ;;  %v19034_v55 = vld [vmem:[#allocation7 + $0x1a8] ss:$16 sps:$4 sm:$0xff]   ;;  %v19043_v25 = vld [vmem:[#allocation7 + $0x1e0] ss:$16 sps:$4 sm:$0xff]  }
 0x53c   :  { %v23033_v16 = vpop.eup %20833  ;;  %20853 = vrcp.f32 %v5597_v35  ;;  %v5743_v57 = vadd.f32 1.0, %v20832_v5  ;;  %6871 = vmatpush1.bf16.msra.mxu0 %v19034_v55  ;;  %6727 = vmatpush1.bf16.msra.mxu1 %v19037_v44  ;;  %v19051_v55 = vld [vmem:[#allocation7 + $0x204] ss:$16 sps:$4 sm:$0xff]   ;;  %v23061_v44 = vrot.slane %v22919_v23, %v623_v14 }
 0x53d   :  { %v20836_v59 = vpop.eup %20835  ;;  %20855 = vrcp.f32 %v5740_v43  ;;  %6872 = vmatprep.subr.bf16.mxu0 %v19042_v60  ;;  %v19046_v60 = vld [vmem:[#allocation7 + $0x1e8] ss:$16 sps:$4 sm:$0xff]  }
 0x53e   :  { %v20838_v33 = vpop.eup %20837  ;;  %20857 = vpow2.f32 %v16306_v49  ;;  %v5602_v35 = vadd.f32 1.0, %v20836_v59 }
 0x53f   :  { %v23042_v28 = vpop.eup %20839  ;;  %20859 = vrcp.f32 %v5599_v19  ;;  %v5604_v17 = vadd.f32 1.0, %v20838_v33  ;;  %v19045_v19 = vld [vmem:[#allocation7 + $0x1e4] ss:$16 sps:$4 sm:$0xff]  }
 0x540   :  { %24234 = vst [vmem:[#allocation55_spill] sm:$0xff] %v23042_v28  ;;  %v23044_v8 = vpop.eup %20841  ;;  %20861 = vrcp.f32 %v5601_v36  ;;  %6728 = vmatprep.subr.bf16.mxu1 %v19045_v19  ;;  %6873 = vmatpush1.bf16.msra.mxu0 %v19040_v46 }
 0x541   :  { %v23048_v43 = vpop.eup %20843  ;;  %20863 = vrcp.f32 %v5600_v45  ;;  %6729 = vmatpush1.bf16.msra.mxu1 %v19043_v25  ;;  %6874 = vmatprep.subr.bf16.mxu0 %v19048_v21 }
 0x542   :  { %v20846_v42 = vpop.eup %20845  ;;  %20865 = vrcp.f32 %v5743_v57  ;;  %6771 = vmatprep.subr.bf16.mxu1 %v19051_v55 }
 0x543   :  { %v23053_v59 = vpop.eup %20847  ;;  %v5603_v38 = vadd.f32 1.0, %v20846_v42 }
 0x544   :  { %v5158_v53 = vpop.f32.mrb[48].mxu1  ;;  %v20850_v33 = vpop.eup %20849  ;;  %6875 = vmatpush1.bf16.msra.mxu0 %v19046_v60 }
 0x545   :  { %v5231_v22 = vpop.f32.mrb[64].mxu0  ;;  %v5160_v1 = vpop.f32.mrb[49].mxu1  ;;  %v5420_v36 = vadd.f32 %v5158_v53, %v23040_v41 }
 0x546   :  { %v5422_v49 = vadd.f32 %v5231_v22, %v22325_v31  ;;  %v5233_v13 = vpop.f32.mrb[65].mxu0  ;;  %v5162_v5 = vpop.f32.mrb[50].mxu1  ;;  %v16330_v22 = vmul.f32 -1.442695, %v5503_v56  ;;  %v5421_v25 = vadd.f32 %v5160_v1, %v23061_v44 }
 0x547   :  { %v5235_v0 = vpop.f32.mrb[66].mxu0  ;;  %v5164_v18 = vpop.f32.mrb[51].mxu1  ;;  %v5432_v53 = vadd.f32 %v5162_v5, %v23040_v41  ;;  %v5423_v5 = vadd.f32 %v5233_v13, %v22334_v4 }
 0x548   :  { %20867 = vtanh.f32 %v5422_v49  ;;  %v5237_v45 = vpop.f32.mrb[67].mxu0  ;;  %v23055_v57 = vpop.eup %20851  ;;  %v16310_v49 = vmul.f32 -1.442695, %v5420_v36  ;;  %v5434_v21 = vadd.f32 %v5235_v0, %v22325_v31  ;;  %v5968_v0 = vmul.f32 %v23000_v3, %v22379_v47 }
 0x549   :  { %20869 = vrcp.f32 %v5602_v35  ;;  %24235 = vst [vmem:[#allocation56_spill] sm:$0xff] %v23055_v57  ;;  %v23058_v28 = vpop.eup %20853  ;;  %v5746_v35 = vadd.f32 1.0, %v20850_v33  ;;  %v16313_v23 = vmul.f32 -1.442695, %v5432_v53  ;;  %v5435_v1 = vadd.f32 %v5237_v45, %v22334_v4 }
 0x54a   :  { %20871 = vrcp.f32 %v5604_v17  ;;  %v23063_v61 = vpop.eup %20855  ;;  %v19054_v17 = vld [vmem:[#allocation7 + $0x20c] ss:$16 sps:$4 sm:$0xff]  }
 0x54b   :  { %20873 = vpow2.f32 %v16308_v20  ;;  %v20858_v19 = vpop.eup %20857  ;;  %6917 = vmatprep.subr.bf16.mxu0 %v19054_v17 }
 0x54c   :  { %20875 = vpow2.f32 %v16307_v6  ;;  %v5168_v56 = vpop.f32.mrb[52].mxu1  ;;  %v23066_v36 = vpop.eup %20859 }
 0x54d   :  { %20877 = vpow2.f32 %v16330_v22  ;;  %v5241_v42 = vpop.f32.mrb[68].mxu0  ;;  %v5170_v20 = vpop.f32.mrb[53].mxu1  ;;  %v5444_v14 = vadd.f32 %v5168_v56, %v23040_v41 }
 0x54e   :  { %20879 = vrcp.f32 %v5603_v38  ;;  %v5243_v46 = vpop.f32.mrb[69].mxu0  ;;  %v5172_v33 = vpop.f32.mrb[54].mxu1  ;;  %v5605_v38 = vadd.f32 1.0, %v20858_v19  ;;  %v16311_v19 = vmul.f32 -1.442695, %v5421_v25  ;;  %v5445_v3 = vadd.f32 %v5170_v20, %v23061_v44 }
 0x54f   :  { %v23069_v6 = vpop.eup %20861  ;;  %20881 = vpow2.f32 %v16310_v49  ;;  %v5245_v22 = vpop.f32.mrb[70].mxu0  ;;  %v5433_v49 = vadd.f32 %v5164_v18, %v23061_v44  ;;  %v16316_v60 = vmul.f32 -1.442695, %v5444_v14  ;;  %v5456_v17 = vadd.f32 %v5172_v33, %v23040_v41 }
 0x550   :  { %24236 = vst [vmem:[#allocation57_spill] sm:$0xff] %v23069_v6  ;;  %v23073_v13 = vpop.f32.mrb[55].mxu1  ;;  %v23075_v55 = vpop.eup %20863  ;;  %20883 = vrcp.f32 %v5746_v35  ;;  %v5446_v18 = vadd.f32 %v5241_v42, %v22325_v31  ;;  %v5447_v33 = vadd.f32 %v5243_v46, %v22334_v4 }
 0x551   :  { %v23077_v53 = vpop.f32.mrb[71].mxu0  ;;  %v23079_v56 = vpop.eup %20865  ;;  %20885 = vtanh.f32 %v5423_v5  ;;  %v16314_v47 = vmul.f32 -1.442695, %v5433_v49 }
 0x552   :  { %v20868_v6 = vpop.eup %20867  ;;  %20887 = vpow2.f32 %v16313_v23 }
 0x553   :  { %v23085_v57 = vpop.eup %20869  ;;  %v5992_v35 = vmul.f32 %v20868_v6, %v22990_v29  ;;  %20889 = vtanh.f32 %v5434_v21  ;;  %v16319_v21 = vmul.f32 -1.442695, %v5456_v17 }
 0x554   :  { %24237 = vst [vmem:[#allocation58_spill] sm:$0xff] %v23085_v57  ;;  %v23089_v11 = vpop.eup %20871  ;;  %20891 = vrcp.f32 %v5605_v38  ;;  %v5178_v45 = vpop.f32.mrb[56].mxu1  ;;  %v5974_v57 = vmul.f32 %v23030_v40, %v22406_v50 }
 0x555   :  { %24238 = vst [vmem:[#allocation59_spill] sm:$0xff] %v23089_v11  ;;  %v20874_v5 = vpop.eup %20873  ;;  %v23092_v48 = vadd.f32 %v5992_v35, %v5968_v0  ;;  %20893 = vtanh.f32 %v5435_v1  ;;  %v23095_v23 = vpop.f32.mrb[72].mxu0  ;;  %v5458_v11 = vadd.f32 %v5245_v22, %v22325_v31 }
 0x556   :  { %v23097_v29 = vpop.f32.mrb[57].mxu1  ;;  %v20876_v14 = vpop.eup %20875  ;;  %20895 = vpow2.f32 %v16316_v60  ;;  %v16317_v60 = vmul.f32 -1.442695, %v5445_v3  ;;  %v5607_v7 = vadd.f32 1.0, %v20874_v5  ;;  %v5971_v5 = vmul.f32 %v23014_v51, %v22389_v15 }
 0x557   :  { %v23100_v6 = vpop.f32.mrb[73].mxu0  ;;  %v23102_v25 = vpop.f32.mrb[58].mxu1  ;;  %20897 = vpow2.f32 %v16311_v19 }
 0x558   :  { %v20878_v42 = vpop.eup %20877  ;;  %v23104_v38 = vpop.f32.mrb[74].mxu0  ;;  %20899 = vtanh.f32 %v5446_v18 }
 0x559   :  { %v23106_v49 = vpop.f32.mrb[59].mxu1  ;;  %v23108_v20 = vpop.eup %20879  ;;  %20901 = vpow2.f32 %v16314_v47  ;;  %v5468_v47 = vadd.f32 %v5178_v45, %v23040_v41  ;;  %v5457_v45 = vadd.f32 %v23073_v13, %v23061_v44 }
 0x55a   :  { %24239 = vst [vmem:[#allocation60_spill] sm:$0xff] %v23108_v20  ;;  %v23110_v1 = vpop.f32.mrb[75].mxu0  ;;  %v20882_v0 = vpop.eup %20881  ;;  %20903 = vtanh.f32 %v5447_v33  ;;  %v5606_v20 = vadd.f32 1.0, %v20876_v14 }
 0x55b   :  { %v23112_v46 = vpop.eup %20883  ;;  %v5729_v35 = vadd.f32 1.0, %v20882_v0  ;;  %20905 = vpow2.f32 %v16319_v21  ;;  %v5749_v21 = vadd.f32 1.0, %v20878_v42 }
 0x55c   :  { %v20886_v19 = vpop.eup %20885  ;;  %v23116_v39 = vpop.f32.mrb[60].mxu1 }
 0x55d   :  { %v20888_v17 = vpop.eup %20887  ;;  %20907 = vrcp.f32 %v5729_v35  ;;  %v5993_v62 = vmul.f32 %v20886_v19, %v22996_v2  ;;  %v23119_v3 = vpop.f32.mrb[76].mxu0 }
 0x55e   :  { %v20890_v18 = vpop.eup %20889  ;;  %v5732_v63 = vadd.f32 1.0, %v20888_v17  ;;  %20909 = vpow2.f32 %v16317_v60  ;;  %v23121_v33 = vpop.f32.mrb[61].mxu1 }
 0x55f   :  { %v23123_v22 = vpop.eup %20891  ;;  %v5995_v2 = vmul.f32 %v20890_v18, %v23004_v58  ;;  %20911 = vtanh.f32 %v5458_v11  ;;  %v23128_v0 = vpop.f32.mrb[77].mxu0  ;;  %v5459_v58 = vadd.f32 %v23077_v53, %v22334_v4  ;;  %v16322_v18 = vmul.f32 -1.442695, %v5468_v47 }
 0x560   :  { %24240 = vst [vmem:[#allocation61_spill] sm:$0xff] %v23123_v22  ;;  %v23130_v14 = vpop.f32.mrb[62].mxu1  ;;  %v20894_v60 = vpop.eup %20893  ;;  %20913 = vrcp.f32 %v5732_v63 }
 0x561   :  { %v23134_v35 = vpop.f32.mrb[78].mxu0  ;;  %v23136_v19 = vpop.f32.mrb[63].mxu1  ;;  %20915 = vrcp.f32 %v5607_v7  ;;  %v6019_v15 = vadd.f32 %v5995_v2, %v5971_v5  ;;  %v5996_v51 = vmul.f32 %v20894_v60, %v23010_v24  ;;  %v16320_v5 = vmul.f32 -1.442695, %v5457_v45 }
 0x562   :  { %v20896_v17 = vpop.eup %20895  ;;  %v23141_v11 = vpop.f32.mrb[79].mxu0  ;;  %20917 = vrcp.f32 %v5606_v20  ;;  %v5470_v20 = vadd.f32 %v23095_v23, %v22325_v31  ;;  %v5977_v23 = vmul.f32 %v23048_v43, %v22427_v30  ;;  %v5482_v43 = vadd.f32 %v23104_v38, %v22325_v31 }
 0x563   :  { %v20898_v42 = vpop.eup %20897  ;;  %v5735_v63 = vadd.f32 1.0, %v20896_v17  ;;  %20919 = vrcp.f32 %v5749_v21  ;;  %v5483_v38 = vadd.f32 %v23110_v1, %v22334_v4 }
 0x564   :  { %v20900_v22 = vpop.eup %20899  ;;  %v5730_v21 = vadd.f32 1.0, %v20898_v42 }
 0x565   :  { %v20902_v13 = vpop.eup %20901  ;;  %20921 = vrcp.f32 %v5735_v63  ;;  %v5998_v7 = vmul.f32 %v20900_v22, %v23018_v12 }
 0x566   :  { %v20904_v24 = vpop.eup %20903  ;;  %20923 = vtanh.f32 %v5459_v58  ;;  %v5733_v12 = vadd.f32 1.0, %v20902_v13 }
 0x567   :  { %v20906_v2 = vpop.eup %20905  ;;  %v6022_v53 = vadd.f32 %v5998_v7, %v5974_v57  ;;  %v5999_v60 = vmul.f32 %v20904_v24, %v23026_v52  ;;  %20925 = vpow2.f32 %v16322_v18  ;;  %v5471_v57 = vadd.f32 %v23100_v6, %v22334_v4 }
 0x568   :  { %v20908_v47 = vpop.eup %20907  ;;  %20927 = vtanh.f32 %v23092_v48  ;;  %v5738_v17 = vadd.f32 1.0, %v20906_v2  ;;  %v5480_v52 = vadd.f32 %v23102_v25, %v23040_v41  ;;  %v5469_v6 = vadd.f32 %v23097_v29, %v23061_v44 }
 0x569   :  { %v20910_v50 = vpop.eup %20909  ;;  %v5969_v40 = vmul.f32 %v20908_v47, %v22385_v9  ;;  %20929 = vpow2.f32 %v16320_v5  ;;  %v5492_v29 = vadd.f32 %v23116_v39, %v23040_v41 }
 0x56a   :  { %v20912_v22 = vpop.eup %20911  ;;  %20931 = vrcp.f32 %v5738_v17  ;;  %v5736_v63 = vadd.f32 1.0, %v20910_v50  ;;  %v16323_v5 = vmul.f32 -1.442695, %v5469_v6 }
 0x56b   :  { %v20914_v45 = vpop.eup %20913  ;;  %v6017_v48 = vadd.f32 %v5993_v62, %v5969_v40  ;;  %v6001_v58 = vmul.f32 %v20912_v22, %v23033_v16  ;;  %20933 = vtanh.f32 %v5470_v20  ;;  %v16325_v62 = vmul.f32 -1.442695, %v5480_v52 }
 0x56c   :  { %v23158_v42 = vpop.eup %20915  ;;  %20935 = vrcp.f32 %v5730_v21  ;;  %v5972_v9 = vmul.f32 %v20914_v45, %v22401_v10  ;;  %v16328_v21 = vmul.f32 -1.442695, %v5492_v29  ;;  %v5493_v45 = vadd.f32 %v23121_v33, %v23061_v44 }
 0x56d   :  { %v23163_v18 = vpop.eup %20917  ;;  %20937 = vrcp.f32 %v5733_v12  ;;  %v6025_v25 = vadd.f32 %v6001_v58, %v5977_v23  ;;  %v5495_v23 = vadd.f32 %v23128_v0, %v22334_v4 }
 0x56e   :  { %v23165_v13 = vpop.eup %20919  ;;  %v6020_v30 = vadd.f32 %v5996_v51, %v5972_v9  ;;  %20939 = vtanh.f32 %v5471_v57  ;;  %v16329_v6 = vmul.f32 -1.442695, %v5493_v45 }
 0x56f   :  { %v20922_v16 = vpop.eup %20921  ;;  %20941 = vtanh.f32 %v6019_v15 }
 0x570   :  { %v20924_v7 = vpop.eup %20923  ;;  %v5975_v10 = vmul.f32 %v20922_v16, %v22416_v32  ;;  %20943 = vrcp.f32 %v5736_v63  ;;  %v5983_v63 = vmul.f32 %v23079_v56, %v22474_v34  ;;  %v5505_v34 = vadd.f32 %v23136_v19, %v23061_v44  ;;  %v24241_v19 = vld [vmem:[#allocation58_spill] sm:$0xff] }
 0x571   :  { %v20926_v24 = vpop.eup %20925  ;;  %20945 = vtanh.f32 %v6022_v53  ;;  %v6002_v2 = vmul.f32 %v20924_v7, %v23044_v8  ;;  %v5481_v8 = vadd.f32 %v23106_v49, %v23061_v44  ;;  %v5504_v49 = vadd.f32 %v23130_v14, %v23040_v41 }
 0x572   :  { %v23173_v51 = vpop.eup %20927  ;;  %v6023_v20 = vadd.f32 %v5999_v60, %v5975_v10  ;;  %v5741_v47 = vadd.f32 1.0, %v20926_v24  ;;  %20947 = vpow2.f32 %v16325_v62  ;;  %v5980_v60 = vmul.f32 %v23063_v61, %v22465_v54 }
 0x573   :  { %v20930_v15 = vpop.eup %20929  ;;  %20949 = vtanh.f32 %v5482_v43  ;;  %v16326_v61 = vmul.f32 -1.442695, %v5481_v8  ;;  %v16331_v41 = vmul.f32 -1.442695, %v5504_v49  ;;  %v5507_v7 = vadd.f32 %v23141_v11, %v22334_v4  ;;  %v24242_v4 = vld [vmem:[#allocation35_spill] sm:$0xff]  ;;  %v24244_v8 = vld [vmem:[#allocation46_spill] sm:$0xff] }
 0x574   :  { %v20932_v32 = vpop.eup %20931  ;;  %20951 = vpow2.f32 %v16323_v5  ;;  %v5739_v1 = vadd.f32 1.0, %v20930_v15  ;;  %v5986_v44 = vmul.f32 %v23112_v46, %v22486_v26  ;;  %v24247_v49 = vld [vmem:[#allocation47_spill] sm:$0xff] }
 0x575   :  { %v20934_v17 = vpop.eup %20933  ;;  %v5978_v39 = vmul.f32 %v20932_v32, %v22460_v27  ;;  %20953 = vrcp.f32 %v5741_v47  ;;  %v5494_v27 = vadd.f32 %v23119_v3, %v22325_v31 }
 0x576   :  { %v23180_v53 = vpop.eup %20935  ;;  %20955 = vtanh.f32 %v6017_v48  ;;  %v6004_v50 = vmul.f32 %v20934_v17, %v23053_v59  ;;  %v24243_v17 = vld [vmem:[#allocation60_spill] sm:$0xff] }
 0x577   :  { %v23185_v40 = vpop.eup %20937  ;;  %v6026_v12 = vadd.f32 %v6002_v2, %v5978_v39  ;;  %20957 = vtanh.f32 %v5483_v38 }
 0x578   :  { %v20940_v22 = vpop.eup %20939  ;;  %v6028_v57 = vadd.f32 %v6004_v50, %v5980_v60  ;;  %20959 = vpow2.f32 %v16328_v21  ;;  %v24245_v50 = vld [vmem:[#allocation36_spill] sm:$0xff] }
 0x579   :  { %v23191_v52 = vpop.eup %20941  ;;  %20961 = vtanh.f32 %v6025_v25  ;;  %v6005_v54 = vmul.f32 %v20940_v22, %v23058_v28  ;;  %v5506_v28 = vadd.f32 %v23134_v35, %v22325_v31  ;;  %v24246_v22 = vld [vmem:[#allocation43_spill] sm:$0xff] }
 0x57a   :  { %v23194_v59 = vpop.eup %20943  ;;  %20963 = vtanh.f32 %v6020_v30 }
 0x57b   :  { %v23200_v48 = vpop.eup %20945  ;;  %20965 = vrcp.f32 %v5739_v1 }
 0x57c   :  { %v20948_v3 = vpop.eup %20947  ;;  %20967 = vtanh.f32 %v5494_v27 }
 0x57d   :  { %v20950_v14 = vpop.eup %20949  ;;  %v5744_v58 = vadd.f32 1.0, %v20948_v3  ;;  %20969 = vpow2.f32 %v16326_v61 }
 0x57e   :  { %v20952_v9 = vpop.eup %20951  ;;  %v6007_v33 = vmul.f32 %v20950_v14, %v23066_v36  ;;  %20971 = vtanh.f32 %v5495_v23 }
 0x57f   :  { %v20954_v0 = vpop.eup %20953  ;;  %20973 = vrcp.f32 %v5744_v58  ;;  %v5742_v10 = vadd.f32 1.0, %v20952_v9 }
 0x580   :  { %v23207_v25 = vpop.eup %20955  ;;  %v5981_v30 = vmul.f32 %v20954_v0, %v22472_v37  ;;  %v6031_v62 = vadd.f32 %v6007_v33, %v5983_v63  ;;  %20975 = vpow2.f32 %v16331_v41  ;;  %v24249_v33 = vld [vmem:[#allocation61_spill] sm:$0xff] }
 0x581   :  { %v20958_v16 = vpop.eup %20957  ;;  %20977 = vtanh.f32 %v5506_v28  ;;  %v24248_v28 = vld [vmem:[#allocation49_spill] sm:$0xff] }
 0x582   :  { %v20960_v43 = vpop.eup %20959  ;;  %v6029_v31 = vadd.f32 %v6005_v54, %v5981_v30  ;;  %v6008_v35 = vmul.f32 %v20958_v16, %v23075_v55  ;;  %20979 = vpow2.f32 %v16329_v6  ;;  %v16332_v55 = vmul.f32 -1.442695, %v5505_v34 }
 0x583   :  { %v23213_v36 = vpop.eup %20961  ;;  %20981 = vtanh.f32 %v6023_v20  ;;  %v5747_v56 = vadd.f32 1.0, %v20960_v43  ;;  %v5989_v9 = vmul.f32 %v23165_v13, %v24248_v28  ;;  %v24253_v28 = vld [vmem:[#allocation51_spill] sm:$0xff] }
 0x584   :  { %v23217_v37 = vpop.eup %20963  ;;  %20983 = vtanh.f32 %v6026_v12 }
 0x585   :  { %v23219_v5 = vpop.eup %20965  ;;  %20985 = vrcp.f32 %v5747_v56  ;;  %v5304_v20 = vpop.f32.mrb[64].mxu1 }
 0x586   :  { %v20968_v29 = vpop.eup %20967  ;;  %20987 = vtanh.f32 %v6028_v57  ;;  %v5424_v11 = vadd.f32 %v5304_v20, %v24242_v4  ;;  %v5377_v15 = vpop.f32.mrb[80].mxu0 }
 0x587   :  { %v20970_v24 = vpop.eup %20969  ;;  %v6010_v2 = vmul.f32 %v20968_v29, %v24241_v19  ;;  %20989 = vtanh.f32 %v5507_v7  ;;  %v5306_v38 = vpop.f32.mrb[65].mxu1  ;;  %v5426_v60 = vadd.f32 %v5377_v15, %v24244_v8 }
 0x588   :  { %v20972_v47 = vpop.eup %20971  ;;  %20991 = vrcp.f32 %v5742_v10  ;;  %v5425_v1 = vadd.f32 %v5306_v38, %v24245_v50  ;;  %v5379_v26 = vpop.f32.mrb[81].mxu0  ;;  %v5745_v27 = vadd.f32 1.0, %v20970_v24  ;;  %v24250_v10 = vld [vmem:[#allocation48_spill] sm:$0xff] }
 0x589   :  { %v20974_v32 = vpop.eup %20973  ;;  %v23225_v21 = vadd.f32 %v6010_v2, %v5986_v44  ;;  %v6011_v39 = vmul.f32 %v20972_v47, %v24243_v17  ;;  %v5308_v46 = vpop.f32.mrb[66].mxu1  ;;  %20993 = vpow2.f32 %v16332_v55  ;;  %v5427_v54 = vadd.f32 %v5379_v26, %v24247_v49 }
 0x58a   :  { %v20976_v12 = vpop.eup %20975  ;;  %v5984_v57 = vmul.f32 %v20974_v32, %v24246_v22  ;;  %v5381_v61 = vpop.f32.mrb[82].mxu0  ;;  %20995 = vtanh.f32 %v6031_v62  ;;  %v16334_v41 = vmul.f32 -1.442695, %v5426_v60  ;;  %v16333_v30 = vmul.f32 -1.442695, %v5425_v1 }
 0x58b   :  { %v5310_v45 = vpop.f32.mrb[67].mxu1  ;;  %v20978_v23 = vpop.eup %20977  ;;  %v5750_v3 = vadd.f32 1.0, %v20976_v12  ;;  %20997 = vtanh.f32 %v5424_v11  ;;  %v5438_v16 = vadd.f32 %v5381_v61, %v24244_v8  ;;  %v16335_v34 = vmul.f32 -1.442695, %v5427_v54  ;;  %v24251_v61 = vld [vmem:[#allocation37_spill] sm:$0xff] }
 0x58c   :  { %v5383_v14 = vpop.f32.mrb[83].mxu0  ;;  %v20980_v58 = vpop.eup %20979  ;;  %v6032_v63 = vadd.f32 %v6008_v35, %v5984_v57  ;;  %v6013_v6 = vmul.f32 %v20978_v23, %v24249_v33  ;;  %v5437_v13 = vadd.f32 %v5310_v45, %v24245_v50  ;;  %v5436_v2 = vadd.f32 %v5308_v46, %v24242_v4 }
 0x58d   :  { %v23235_v0 = vpop.eup %20981  ;;  %20999 = vrcp.f32 %v5750_v3  ;;  %v5748_v7 = vadd.f32 1.0, %v20980_v58  ;;  %v5439_v55 = vadd.f32 %v5383_v14, %v24247_v49  ;;  %v5314_v24 = vpop.f32.mrb[68].mxu1  ;;  %v16337_v20 = vmul.f32 -1.442695, %v5438_v16  ;;  %v24252_v3 = vld [vmem:[#allocation52_spill] sm:$0xff] }
 0x58e   :  { %v23238_v43 = vpop.eup %20983  ;;  %21001 = vrcp.f32 %v5745_v27  ;;  %v23240_v62 = vadd.f32 %v6013_v6, %v5989_v9  ;;  %v5387_v44 = vpop.f32.mrb[84].mxu0  ;;  %v16336_v1 = vmul.f32 -1.442695, %v5437_v13  ;;  %v5970_v45 = vmul.f32 %v23180_v53, %v24251_v61 }
 0x58f   :  { %v20986_v56 = vpop.eup %20985  ;;  %21003 = vpow2.f32 %v16334_v41  ;;  %v5316_v47 = vpop.f32.mrb[69].mxu1  ;;  %v16338_v22 = vmul.f32 -1.442695, %v5439_v55 }
 0x590   :  { %v23243_v35 = vpop.eup %20987  ;;  %21005 = vtanh.f32 %v6029_v31  ;;  %v5987_v29 = vmul.f32 %v20986_v56, %v24250_v10  ;;  %v5389_v11 = vpop.f32.mrb[85].mxu0  ;;  %v5450_v31 = vadd.f32 %v5387_v44, %v24244_v8 }
 0x591   :  { %v20990_v19 = vpop.eup %20989  ;;  %21007 = vpow2.f32 %v16333_v30  ;;  %v5318_v17 = vpop.f32.mrb[70].mxu1  ;;  %v5451_v53 = vadd.f32 %v5389_v11, %v24247_v49 }
 0x592   :  { %v23248_v15 = vpop.eup %20991  ;;  %v23250_v38 = vadd.f32 %v6011_v39, %v5987_v29  ;;  %v6014_v32 = vmul.f32 %v20990_v19, %v23163_v18  ;;  %21009 = vpow2.f32 %v16335_v34  ;;  %v23254_v60 = vpop.f32.mrb[86].mxu0  ;;  %v5448_v18 = vadd.f32 %v5314_v24, %v24242_v4 }
 0x593   :  { %21011 = vrcp.f32 %v5748_v7  ;;  %v23256_v26 = vpop.f32.mrb[71].mxu1  ;;  %v23258_v46 = vpop.f32.mrb[87].mxu0  ;;  %v16340_v27 = vmul.f32 -1.442695, %v5450_v31 }
 0x594   :  { %v20994_v12 = vpop.eup %20993  ;;  %21013 = vtanh.f32 %v6032_v63  ;;  %v5449_v63 = vadd.f32 %v5316_v47, %v24245_v50 }
 0x595   :  { %v23260_v57 = vpop.eup %20995  ;;  %21015 = vtanh.f32 %v5436_v2  ;;  %v5751_v23 = vadd.f32 1.0, %v20994_v12  ;;  %v23266_v14 = vpop.f32.mrb[72].mxu1 }
 0x596   :  { %v20998_v39 = vpop.eup %20997  ;;  %21017 = vpow2.f32 %v16337_v20  ;;  %v23272_v33 = vpop.f32.mrb[88].mxu0  ;;  %v16339_v20 = vmul.f32 -1.442695, %v5449_v63 }
 0x597   :  { %v21000_v54 = vpop.eup %20999  ;;  %v5994_v41 = vmul.f32 %v20998_v39, %v24252_v3  ;;  %21019 = vpow2.f32 %v16336_v1  ;;  %v23274_v6 = vpop.f32.mrb[73].mxu1  ;;  %v5460_v1 = vadd.f32 %v5318_v17, %v24242_v4  ;;  %v24254_v39 = vld [vmem:[#allocation38_spill] sm:$0xff]  ;;  %v5462_v17 = vadd.f32 %v23254_v60, %v24244_v8 }
 0x598   :  { %v23268_v58 = vpop.eup %21001  ;;  %v5990_v9 = vmul.f32 %v21000_v54, %v24253_v28  ;;  %21021 = vpow2.f32 %v16338_v22  ;;  %v23277_v34 = vpop.f32.mrb[89].mxu0  ;;  %v24255_v54 = vld [vmem:[#allocation53_spill] sm:$0xff]  ;;  %v5463_v60 = vadd.f32 %v23258_v46, %v24247_v49 }
 0x599   :  { %v21004_v30 = vpop.eup %21003  ;;  %v6018_v16 = vadd.f32 %v5994_v41, %v5970_v45  ;;  %21023 = vtanh.f32 %v5448_v18  ;;  %v23279_v56 = vpop.f32.mrb[74].mxu1 }
 0x59a   :  { %v23281_v7 = vpop.eup %21005  ;;  %v23283_v13 = vadd.f32 %v6014_v32, %v5990_v9  ;;  %v5897_v10 = vadd.f32 1.0, %v21004_v30  ;;  %21025 = vpow2.f32 %v16340_v27  ;;  %v23285_v29 = vpop.f32.mrb[90].mxu0  ;;  %v16341_v32 = vmul.f32 -1.442695, %v5451_v53 }
 0x59b   :  { %v23287_v55 = vpop.f32.mrb[75].mxu1  ;;  %v21008_v24 = vpop.eup %21007  ;;  %21027 = vrcp.f32 %v5751_v23  ;;  %v5973_v27 = vmul.f32 %v23185_v40, %v24254_v39  ;;  %v16343_v39 = vmul.f32 -1.442695, %v5462_v17  ;;  %v16344_v46 = vmul.f32 -1.442695, %v5463_v60 }
 0x59c   :  { %v23289_v44 = vpop.f32.mrb[91].mxu0  ;;  %v21010_v19 = vpop.eup %21009  ;;  %21029 = vtanh.f32 %v6018_v16  ;;  %v5896_v2 = vadd.f32 1.0, %v21008_v24  ;;  %v5461_v16 = vadd.f32 %v23256_v26, %v24245_v50 }
 0x59d   :  { %v23291_v47 = vpop.eup %21011  ;;  %21031 = vrcp.f32 %v5897_v10  ;;  %v5898_v11 = vadd.f32 1.0, %v21010_v19  ;;  %v23296_v22 = vpop.f32.mrb[76].mxu1 }
 0x59e   :  { %v23293_v31 = vpop.eup %21013  ;;  %21033 = vrcp.f32 %v5896_v2  ;;  %v23301_v45 = vpop.f32.mrb[92].mxu0 }
 0x59f   :  { %v21016_v12 = vpop.eup %21015  ;;  %21035 = vrcp.f32 %v5898_v11  ;;  %v23303_v23 = vpop.f32.mrb[77].mxu1  ;;  %v24256_v11 = vld [vmem:[#allocation39_spill] sm:$0xff] }
 0x5a0   :  { %v21018_v18 = vpop.eup %21017  ;;  %v5997_v61 = vmul.f32 %v21016_v12, %v24255_v54  ;;  %21037 = vpow2.f32 %v16339_v20  ;;  %v23307_v28 = vpop.f32.mrb[93].mxu0 }
 0x5a1   :  { %v21020_v3 = vpop.eup %21019  ;;  %v5900_v41 = vadd.f32 1.0, %v21018_v18  ;;  %21039 = vpow2.f32 %v16341_v32  ;;  %v23309_v9 = vpop.f32.mrb[78].mxu1  ;;  %v5976_v32 = vmul.f32 %v23194_v59, %v24256_v11  ;;  %v5472_v59 = vadd.f32 %v23266_v14, %v24242_v4 }
 0x5a2   :  { %v21022_v63 = vpop.eup %21021  ;;  %v6021_v30 = vadd.f32 %v5997_v61, %v5973_v27  ;;  %v5899_v40 = vadd.f32 1.0, %v21020_v3  ;;  %21041 = vtanh.f32 %v5460_v1  ;;  %v23313_v53 = vpop.f32.mrb[94].mxu0  ;;  %v24257_v1 = vld [vmem:[#allocation54_spill] sm:$0xff]  ;;  %v16342_v61 = vmul.f32 -1.442695, %v5461_v16 }
 0x5a3   :  { %v23315_v10 = vpop.f32.mrb[79].mxu1  ;;  %v21024_v24 = vpop.eup %21023  ;;  %21043 = vrcp.f32 %v5900_v41  ;;  %v5901_v19 = vadd.f32 1.0, %v21022_v63  ;;  %v5474_v41 = vadd.f32 %v23272_v33, %v24244_v8 }
 0x5a4   :  { %v23319_v2 = vpop.f32.mrb[95].mxu0  ;;  %v21026_v20 = vpop.eup %21025  ;;  %21045 = vtanh.f32 %v6021_v30  ;;  %v6000_v12 = vmul.f32 %v21024_v24, %v24257_v1  ;;  %v5473_v30 = vadd.f32 %v23274_v6, %v24245_v50 }
 0x5a5   :  { %v23324_v26 = vpop.eup %21027  ;;  %21047 = vrcp.f32 %v5899_v40  ;;  %v5903_v18 = vadd.f32 1.0, %v21026_v20  ;;  %v16346_v11 = vmul.f32 -1.442695, %v5474_v41 }
 0x5a6   :  { %v21030_v27 = vpop.eup %21029  ;;  %21049 = vrcp.f32 %v5901_v19  ;;  %v6024_v54 = vadd.f32 %v6000_v12, %v5976_v32  ;;  %v5475_v19 = vadd.f32 %v23277_v34, %v24247_v49  ;;  %v16345_v6 = vmul.f32 -1.442695, %v5473_v30  ;;  %v24258_v12 = vld [vmem:[#allocation40_spill] sm:$0xff] }
 0x5a7   :  { %v21032_v3 = vpop.eup %21031  ;;  %21051 = vrcp.f32 %v5903_v18  ;;  %v24259_v18 = vld [vmem:[#allocation55_spill] sm:$0xff]  ;;  %v5485_v34 = vadd.f32 %v23287_v55, %v24245_v50 }
 0x5a8   :  { %v21034_v63 = vpop.eup %21033  ;;  %21053 = vtanh.f32 %v6024_v54  ;;  %v6065_v17 = vmul.f32 %v21032_v3, %v23207_v25  ;;  %v5486_v25 = vadd.f32 %v23285_v29, %v24244_v8  ;;  %v16347_v54 = vmul.f32 -1.442695, %v5475_v19 }
 0x5a9   :  { %v21036_v40 = vpop.eup %21035  ;;  %21055 = vpow2.f32 %v16343_v39  ;;  %v6064_v16 = vmul.f32 %v21034_v63, %v23173_v51  ;;  %v5979_v51 = vmul.f32 %v23219_v5, %v24258_v12  ;;  %v5484_v29 = vadd.f32 %v23279_v56, %v24242_v4 }
 0x5aa   :  { %v21038_v24 = vpop.eup %21037  ;;  %21057 = vpow2.f32 %v16342_v61  ;;  %v6066_v33 = vmul.f32 %v21036_v40, %v21030_v27  ;;  %v16349_v5 = vmul.f32 -1.442695, %v5486_v25  ;;  %v16348_v55 = vmul.f32 -1.442695, %v5485_v34  ;;  %v19066_v34 = vld [vmem:[#allocation7 + $0x24c] ss:$16 sps:$4 sm:$0xff]  }
 0x5ab   :  { %v21040_v60 = vpop.eup %21039  ;;  %v5902_v20 = vadd.f32 1.0, %v21038_v24  ;;  %21059 = vpow2.f32 %v16344_v46  ;;  %v5487_v40 = vadd.f32 %v23289_v44, %v24247_v49  ;;  %v19049_v24 = vld [vmem:[#allocation7 + $0x200] ss:$16 sps:$4 sm:$0xff]  }
 0x5ac   :  { %v21042_v14 = vpop.eup %21041  ;;  %v5904_v32 = vadd.f32 1.0, %v21040_v60  ;;  %21061 = vtanh.f32 %v5472_v59  ;;  %v19055_v44 = vld [vmem:[#allocation7 + $0x220] ss:$16 sps:$4 sm:$0xff]  }
 0x5ad   :  { %v21044_v1 = vpop.eup %21043  ;;  %21063 = vrcp.f32 %v5902_v20  ;;  %v6003_v39 = vmul.f32 %v21042_v14, %v24259_v18  ;;  %v19057_v20 = vld [vmem:[#allocation7 + $0x224] ss:$16 sps:$4 sm:$0xff]   ;;  %v16350_v12 = vmul.f32 -1.442695, %v5487_v40  ;;  %v5498_v18 = vadd.f32 %v23301_v45, %v24244_v8 }
 0x5ae   :  { %v21046_v27 = vpop.eup %21045  ;;  %21065 = vrcp.f32 %v5904_v32  ;;  %v6068_v61 = vmul.f32 %v21044_v1, %v23217_v37  ;;  %v19052_v37 = vld [vmem:[#allocation7 + $0x208] ss:$16 sps:$4 sm:$0xff]  }
 0x5af   :  { %v21048_v3 = vpop.eup %21047  ;;  %v6027_v46 = vadd.f32 %v6003_v39, %v5979_v51  ;;  %21067 = vpow2.f32 %v16346_v11  ;;  %v19060_v11 = vld [vmem:[#allocation7 + $0x22c] ss:$16 sps:$4 sm:$0xff]   ;;  %v19063_v39 = vld [vmem:[#allocation7 + $0x244] ss:$16 sps:$4 sm:$0xff]  }
 0x5b0   :  { %v21050_v41 = vpop.eup %21049  ;;  %21069 = vpow2.f32 %v16345_v6  ;;  %v6089_v63 = vpack.c.bf16 %v6068_v61, %v6065_v17  ;;  %v6067_v59 = vmul.f32 %v21048_v3, %v23191_v52  ;;  %v24261_v3 = vld [vmem:[#allocation56_spill] sm:$0xff] }
 0x5b1   :  { %v21052_v30 = vpop.eup %21051  ;;  %21071 = vtanh.f32 %v6027_v46  ;;  %v6069_v19 = vmul.f32 %v21050_v41, %v21046_v27  ;;  %v5497_v41 = vadd.f32 %v23303_v23, %v24245_v50  ;;  %v19072_v23 = vld [vmem:[#allocation7 + $0x26c] ss:$16 sps:$4 sm:$0xff]  }
 0x5b2   :  { %v21054_v60 = vpop.eup %21053  ;;  %21073 = vpow2.f32 %v16347_v54  ;;  %6730 = vmatprep.mubr.bf16.mxu1 %v6089_v63  ;;  %6876 = vmatprep.mubr.bf16.mxu0 %v6089_v63  ;;  %v6088_v56 = vpack.c.bf16 %v6067_v59, %v6064_v16  ;;  %v23350_v17 = vmul.f32 %v21052_v30, %v23235_v0  ;;  %v19058_v16 = vld [vmem:[#allocation7 + $0x228] ss:$16 sps:$4 sm:$0xff]   ;;  %v19061_v63 = vld [vmem:[#allocation7 + $0x240] ss:$16 sps:$4 sm:$0xff]   ;;  %v19069_v30 = vld [vmem:[#allocation7 + $0x264] ss:$16 sps:$4 sm:$0xff]  }
 0x5b3   :  { %v21056_v52 = vpop.eup %21055  ;;  %21075 = vtanh.f32 %v5484_v29  ;;  %v23352_v14 = vpack.c.bf16 %v6069_v19, %v6066_v33  ;;  %v5496_v33 = vadd.f32 %v23296_v22, %v24242_v4  ;;  %v24260_v54 = vld [vmem:[#allocation41_spill] sm:$0xff]  ;;  %v5499_v19 = vadd.f32 %v23307_v28, %v24247_v49  ;;  %v19075_v28 = vld [vmem:[#allocation7 + $0x284] ss:$16 sps:$4 sm:$0xff]  }
 0x5b4   :  { %v21058_v32 = vpop.eup %21057  ;;  %v5906_v6 = vadd.f32 1.0, %v21056_v52  ;;  %21077 = vpow2.f32 %v16349_v5  ;;  %6731 = vmatmul.mubr.bf16.vlgmr.msra.gmra.mrb[80].mxu1 %v6088_v56  ;;  %6877 = vmatmul.mubr.bf16.vlgmr.msra.gmra.mrb[96].mxu0 %v6088_v56  ;;  %v5982_v61 = vmul.f32 %v23248_v15, %v24260_v54  ;;  %v19064_v59 = vld [vmem:[#allocation7 + $0x248] ss:$16 sps:$4 sm:$0xff]   ;;  %v19067_v52 = vld [vmem:[#allocation7 + $0x260] ss:$16 sps:$4 sm:$0xff]  }
 0x5b5   :  { %v21060_v25 = vpop.eup %21059  ;;  %v5905_v1 = vadd.f32 1.0, %v21058_v32  ;;  %21079 = vpow2.f32 %v16348_v55  ;;  %6772 = vmatpush1.bf16.msra.mxu1 %v19049_v24  ;;  %6918 = vmatpush1.bf16.msra.mxu0 %v19052_v37  ;;  %v16352_v24 = vmul.f32 -1.442695, %v5498_v18  ;;  %v19070_v32 = vld [vmem:[#allocation7 + $0x268] ss:$16 sps:$4 sm:$0xff]   ;;  %v5510_v18 = vadd.f32 %v23313_v53, %v24244_v8 }
 0x5b6   :  { %v21062_v51 = vpop.eup %21061  ;;  %21081 = vrcp.f32 %v5906_v6  ;;  %v5907_v0 = vadd.f32 1.0, %v21060_v25  ;;  %6773 = vmatprep.subr.bf16.mxu1 %v19057_v20  ;;  %6919 = vmatprep.subr.bf16.mxu0 %v19060_v11  ;;  %v16351_v20 = vmul.f32 -1.442695, %v5497_v41  ;;  %v5511_v8 = vadd.f32 %v23319_v2, %v24247_v49  ;;  %v19084_v49 = vld [vmem:[#allocation7 + $0x2ac] ss:$16 sps:$4 sm:$0xff]  }
 0x5b7   :  { %v21064_v27 = vpop.eup %21063  ;;  %21083 = vrcp.f32 %v5905_v1  ;;  %v6006_v46 = vmul.f32 %v21062_v51, %v24261_v3  ;;  %v24263_v1 = vld [vmem:[#allocation57_spill] sm:$0xff] }
 0x5b8   :  { %v21066_v29 = vpop.eup %21065  ;;  %21085 = vrcp.f32 %v5907_v0  ;;  %v23364_v22 = vmul.f32 %v21064_v27, %v23200_v48 }
 0x5b9   :  { %v21068_v45 = vpop.eup %21067  ;;  %v6030_v5 = vadd.f32 %v6006_v46, %v5982_v61  ;;  %21087 = vpow2.f32 %v16350_v12  ;;  %6774 = vmatpush1.bf16.msra.mxu1 %v19055_v44  ;;  %6920 = vmatpush1.bf16.msra.mxu0 %v19058_v16  ;;  %v23366_v15 = vmul.f32 %v21066_v29, %v21054_v60  ;;  %v24262_v44 = vld [vmem:[#allocation42_spill] sm:$0xff]  ;;  %v19078_v16 = vld [vmem:[#allocation7 + $0x28c] ss:$16 sps:$4 sm:$0xff]   ;;  %v5508_v61 = vadd.f32 %v23309_v9, %v24242_v4 }
 0x5ba   :  { %v21070_v55 = vpop.eup %21069  ;;  %v5909_v40 = vadd.f32 1.0, %v21068_v45  ;;  %21089 = vtanh.f32 %v5496_v33  ;;  %6775 = vmatprep.subr.bf16.mxu1 %v19063_v39  ;;  %6921 = vmatprep.subr.bf16.mxu0 %v19066_v34  ;;  %v5985_v25 = vmul.f32 %v23268_v58, %v24262_v44  ;;  %v16353_v33 = vmul.f32 -1.442695, %v5499_v19  ;;  %v19073_v29 = vld [vmem:[#allocation7 + $0x280] ss:$16 sps:$4 sm:$0xff]  }
 0x5bb   :  { %v21072_v37 = vpop.eup %21071  ;;  %21091 = vtanh.f32 %v6030_v5  ;;  %v5908_v48 = vadd.f32 1.0, %v21070_v55  ;;  %v5509_v58 = vadd.f32 %v23315_v10, %v24245_v50  ;;  %v16355_v10 = vmul.f32 -1.442695, %v5510_v18  ;;  %v19076_v4 = vld [vmem:[#allocation7 + $0x288] ss:$16 sps:$4 sm:$0xff]  }
 0x5bc   :  { %v21074_v56 = vpop.eup %21073  ;;  %21093 = vrcp.f32 %v5909_v40  ;;  %v19081_v9 = vld [vmem:[#allocation7 + $0x2a4] ss:$16 sps:$4 sm:$0xff]   ;;  %v24265_v55 = vld [vmem:[#allocation59_spill] sm:$0xff] }
 0x5bd   :  { %v21076_v11 = vpop.eup %21075  ;;  %21095 = vrcp.f32 %v5908_v48  ;;  %v5910_v60 = vadd.f32 1.0, %v21074_v56  ;;  %6776 = vmatpush1.bf16.msra.mxu1 %v19061_v63  ;;  %6922 = vmatpush1.bf16.msra.mxu0 %v19064_v59  ;;  %v16354_v63 = vmul.f32 -1.442695, %v5509_v58  ;;  %v19082_v19 = vld [vmem:[#allocation7 + $0x2a8] ss:$16 sps:$4 sm:$0xff]  }
 0x5be   :  { %v21078_v6 = vpop.eup %21077  ;;  %v6009_v12 = vmul.f32 %v21076_v11, %v24263_v1  ;;  %21097 = vpow2.f32 %v16352_v24  ;;  %6777 = vmatprep.subr.bf16.mxu1 %v19069_v30  ;;  %6923 = vmatprep.subr.bf16.mxu0 %v19072_v23  ;;  %v16356_v23 = vmul.f32 -1.442695, %v5511_v8  ;;  %v19090_v11 = vld [vmem:[#allocation7 + $0x2cc] ss:$16 sps:$4 sm:$0xff]   ;;  %v19088_v1 = vld [vmem:[#allocation7 + $0x2c8] ss:$16 sps:$4 sm:$0xff]  }
 0x5bf   :  { %v21080_v51 = vpop.eup %21079  ;;  %21099 = vrcp.f32 %v5910_v60  ;;  %v5912_v0 = vadd.f32 1.0, %v21078_v6  ;;  %v24266_v58 = vld [vmem:[#allocation50_spill] sm:$0xff] }
 0x5c0   :  { %v21082_v39 = vpop.eup %21081  ;;  %v6033_v34 = vadd.f32 %v6009_v12, %v5985_v25  ;;  %v5911_v27 = vadd.f32 1.0, %v21080_v51  ;;  %21101 = vpow2.f32 %v16351_v20  ;;  %v19085_v25 = vld [vmem:[#allocation7 + $0x2c0] ss:$16 sps:$4 sm:$0xff]  }
 0x5c1   :  { %v21084_v54 = vpop.eup %21083  ;;  %21103 = vrcp.f32 %v5912_v0  ;;  %v6074_v3 = vmul.f32 %v21082_v39, %v23238_v43  ;;  %6778 = vmatpush1.bf16.msra.mxu1 %v19067_v52  ;;  %6924 = vmatpush1.bf16.msra.mxu0 %v19070_v32 }
 0x5c2   :  { %v21086_v46 = vpop.eup %21085  ;;  %21105 = vtanh.f32 %v6033_v34  ;;  %v6073_v53 = vmul.f32 %v21084_v54, %v23213_v36  ;;  %6779 = vmatprep.subr.bf16.mxu1 %v19075_v28  ;;  %6925 = vmatprep.subr.bf16.mxu0 %v19078_v16  ;;  %v24264_v36 = vld [vmem:[#allocation44_spill] sm:$0xff]  ;;  %v19096_v16 = vld [vmem:[#allocation7 + $0x2ec] ss:$16 sps:$4 sm:$0xff]  }
 0x5c3   :  { %v21088_v50 = vpop.eup %21087  ;;  %21107 = vrcp.f32 %v5911_v27  ;;  %v6092_v41 = vpack.c.bf16 %v6074_v3, %v23350_v17  ;;  %v6075_v43 = vmul.f32 %v21086_v46, %v21072_v37  ;;  %v5988_v30 = vmul.f32 %v23291_v47, %v24264_v36  ;;  %v19079_v47 = vld [vmem:[#allocation7 + $0x2a0] ss:$16 sps:$4 sm:$0xff]   ;;  %v19094_v27 = vld [vmem:[#allocation7 + $0x2e8] ss:$16 sps:$4 sm:$0xff]  }
 0x5c4   :  { %v21090_v45 = vpop.eup %21089  ;;  %v5913_v5 = vadd.f32 1.0, %v21088_v50  ;;  %21109 = vpow2.f32 %v16353_v33  ;;  %v6091_v59 = vpack.c.bf16 %v6073_v53, %v23364_v22  ;;  %v19091_v34 = vld [vmem:[#allocation7 + $0x2e0] ss:$16 sps:$4 sm:$0xff]   ;;  %v19099_v3 = vld [vmem:[#allocation10 + $0x4] ss:$16 sps:$4 sm:$0xff]  }
 0x5c5   :  { %v21092_v2 = vpop.eup %21091  ;;  %v6012_v40 = vmul.f32 %v21090_v45, %v24265_v55  ;;  %21111 = vtanh.f32 %v5508_v61  ;;  %6740 = vmatprep.mubr.bf16.mxu1 %v6092_v41  ;;  %6886 = vmatprep.mubr.bf16.mxu0 %v6092_v41  ;;  %v23389_v17 = vpack.c.bf16 %v6075_v43, %v23366_v15  ;;  %v19087_v15 = vld [vmem:[#allocation7 + $0x2c4] ss:$16 sps:$4 sm:$0xff]   ;;  %v19102_v46 = vld [vmem:[#allocation10 + $0xc] ss:$16 sps:$4 sm:$0xff]  }
 0x5c6   :  { %v21094_v24 = vpop.eup %21093  ;;  %21113 = vrcp.f32 %v5913_v5  ;;  %6741 = vmatmul.mubr.bf16.gmra.mrb[84].mxu1 %v6091_v59  ;;  %6887 = vmatmul.mubr.bf16.gmra.mrb[100].mxu0 %v6091_v59 }
 0x5c7   :  { %v21096_v37 = vpop.eup %21095  ;;  %v6036_v22 = vadd.f32 %v6012_v40, %v5988_v30  ;;  %21115 = vpow2.f32 %v16355_v10  ;;  %v6077_v48 = vmul.f32 %v21094_v24, %v23281_v7  ;;  %6780 = vmatpush1.bf16.msra.mxu1 %v19073_v29  ;;  %6926 = vmatpush1.bf16.msra.mxu0 %v19076_v4 }
 0x5c8   :  { %v21098_v56 = vpop.eup %21097  ;;  %21117 = vpow2.f32 %v16354_v63  ;;  %v6076_v20 = vmul.f32 %v21096_v37, %v23243_v35  ;;  %6781 = vmatprep.subr.bf16.mxu1 %v19081_v9  ;;  %6927 = vmatprep.subr.bf16.mxu0 %v19084_v49 }
 0x5c9   :  { %v21100_v60 = vpop.eup %21099  ;;  %21119 = vtanh.f32 %v23250_v38  ;;  %v5915_v52 = vadd.f32 1.0, %v21098_v56  ;;  %v19093_v38 = vld [vmem:[#allocation7 + $0x2e4] ss:$16 sps:$4 sm:$0xff]  }
 0x5ca   :  { %v21102_v32 = vpop.eup %21101  ;;  %21121 = vpow2.f32 %v16356_v23  ;;  %v6078_v6 = vmul.f32 %v21100_v60, %v21092_v2  ;;  %v19097_v56 = vld [vmem:[#allocation10] ss:$16 sps:$4 sm:$0xff]  }
 0x5cb   :  { %v21104_v7 = vpop.eup %21103  ;;  %21123 = vrcp.f32 %v5915_v52  ;;  %v5914_v44 = vadd.f32 1.0, %v21102_v32  ;;  %6782 = vmatpush1.bf16.msra.mxu1 %v19079_v47  ;;  %6928 = vmatpush1.bf16.msra.mxu0 %v19082_v19  ;;  %v24267_v19 = vmov 0   ;;  %v19103_v60 = vld [vmem:[#allocation10 + $0x20] ss:$16 sps:$4 sm:$0xff]   ;;  %v19106_v52 = vld [vmem:[#allocation10 + $0x28] ss:$16 sps:$4 sm:$0xff]  }
 0x5cc   :  { %v21106_v12 = vpop.eup %21105  ;;  %21125 = vtanh.f32 %v23225_v21  ;;  %v6080_v35 = vmul.f32 %v21104_v7, %v23293_v31  ;;  %6783 = vmatprep.subr.bf16.mxu1 %v19087_v15  ;;  %6929 = vmatprep.subr.bf16.mxu0 %v19090_v11  ;;  %v5991_v31 = vmul.f32 %v23324_v26, %v24266_v58  ;;  %v19105_v15 = vld [vmem:[#allocation10 + $0x24] ss:$16 sps:$4 sm:$0xff]   ;;  %v19108_v11 = vld [vmem:[#allocation10 + $0x2c] ss:$16 sps:$4 sm:$0xff]   ;;  %v19109_v7 = vld [vmem:[#allocation10 + $0x40] ss:$16 sps:$4 sm:$0xff]  }
 0x5cd   :  { %v21108_v28 = vpop.eup %21107  ;;  %21127 = vrcp.f32 %v5914_v44  ;;  %v19111_v32 = vld [vmem:[#allocation10 + $0x44] ss:$16 sps:$4 sm:$0xff]   ;;  %v19112_v44 = vld [vmem:[#allocation10 + $0x48] ss:$16 sps:$4 sm:$0xff]   ;;  %v19144_v58 = vld [vmem:[#allocation10 + $0xec] ss:$16 sps:$4 sm:$0xff]  }
 0x5ce   :  { %v21110_v51 = vpop.eup %21109  ;;  %v6095_v0 = vpack.c.bf16 %v6080_v35, %v6077_v48  ;;  %v6079_v33 = vmul.f32 %v21108_v28, %v23260_v57  ;;  %21129 = vtanh.f32 %v6036_v22  ;;  %v19123_v35 = vld [vmem:[#allocation10 + $0x84] ss:$16 sps:$4 sm:$0xff]   ;;  %v19126_v28 = vld [vmem:[#allocation10 + $0x8c] ss:$16 sps:$4 sm:$0xff]  }
 0x5cf   :  { %v21112_v18 = vpop.eup %21111  ;;  %v5916_v39 = vadd.f32 1.0, %v21110_v51  ;;  %6784 = vmatpush1.bf16.msra.mxu1 %v19085_v25  ;;  %6930 = vmatpush1.bf16.msra.mxu0 %v19088_v1  ;;  %v19117_v25 = vld [vmem:[#allocation10 + $0x64] ss:$16 sps:$4 sm:$0xff]   ;;  %v19115_v1 = vld [vmem:[#allocation10 + $0x60] ss:$16 sps:$4 sm:$0xff]  }
 0x5d0   :  { %v21114_v21 = vpop.eup %21113  ;;  %v6015_v54 = vmul.f32 %v21112_v18, %v23158_v42  ;;  %6750 = vmatprep.mubr.bf16.mxu1 %v6095_v0  ;;  %6896 = vmatprep.mubr.bf16.mxu0 %v6095_v0  ;;  %v6094_v61 = vpack.c.bf16 %v6079_v33, %v6076_v20  ;;  %v19100_v20 = vld [vmem:[#allocation10 + $0x8] ss:$16 sps:$4 sm:$0xff]   ;;  %v19129_v51 = vld [vmem:[#allocation10 + $0xa4] ss:$16 sps:$4 sm:$0xff]   ;;  %v19127_v0 = vld [vmem:[#allocation10 + $0xa0] ss:$16 sps:$4 sm:$0xff]  }
 0x5d1   :  { %v21116_v8 = vpop.eup %21115  ;;  %21131 = vrcp.f32 %v5916_v39  ;;  %6785 = vmatprep.subr.bf16.mxu1 %v19093_v38  ;;  %6931 = vmatprep.subr.bf16.mxu0 %v19096_v16  ;;  %v6081_v57 = vmul.f32 %v21114_v21, %v21106_v12  ;;  %v19118_v12 = vld [vmem:[#allocation10 + $0x68] ss:$16 sps:$4 sm:$0xff]   ;;  %v19121_v38 = vld [vmem:[#allocation10 + $0x80] ss:$16 sps:$4 sm:$0xff]   ;;  %v19135_v18 = vld [vmem:[#allocation10 + $0xc4] ss:$16 sps:$4 sm:$0xff]  }
 0x5d2   :  { %v21118_v53 = vpop.eup %21117  ;;  %21133 = vtanh.f32 %v23240_v62  ;;  %v6039_v29 = vadd.f32 %v6015_v54, %v5991_v31  ;;  %v5918_v50 = vadd.f32 1.0, %v21116_v8  ;;  %6751 = vmatmul.mubr.bf16.gmra.mrb[88].mxu1 %v6094_v61  ;;  %6897 = vmatmul.mubr.bf16.gmra.mrb[104].mxu0 %v6094_v61  ;;  %v19124_v16 = vld [vmem:[#allocation10 + $0x88] ss:$16 sps:$4 sm:$0xff]   ;;  %v19138_v39 = vld [vmem:[#allocation10 + $0xcc] ss:$16 sps:$4 sm:$0xff]  }
 0x5d3   :  { %v21120_v26 = vpop.eup %21119  ;;  %21135 = vtanh.f32 %v23283_v13  ;;  %v5917_v42 = vadd.f32 1.0, %v21118_v53  ;;  %6786 = vmatpush1.bf16.msra.mxu1 %v19091_v34  ;;  %6932 = vmatpush1.bf16.msra.mxu0 %v19094_v27  ;;  %v23402_v10 = vpack.c.bf16 %v6081_v57, %v6078_v6  ;;  %v19114_v6 = vld [vmem:[#allocation10 + $0x4c] ss:$16 sps:$4 sm:$0xff]   ;;  %v19130_v33 = vld [vmem:[#allocation10 + $0xa8] ss:$16 sps:$4 sm:$0xff]  }
 0x5d4   :  { %v21122_v41 = vpop.eup %21121  ;;  %21137 = vtanh.f32 %v6039_v29  ;;  %7796 = vmatprep.subr.bf16.mxu1 %v19099_v3  ;;  %7942 = vmatprep.subr.bf16.mxu0 %v19102_v46  ;;  %v19133_v34 = vld [vmem:[#allocation10 + $0xc0] ss:$16 sps:$4 sm:$0xff]   ;;  %v19136_v27 = vld [vmem:[#allocation10 + $0xc8] ss:$16 sps:$4 sm:$0xff]   ;;  %v19141_v21 = vld [vmem:[#allocation10 + $0xe4] ss:$16 sps:$4 sm:$0xff]  }
 0x5d5   :  { %v21124_v4 = vpop.eup %21123  ;;  %21139 = vrcp.f32 %v5918_v50  ;;  %v5919_v9 = vadd.f32 1.0, %v21122_v41  ;;  %v19139_v31 = vld [vmem:[#allocation10 + $0xe0] ss:$16 sps:$4 sm:$0xff]   ;;  %v19142_v54 = vld [vmem:[#allocation10 + $0xe8] ss:$16 sps:$4 sm:$0xff]  }
 0x5d6   :  { %v21126_v62 = vpop.eup %21125  ;;  %21141 = vrcp.f32 %v5917_v42  ;;  %v6083_v43 = vmul.f32 %v21124_v4, %v21120_v26  ;;  %v19147_v61 = vld [vmem:[#allocation10 + $0x104] ss:$16 sps:$4 sm:$0xff]   ;;  %v19150_v3 = vld [vmem:[#allocation10 + $0x10c] ss:$16 sps:$4 sm:$0xff]   ;;  %v19145_v46 = vld [vmem:[#allocation10 + $0x100] ss:$16 sps:$4 sm:$0xff]  }
 0x5d7   :  { %v21128_v45 = vpop.eup %21127  ;;  %21143 = vrcp.f32 %v5919_v9  ;;  %v19148_v8 = vld [vmem:[#allocation10 + $0x108] ss:$16 sps:$4 sm:$0xff]   ;;  %v19153_v57 = vld [vmem:[#allocation10 + $0x124] ss:$16 sps:$4 sm:$0xff]   ;;  %v19156_v53 = vld [vmem:[#allocation10 + $0x12c] ss:$16 sps:$4 sm:$0xff]  }
 0x5d8   :  { %v6082_v5 = vmul.f32 %v21128_v45, %v21126_v62  ;;  %v21130_v63 = vpop.eup %21129  ;;  %v19151_v29 = vld [vmem:[#allocation10 + $0x120] ss:$16 sps:$4 sm:$0xff]   ;;  %v19154_v50 = vld [vmem:[#allocation10 + $0x128] ss:$16 sps:$4 sm:$0xff]   ;;  %v19159_v26 = vld [vmem:[#allocation10 + $0x144] ss:$16 sps:$4 sm:$0xff]  }
 0x5d9   :  { %v19162_v42 = vld [vmem:[#allocation10 + $0x14c] ss:$16 sps:$4 sm:$0xff]   ;;  %v19160_v41 = vld [vmem:[#allocation10 + $0x148] ss:$16 sps:$4 sm:$0xff]   ;;  %v19165_v4 = vld [vmem:[#allocation10 + $0x164] ss:$16 sps:$4 sm:$0xff]  }
 0x5da   :  { %v19168_v9 = vld [vmem:[#allocation10 + $0x16c] ss:$16 sps:$4 sm:$0xff]   ;;  %v19163_v62 = vld [vmem:[#allocation10 + $0x160] ss:$16 sps:$4 sm:$0xff]   ;;  %v19171_v45 = vld [vmem:[#allocation10 + $0x184] ss:$16 sps:$4 sm:$0xff]  }
 0x5db   :  { %v21132_v13 = vpop.eup %21131 }
 0x5dc   :  { %v21134_v59 = vpop.eup %21133  ;;  %v6084_v49 = vmul.f32 %v21132_v13, %v21130_v63  ;;  %v19169_v63 = vld [vmem:[#allocation10 + $0x180] ss:$16 sps:$4 sm:$0xff]   ;;  %v19172_v13 = vld [vmem:[#allocation10 + $0x188] ss:$16 sps:$4 sm:$0xff]  }
 0x5dd   :  { %v21136_v2 = vpop.eup %21135 }
 0x5de   :  { %v21138_v36 = vpop.eup %21137 }
 0x5df   :  { %v21140_v30 = vpop.eup %21139 }
 0x5e0   :  { %v21142_v55 = vpop.eup %21141  ;;  %v6086_v40 = vmul.f32 %v21140_v30, %v21136_v2  ;;  %v19175_v2 = vld [vmem:[#allocation10 + $0x1a0] ss:$16 sps:$4 sm:$0xff]   ;;  %v19183_v30 = vld [vmem:[#allocation10 + $0x1c4] ss:$16 sps:$4 sm:$0xff]  }
 0x5e1   :  { %v21144_v24 = vpop.eup %21143  ;;  %v6085_v23 = vmul.f32 %v21142_v55, %v21134_v59  ;;  %v19177_v59 = vld [vmem:[#allocation10 + $0x1a4] ss:$16 sps:$4 sm:$0xff]   ;;  %v19186_v55 = vld [vmem:[#allocation10 + $0x1cc] ss:$16 sps:$4 sm:$0xff]  }
 0x5e2   :  { %v6098_v37 = vpack.c.bf16 %v6086_v40, %v6083_v43  ;;  %v6087_v22 = vmul.f32 %v21144_v24, %v21138_v36  ;;  %v19166_v43 = vld [vmem:[#allocation10 + $0x168] ss:$16 sps:$4 sm:$0xff]   ;;  %v19181_v40 = vld [vmem:[#allocation10 + $0x1c0] ss:$16 sps:$4 sm:$0xff]  }
 0x5e3   :  { %v6097_v48 = vpack.c.bf16 %v6085_v23, %v6082_v5  ;;  %v19174_v5 = vld [vmem:[#allocation10 + $0x18c] ss:$16 sps:$4 sm:$0xff]   ;;  %v19178_v36 = vld [vmem:[#allocation10 + $0x1a8] ss:$16 sps:$4 sm:$0xff]   ;;  %v19189_v23 = vld [vmem:[#allocation10 + $0x1e4] ss:$16 sps:$4 sm:$0xff]  }
 0x5e4   :  { %6760 = vmatprep.mubr.bf16.mxu1 %v6098_v37  ;;  %6906 = vmatprep.mubr.bf16.mxu0 %v6098_v37  ;;  %v23404_v47 = vpack.c.bf16 %v6087_v22, %v6084_v49  ;;  %v19180_v49 = vld [vmem:[#allocation10 + $0x1ac] ss:$16 sps:$4 sm:$0xff]   ;;  %v19184_v24 = vld [vmem:[#allocation10 + $0x1c8] ss:$16 sps:$4 sm:$0xff]   ;;  %v19187_v22 = vld [vmem:[#allocation10 + $0x1e0] ss:$16 sps:$4 sm:$0xff]  }
 0x5e5   :  { %6761 = vmatmul.mubr.bf16.gmra.mrb[92].mxu1 %v6097_v48  ;;  %6907 = vmatmul.mubr.bf16.gmra.mrb[108].mxu0 %v6097_v48  ;;  %v19192_v37 = vld [vmem:[#allocation10 + $0x1ec] ss:$16 sps:$4 sm:$0xff]   ;;  %v19190_v48 = vld [vmem:[#allocation10 + $0x1e8] ss:$16 sps:$4 sm:$0xff]  }
 0x5e6   :  { %6803 = vmatprep.mubr.bf16.mxu1 %v24267_v19  ;;  %6949 = vmatprep.mubr.bf16.mxu0 %v24267_v19 }
 0x5ed   :  { %6804 = vmatmul.mubr.bf16.vlgmr.msra.gmra.mrb[80].mxu1 %v23352_v14  ;;  %6950 = vmatmul.mubr.bf16.vlgmr.msra.gmra.mrb[96].mxu0 %v23352_v14  ;;  %v19120_v14 = vld [vmem:[#allocation10 + $0x6c] ss:$16 sps:$4 sm:$0xff]  }
 0x5ee   :  { %6813 = vmatprep.mubr.bf16.mxu1 %v24267_v19  ;;  %6959 = vmatprep.mubr.bf16.mxu0 %v24267_v19 }
 0x5ef   :  { %7797 = vmatpush1.bf16.msra.mxu1 %v19097_v56  ;;  %7943 = vmatpush1.bf16.msra.mxu0 %v19100_v20  ;;  %v6196_v56 = vld [vmem:[#allocation9] sm:$0xf]  ;;  %v24268_v20 = vld [vmem:[#allocation32_spill] sm:$0xff] }
 0x5f0   :  { %7798 = vmatprep.subr.bf16.mxu1 %v19105_v15  ;;  %7944 = vmatprep.subr.bf16.mxu0 %v19108_v11  ;;  %v23423_v15 = vrot.slane %v6196_v56, %v24268_v20  ;;  %v24269_v11 = vld [vmem:[#allocation33_spill] sm:$0xff] }
 0x5f3   :  { %7799 = vmatpush1.bf16.msra.mxu1 %v19103_v60  ;;  %7945 = vmatpush1.bf16.msra.mxu0 %v19106_v52  ;;  %v23426_v60 = vrot.slane %v6196_v56, %v24269_v11 }
 0x5f4   :  { %7800 = vmatprep.subr.bf16.mxu1 %v19111_v32  ;;  %7946 = vmatprep.subr.bf16.mxu0 %v19114_v6  ;;  %v24270_v6 = vld [vmem:[#allocation34_spill] sm:$0xff] }
 0x5f5   :  { %6814 = vmatmul.mubr.bf16.gmra.mrb[84].mxu1 %v23389_v17  ;;  %6960 = vmatmul.mubr.bf16.gmra.mrb[100].mxu0 %v23389_v17  ;;  %v19132_v17 = vld [vmem:[#allocation10 + $0xac] ss:$16 sps:$4 sm:$0xff]  }
 0x5f6   :  { %6823 = vmatprep.mubr.bf16.mxu1 %v24267_v19  ;;  %6969 = vmatprep.mubr.bf16.mxu0 %v24267_v19 }
 0x5f7   :  { %7801 = vmatpush1.bf16.msra.mxu1 %v19109_v7  ;;  %7947 = vmatpush1.bf16.msra.mxu0 %v19112_v44  ;;  %v23429_v7 = vrot.slane %v6196_v56, %v24270_v6  ;;  %v24271_v44 = vld [vmem:[#allocation45_spill] sm:$0xff] }
 0x5f8   :  { %7802 = vmatprep.subr.bf16.mxu1 %v19117_v25  ;;  %7948 = vmatprep.subr.bf16.mxu0 %v19120_v14  ;;  %v23432_v25 = vrot.slane %v6196_v56, %v24271_v44 }
 0x5fb   :  { %7803 = vmatpush1.bf16.msra.mxu1 %v19115_v1  ;;  %7949 = vmatpush1.bf16.msra.mxu0 %v19118_v12 }
 0x5fc   :  { %7804 = vmatprep.subr.bf16.mxu1 %v19123_v35  ;;  %7950 = vmatprep.subr.bf16.mxu0 %v19126_v28 }
 0x5fd   :  { %6824 = vmatmul.mubr.bf16.gmra.mrb[88].mxu1 %v23402_v10  ;;  %6970 = vmatmul.mubr.bf16.gmra.mrb[104].mxu0 %v23402_v10  ;;  %v19157_v10 = vld [vmem:[#allocation10 + $0x140] ss:$16 sps:$4 sm:$0xff]  }
 0x5fe   :  { %6833 = vmatprep.mubr.bf16.mxu1 %v24267_v19  ;;  %6979 = vmatprep.mubr.bf16.mxu0 %v24267_v19  ;;  %v19198_v19 = vld [vmem:[#allocation10 + $0x20c] ss:$16 sps:$4 sm:$0xff]  }
 0x5ff   :  { %7805 = vmatpush1.bf16.msra.mxu1 %v19121_v38  ;;  %7951 = vmatpush1.bf16.msra.mxu0 %v19124_v16 }
 0x600   :  { %7806 = vmatprep.subr.bf16.mxu1 %v19129_v51  ;;  %7952 = vmatprep.subr.bf16.mxu0 %v19132_v17 }
 0x603   :  { %7807 = vmatpush1.bf16.msra.mxu1 %v19127_v0  ;;  %7953 = vmatpush1.bf16.msra.mxu0 %v19130_v33 }
 0x604   :  { %7808 = vmatprep.subr.bf16.mxu1 %v19135_v18  ;;  %7954 = vmatprep.subr.bf16.mxu0 %v19138_v39 }
 0x605   :  { %6834 = vmatmul.mubr.bf16.gmra.mrb[92].mxu1 %v23404_v47  ;;  %6980 = vmatmul.mubr.bf16.gmra.mrb[108].mxu0 %v23404_v47  ;;  %v19195_v47 = vld [vmem:[#allocation10 + $0x204] ss:$16 sps:$4 sm:$0xff]  }
 0x607   :  { %7809 = vmatpush1.bf16.msra.mxu1 %v19133_v34  ;;  %7955 = vmatpush1.bf16.msra.mxu0 %v19136_v27 }
 0x608   :  { %7810 = vmatprep.subr.bf16.mxu1 %v19141_v21  ;;  %7956 = vmatprep.subr.bf16.mxu0 %v19144_v58 }
 0x60b   :  { %7811 = vmatpush1.bf16.msra.mxu1 %v19139_v31  ;;  %7957 = vmatpush1.bf16.msra.mxu0 %v19142_v54  ;;  %v19193_v54 = vld [vmem:[#allocation10 + $0x200] ss:$16 sps:$4 sm:$0xff]  }
 0x60c   :  { %7812 = vmatprep.subr.bf16.mxu1 %v19147_v61  ;;  %7958 = vmatprep.subr.bf16.mxu0 %v19150_v3  ;;  %v19196_v61 = vld [vmem:[#allocation10 + $0x208] ss:$16 sps:$4 sm:$0xff]   ;;  %v19201_v3 = vld [vmem:[#allocation10 + $0x224] ss:$16 sps:$4 sm:$0xff]  }
 0x60f   :  { %7813 = vmatpush1.bf16.msra.mxu1 %v19145_v46  ;;  %7959 = vmatpush1.bf16.msra.mxu0 %v19148_v8  ;;  %v19204_v46 = vld [vmem:[#allocation10 + $0x22c] ss:$16 sps:$4 sm:$0xff]  }
 0x610   :  { %7814 = vmatprep.subr.bf16.mxu1 %v19153_v57  ;;  %7960 = vmatprep.subr.bf16.mxu0 %v19156_v53 }
 0x613   :  { %7815 = vmatpush1.bf16.msra.mxu1 %v19151_v29  ;;  %7961 = vmatpush1.bf16.msra.mxu0 %v19154_v50 }
 0x614   :  { %7816 = vmatprep.subr.bf16.mxu1 %v19159_v26  ;;  %7962 = vmatprep.subr.bf16.mxu0 %v19162_v42 }
 0x617   :  { %7817 = vmatpush1.bf16.msra.mxu1 %v19157_v10  ;;  %7963 = vmatpush1.bf16.msra.mxu0 %v19160_v41  ;;  %v19199_v10 = vld [vmem:[#allocation10 + $0x220] ss:$16 sps:$4 sm:$0xff]   ;;  %v19202_v41 = vld [vmem:[#allocation10 + $0x228] ss:$16 sps:$4 sm:$0xff]  }
 0x618   :  { %7818 = vmatprep.subr.bf16.mxu1 %v19165_v4  ;;  %7964 = vmatprep.subr.bf16.mxu0 %v19168_v9 }
 0x61b   :  { %7819 = vmatpush1.bf16.msra.mxu1 %v19163_v62  ;;  %7965 = vmatpush1.bf16.msra.mxu0 %v19166_v43 }
 0x61c   :  { %7820 = vmatprep.subr.bf16.mxu1 %v19171_v45  ;;  %7966 = vmatprep.subr.bf16.mxu0 %v19174_v5  ;;  %v19207_v5 = vld [vmem:[#allocation10 + $0x244] ss:$16 sps:$4 sm:$0xff]  }
 0x61f   :  { %7821 = vmatpush1.bf16.msra.mxu1 %v19169_v63  ;;  %7967 = vmatpush1.bf16.msra.mxu0 %v19172_v13  ;;  %v19210_v63 = vld [vmem:[#allocation10 + $0x24c] ss:$16 sps:$4 sm:$0xff]  }
 0x620   :  { %7822 = vmatprep.subr.bf16.mxu1 %v19177_v59  ;;  %7968 = vmatprep.subr.bf16.mxu0 %v19180_v49 }
 0x623   :  { %7823 = vmatpush1.bf16.msra.mxu1 %v19175_v2  ;;  %7969 = vmatpush1.bf16.msra.mxu0 %v19178_v36 }
 0x624   :  { %7824 = vmatprep.subr.bf16.mxu1 %v19183_v30  ;;  %7970 = vmatprep.subr.bf16.mxu0 %v19186_v55 }
 0x627   :  { %7825 = vmatpush1.bf16.msra.mxu1 %v19181_v40  ;;  %7971 = vmatpush1.bf16.msra.mxu0 %v19184_v24  ;;  %v19205_v24 = vld [vmem:[#allocation10 + $0x240] ss:$16 sps:$4 sm:$0xff]  }
 0x628   :  { %7826 = vmatprep.subr.bf16.mxu1 %v19189_v23  ;;  %7972 = vmatprep.subr.bf16.mxu0 %v19192_v37  ;;  %v19208_v23 = vld [vmem:[#allocation10 + $0x248] ss:$16 sps:$4 sm:$0xff]   ;;  %v19213_v37 = vld [vmem:[#allocation10 + $0x264] ss:$16 sps:$4 sm:$0xff]  }
 0x62b   :  { %7827 = vmatpush1.bf16.msra.mxu1 %v19187_v22  ;;  %7973 = vmatpush1.bf16.msra.mxu0 %v19190_v48  ;;  %v19216_v22 = vld [vmem:[#allocation10 + $0x26c] ss:$16 sps:$4 sm:$0xff]  }
 0x62c   :  { %7869 = vmatprep.subr.bf16.mxu1 %v19195_v47  ;;  %8015 = vmatprep.subr.bf16.mxu0 %v19198_v19 }
 0x6c0   :  { %v6805_v52 = vpop.f32.mrb[80].mxu1  ;;  %v6951_v32 = vpop.f32.mrb[96].mxu0 }
 0x6c1   :  { %v6807_v14 = vpop.f32.mrb[81].mxu1  ;;  %v6953_v1 = vpop.f32.mrb[97].mxu0  ;;  %v17534_v28 = vadd.f32 %v6805_v52, %v23423_v15  ;;  %v17550_v38 = vadd.f32 %v6951_v32, %v23426_v60 }
 0x6c2   :  { %v6809_v12 = vpop.f32.mrb[82].mxu1  ;;  %v6955_v35 = vpop.f32.mrb[98].mxu0  ;;  %v17535_v33 = vadd.f32 %v6807_v14, %v23429_v7  ;;  %v17551_v18 = vadd.f32 %v6953_v1, %v23432_v25  ;;  %v19211_v1 = vld [vmem:[#allocation10 + $0x260] ss:$16 sps:$4 sm:$0xff]  }
 0x6c3   :  { %v17536_v16 = vadd.f32 %v6809_v12, %v23423_v15  ;;  %v17552_v51 = vadd.f32 %v6955_v35, %v23426_v60  ;;  %v6811_v17 = vpop.f32.mrb[83].mxu1  ;;  %v6957_v0 = vpop.f32.mrb[99].mxu0  ;;  %v19214_v12 = vld [vmem:[#allocation10 + $0x268] ss:$16 sps:$4 sm:$0xff]  }
 0x6c4   :  { %v17537_v39 = vadd.f32 %v6811_v17, %v23429_v7  ;;  %v17553_v34 = vadd.f32 %v6957_v0, %v23432_v25  ;;  %v19219_v17 = vld [vmem:[#allocation10 + $0x284] ss:$16 sps:$4 sm:$0xff]   ;;  %v19222_v0 = vld [vmem:[#allocation10 + $0x28c] ss:$16 sps:$4 sm:$0xff]  }
 0x6c5   :  { %v6990_v27 = vpack.c.bf16 %v17536_v16, %v17534_v28  ;;  %v23442_v21 = vpack.c.bf16 %v17552_v51, %v17550_v38 }
 0x6c6   :  { %v6991_v58 = vpack.c.bf16 %v17537_v39, %v17535_v33  ;;  %v23444_v31 = vpack.c.bf16 %v17553_v34, %v17551_v18 }
 0x6c8   :  { %v6815_v8 = vpop.f32.mrb[84].mxu1  ;;  %v6961_v57 = vpop.f32.mrb[100].mxu0  ;;  %7828 = vmatprep.mubr.bf16.mxu1 %v6991_v58  ;;  %7974 = vmatprep.mubr.bf16.mxu0 %v6991_v58 }
 0x6c9   :  { %v6817_v53 = vpop.f32.mrb[85].mxu1  ;;  %v6963_v29 = vpop.f32.mrb[101].mxu0  ;;  %7829 = vmatmul.mubr.bf16.vlgmr.msra.gmra.mrb[96].mxu1 %v6990_v27  ;;  %7975 = vmatmul.mubr.bf16.vlgmr.msra.gmra.mrb[112].mxu0 %v6990_v27  ;;  %v17538_v50 = vadd.f32 %v6815_v8, %v23423_v15  ;;  %v17554_v4 = vadd.f32 %v6961_v57, %v23426_v60  ;;  %v19225_v8 = vld [vmem:[#allocation10 + $0x2a4] ss:$16 sps:$4 sm:$0xff]   ;;  %v19228_v57 = vld [vmem:[#allocation10 + $0x2ac] ss:$16 sps:$4 sm:$0xff]  }
 0x6ca   :  { %7870 = vmatpush1.bf16.msra.mxu1 %v19193_v54  ;;  %8016 = vmatpush1.bf16.msra.mxu0 %v19196_v61  ;;  %v6819_v26 = vpop.f32.mrb[86].mxu1  ;;  %v6965_v42 = vpop.f32.mrb[102].mxu0  ;;  %v17539_v13 = vadd.f32 %v6817_v53, %v23429_v7  ;;  %v17555_v59 = vadd.f32 %v6963_v29, %v23432_v25 }
 0x6cb   :  { %v17540_v9 = vadd.f32 %v6819_v26, %v23423_v15  ;;  %v17556_v62 = vadd.f32 %v6965_v42, %v23426_v60  ;;  %v6821_v43 = vpop.f32.mrb[87].mxu1  ;;  %v6967_v45 = vpop.f32.mrb[103].mxu0  ;;  %7871 = vmatprep.subr.bf16.mxu1 %v19201_v3  ;;  %8017 = vmatprep.subr.bf16.mxu0 %v19204_v46  ;;  %v19217_v3 = vld [vmem:[#allocation10 + $0x280] ss:$16 sps:$4 sm:$0xff]   ;;  %v19220_v46 = vld [vmem:[#allocation10 + $0x288] ss:$16 sps:$4 sm:$0xff]  }
 0x6cc   :  { %v17541_v49 = vadd.f32 %v6821_v43, %v23429_v7  ;;  %v17557_v2 = vadd.f32 %v6967_v45, %v23432_v25 }
 0x6cd   :  { %v6994_v36 = vpack.c.bf16 %v17540_v9, %v17538_v50  ;;  %v23454_v30 = vpack.c.bf16 %v17556_v62, %v17554_v4  ;;  %v19223_v4 = vld [vmem:[#allocation10 + $0x2a0] ss:$16 sps:$4 sm:$0xff]   ;;  %v19226_v9 = vld [vmem:[#allocation10 + $0x2a8] ss:$16 sps:$4 sm:$0xff]  }
 0x6ce   :  { %v6995_v55 = vpack.c.bf16 %v17541_v49, %v17539_v13  ;;  %v23456_v40 = vpack.c.bf16 %v17557_v2, %v17555_v59  ;;  %7872 = vmatpush1.bf16.msra.mxu1 %v19199_v10  ;;  %8018 = vmatpush1.bf16.msra.mxu0 %v19202_v41  ;;  %v19231_v13 = vld [vmem:[#allocation10 + $0x2c4] ss:$16 sps:$4 sm:$0xff]   ;;  %v19234_v59 = vld [vmem:[#allocation10 + $0x2cc] ss:$16 sps:$4 sm:$0xff]  }
 0x6cf   :  { %7873 = vmatprep.subr.bf16.mxu1 %v19207_v5  ;;  %8019 = vmatprep.subr.bf16.mxu0 %v19210_v63 }
 0x6d0   :  { %v6825_v48 = vpop.f32.mrb[88].mxu1  ;;  %v6971_v47 = vpop.f32.mrb[104].mxu0  ;;  %7838 = vmatprep.mubr.bf16.mxu1 %v6995_v55  ;;  %7984 = vmatprep.mubr.bf16.mxu0 %v6995_v55 }
 0x6d1   :  { %v6827_v19 = vpop.f32.mrb[89].mxu1  ;;  %v6973_v56 = vpop.f32.mrb[105].mxu0  ;;  %7839 = vmatmul.mubr.bf16.gmra.mrb[100].mxu1 %v6994_v36  ;;  %7985 = vmatmul.mubr.bf16.gmra.mrb[116].mxu0 %v6994_v36  ;;  %v17542_v52 = vadd.f32 %v6825_v48, %v23423_v15  ;;  %v17558_v35 = vadd.f32 %v6971_v47, %v23426_v60  ;;  %v19237_v48 = vld [vmem:[#allocation10 + $0x2e4] ss:$16 sps:$4 sm:$0xff]   ;;  %v19240_v47 = vld [vmem:[#allocation10 + $0x2ec] ss:$16 sps:$4 sm:$0xff]  }
 0x6d2   :  { %7874 = vmatpush1.bf16.msra.mxu1 %v19205_v24  ;;  %8020 = vmatpush1.bf16.msra.mxu0 %v19208_v23  ;;  %v6829_v32 = vpop.f32.mrb[90].mxu1  ;;  %v6975_v14 = vpop.f32.mrb[106].mxu0  ;;  %v17543_v33 = vadd.f32 %v6827_v19, %v23429_v7  ;;  %v17559_v18 = vadd.f32 %v6973_v56, %v23432_v25  ;;  %v19243_v19 = vld [vmem:[#allocation10 + $0x304] ss:$16 sps:$4 sm:$0xff]   ;;  %v19246_v56 = vld [vmem:[#allocation10 + $0x30c] ss:$16 sps:$4 sm:$0xff]  }
 0x6d3   :  { %v17544_v28 = vadd.f32 %v6829_v32, %v23423_v15  ;;  %v17560_v38 = vadd.f32 %v6975_v14, %v23426_v60  ;;  %v6831_v16 = vpop.f32.mrb[91].mxu1  ;;  %v6977_v51 = vpop.f32.mrb[107].mxu0  ;;  %7875 = vmatprep.subr.bf16.mxu1 %v19213_v37  ;;  %8021 = vmatprep.subr.bf16.mxu0 %v19216_v22  ;;  %v19232_v22 = vld [vmem:[#allocation10 + $0x2c8] ss:$16 sps:$4 sm:$0xff]   ;;  %v19249_v14 = vld [vmem:[#allocation10 + $0x324] ss:$16 sps:$4 sm:$0xff]  }
 0x6d4   :  { %v17545_v39 = vadd.f32 %v6831_v16, %v23429_v7  ;;  %v17561_v34 = vadd.f32 %v6977_v51, %v23432_v25  ;;  %v19244_v32 = vld [vmem:[#allocation10 + $0x308] ss:$16 sps:$4 sm:$0xff]   ;;  %v19261_v51 = vld [vmem:[#allocation10 + $0x364] ss:$16 sps:$4 sm:$0xff]  }
 0x6d5   :  { %v6998_v27 = vpack.c.bf16 %v17544_v28, %v17542_v52  ;;  %v23466_v58 = vpack.c.bf16 %v17560_v38, %v17558_v35  ;;  %v19241_v52 = vld [vmem:[#allocation10 + $0x300] ss:$16 sps:$4 sm:$0xff]   ;;  %v19250_v35 = vld [vmem:[#allocation10 + $0x328] ss:$16 sps:$4 sm:$0xff]   ;;  %v19255_v28 = vld [vmem:[#allocation10 + $0x344] ss:$16 sps:$4 sm:$0xff]  }
 0x6d6   :  { %v6999_v54 = vpack.c.bf16 %v17545_v39, %v17543_v33  ;;  %v23468_v61 = vpack.c.bf16 %v17561_v34, %v17559_v18  ;;  %7876 = vmatpush1.bf16.msra.mxu1 %v19211_v1  ;;  %8022 = vmatpush1.bf16.msra.mxu0 %v19214_v12  ;;  %v19252_v1 = vld [vmem:[#allocation10 + $0x32c] ss:$16 sps:$4 sm:$0xff]   ;;  %v19247_v12 = vld [vmem:[#allocation10 + $0x320] ss:$16 sps:$4 sm:$0xff]   ;;  %v19256_v16 = vld [vmem:[#allocation10 + $0x348] ss:$16 sps:$4 sm:$0xff]  }
 0x6d7   :  { %7877 = vmatprep.subr.bf16.mxu1 %v19219_v17  ;;  %8023 = vmatprep.subr.bf16.mxu0 %v19222_v0  ;;  %v19253_v38 = vld [vmem:[#allocation10 + $0x340] ss:$16 sps:$4 sm:$0xff]   ;;  %v19264_v17 = vld [vmem:[#allocation10 + $0x36c] ss:$16 sps:$4 sm:$0xff]   ;;  %v19262_v33 = vld [vmem:[#allocation10 + $0x368] ss:$16 sps:$4 sm:$0xff]  }
 0x6d8   :  { %v6835_v53 = vpop.f32.mrb[92].mxu1  ;;  %v6981_v29 = vpop.f32.mrb[108].mxu0  ;;  %7848 = vmatprep.mubr.bf16.mxu1 %v6999_v54  ;;  %7994 = vmatprep.mubr.bf16.mxu0 %v6999_v54  ;;  %v19259_v0 = vld [vmem:[#allocation10 + $0x360] ss:$16 sps:$4 sm:$0xff]   ;;  %v19267_v18 = vld [vmem:[#allocation10 + $0x384] ss:$16 sps:$4 sm:$0xff]  }
 0x6d9   :  { %v6837_v50 = vpop.f32.mrb[93].mxu1  ;;  %v6983_v26 = vpop.f32.mrb[109].mxu0  ;;  %7849 = vmatmul.mubr.bf16.gmra.mrb[104].mxu1 %v6998_v27  ;;  %7995 = vmatmul.mubr.bf16.gmra.mrb[120].mxu0 %v6998_v27  ;;  %v17546_v42 = vadd.f32 %v6835_v53, %v23423_v15  ;;  %v17562_v62 = vadd.f32 %v6981_v29, %v23426_v60  ;;  %v19270_v39 = vld [vmem:[#allocation10 + $0x38c] ss:$16 sps:$4 sm:$0xff]   ;;  %v19265_v34 = vld [vmem:[#allocation10 + $0x380] ss:$16 sps:$4 sm:$0xff]  }
 0x6da   :  { %7878 = vmatpush1.bf16.msra.mxu1 %v19217_v3  ;;  %8024 = vmatpush1.bf16.msra.mxu0 %v19220_v46  ;;  %v6839_v10 = vpop.f32.mrb[94].mxu1  ;;  %v6985_v41 = vpop.f32.mrb[110].mxu0  ;;  %v17547_v49 = vadd.f32 %v6837_v50, %v23429_v7  ;;  %v17563_v2 = vadd.f32 %v6983_v26, %v23432_v25  ;;  %v19268_v27 = vld [vmem:[#allocation10 + $0x388] ss:$16 sps:$4 sm:$0xff]   ;;  %v19273_v54 = vld [vmem:[#allocation10 + $0x3a4] ss:$16 sps:$4 sm:$0xff]  }
 0x6db   :  { %v17548_v43 = vadd.f32 %v6839_v10, %v23423_v15  ;;  %v17564_v45 = vadd.f32 %v6985_v41, %v23426_v60  ;;  %v6841_v5 = vpop.f32.mrb[95].mxu1  ;;  %v6987_v63 = vpop.f32.mrb[111].mxu0  ;;  %7879 = vmatprep.subr.bf16.mxu1 %v19225_v8  ;;  %8025 = vmatprep.subr.bf16.mxu0 %v19228_v57  ;;  %v19229_v60 = vld [vmem:[#allocation10 + $0x2c0] ss:$16 sps:$4 sm:$0xff]   ;;  %v19276_v3 = vld [vmem:[#allocation10 + $0x3ac] ss:$16 sps:$4 sm:$0xff]  }
 0x6dc   :  { %v17549_v36 = vadd.f32 %v6841_v5, %v23429_v7  ;;  %v17565_v55 = vadd.f32 %v6987_v63, %v23432_v25  ;;  %v19235_v7 = vld [vmem:[#allocation10 + $0x2e0] ss:$16 sps:$4 sm:$0xff]   ;;  %v19238_v25 = vld [vmem:[#allocation10 + $0x2e8] ss:$16 sps:$4 sm:$0xff]   ;;  %v19279_v57 = vld [vmem:[#allocation10 + $0x3c4] ss:$16 sps:$4 sm:$0xff]  }
 0x6dd   :  { %v7002_v24 = vpack.c.bf16 %v17548_v43, %v17546_v42  ;;  %v23478_v23 = vpack.c.bf16 %v17564_v45, %v17562_v62  ;;  %v19271_v46 = vld [vmem:[#allocation10 + $0x3a0] ss:$16 sps:$4 sm:$0xff]   ;;  %v19274_v8 = vld [vmem:[#allocation10 + $0x3a8] ss:$16 sps:$4 sm:$0xff]   ;;  %v19282_v53 = vld [vmem:[#allocation10 + $0x3cc] ss:$16 sps:$4 sm:$0xff]  }
 0x6de   :  { %v7003_v15 = vpack.c.bf16 %v17549_v36, %v17547_v49  ;;  %v23480_v37 = vpack.c.bf16 %v17565_v55, %v17563_v2  ;;  %7880 = vmatpush1.bf16.msra.mxu1 %v19223_v4  ;;  %8026 = vmatpush1.bf16.msra.mxu0 %v19226_v9  ;;  %v19277_v29 = vld [vmem:[#allocation10 + $0x3c0] ss:$16 sps:$4 sm:$0xff]   ;;  %v19280_v50 = vld [vmem:[#allocation10 + $0x3c8] ss:$16 sps:$4 sm:$0xff]   ;;  %v19285_v26 = vld [vmem:[#allocation10 + $0x3e4] ss:$16 sps:$4 sm:$0xff]  }
 0x6df   :  { %7881 = vmatprep.subr.bf16.mxu1 %v19231_v13  ;;  %8027 = vmatprep.subr.bf16.mxu0 %v19234_v59  ;;  %v19288_v42 = vld [vmem:[#allocation10 + $0x3ec] ss:$16 sps:$4 sm:$0xff]   ;;  %v19283_v10 = vld [vmem:[#allocation10 + $0x3e0] ss:$16 sps:$4 sm:$0xff]   ;;  %v19286_v41 = vld [vmem:[#allocation10 + $0x3e8] ss:$16 sps:$4 sm:$0xff]  }
 0x6e0   :  { %7858 = vmatprep.mubr.bf16.mxu1 %v7003_v15  ;;  %8004 = vmatprep.mubr.bf16.mxu0 %v7003_v15  ;;  %v19291_v4 = vld [vmem:[#allocation13 + $0x4] ss:$16 sps:$4 sm:$0xff]   ;;  %v19294_v9 = vld [vmem:[#allocation13 + $0xc] ss:$16 sps:$4 sm:$0xff]   ;;  %v19289_v62 = vld [vmem:[#allocation13] ss:$16 sps:$4 sm:$0xff]  }
 0x6e1   :  { %7859 = vmatmul.mubr.bf16.gmra.mrb[108].mxu1 %v7002_v24  ;;  %8005 = vmatmul.mubr.bf16.gmra.mrb[124].mxu0 %v7002_v24  ;;  %v19292_v43 = vld [vmem:[#allocation13 + $0x8] ss:$16 sps:$4 sm:$0xff]   ;;  %v19297_v45 = vld [vmem:[#allocation13 + $0x24] ss:$16 sps:$4 sm:$0xff]   ;;  %v19300_v5 = vld [vmem:[#allocation13 + $0x2c] ss:$16 sps:$4 sm:$0xff]  }
 0x6e2   :  { %7882 = vmatpush1.bf16.msra.mxu1 %v19229_v60  ;;  %8028 = vmatpush1.bf16.msra.mxu0 %v19232_v22  ;;  %v19295_v63 = vld [vmem:[#allocation13 + $0x20] ss:$16 sps:$4 sm:$0xff]   ;;  %v19298_v13 = vld [vmem:[#allocation13 + $0x28] ss:$16 sps:$4 sm:$0xff]   ;;  %v19303_v59 = vld [vmem:[#allocation13 + $0x44] ss:$16 sps:$4 sm:$0xff]  }
 0x6e3   :  { %7901 = vmatprep.mubr.bf16.mxu1 %v23444_v31  ;;  %8047 = vmatprep.mubr.bf16.mxu0 %v23444_v31  ;;  %v19258_v31 = vld [vmem:[#allocation10 + $0x34c] ss:$16 sps:$4 sm:$0xff]   ;;  %v19306_v49 = vld [vmem:[#allocation13 + $0x4c] ss:$16 sps:$4 sm:$0xff]   ;;  %v19301_v2 = vld [vmem:[#allocation13 + $0x40] ss:$16 sps:$4 sm:$0xff]  }
 0x6e4   :  { %7883 = vmatprep.subr.bf16.mxu1 %v19237_v48  ;;  %8029 = vmatprep.subr.bf16.mxu0 %v19240_v47  ;;  %v19304_v36 = vld [vmem:[#allocation13 + $0x48] ss:$16 sps:$4 sm:$0xff]   ;;  %v19309_v55 = vld [vmem:[#allocation13 + $0x64] ss:$16 sps:$4 sm:$0xff]   ;;  %v19318_v60 = vld [vmem:[#allocation13 + $0x8c] ss:$16 sps:$4 sm:$0xff]  }
 0x6e5   :  { %v19310_v24 = vld [vmem:[#allocation13 + $0x68] ss:$16 sps:$4 sm:$0xff]   ;;  %v19315_v15 = vld [vmem:[#allocation13 + $0x84] ss:$16 sps:$4 sm:$0xff]   ;;  %v19313_v22 = vld [vmem:[#allocation13 + $0x80] ss:$16 sps:$4 sm:$0xff]  }
 0x6e6   :  { %7884 = vmatpush1.bf16.msra.mxu1 %v19235_v7  ;;  %8030 = vmatpush1.bf16.msra.mxu0 %v19238_v25  ;;  %v19316_v48 = vld [vmem:[#allocation13 + $0x88] ss:$16 sps:$4 sm:$0xff]   ;;  %v19321_v47 = vld [vmem:[#allocation13 + $0xa4] ss:$16 sps:$4 sm:$0xff]   ;;  %v23499_v25 = vld [vmem:[%s24272_s23] sm:$0xff] }
 0x6e7   :  { %7885 = vmatprep.subr.bf16.mxu1 %v19243_v19  ;;  %8031 = vmatprep.subr.bf16.mxu0 %v19246_v56  ;;  %v19322_v7 = vld [vmem:[#allocation13 + $0xa8] ss:$16 sps:$4 sm:$0xff]   ;;  %v23504_v19 = vld [vmem:[%s24272_s23 + $0x40] sm:$0xff] }
 0x6e8   :  { %v19330_v56 = vld [vmem:[#allocation13 + $0xcc] ss:$16 sps:$4 sm:$0xff]  }
 0x6ea   :  { %7886 = vmatpush1.bf16.msra.mxu1 %v19241_v52  ;;  %8032 = vmatpush1.bf16.msra.mxu0 %v19244_v32  ;;  %v19325_v52 = vld [vmem:[#allocation13 + $0xc0] ss:$16 sps:$4 sm:$0xff]   ;;  %v19328_v32 = vld [vmem:[#allocation13 + $0xc8] ss:$16 sps:$4 sm:$0xff]  }
 0x6eb   :  { %7887 = vmatprep.subr.bf16.mxu1 %v19249_v14  ;;  %8033 = vmatprep.subr.bf16.mxu0 %v19252_v1  ;;  %v19333_v14 = vld [vmem:[#allocation13 + $0xe4] ss:$16 sps:$4 sm:$0xff]   ;;  %v19336_v1 = vld [vmem:[#allocation13 + $0xec] ss:$16 sps:$4 sm:$0xff]  }
 0x6ee   :  { %7888 = vmatpush1.bf16.msra.mxu1 %v19247_v12  ;;  %8034 = vmatpush1.bf16.msra.mxu0 %v19250_v35  ;;  %v19331_v12 = vld [vmem:[#allocation13 + $0xe0] ss:$16 sps:$4 sm:$0xff]   ;;  %v19334_v35 = vld [vmem:[#allocation13 + $0xe8] ss:$16 sps:$4 sm:$0xff]  }
 0x6ef   :  { %7889 = vmatprep.subr.bf16.mxu1 %v19255_v28  ;;  %8035 = vmatprep.subr.bf16.mxu0 %v19258_v31  ;;  %v19339_v28 = vld [vmem:[#allocation13 + $0x104] ss:$16 sps:$4 sm:$0xff]   ;;  %v19342_v31 = vld [vmem:[#allocation13 + $0x10c] ss:$16 sps:$4 sm:$0xff]  }
 0x6f2   :  { %7890 = vmatpush1.bf16.msra.mxu1 %v19253_v38  ;;  %8036 = vmatpush1.bf16.msra.mxu0 %v19256_v16  ;;  %v19337_v38 = vld [vmem:[#allocation13 + $0x100] ss:$16 sps:$4 sm:$0xff]   ;;  %v19340_v16 = vld [vmem:[#allocation13 + $0x108] ss:$16 sps:$4 sm:$0xff]  }
 0x6f3   :  { %7891 = vmatprep.subr.bf16.mxu1 %v19261_v51  ;;  %8037 = vmatprep.subr.bf16.mxu0 %v19264_v17  ;;  %v19345_v51 = vld [vmem:[#allocation13 + $0x124] ss:$16 sps:$4 sm:$0xff]   ;;  %v19348_v17 = vld [vmem:[#allocation13 + $0x12c] ss:$16 sps:$4 sm:$0xff]  }
 0x6f6   :  { %7892 = vmatpush1.bf16.msra.mxu1 %v19259_v0  ;;  %8038 = vmatpush1.bf16.msra.mxu0 %v19262_v33  ;;  %v19346_v0 = vld [vmem:[#allocation13 + $0x128] ss:$16 sps:$4 sm:$0xff]   ;;  %v19351_v33 = vld [vmem:[#allocation13 + $0x144] ss:$16 sps:$4 sm:$0xff]  }
 0x6f7   :  { %7893 = vmatprep.subr.bf16.mxu1 %v19267_v18  ;;  %8039 = vmatprep.subr.bf16.mxu0 %v19270_v39  ;;  %v19354_v18 = vld [vmem:[#allocation13 + $0x14c] ss:$16 sps:$4 sm:$0xff]   ;;  %v19349_v39 = vld [vmem:[#allocation13 + $0x140] ss:$16 sps:$4 sm:$0xff]  }
 0x6fa   :  { %7894 = vmatpush1.bf16.msra.mxu1 %v19265_v34  ;;  %8040 = vmatpush1.bf16.msra.mxu0 %v19268_v27  ;;  %v19352_v34 = vld [vmem:[#allocation13 + $0x148] ss:$16 sps:$4 sm:$0xff]   ;;  %v19357_v27 = vld [vmem:[#allocation13 + $0x164] ss:$16 sps:$4 sm:$0xff]  }
 0x6fb   :  { %7895 = vmatprep.subr.bf16.mxu1 %v19273_v54  ;;  %8041 = vmatprep.subr.bf16.mxu0 %v19276_v3  ;;  %v19360_v54 = vld [vmem:[#allocation13 + $0x16c] ss:$16 sps:$4 sm:$0xff]   ;;  %v19355_v3 = vld [vmem:[#allocation13 + $0x160] ss:$16 sps:$4 sm:$0xff]  }
 0x6fe   :  { %7896 = vmatpush1.bf16.msra.mxu1 %v19271_v46  ;;  %8042 = vmatpush1.bf16.msra.mxu0 %v19274_v8  ;;  %v19358_v46 = vld [vmem:[#allocation13 + $0x168] ss:$16 sps:$4 sm:$0xff]   ;;  %v19363_v8 = vld [vmem:[#allocation13 + $0x184] ss:$16 sps:$4 sm:$0xff]  }
 0x6ff   :  { %7897 = vmatprep.subr.bf16.mxu1 %v19279_v57  ;;  %8043 = vmatprep.subr.bf16.mxu0 %v19282_v53  ;;  %v19366_v57 = vld [vmem:[#allocation13 + $0x18c] ss:$16 sps:$4 sm:$0xff]   ;;  %v19361_v53 = vld [vmem:[#allocation13 + $0x180] ss:$16 sps:$4 sm:$0xff]  }
 0x702   :  { %7898 = vmatpush1.bf16.msra.mxu1 %v19277_v29  ;;  %8044 = vmatpush1.bf16.msra.mxu0 %v19280_v50  ;;  %v19364_v29 = vld [vmem:[#allocation13 + $0x188] ss:$16 sps:$4 sm:$0xff]   ;;  %v19369_v50 = vld [vmem:[#allocation13 + $0x1a4] ss:$16 sps:$4 sm:$0xff]  }
 0x703   :  { %7899 = vmatprep.subr.bf16.mxu1 %v19285_v26  ;;  %8045 = vmatprep.subr.bf16.mxu0 %v19288_v42  ;;  %v19372_v26 = vld [vmem:[#allocation13 + $0x1ac] ss:$16 sps:$4 sm:$0xff]   ;;  %v19367_v42 = vld [vmem:[#allocation13 + $0x1a0] ss:$16 sps:$4 sm:$0xff]  }
 0x706   :  { %7900 = vmatpush1.bf16.msra.mxu1 %v19283_v10  ;;  %8046 = vmatpush1.bf16.msra.mxu0 %v19286_v41  ;;  %v19370_v10 = vld [vmem:[#allocation13 + $0x1a8] ss:$16 sps:$4 sm:$0xff]   ;;  %v19375_v41 = vld [vmem:[#allocation13 + $0x1c4] ss:$16 sps:$4 sm:$0xff]  }
 0x707   :  { %11598 = vmatprep.subr.bf16.mxu1 %v19291_v4  ;;  %12182 = vmatprep.subr.bf16.mxu0 %v19294_v9  ;;  %v19378_v4 = vld [vmem:[#allocation13 + $0x1cc] ss:$16 sps:$4 sm:$0xff]   ;;  %v19373_v9 = vld [vmem:[#allocation13 + $0x1c0] ss:$16 sps:$4 sm:$0xff]  }
 0x709   :  { %7902 = vmatmul.mubr.bf16.vlgmr.msra.gmra.mrb[96].mxu1 %v23442_v21  ;;  %8048 = vmatmul.mubr.bf16.vlgmr.msra.gmra.mrb[112].mxu0 %v23442_v21  ;;  %v19312_v21 = vld [vmem:[#allocation13 + $0x6c] ss:$16 sps:$4 sm:$0xff]  }
 0x70a   :  { %7911 = vmatprep.mubr.bf16.mxu1 %v23456_v40  ;;  %8057 = vmatprep.mubr.bf16.mxu0 %v23456_v40  ;;  %v19307_v40 = vld [vmem:[#allocation13 + $0x60] ss:$16 sps:$4 sm:$0xff]  }
 0x70b   :  { %11599 = vmatpush1.bf16.msra.mxu1 %v19289_v62  ;;  %12183 = vmatpush1.bf16.msra.mxu0 %v19292_v43  ;;  %v19376_v62 = vld [vmem:[#allocation13 + $0x1c8] ss:$16 sps:$4 sm:$0xff]   ;;  %v19381_v43 = vld [vmem:[#allocation13 + $0x1e4] ss:$16 sps:$4 sm:$0xff]  }
 0x70c   :  { %11600 = vmatprep.subr.bf16.mxu1 %v19297_v45  ;;  %12184 = vmatprep.subr.bf16.mxu0 %v19300_v5  ;;  %v19384_v45 = vld [vmem:[#allocation13 + $0x1ec] ss:$16 sps:$4 sm:$0xff]   ;;  %v19379_v5 = vld [vmem:[#allocation13 + $0x1e0] ss:$16 sps:$4 sm:$0xff]  }
 0x70f   :  { %11601 = vmatpush1.bf16.msra.mxu1 %v19295_v63  ;;  %12185 = vmatpush1.bf16.msra.mxu0 %v19298_v13  ;;  %v19382_v63 = vld [vmem:[#allocation13 + $0x1e8] ss:$16 sps:$4 sm:$0xff]   ;;  %v19387_v13 = vld [vmem:[#allocation13 + $0x204] ss:$16 sps:$4 sm:$0xff]  }
 0x710   :  { %11602 = vmatprep.subr.bf16.mxu1 %v19303_v59  ;;  %12186 = vmatprep.subr.bf16.mxu0 %v19306_v49  ;;  %v19390_v59 = vld [vmem:[#allocation13 + $0x20c] ss:$16 sps:$4 sm:$0xff]   ;;  %v16581_v49 = vcombine.low %v23499_v25, %v23504_v19 }
 0x711   :  { %7912 = vmatmul.mubr.bf16.gmra.mrb[100].mxu1 %v23454_v30  ;;  %8058 = vmatmul.mubr.bf16.gmra.mrb[116].mxu0 %v23454_v30  ;;  %v19324_v30 = vld [vmem:[#allocation13 + $0xac] ss:$16 sps:$4 sm:$0xff]  }
 0x712   :  { %7921 = vmatprep.mubr.bf16.mxu1 %v23468_v61  ;;  %8067 = vmatprep.mubr.bf16.mxu0 %v23468_v61  ;;  %v19319_v61 = vld [vmem:[#allocation13 + $0xa0] ss:$16 sps:$4 sm:$0xff]  }
 0x713   :  { %11603 = vmatpush1.bf16.msra.mxu1 %v19301_v2  ;;  %12187 = vmatpush1.bf16.msra.mxu0 %v19304_v36  ;;  %v8136_v2 = vld [vmem:[%s24272_s23 + $0x80] sm:$0xff] }
 0x714   :  { %11604 = vmatprep.subr.bf16.mxu1 %v19309_v55  ;;  %12188 = vmatprep.subr.bf16.mxu0 %v19312_v21  ;;  %v8144_v36 = vld [vmem:[%s24272_s23 + $0xc0] sm:$0xff]  ;;  %v19388_v21 = vld [vmem:[#allocation13 + $0x208] ss:$16 sps:$4 sm:$0xff]  }
 0x715   :  { %v19385_v55 = vld [vmem:[#allocation13 + $0x200] ss:$16 sps:$4 sm:$0xff]  }
 0x717   :  { %11605 = vmatpush1.bf16.msra.mxu1 %v19307_v40  ;;  %12189 = vmatpush1.bf16.msra.mxu0 %v19310_v24  ;;  %v19393_v40 = vld [vmem:[#allocation13 + $0x224] ss:$16 sps:$4 sm:$0xff]   ;;  %v19396_v24 = vld [vmem:[#allocation13 + $0x22c] ss:$16 sps:$4 sm:$0xff]  }
 0x718   :  { %11606 = vmatprep.subr.bf16.mxu1 %v19315_v15  ;;  %12190 = vmatprep.subr.bf16.mxu0 %v19318_v60  ;;  %v16598_v15 = vcombine.high %v8136_v2, %v8144_v36  ;;  %v19391_v60 = vld [vmem:[#allocation13 + $0x220] ss:$16 sps:$4 sm:$0xff]  }
 0x719   :  { %7922 = vmatmul.mubr.bf16.gmra.mrb[104].mxu1 %v23466_v58  ;;  %8068 = vmatmul.mubr.bf16.gmra.mrb[120].mxu0 %v23466_v58  ;;  %v19327_v58 = vld [vmem:[#allocation13 + $0xc4] ss:$16 sps:$4 sm:$0xff]  }
 0x71a   :  { %7931 = vmatprep.mubr.bf16.mxu1 %v23480_v37  ;;  %8077 = vmatprep.mubr.bf16.mxu0 %v23480_v37  ;;  %v16582_v37 = vcombine.high %v23499_v25, %v23504_v19  ;;  %v19397_v25 = vld [vmem:[#allocation13 + $0x240] ss:$16 sps:$4 sm:$0xff]   ;;  %v19400_v19 = vld [vmem:[#allocation13 + $0x248] ss:$16 sps:$4 sm:$0xff]  }
 0x71b   :  { %11607 = vmatpush1.bf16.msra.mxu1 %v19313_v22  ;;  %12191 = vmatpush1.bf16.msra.mxu0 %v19316_v48  ;;  %v19394_v22 = vld [vmem:[#allocation13 + $0x228] ss:$16 sps:$4 sm:$0xff]   ;;  %v19399_v48 = vld [vmem:[#allocation13 + $0x244] ss:$16 sps:$4 sm:$0xff]  }
 0x71c   :  { %11608 = vmatprep.subr.bf16.mxu1 %v19321_v47  ;;  %12192 = vmatprep.subr.bf16.mxu0 %v19324_v30  ;;  %v19402_v47 = vld [vmem:[#allocation13 + $0x24c] ss:$16 sps:$4 sm:$0xff]   ;;  %v16597_v30 = vcombine.low %v8136_v2, %v8144_v36  ;;  %v19454_v2 = vld [vmem:[#allocation13 + $0x368] ss:$16 sps:$4 sm:$0xff]   ;;  %v19459_v36 = vld [vmem:[#allocation13 + $0x384] ss:$16 sps:$4 sm:$0xff]  }
 0x71f   :  { %11609 = vmatpush1.bf16.msra.mxu1 %v19319_v61  ;;  %12193 = vmatpush1.bf16.msra.mxu0 %v19322_v7  ;;  %v8152_v61 = vld [vmem:[%s24272_s23 + $0x100] sm:$0xff] }
 0x720   :  { %11610 = vmatprep.subr.bf16.mxu1 %v19327_v58  ;;  %12194 = vmatprep.subr.bf16.mxu0 %v19330_v56  ;;  %v8160_v7 = vld [vmem:[%s24272_s23 + $0x140] sm:$0xff]  ;;  %v19405_v58 = vld [vmem:[#allocation13 + $0x264] ss:$16 sps:$4 sm:$0xff]  }
 0x721   :  { %7932 = vmatmul.mubr.bf16.gmra.mrb[108].mxu1 %v23478_v23  ;;  %8078 = vmatmul.mubr.bf16.gmra.mrb[124].mxu0 %v23478_v23  ;;  %v19343_v23 = vld [vmem:[#allocation13 + $0x120] ss:$16 sps:$4 sm:$0xff]   ;;  %v19408_v56 = vld [vmem:[#allocation13 + $0x26c] ss:$16 sps:$4 sm:$0xff]  }
 0x722   :  { %11630 = vmatprep.mubr.bf16.mxu1 %v16582_v37  ;;  %12214 = vmatprep.mubr.bf16.mxu0 %v16582_v37  ;;  %v16614_v37 = vcombine.high %v8152_v61, %v8160_v7 }
 0x723   :  { %11611 = vmatpush1.bf16.msra.mxu1 %v19325_v52  ;;  %12195 = vmatpush1.bf16.msra.mxu0 %v19328_v32  ;;  %v19403_v52 = vld [vmem:[#allocation13 + $0x260] ss:$16 sps:$4 sm:$0xff]   ;;  %v19406_v32 = vld [vmem:[#allocation13 + $0x268] ss:$16 sps:$4 sm:$0xff]  }
 0x724   :  { %11612 = vmatprep.subr.bf16.mxu1 %v19333_v14  ;;  %12196 = vmatprep.subr.bf16.mxu0 %v19336_v1  ;;  %v19411_v14 = vld [vmem:[#allocation13 + $0x284] ss:$16 sps:$4 sm:$0xff]   ;;  %v19414_v1 = vld [vmem:[#allocation13 + $0x28c] ss:$16 sps:$4 sm:$0xff]  }
 0x727   :  { %11613 = vmatpush1.bf16.msra.mxu1 %v19331_v12  ;;  %12197 = vmatpush1.bf16.msra.mxu0 %v19334_v35  ;;  %v16613_v12 = vcombine.low %v8152_v61, %v8160_v7  ;;  %v8168_v35 = vld [vmem:[%s24272_s23 + $0x180] sm:$0xff]  ;;  %v19472_v61 = vld [vmem:[#allocation13 + $0x3c8] ss:$16 sps:$4 sm:$0xff]   ;;  %v19477_v7 = vld [vmem:[#allocation13 + $0x3e4] ss:$16 sps:$4 sm:$0xff]  }
 0x728   :  { %11614 = vmatprep.subr.bf16.mxu1 %v19339_v28  ;;  %12198 = vmatprep.subr.bf16.mxu0 %v19342_v31  ;;  %v8176_v28 = vld [vmem:[%s24272_s23 + $0x1c0] sm:$0xff] }
 0x729   :  { %v19409_v31 = vld [vmem:[#allocation13 + $0x280] ss:$16 sps:$4 sm:$0xff]  }
 0x72b   :  { %11615 = vmatpush1.bf16.msra.mxu1 %v19337_v38  ;;  %12199 = vmatpush1.bf16.msra.mxu0 %v19340_v16  ;;  %v19412_v38 = vld [vmem:[#allocation13 + $0x288] ss:$16 sps:$4 sm:$0xff]   ;;  %v19417_v16 = vld [vmem:[#allocation13 + $0x2a4] ss:$16 sps:$4 sm:$0xff]  }
 0x72c   :  { %11616 = vmatprep.subr.bf16.mxu1 %v19345_v51  ;;  %12200 = vmatprep.subr.bf16.mxu0 %v19348_v17  ;;  %v19420_v51 = vld [vmem:[#allocation13 + $0x2ac] ss:$16 sps:$4 sm:$0xff]   ;;  %v16630_v17 = vcombine.high %v8168_v35, %v8176_v28 }
 0x72f   :  { %11617 = vmatpush1.bf16.msra.mxu1 %v19343_v23  ;;  %12201 = vmatpush1.bf16.msra.mxu0 %v19346_v0  ;;  %v19415_v23 = vld [vmem:[#allocation13 + $0x2a0] ss:$16 sps:$4 sm:$0xff]   ;;  %v19418_v0 = vld [vmem:[#allocation13 + $0x2a8] ss:$16 sps:$4 sm:$0xff]  }
 0x730   :  { %11618 = vmatprep.subr.bf16.mxu1 %v19351_v33  ;;  %12202 = vmatprep.subr.bf16.mxu0 %v19354_v18  ;;  %v19423_v33 = vld [vmem:[#allocation13 + $0x2c4] ss:$16 sps:$4 sm:$0xff]   ;;  %v19426_v18 = vld [vmem:[#allocation13 + $0x2cc] ss:$16 sps:$4 sm:$0xff]  }
 0x733   :  { %11619 = vmatpush1.bf16.msra.mxu1 %v19349_v39  ;;  %12203 = vmatpush1.bf16.msra.mxu0 %v19352_v34  ;;  %v16629_v39 = vcombine.low %v8168_v35, %v8176_v28  ;;  %v23533_v34 = vld [vmem:[%s24272_s23 + $0x8] sm:$0xff]  ;;  %v19492_v28 = vld [vmem:[#allocation13 + $0x42c] ss:$16 sps:$4 sm:$0xff]  }
 0x734   :  { %11620 = vmatprep.subr.bf16.mxu1 %v19357_v27  ;;  %12204 = vmatprep.subr.bf16.mxu0 %v19360_v54  ;;  %v23538_v27 = vld [vmem:[%s24272_s23 + $0x48] sm:$0xff]  ;;  %v19421_v54 = vld [vmem:[#allocation13 + $0x2c0] ss:$16 sps:$4 sm:$0xff]  }
 0x735   :  { %v19489_v35 = vld [vmem:[#allocation13 + $0x424] ss:$16 sps:$4 sm:$0xff]  }
 0x737   :  { %11621 = vmatpush1.bf16.msra.mxu1 %v19355_v3  ;;  %12205 = vmatpush1.bf16.msra.mxu0 %v19358_v46  ;;  %v19424_v3 = vld [vmem:[#allocation13 + $0x2c8] ss:$16 sps:$4 sm:$0xff]   ;;  %v19429_v46 = vld [vmem:[#allocation13 + $0x2e4] ss:$16 sps:$4 sm:$0xff]  }
 0x738   :  { %11622 = vmatprep.subr.bf16.mxu1 %v19363_v8  ;;  %12206 = vmatprep.subr.bf16.mxu0 %v19366_v57  ;;  %v19432_v8 = vld [vmem:[#allocation13 + $0x2ec] ss:$16 sps:$4 sm:$0xff]   ;;  %v16584_v57 = vcombine.high %v23533_v34, %v23538_v27 }
 0x73b   :  { %11623 = vmatpush1.bf16.msra.mxu1 %v19361_v53  ;;  %12207 = vmatpush1.bf16.msra.mxu0 %v19364_v29  ;;  %v19427_v53 = vld [vmem:[#allocation13 + $0x2e0] ss:$16 sps:$4 sm:$0xff]   ;;  %v19430_v29 = vld [vmem:[#allocation13 + $0x2e8] ss:$16 sps:$4 sm:$0xff]  }
 0x73c   :  { %11624 = vmatprep.subr.bf16.mxu1 %v19369_v50  ;;  %12208 = vmatprep.subr.bf16.mxu0 %v19372_v26  ;;  %v19435_v50 = vld [vmem:[#allocation13 + $0x304] ss:$16 sps:$4 sm:$0xff]   ;;  %v19438_v26 = vld [vmem:[#allocation13 + $0x30c] ss:$16 sps:$4 sm:$0xff]  }
 0x73f   :  { %11625 = vmatpush1.bf16.msra.mxu1 %v19367_v42  ;;  %12209 = vmatpush1.bf16.msra.mxu0 %v19370_v10  ;;  %v19433_v42 = vld [vmem:[#allocation13 + $0x300] ss:$16 sps:$4 sm:$0xff]   ;;  %v19436_v10 = vld [vmem:[#allocation13 + $0x308] ss:$16 sps:$4 sm:$0xff]  }
 0x740   :  { %11626 = vmatprep.subr.bf16.mxu1 %v19375_v41  ;;  %12210 = vmatprep.subr.bf16.mxu0 %v19378_v4  ;;  %v19441_v41 = vld [vmem:[#allocation13 + $0x324] ss:$16 sps:$4 sm:$0xff]   ;;  %v19444_v4 = vld [vmem:[#allocation13 + $0x32c] ss:$16 sps:$4 sm:$0xff]  }
 0x743   :  { %11627 = vmatpush1.bf16.msra.mxu1 %v19373_v9  ;;  %12211 = vmatpush1.bf16.msra.mxu0 %v19376_v62  ;;  %v19439_v9 = vld [vmem:[#allocation13 + $0x320] ss:$16 sps:$4 sm:$0xff]   ;;  %v19442_v62 = vld [vmem:[#allocation13 + $0x328] ss:$16 sps:$4 sm:$0xff]  }
 0x744   :  { %11628 = vmatprep.subr.bf16.mxu1 %v19381_v43  ;;  %12212 = vmatprep.subr.bf16.mxu0 %v19384_v45  ;;  %v19447_v43 = vld [vmem:[#allocation13 + $0x344] ss:$16 sps:$4 sm:$0xff]   ;;  %v19450_v45 = vld [vmem:[#allocation13 + $0x34c] ss:$16 sps:$4 sm:$0xff]  }
 0x747   :  { %11629 = vmatpush1.bf16.msra.mxu1 %v19379_v5  ;;  %12213 = vmatpush1.bf16.msra.mxu0 %v19382_v63  ;;  %v19445_v5 = vld [vmem:[#allocation13 + $0x340] ss:$16 sps:$4 sm:$0xff]   ;;  %v19448_v63 = vld [vmem:[#allocation13 + $0x348] ss:$16 sps:$4 sm:$0xff]  }
 0x748   :  { %11671 = vmatprep.subr.bf16.mxu1 %v19387_v13  ;;  %12255 = vmatprep.subr.bf16.mxu0 %v19390_v59  ;;  %v19453_v13 = vld [vmem:[#allocation13 + $0x364] ss:$16 sps:$4 sm:$0xff]   ;;  %v19456_v59 = vld [vmem:[#allocation13 + $0x36c] ss:$16 sps:$4 sm:$0xff]  }
 0x74a   :  { %11631 = vmatmul.mubr.bf16.vlgmr.msra.gmra.mrb[112].mxu1 %v16581_v49  ;;  %12215 = vmatmul.mubr.bf16.vlgmr.msra.gmra.mrb[128].mxu0 %v16581_v49  ;;  %v19451_v49 = vld [vmem:[#allocation13 + $0x360] ss:$16 sps:$4 sm:$0xff]  }
 0x74b   :  { %11672 = vmatpush1.bf16.msra.mxu1 %v19385_v55  ;;  %12256 = vmatpush1.bf16.msra.mxu0 %v19388_v21  ;;  %v19462_v55 = vld [vmem:[#allocation13 + $0x38c] ss:$16 sps:$4 sm:$0xff]   ;;  %v19457_v21 = vld [vmem:[#allocation13 + $0x380] ss:$16 sps:$4 sm:$0xff]  }
 0x74c   :  { %11673 = vmatprep.subr.bf16.mxu1 %v19393_v40  ;;  %12257 = vmatprep.subr.bf16.mxu0 %v19396_v24  ;;  %v19460_v40 = vld [vmem:[#allocation13 + $0x388] ss:$16 sps:$4 sm:$0xff]   ;;  %v19465_v24 = vld [vmem:[#allocation13 + $0x3a4] ss:$16 sps:$4 sm:$0xff]  }
 0x74d   :  { %11640 = vmatprep.mubr.bf16.mxu1 %v16598_v15  ;;  %12224 = vmatprep.mubr.bf16.mxu0 %v16598_v15  ;;  %v19468_v15 = vld [vmem:[#allocation13 + $0x3ac] ss:$16 sps:$4 sm:$0xff]  }
 0x74f   :  { %11674 = vmatpush1.bf16.msra.mxu1 %v19391_v60  ;;  %12258 = vmatpush1.bf16.msra.mxu0 %v19394_v22  ;;  %v19463_v60 = vld [vmem:[#allocation13 + $0x3a0] ss:$16 sps:$4 sm:$0xff]   ;;  %v19466_v22 = vld [vmem:[#allocation13 + $0x3a8] ss:$16 sps:$4 sm:$0xff]  }
 0x750   :  { %11675 = vmatprep.subr.bf16.mxu1 %v19399_v48  ;;  %12259 = vmatprep.subr.bf16.mxu0 %v19402_v47  ;;  %v19471_v48 = vld [vmem:[#allocation13 + $0x3c4] ss:$16 sps:$4 sm:$0xff]   ;;  %v19474_v47 = vld [vmem:[#allocation13 + $0x3cc] ss:$16 sps:$4 sm:$0xff]  }
 0x752   :  { %11641 = vmatmul.mubr.bf16.gmra.mrb[116].mxu1 %v16597_v30  ;;  %12225 = vmatmul.mubr.bf16.gmra.mrb[132].mxu0 %v16597_v30  ;;  %v19469_v30 = vld [vmem:[#allocation13 + $0x3c0] ss:$16 sps:$4 sm:$0xff]  }
 0x753   :  { %11676 = vmatpush1.bf16.msra.mxu1 %v19397_v25  ;;  %12260 = vmatpush1.bf16.msra.mxu0 %v19400_v19  ;;  %v19480_v25 = vld [vmem:[#allocation13 + $0x3ec] ss:$16 sps:$4 sm:$0xff]   ;;  %v19475_v19 = vld [vmem:[#allocation13 + $0x3e0] ss:$16 sps:$4 sm:$0xff]  }
 0x754   :  { %11677 = vmatprep.subr.bf16.mxu1 %v19405_v58  ;;  %12261 = vmatprep.subr.bf16.mxu0 %v19408_v56  ;;  %v19478_v58 = vld [vmem:[#allocation13 + $0x3e8] ss:$16 sps:$4 sm:$0xff]   ;;  %v19483_v56 = vld [vmem:[#allocation13 + $0x404] ss:$16 sps:$4 sm:$0xff]  }
 0x755   :  { %11650 = vmatprep.mubr.bf16.mxu1 %v16614_v37  ;;  %12234 = vmatprep.mubr.bf16.mxu0 %v16614_v37  ;;  %v19486_v37 = vld [vmem:[#allocation13 + $0x40c] ss:$16 sps:$4 sm:$0xff]  }
 0x757   :  { %11678 = vmatpush1.bf16.msra.mxu1 %v19403_v52  ;;  %12262 = vmatpush1.bf16.msra.mxu0 %v19406_v32  ;;  %v16583_v52 = vcombine.low %v23533_v34, %v23538_v27  ;;  %v8137_v32 = vld [vmem:[%s24272_s23 + $0x88] sm:$0xff]  ;;  %v19504_v27 = vld [vmem:[#allocation13 + $0x46c] ss:$16 sps:$4 sm:$0xff]  }
 0x758   :  { %11679 = vmatprep.subr.bf16.mxu1 %v19411_v14  ;;  %12263 = vmatprep.subr.bf16.mxu0 %v19414_v1  ;;  %v8145_v14 = vld [vmem:[%s24272_s23 + $0xc8] sm:$0xff]  ;;  %v19481_v1 = vld [vmem:[#allocation13 + $0x400] ss:$16 sps:$4 sm:$0xff]  }
 0x759   :  { %v19501_v34 = vld [vmem:[#allocation13 + $0x464] ss:$16 sps:$4 sm:$0xff]  }
 0x75a   :  { %11651 = vmatmul.mubr.bf16.gmra.mrb[120].mxu1 %v16613_v12  ;;  %12235 = vmatmul.mubr.bf16.gmra.mrb[136].mxu0 %v16613_v12  ;;  %v19484_v12 = vld [vmem:[#allocation13 + $0x408] ss:$16 sps:$4 sm:$0xff]  }
 0x75b   :  { %11680 = vmatpush1.bf16.msra.mxu1 %v19409_v31  ;;  %12264 = vmatpush1.bf16.msra.mxu0 %v19412_v38  ;;  %v16600_v31 = vcombine.high %v8137_v32, %v8145_v14  ;;  %v19487_v38 = vld [vmem:[#allocation13 + $0x420] ss:$16 sps:$4 sm:$0xff]  }
 0x75c   :  { %11681 = vmatprep.subr.bf16.mxu1 %v19417_v16  ;;  %12265 = vmatprep.subr.bf16.mxu0 %v19420_v51  ;;  %v19490_v16 = vld [vmem:[#allocation13 + $0x428] ss:$16 sps:$4 sm:$0xff]   ;;  %v19495_v51 = vld [vmem:[#allocation13 + $0x444] ss:$16 sps:$4 sm:$0xff]  }
 0x75d   :  { %11660 = vmatprep.mubr.bf16.mxu1 %v16630_v17  ;;  %12244 = vmatprep.mubr.bf16.mxu0 %v16630_v17  ;;  %v19498_v17 = vld [vmem:[#allocation13 + $0x44c] ss:$16 sps:$4 sm:$0xff]  }
 0x75f   :  { %11682 = vmatpush1.bf16.msra.mxu1 %v19415_v23  ;;  %12266 = vmatpush1.bf16.msra.mxu0 %v19418_v0  ;;  %v16599_v23 = vcombine.low %v8137_v32, %v8145_v14  ;;  %v8153_v0 = vld [vmem:[%s24272_s23 + $0x108] sm:$0xff] }
 0x760   :  { %11683 = vmatprep.subr.bf16.mxu1 %v19423_v33  ;;  %12267 = vmatprep.subr.bf16.mxu0 %v19426_v18  ;;  %v8161_v33 = vld [vmem:[%s24272_s23 + $0x148] sm:$0xff]  ;;  %v19493_v18 = vld [vmem:[#allocation13 + $0x440] ss:$16 sps:$4 sm:$0xff]  }
 0x761   :  { %v19550_v32 = vld [vmem:[#allocation13 + $0x568] ss:$16 sps:$4 sm:$0xff]   ;;  %v19555_v14 = vld [vmem:[#allocation13 + $0x584] ss:$16 sps:$4 sm:$0xff]  }
 0x762   :  { %11661 = vmatmul.mubr.bf16.gmra.mrb[124].mxu1 %v16629_v39  ;;  %12245 = vmatmul.mubr.bf16.gmra.mrb[140].mxu0 %v16629_v39  ;;  %v19496_v39 = vld [vmem:[#allocation13 + $0x448] ss:$16 sps:$4 sm:$0xff]  }
 0x763   :  { %11684 = vmatpush1.bf16.msra.mxu1 %v19421_v54  ;;  %12268 = vmatpush1.bf16.msra.mxu0 %v19424_v3  ;;  %v16616_v54 = vcombine.high %v8153_v0, %v8161_v33  ;;  %v19499_v3 = vld [vmem:[#allocation13 + $0x460] ss:$16 sps:$4 sm:$0xff]  }
 0x764   :  { %11685 = vmatprep.subr.bf16.mxu1 %v19429_v46  ;;  %12269 = vmatprep.subr.bf16.mxu0 %v19432_v8  ;;  %v19502_v46 = vld [vmem:[#allocation13 + $0x468] ss:$16 sps:$4 sm:$0xff]   ;;  %v19507_v8 = vld [vmem:[#allocation13 + $0x484] ss:$16 sps:$4 sm:$0xff]  }
 0x765   :  { %11703 = vmatprep.mubr.bf16.mxu1 %v16584_v57  ;;  %12287 = vmatprep.mubr.bf16.mxu0 %v16584_v57  ;;  %v19510_v57 = vld [vmem:[#allocation13 + $0x48c] ss:$16 sps:$4 sm:$0xff]  }
 0x767   :  { %11686 = vmatpush1.bf16.msra.mxu1 %v19427_v53  ;;  %12270 = vmatpush1.bf16.msra.mxu0 %v19430_v29  ;;  %v16615_v53 = vcombine.low %v8153_v0, %v8161_v33  ;;  %v8169_v29 = vld [vmem:[%s24272_s23 + $0x188] sm:$0xff] }
 0x768   :  { %11687 = vmatprep.subr.bf16.mxu1 %v19435_v50  ;;  %12271 = vmatprep.subr.bf16.mxu0 %v19438_v26  ;;  %v8177_v50 = vld [vmem:[%s24272_s23 + $0x1c8] sm:$0xff]  ;;  %v19505_v26 = vld [vmem:[#allocation13 + $0x480] ss:$16 sps:$4 sm:$0xff]  }
 0x769   :  { %v19568_v0 = vld [vmem:[#allocation13 + $0x5c8] ss:$16 sps:$4 sm:$0xff]   ;;  %v19573_v33 = vld [vmem:[#allocation13 + $0x5e4] ss:$16 sps:$4 sm:$0xff]  }
 0x76b   :  { %11688 = vmatpush1.bf16.msra.mxu1 %v19433_v42  ;;  %12272 = vmatpush1.bf16.msra.mxu0 %v19436_v10  ;;  %v19508_v42 = vld [vmem:[#allocation13 + $0x488] ss:$16 sps:$4 sm:$0xff]   ;;  %v19513_v10 = vld [vmem:[#allocation13 + $0x4a4] ss:$16 sps:$4 sm:$0xff]  }
 0x76c   :  { %11689 = vmatprep.subr.bf16.mxu1 %v19441_v41  ;;  %12273 = vmatprep.subr.bf16.mxu0 %v19444_v4  ;;  %v19516_v41 = vld [vmem:[#allocation13 + $0x4ac] ss:$16 sps:$4 sm:$0xff]   ;;  %v16632_v4 = vcombine.high %v8169_v29, %v8177_v50 }
 0x76f   :  { %11690 = vmatpush1.bf16.msra.mxu1 %v19439_v9  ;;  %12274 = vmatpush1.bf16.msra.mxu0 %v19442_v62  ;;  %v19511_v9 = vld [vmem:[#allocation13 + $0x4a0] ss:$16 sps:$4 sm:$0xff]   ;;  %v19514_v62 = vld [vmem:[#allocation13 + $0x4a8] ss:$16 sps:$4 sm:$0xff]  }
 0x770   :  { %11691 = vmatprep.subr.bf16.mxu1 %v19447_v43  ;;  %12275 = vmatprep.subr.bf16.mxu0 %v19450_v45  ;;  %v19519_v43 = vld [vmem:[#allocation13 + $0x4c4] ss:$16 sps:$4 sm:$0xff]   ;;  %v19522_v45 = vld [vmem:[#allocation13 + $0x4cc] ss:$16 sps:$4 sm:$0xff]  }
 0x773   :  { %11692 = vmatpush1.bf16.msra.mxu1 %v19445_v5  ;;  %12276 = vmatpush1.bf16.msra.mxu0 %v19448_v63  ;;  %v16631_v5 = vcombine.low %v8169_v29, %v8177_v50  ;;  %v23565_v63 = vld [vmem:[%s24272_s23 + $0x10] sm:$0xff]  ;;  %v19585_v29 = vld [vmem:[#allocation13 + $0x624] ss:$16 sps:$4 sm:$0xff]  }
 0x774   :  { %11693 = vmatprep.subr.bf16.mxu1 %v19453_v13  ;;  %12277 = vmatprep.subr.bf16.mxu0 %v19456_v59  ;;  %v23570_v13 = vld [vmem:[%s24272_s23 + $0x50] sm:$0xff] }
 0x775   :  { %v19517_v59 = vld [vmem:[#allocation13 + $0x4c0] ss:$16 sps:$4 sm:$0xff]   ;;  %v19588_v50 = vld [vmem:[#allocation13 + $0x62c] ss:$16 sps:$4 sm:$0xff]  }
 0x777   :  { %11694 = vmatpush1.bf16.msra.mxu1 %v19451_v49  ;;  %12278 = vmatpush1.bf16.msra.mxu0 %v19454_v2  ;;  %v19520_v49 = vld [vmem:[#allocation13 + $0x4c8] ss:$16 sps:$4 sm:$0xff]   ;;  %v19525_v2 = vld [vmem:[#allocation13 + $0x4e4] ss:$16 sps:$4 sm:$0xff]  }
 0x778   :  { %11695 = vmatprep.subr.bf16.mxu1 %v19459_v36  ;;  %12279 = vmatprep.subr.bf16.mxu0 %v19462_v55  ;;  %v19528_v36 = vld [vmem:[#allocation13 + $0x4ec] ss:$16 sps:$4 sm:$0xff]   ;;  %v16586_v55 = vcombine.high %v23565_v63, %v23570_v13 }
 0x77b   :  { %11696 = vmatpush1.bf16.msra.mxu1 %v19457_v21  ;;  %12280 = vmatpush1.bf16.msra.mxu0 %v19460_v40  ;;  %v19523_v21 = vld [vmem:[#allocation13 + $0x4e0] ss:$16 sps:$4 sm:$0xff]   ;;  %v19526_v40 = vld [vmem:[#allocation13 + $0x4e8] ss:$16 sps:$4 sm:$0xff]  }
 0x77c   :  { %11697 = vmatprep.subr.bf16.mxu1 %v19465_v24  ;;  %12281 = vmatprep.subr.bf16.mxu0 %v19468_v15  ;;  %v19531_v24 = vld [vmem:[#allocation13 + $0x504] ss:$16 sps:$4 sm:$0xff]   ;;  %v19534_v15 = vld [vmem:[#allocation13 + $0x50c] ss:$16 sps:$4 sm:$0xff]  }
 0x77f   :  { %11698 = vmatpush1.bf16.msra.mxu1 %v19463_v60  ;;  %12282 = vmatpush1.bf16.msra.mxu0 %v19466_v22  ;;  %v19529_v60 = vld [vmem:[#allocation13 + $0x500] ss:$16 sps:$4 sm:$0xff]   ;;  %v19532_v22 = vld [vmem:[#allocation13 + $0x508] ss:$16 sps:$4 sm:$0xff]  }
 0x780   :  { %11699 = vmatprep.subr.bf16.mxu1 %v19471_v48  ;;  %12283 = vmatprep.subr.bf16.mxu0 %v19474_v47  ;;  %v19537_v48 = vld [vmem:[#allocation13 + $0x524] ss:$16 sps:$4 sm:$0xff]   ;;  %v19540_v47 = vld [vmem:[#allocation13 + $0x52c] ss:$16 sps:$4 sm:$0xff]  }
 0x783   :  { %11700 = vmatpush1.bf16.msra.mxu1 %v19469_v30  ;;  %12284 = vmatpush1.bf16.msra.mxu0 %v19472_v61  ;;  %v19535_v30 = vld [vmem:[#allocation13 + $0x520] ss:$16 sps:$4 sm:$0xff]   ;;  %v19538_v61 = vld [vmem:[#allocation13 + $0x528] ss:$16 sps:$4 sm:$0xff]  }
 0x784   :  { %11701 = vmatprep.subr.bf16.mxu1 %v19477_v7  ;;  %12285 = vmatprep.subr.bf16.mxu0 %v19480_v25  ;;  %v19543_v7 = vld [vmem:[#allocation13 + $0x544] ss:$16 sps:$4 sm:$0xff]   ;;  %v19546_v25 = vld [vmem:[#allocation13 + $0x54c] ss:$16 sps:$4 sm:$0xff]  }
 0x787   :  { %11702 = vmatpush1.bf16.msra.mxu1 %v19475_v19  ;;  %12286 = vmatpush1.bf16.msra.mxu0 %v19478_v58  ;;  %v19541_v19 = vld [vmem:[#allocation13 + $0x540] ss:$16 sps:$4 sm:$0xff]   ;;  %v19544_v58 = vld [vmem:[#allocation13 + $0x548] ss:$16 sps:$4 sm:$0xff]  }
 0x788   :  { %11744 = vmatprep.subr.bf16.mxu1 %v19483_v56  ;;  %12328 = vmatprep.subr.bf16.mxu0 %v19486_v37  ;;  %v19549_v56 = vld [vmem:[#allocation13 + $0x564] ss:$16 sps:$4 sm:$0xff]   ;;  %v19552_v37 = vld [vmem:[#allocation13 + $0x56c] ss:$16 sps:$4 sm:$0xff]  }
 0x78a   :  { %11704 = vmatmul.mubr.bf16.vlgmr.msra.gmra.mrb[112].mxu1 %v16583_v52  ;;  %12288 = vmatmul.mubr.bf16.vlgmr.msra.gmra.mrb[128].mxu0 %v16583_v52  ;;  %v19547_v52 = vld [vmem:[#allocation13 + $0x560] ss:$16 sps:$4 sm:$0xff]  }
 0x78b   :  { %11745 = vmatpush1.bf16.msra.mxu1 %v19481_v1  ;;  %12329 = vmatpush1.bf16.msra.mxu0 %v19484_v12  ;;  %v19558_v1 = vld [vmem:[#allocation13 + $0x58c] ss:$16 sps:$4 sm:$0xff]   ;;  %v19553_v12 = vld [vmem:[#allocation13 + $0x580] ss:$16 sps:$4 sm:$0xff]  }
 0x78c   :  { %11746 = vmatprep.subr.bf16.mxu1 %v19489_v35  ;;  %12330 = vmatprep.subr.bf16.mxu0 %v19492_v28  ;;  %v19556_v35 = vld [vmem:[#allocation13 + $0x588] ss:$16 sps:$4 sm:$0xff]   ;;  %v19561_v28 = vld [vmem:[#allocation13 + $0x5a4] ss:$16 sps:$4 sm:$0xff]  }
 0x78d   :  { %11713 = vmatprep.mubr.bf16.mxu1 %v16600_v31  ;;  %12297 = vmatprep.mubr.bf16.mxu0 %v16600_v31  ;;  %v19564_v31 = vld [vmem:[#allocation13 + $0x5ac] ss:$16 sps:$4 sm:$0xff]  }
 0x78f   :  { %11747 = vmatpush1.bf16.msra.mxu1 %v19487_v38  ;;  %12331 = vmatpush1.bf16.msra.mxu0 %v19490_v16  ;;  %v19559_v38 = vld [vmem:[#allocation13 + $0x5a0] ss:$16 sps:$4 sm:$0xff]   ;;  %v19562_v16 = vld [vmem:[#allocation13 + $0x5a8] ss:$16 sps:$4 sm:$0xff]  }
 0x790   :  { %11748 = vmatprep.subr.bf16.mxu1 %v19495_v51  ;;  %12332 = vmatprep.subr.bf16.mxu0 %v19498_v17  ;;  %v19567_v51 = vld [vmem:[#allocation13 + $0x5c4] ss:$16 sps:$4 sm:$0xff]   ;;  %v19570_v17 = vld [vmem:[#allocation13 + $0x5cc] ss:$16 sps:$4 sm:$0xff]  }
 0x792   :  { %11714 = vmatmul.mubr.bf16.gmra.mrb[116].mxu1 %v16599_v23  ;;  %12298 = vmatmul.mubr.bf16.gmra.mrb[132].mxu0 %v16599_v23  ;;  %v19565_v23 = vld [vmem:[#allocation13 + $0x5c0] ss:$16 sps:$4 sm:$0xff]  }
 0x793   :  { %11749 = vmatpush1.bf16.msra.mxu1 %v19493_v18  ;;  %12333 = vmatpush1.bf16.msra.mxu0 %v19496_v39  ;;  %v19576_v18 = vld [vmem:[#allocation13 + $0x5ec] ss:$16 sps:$4 sm:$0xff]   ;;  %v19571_v39 = vld [vmem:[#allocation13 + $0x5e0] ss:$16 sps:$4 sm:$0xff]  }
 0x794   :  { %11750 = vmatprep.subr.bf16.mxu1 %v19501_v34  ;;  %12334 = vmatprep.subr.bf16.mxu0 %v19504_v27  ;;  %v19574_v34 = vld [vmem:[#allocation13 + $0x5e8] ss:$16 sps:$4 sm:$0xff]   ;;  %v19579_v27 = vld [vmem:[#allocation13 + $0x604] ss:$16 sps:$4 sm:$0xff]  }
 0x795   :  { %11723 = vmatprep.mubr.bf16.mxu1 %v16616_v54  ;;  %12307 = vmatprep.mubr.bf16.mxu0 %v16616_v54  ;;  %v19582_v54 = vld [vmem:[#allocation13 + $0x60c] ss:$16 sps:$4 sm:$0xff]  }
 0x797   :  { %11751 = vmatpush1.bf16.msra.mxu1 %v19499_v3  ;;  %12335 = vmatpush1.bf16.msra.mxu0 %v19502_v46  ;;  %v16585_v3 = vcombine.low %v23565_v63, %v23570_v13  ;;  %v8138_v46 = vld [vmem:[%s24272_s23 + $0x90] sm:$0xff]  ;;  %v19597_v63 = vld [vmem:[#allocation13 + $0x664] ss:$16 sps:$4 sm:$0xff]  }
 0x798   :  { %11752 = vmatprep.subr.bf16.mxu1 %v19507_v8  ;;  %12336 = vmatprep.subr.bf16.mxu0 %v19510_v57  ;;  %v8146_v8 = vld [vmem:[%s24272_s23 + $0xd0] sm:$0xff] }
 0x799   :  { %v19577_v57 = vld [vmem:[#allocation13 + $0x600] ss:$16 sps:$4 sm:$0xff]   ;;  %v19600_v13 = vld [vmem:[#allocation13 + $0x66c] ss:$16 sps:$4 sm:$0xff]  }
 0x79a   :  { %11724 = vmatmul.mubr.bf16.gmra.mrb[120].mxu1 %v16615_v53  ;;  %12308 = vmatmul.mubr.bf16.gmra.mrb[136].mxu0 %v16615_v53  ;;  %v19580_v53 = vld [vmem:[#allocation13 + $0x608] ss:$16 sps:$4 sm:$0xff]  }
 0x79b   :  { %11753 = vmatpush1.bf16.msra.mxu1 %v19505_v26  ;;  %12337 = vmatpush1.bf16.msra.mxu0 %v19508_v42  ;;  %v16602_v26 = vcombine.high %v8138_v46, %v8146_v8  ;;  %v19583_v42 = vld [vmem:[#allocation13 + $0x620] ss:$16 sps:$4 sm:$0xff]  }
 0x79c   :  { %11754 = vmatprep.subr.bf16.mxu1 %v19513_v10  ;;  %12338 = vmatprep.subr.bf16.mxu0 %v19516_v41  ;;  %v19586_v10 = vld [vmem:[#allocation13 + $0x628] ss:$16 sps:$4 sm:$0xff]   ;;  %v19591_v41 = vld [vmem:[#allocation13 + $0x644] ss:$16 sps:$4 sm:$0xff]  }
 0x79d   :  { %11733 = vmatprep.mubr.bf16.mxu1 %v16632_v4  ;;  %12317 = vmatprep.mubr.bf16.mxu0 %v16632_v4  ;;  %v19594_v4 = vld [vmem:[#allocation13 + $0x64c] ss:$16 sps:$4 sm:$0xff]  }
 0x79f   :  { %11755 = vmatpush1.bf16.msra.mxu1 %v19511_v9  ;;  %12339 = vmatpush1.bf16.msra.mxu0 %v19514_v62  ;;  %v16601_v9 = vcombine.low %v8138_v46, %v8146_v8  ;;  %v8154_v62 = vld [vmem:[%s24272_s23 + $0x110] sm:$0xff]  ;;  %v19621_v8 = vld [vmem:[#allocation13 + $0x6e4] ss:$16 sps:$4 sm:$0xff]  }
 0x7a0   :  { %11756 = vmatprep.subr.bf16.mxu1 %v19519_v43  ;;  %12340 = vmatprep.subr.bf16.mxu0 %v19522_v45  ;;  %v8162_v43 = vld [vmem:[%s24272_s23 + $0x150] sm:$0xff] }
 0x7a1   :  { %v19589_v45 = vld [vmem:[#allocation13 + $0x640] ss:$16 sps:$4 sm:$0xff]  }
 0x7a2   :  { %11734 = vmatmul.mubr.bf16.gmra.mrb[124].mxu1 %v16631_v5  ;;  %12318 = vmatmul.mubr.bf16.gmra.mrb[140].mxu0 %v16631_v5  ;;  %v19592_v5 = vld [vmem:[#allocation13 + $0x648] ss:$16 sps:$4 sm:$0xff]  }
 0x7a3   :  { %11757 = vmatpush1.bf16.msra.mxu1 %v19517_v59  ;;  %12341 = vmatpush1.bf16.msra.mxu0 %v19520_v49  ;;  %v16618_v59 = vcombine.high %v8154_v62, %v8162_v43  ;;  %v19595_v49 = vld [vmem:[#allocation13 + $0x660] ss:$16 sps:$4 sm:$0xff]  }
 0x7a4   :  { %11758 = vmatprep.subr.bf16.mxu1 %v19525_v2  ;;  %12342 = vmatprep.subr.bf16.mxu0 %v19528_v36  ;;  %v19598_v2 = vld [vmem:[#allocation13 + $0x668] ss:$16 sps:$4 sm:$0xff]   ;;  %v19603_v36 = vld [vmem:[#allocation13 + $0x684] ss:$16 sps:$4 sm:$0xff]  }
 0x7a5   :  { %11776 = vmatprep.mubr.bf16.mxu1 %v16586_v55  ;;  %12360 = vmatprep.mubr.bf16.mxu0 %v16586_v55  ;;  %v19606_v55 = vld [vmem:[#allocation13 + $0x68c] ss:$16 sps:$4 sm:$0xff]  }
 0x7a7   :  { %11759 = vmatpush1.bf16.msra.mxu1 %v19523_v21  ;;  %12343 = vmatpush1.bf16.msra.mxu0 %v19526_v40  ;;  %v7134_v21 = vld [vmem:[#allocation12] sm:$0xf]  ;;  %v16617_v40 = vcombine.low %v8154_v62, %v8162_v43 }
 0x7a8   :  { %11760 = vmatprep.subr.bf16.mxu1 %v19531_v24  ;;  %12344 = vmatprep.subr.bf16.mxu0 %v19534_v15  ;;  %v8170_v24 = vld [vmem:[%s24272_s23 + $0x190] sm:$0xff] }
 0x7a9   :  { %v8178_v15 = vld [vmem:[%s24272_s23 + $0x1d0] sm:$0xff] }
 0x7ab   :  { %11761 = vmatpush1.bf16.msra.mxu1 %v19529_v60  ;;  %12345 = vmatpush1.bf16.msra.mxu0 %v19532_v22  ;;  %v19601_v60 = vld [vmem:[#allocation13 + $0x680] ss:$16 sps:$4 sm:$0xff]   ;;  %v19604_v22 = vld [vmem:[#allocation13 + $0x688] ss:$16 sps:$4 sm:$0xff]  }
 0x7ac   :  { %11762 = vmatprep.subr.bf16.mxu1 %v19537_v48  ;;  %12346 = vmatprep.subr.bf16.mxu0 %v19540_v47  ;;  %v19609_v48 = vld [vmem:[#allocation13 + $0x6a4] ss:$16 sps:$4 sm:$0xff]   ;;  %v19612_v47 = vld [vmem:[#allocation13 + $0x6ac] ss:$16 sps:$4 sm:$0xff]  }
 0x7af   :  { %11763 = vmatpush1.bf16.msra.mxu1 %v19535_v30  ;;  %12347 = vmatpush1.bf16.msra.mxu0 %v19538_v61  ;;  %v23595_v30 = vrot.slane %v7134_v21, %v24268_v20  ;;  %v23598_v61 = vrot.slane %v7134_v21, %v24269_v11 }
 0x7b0   :  { %11764 = vmatprep.subr.bf16.mxu1 %v19543_v7  ;;  %12348 = vmatprep.subr.bf16.mxu0 %v19546_v25  ;;  %v16634_v7 = vcombine.high %v8170_v24, %v8178_v15  ;;  %v23601_v25 = vrot.slane %v7134_v21, %v24270_v6 }
 0x7b3   :  { %11765 = vmatpush1.bf16.msra.mxu1 %v19541_v19  ;;  %12349 = vmatpush1.bf16.msra.mxu0 %v19544_v58  ;;  %v23604_v19 = vrot.slane %v7134_v21, %v24271_v44  ;;  %v19607_v58 = vld [vmem:[#allocation13 + $0x6a0] ss:$16 sps:$4 sm:$0xff]  }
 0x7b4   :  { %11766 = vmatprep.subr.bf16.mxu1 %v19549_v56  ;;  %12350 = vmatprep.subr.bf16.mxu0 %v19552_v37  ;;  %v19610_v56 = vld [vmem:[#allocation13 + $0x6a8] ss:$16 sps:$4 sm:$0xff]  }
 0x7b7   :  { %11767 = vmatpush1.bf16.msra.mxu1 %v19547_v52  ;;  %12351 = vmatpush1.bf16.msra.mxu0 %v19550_v32  ;;  %v19615_v32 = vld [vmem:[#allocation13 + $0x6c4] ss:$16 sps:$4 sm:$0xff]  }
 0x7b8   :  { %11768 = vmatprep.subr.bf16.mxu1 %v19555_v14  ;;  %12352 = vmatprep.subr.bf16.mxu0 %v19558_v1  ;;  %v19618_v14 = vld [vmem:[#allocation13 + $0x6cc] ss:$16 sps:$4 sm:$0xff]  }
 0x7bb   :  { %11769 = vmatpush1.bf16.msra.mxu1 %v19553_v12  ;;  %12353 = vmatpush1.bf16.msra.mxu0 %v19556_v35 }
 0x7bc   :  { %11770 = vmatprep.subr.bf16.mxu1 %v19561_v28  ;;  %12354 = vmatprep.subr.bf16.mxu0 %v19564_v31  ;;  %v23611_v31 = vld [vmem:[%s24272_s23 + $0x18] sm:$0xff] }
 0x7bf   :  { %11771 = vmatpush1.bf16.msra.mxu1 %v19559_v38  ;;  %12355 = vmatpush1.bf16.msra.mxu0 %v19562_v16  ;;  %v23616_v38 = vld [vmem:[%s24272_s23 + $0x58] sm:$0xff] }
 0x7c0   :  { %11772 = vmatprep.subr.bf16.mxu1 %v19567_v51  ;;  %12356 = vmatprep.subr.bf16.mxu0 %v19570_v17 }
 0x7c3   :  { %11773 = vmatpush1.bf16.msra.mxu1 %v19565_v23  ;;  %12357 = vmatpush1.bf16.msra.mxu0 %v19568_v0  ;;  %v16633_v0 = vcombine.low %v8170_v24, %v8178_v15 }
 0x7c4   :  { %11774 = vmatprep.subr.bf16.mxu1 %v19573_v33  ;;  %12358 = vmatprep.subr.bf16.mxu0 %v19576_v18 }
 0x7c7   :  { %11775 = vmatpush1.bf16.msra.mxu1 %v19571_v39  ;;  %12359 = vmatpush1.bf16.msra.mxu0 %v19574_v34 }
 0x7c8   :  { %11817 = vmatprep.subr.bf16.mxu1 %v19579_v27  ;;  %12401 = vmatprep.subr.bf16.mxu0 %v19582_v54  ;;  %v19613_v27 = vld [vmem:[#allocation13 + $0x6c0] ss:$16 sps:$4 sm:$0xff]   ;;  %v19616_v54 = vld [vmem:[#allocation13 + $0x6c8] ss:$16 sps:$4 sm:$0xff]  }
 0x7ca   :  { %11777 = vmatmul.mubr.bf16.vlgmr.msra.gmra.mrb[112].mxu1 %v16585_v3  ;;  %12361 = vmatmul.mubr.bf16.vlgmr.msra.gmra.mrb[128].mxu0 %v16585_v3 }
 0x7cb   :  { %11818 = vmatpush1.bf16.msra.mxu1 %v19577_v57  ;;  %12402 = vmatpush1.bf16.msra.mxu0 %v19580_v53  ;;  %v19624_v57 = vld [vmem:[#allocation13 + $0x6ec] ss:$16 sps:$4 sm:$0xff]   ;;  %v16588_v53 = vcombine.high %v23611_v31, %v23616_v38 }
 0x7cc   :  { %11819 = vmatprep.subr.bf16.mxu1 %v19585_v29  ;;  %12403 = vmatprep.subr.bf16.mxu0 %v19588_v50 }
 0x7cd   :  { %11786 = vmatprep.mubr.bf16.mxu1 %v16602_v26  ;;  %12370 = vmatprep.mubr.bf16.mxu0 %v16602_v26 }
 0x7cf   :  { %11820 = vmatpush1.bf16.msra.mxu1 %v19583_v42  ;;  %12404 = vmatpush1.bf16.msra.mxu0 %v19586_v10 }
 0x7d0   :  { %11821 = vmatprep.subr.bf16.mxu1 %v19591_v41  ;;  %12405 = vmatprep.subr.bf16.mxu0 %v19594_v4 }
 0x7d2   :  { %11787 = vmatmul.mubr.bf16.gmra.mrb[116].mxu1 %v16601_v9  ;;  %12371 = vmatmul.mubr.bf16.gmra.mrb[132].mxu0 %v16601_v9 }
 0x7d3   :  { %11822 = vmatpush1.bf16.msra.mxu1 %v19589_v45  ;;  %12406 = vmatpush1.bf16.msra.mxu0 %v19592_v5  ;;  %v19619_v45 = vld [vmem:[#allocation13 + $0x6e0] ss:$16 sps:$4 sm:$0xff]   ;;  %v19622_v5 = vld [vmem:[#allocation13 + $0x6e8] ss:$16 sps:$4 sm:$0xff]  }
 0x7d4   :  { %11823 = vmatprep.subr.bf16.mxu1 %v19597_v63  ;;  %12407 = vmatprep.subr.bf16.mxu0 %v19600_v13 }
 0x7d5   :  { %11796 = vmatprep.mubr.bf16.mxu1 %v16618_v59  ;;  %12380 = vmatprep.mubr.bf16.mxu0 %v16618_v59 }
 0x7d7   :  { %11824 = vmatpush1.bf16.msra.mxu1 %v19595_v49  ;;  %12408 = vmatpush1.bf16.msra.mxu0 %v19598_v2  ;;  %v19627_v2 = vld [vmem:[#allocation13 + $0x704] ss:$16 sps:$4 sm:$0xff]  }
 0x7d8   :  { %11825 = vmatprep.subr.bf16.mxu1 %v19603_v36  ;;  %12409 = vmatprep.subr.bf16.mxu0 %v19606_v55  ;;  %v19630_v36 = vld [vmem:[#allocation13 + $0x70c] ss:$16 sps:$4 sm:$0xff]  }
 0x7da   :  { %11797 = vmatmul.mubr.bf16.gmra.mrb[120].mxu1 %v16617_v40  ;;  %12381 = vmatmul.mubr.bf16.gmra.mrb[136].mxu0 %v16617_v40 }
 0x7db   :  { %11826 = vmatpush1.bf16.msra.mxu1 %v19601_v60  ;;  %12410 = vmatpush1.bf16.msra.mxu0 %v19604_v22 }
 0x7dc   :  { %v7903_v37 = vpop.f32.mrb[96].mxu1  ;;  %v8049_v52 = vpop.f32.mrb[112].mxu0  ;;  %11827 = vmatprep.subr.bf16.mxu1 %v19609_v48  ;;  %12411 = vmatprep.subr.bf16.mxu0 %v19612_v47 }
 0x7dd   :  { %v17566_v1 = vadd.f32 %v7903_v37, %v23595_v30  ;;  %v17582_v12 = vadd.f32 %v8049_v52, %v23598_v61  ;;  %v7905_v35 = vpop.f32.mrb[97].mxu1  ;;  %v8051_v28 = vpop.f32.mrb[113].mxu0  ;;  %11806 = vmatprep.mubr.bf16.mxu1 %v16634_v7  ;;  %12390 = vmatprep.mubr.bf16.mxu0 %v16634_v7  ;;  %v19625_v37 = vld [vmem:[#allocation13 + $0x700] ss:$16 sps:$4 sm:$0xff]   ;;  %v19628_v52 = vld [vmem:[#allocation13 + $0x708] ss:$16 sps:$4 sm:$0xff]  }
 0x7de   :  { %v17567_v16 = vadd.f32 %v7905_v35, %v23601_v25  ;;  %v17583_v51 = vadd.f32 %v8051_v28, %v23604_v19  ;;  %v7907_v17 = vpop.f32.mrb[98].mxu1  ;;  %v8053_v23 = vpop.f32.mrb[114].mxu0 }
 0x7df   :  { %v17568_v33 = vadd.f32 %v7907_v17, %v23595_v30  ;;  %v17584_v18 = vadd.f32 %v8053_v23, %v23598_v61  ;;  %11828 = vmatpush1.bf16.msra.mxu1 %v19607_v58  ;;  %12412 = vmatpush1.bf16.msra.mxu0 %v19610_v56  ;;  %v7909_v39 = vpop.f32.mrb[99].mxu1  ;;  %v8055_v34 = vpop.f32.mrb[115].mxu0  ;;  %v8088_v29 = vmax.f32 %v17566_v1, 0.0  ;;  %v8090_v50 = vmax.f32 %v17582_v12, 0.0  ;;  %v19633_v1 = vld [vmem:[#allocation13 + $0x724] ss:$16 sps:$4 sm:$0xff]  }
 0x7e0   :  { %v17569_v3 = vadd.f32 %v7909_v39, %v23601_v25  ;;  %v17585_v46 = vadd.f32 %v8055_v34, %v23604_v19  ;;  %11829 = vmatprep.subr.bf16.mxu1 %v19615_v32  ;;  %12413 = vmatprep.subr.bf16.mxu0 %v19618_v14  ;;  %v8089_v10 = vmax.f32 %v17567_v16, 0.0  ;;  %v8091_v41 = vmax.f32 %v17583_v51, 0.0  ;;  %v19636_v12 = vld [vmem:[#allocation13 + $0x72c] ss:$16 sps:$4 sm:$0xff]   ;;  %v19631_v34 = vld [vmem:[#allocation13 + $0x720] ss:$16 sps:$4 sm:$0xff]  }
 0x7e1   :  { %v8092_v26 = vmax.f32 %v17568_v33, 0.0  ;;  %v8094_v42 = vmax.f32 %v17584_v18, 0.0 }
 0x7e2   :  { %v8093_v4 = vmax.f32 %v17569_v3, 0.0  ;;  %v8095_v9 = vmax.f32 %v17585_v46, 0.0  ;;  %11807 = vmatmul.mubr.bf16.gmra.mrb[124].mxu1 %v16633_v0  ;;  %12391 = vmatmul.mubr.bf16.gmra.mrb[140].mxu0 %v16633_v0 }
 0x7e3   :  { %v23626_v62 = vpack.c.bf16 %v8092_v26, %v8088_v29  ;;  %v23628_v43 = vpack.c.bf16 %v8094_v42, %v8090_v50  ;;  %11830 = vmatpush1.bf16.msra.mxu1 %v19613_v27  ;;  %12414 = vmatpush1.bf16.msra.mxu0 %v19616_v54  ;;  %v19634_v27 = vld [vmem:[#allocation13 + $0x728] ss:$16 sps:$4 sm:$0xff]  }
 0x7e4   :  { %v23630_v63 = vpack.c.bf16 %v8093_v4, %v8089_v10  ;;  %v23632_v13 = vpack.c.bf16 %v8095_v9, %v8091_v41  ;;  %v7913_v59 = vpop.f32.mrb[100].mxu1  ;;  %v8059_v49 = vpop.f32.mrb[116].mxu0  ;;  %11831 = vmatprep.subr.bf16.mxu1 %v19621_v8  ;;  %12415 = vmatprep.subr.bf16.mxu0 %v19624_v57  ;;  %v19639_v57 = vld [vmem:[#allocation13 + $0x744] ss:$16 sps:$4 sm:$0xff]  }
 0x7e5   :  { %v17570_v55 = vadd.f32 %v7913_v59, %v23595_v30  ;;  %v17586_v21 = vadd.f32 %v8059_v49, %v23598_v61  ;;  %v7915_v40 = vpop.f32.mrb[101].mxu1  ;;  %v8061_v24 = vpop.f32.mrb[117].mxu0  ;;  %11849 = vmatprep.mubr.bf16.mxu1 %v16588_v53  ;;  %12433 = vmatprep.mubr.bf16.mxu0 %v16588_v53  ;;  %v19642_v53 = vld [vmem:[#allocation13 + $0x74c] ss:$16 sps:$4 sm:$0xff]  }
 0x7e6   :  { %v17571_v15 = vadd.f32 %v7915_v40, %v23601_v25  ;;  %v17587_v60 = vadd.f32 %v8061_v24, %v23604_v19  ;;  %v7917_v22 = vpop.f32.mrb[102].mxu1  ;;  %v8063_v48 = vpop.f32.mrb[118].mxu0  ;;  %v19645_v40 = vld [vmem:[#allocation13 + $0x764] ss:$16 sps:$4 sm:$0xff]   ;;  %v19648_v24 = vld [vmem:[#allocation13 + $0x76c] ss:$16 sps:$4 sm:$0xff]  }
 0x7e7   :  { %v17572_v47 = vadd.f32 %v7917_v22, %v23595_v30  ;;  %v17588_v7 = vadd.f32 %v8063_v48, %v23598_v61  ;;  %11832 = vmatpush1.bf16.msra.mxu1 %v19619_v45  ;;  %12416 = vmatpush1.bf16.msra.mxu0 %v19622_v5  ;;  %v7919_v58 = vpop.f32.mrb[103].mxu1  ;;  %v8065_v56 = vpop.f32.mrb[119].mxu0  ;;  %v8096_v35 = vmax.f32 %v17570_v55, 0.0  ;;  %v8098_v28 = vmax.f32 %v17586_v21, 0.0 }
 0x7e8   :  { %v17573_v32 = vadd.f32 %v7919_v58, %v23601_v25  ;;  %v17589_v14 = vadd.f32 %v8065_v56, %v23604_v19  ;;  %11833 = vmatprep.subr.bf16.mxu1 %v19627_v2  ;;  %12417 = vmatprep.subr.bf16.mxu0 %v19630_v36  ;;  %v8097_v17 = vmax.f32 %v17571_v15, 0.0  ;;  %v8099_v23 = vmax.f32 %v17587_v60, 0.0  ;;  %v19637_v2 = vld [vmem:[#allocation13 + $0x740] ss:$16 sps:$4 sm:$0xff]   ;;  %v19640_v36 = vld [vmem:[#allocation13 + $0x748] ss:$16 sps:$4 sm:$0xff]  }
 0x7e9   :  { %v8100_v16 = vmax.f32 %v17572_v47, 0.0  ;;  %v8102_v51 = vmax.f32 %v17588_v7, 0.0 }
 0x7ea   :  { %v8101_v0 = vmax.f32 %v17573_v32, 0.0  ;;  %v8103_v33 = vmax.f32 %v17589_v14, 0.0  ;;  %v19643_v32 = vld [vmem:[#allocation13 + $0x760] ss:$16 sps:$4 sm:$0xff]   ;;  %v19646_v14 = vld [vmem:[#allocation13 + $0x768] ss:$16 sps:$4 sm:$0xff]  }
 0x7eb   :  { %v23642_v18 = vpack.c.bf16 %v8100_v16, %v8096_v35  ;;  %v23644_v39 = vpack.c.bf16 %v8102_v51, %v8098_v28  ;;  %11834 = vmatpush1.bf16.msra.mxu1 %v19625_v37  ;;  %12418 = vmatpush1.bf16.msra.mxu0 %v19628_v52  ;;  %v19651_v16 = vld [vmem:[#allocation13 + $0x784] ss:$16 sps:$4 sm:$0xff]   ;;  %v19654_v51 = vld [vmem:[#allocation13 + $0x78c] ss:$16 sps:$4 sm:$0xff]  }
 0x7ec   :  { %v23646_v54 = vpack.c.bf16 %v8101_v0, %v8097_v17  ;;  %v23648_v3 = vpack.c.bf16 %v8103_v33, %v8099_v23  ;;  %v7923_v46 = vpop.f32.mrb[104].mxu1  ;;  %v8069_v8 = vpop.f32.mrb[120].mxu0  ;;  %11835 = vmatprep.subr.bf16.mxu1 %v19633_v1  ;;  %12419 = vmatprep.subr.bf16.mxu0 %v19636_v12 }
 0x7ed   :  { %v17574_v29 = vadd.f32 %v7923_v46, %v23595_v30  ;;  %v17590_v50 = vadd.f32 %v8069_v8, %v23598_v61  ;;  %v7925_v26 = vpop.f32.mrb[105].mxu1  ;;  %v8071_v42 = vpop.f32.mrb[121].mxu0 }
 0x7ee   :  { %v17575_v10 = vadd.f32 %v7925_v26, %v23601_v25  ;;  %v17591_v41 = vadd.f32 %v8071_v42, %v23604_v19  ;;  %v7927_v4 = vpop.f32.mrb[106].mxu1  ;;  %v8073_v9 = vpop.f32.mrb[122].mxu0  ;;  %v19649_v26 = vld [vmem:[#allocation13 + $0x780] ss:$16 sps:$4 sm:$0xff]   ;;  %v19652_v42 = vld [vmem:[#allocation13 + $0x788] ss:$16 sps:$4 sm:$0xff]  }
 0x7ef   :  { %v17576_v45 = vadd.f32 %v7927_v4, %v23595_v30  ;;  %v17592_v5 = vadd.f32 %v8073_v9, %v23598_v61  ;;  %11836 = vmatpush1.bf16.msra.mxu1 %v19631_v34  ;;  %12420 = vmatpush1.bf16.msra.mxu0 %v19634_v27  ;;  %v7929_v59 = vpop.f32.mrb[107].mxu1  ;;  %v8075_v49 = vpop.f32.mrb[123].mxu0  ;;  %v8104_v15 = vmax.f32 %v17574_v29, 0.0  ;;  %v8106_v60 = vmax.f32 %v17590_v50, 0.0  ;;  %v19657_v4 = vld [vmem:[#allocation13 + $0x7a4] ss:$16 sps:$4 sm:$0xff]  }
 0x7f0   :  { %v17577_v55 = vadd.f32 %v7929_v59, %v23601_v25  ;;  %v17593_v21 = vadd.f32 %v8075_v49, %v23604_v19  ;;  %11837 = vmatprep.subr.bf16.mxu1 %v19639_v57  ;;  %12421 = vmatprep.subr.bf16.mxu0 %v19642_v53  ;;  %v8105_v47 = vmax.f32 %v17575_v10, 0.0  ;;  %v8107_v7 = vmax.f32 %v17591_v41, 0.0  ;;  %v19660_v9 = vld [vmem:[#allocation13 + $0x7ac] ss:$16 sps:$4 sm:$0xff]  }
 0x7f1   :  { %v8108_v22 = vmax.f32 %v17576_v45, 0.0  ;;  %v8110_v48 = vmax.f32 %v17592_v5, 0.0 }
 0x7f2   :  { %v8109_v58 = vmax.f32 %v17577_v55, 0.0  ;;  %v8111_v56 = vmax.f32 %v17593_v21, 0.0 }
 0x7f3   :  { %v23658_v37 = vpack.c.bf16 %v8108_v22, %v8104_v15  ;;  %v23660_v52 = vpack.c.bf16 %v8110_v48, %v8106_v60  ;;  %11838 = vmatpush1.bf16.msra.mxu1 %v19637_v2  ;;  %12422 = vmatpush1.bf16.msra.mxu0 %v19640_v36  ;;  %v19663_v15 = vld [vmem:[#allocation13 + $0x7c4] ss:$16 sps:$4 sm:$0xff]   ;;  %v19666_v60 = vld [vmem:[#allocation13 + $0x7cc] ss:$16 sps:$4 sm:$0xff]   ;;  %v19661_v22 = vld [vmem:[#allocation13 + $0x7c0] ss:$16 sps:$4 sm:$0xff]  }
 0x7f4   :  { %v23662_v1 = vpack.c.bf16 %v8109_v58, %v8105_v47  ;;  %v23664_v12 = vpack.c.bf16 %v8111_v56, %v8107_v7  ;;  %v7933_v35 = vpop.f32.mrb[108].mxu1  ;;  %v8079_v28 = vpop.f32.mrb[124].mxu0  ;;  %11839 = vmatprep.subr.bf16.mxu1 %v19645_v40  ;;  %12423 = vmatprep.subr.bf16.mxu0 %v19648_v24  ;;  %v19664_v48 = vld [vmem:[#allocation13 + $0x7c8] ss:$16 sps:$4 sm:$0xff]   ;;  %v19669_v47 = vld [vmem:[#allocation13 + $0x7e4] ss:$16 sps:$4 sm:$0xff]  }
 0x7f5   :  { %v17578_v17 = vadd.f32 %v7933_v35, %v23595_v30  ;;  %v17594_v23 = vadd.f32 %v8079_v28, %v23598_v61  ;;  %v7935_v0 = vpop.f32.mrb[109].mxu1  ;;  %v8081_v33 = vpop.f32.mrb[125].mxu0  ;;  %v19672_v7 = vld [vmem:[#allocation13 + $0x7ec] ss:$16 sps:$4 sm:$0xff]   ;;  %v19667_v58 = vld [vmem:[#allocation13 + $0x7e0] ss:$16 sps:$4 sm:$0xff]   ;;  %v16587_v35 = vcombine.low %v23611_v31, %v23616_v38 }
 0x7f6   :  { %v17579_v34 = vadd.f32 %v7935_v0, %v23601_v25  ;;  %v17595_v27 = vadd.f32 %v8081_v33, %v23604_v19  ;;  %v7937_v46 = vpop.f32.mrb[110].mxu1  ;;  %v8083_v8 = vpop.f32.mrb[126].mxu0  ;;  %v19670_v56 = vld [vmem:[#allocation13 + $0x7e8] ss:$16 sps:$4 sm:$0xff]   ;;  %v19684_v0 = vld [vmem:[#allocation13 + $0x82c] ss:$16 sps:$4 sm:$0xff]  }
 0x7f7   :  { %v17580_v57 = vadd.f32 %v7937_v46, %v23595_v30  ;;  %v17596_v53 = vadd.f32 %v8083_v8, %v23598_v61  ;;  %11840 = vmatpush1.bf16.msra.mxu1 %v19643_v32  ;;  %12424 = vmatpush1.bf16.msra.mxu0 %v19646_v14  ;;  %v7939_v29 = vpop.f32.mrb[111].mxu1  ;;  %v8085_v50 = vpop.f32.mrb[127].mxu0  ;;  %v8112_v45 = vmax.f32 %v17578_v17, 0.0  ;;  %v8114_v5 = vmax.f32 %v17594_v23, 0.0  ;;  %v19675_v32 = vld [vmem:[#allocation13 + $0x804] ss:$16 sps:$4 sm:$0xff]  }
 0x7f8   :  { %v17581_v10 = vadd.f32 %v7939_v29, %v23601_v25  ;;  %v17597_v41 = vadd.f32 %v8085_v50, %v23604_v19  ;;  %11841 = vmatprep.subr.bf16.mxu1 %v19651_v16  ;;  %12425 = vmatprep.subr.bf16.mxu0 %v19654_v51  ;;  %v8113_v49 = vmax.f32 %v17579_v34, 0.0  ;;  %v8115_v61 = vmax.f32 %v17595_v27, 0.0  ;;  %v19655_v25 = vld [vmem:[#allocation13 + $0x7a0] ss:$16 sps:$4 sm:$0xff]   ;;  %v19658_v19 = vld [vmem:[#allocation13 + $0x7a8] ss:$16 sps:$4 sm:$0xff]  }
 0x7f9   :  { %v8116_v59 = vmax.f32 %v17580_v57, 0.0  ;;  %v8118_v30 = vmax.f32 %v17596_v53, 0.0  ;;  %v19678_v14 = vld [vmem:[#allocation13 + $0x80c] ss:$16 sps:$4 sm:$0xff]   ;;  %v8139_v28 = vld [vmem:[%s24272_s23 + $0x98] sm:$0xff] }
 0x7fa   :  { %v8117_v2 = vmax.f32 %v17581_v10, 0.0  ;;  %v8119_v36 = vmax.f32 %v17597_v41, 0.0  ;;  %v8147_v16 = vld [vmem:[%s24272_s23 + $0xd8] sm:$0xff]  ;;  %v19673_v51 = vld [vmem:[#allocation13 + $0x800] ss:$16 sps:$4 sm:$0xff]  }
 0x7fb   :  { %v23674_v55 = vpack.c.bf16 %v8116_v59, %v8112_v45  ;;  %v23676_v21 = vpack.c.bf16 %v8118_v30, %v8114_v5  ;;  %11842 = vmatpush1.bf16.msra.mxu1 %v19649_v26  ;;  %12426 = vmatpush1.bf16.msra.mxu0 %v19652_v42  ;;  %v19676_v17 = vld [vmem:[#allocation13 + $0x808] ss:$16 sps:$4 sm:$0xff]   ;;  %v19681_v23 = vld [vmem:[#allocation13 + $0x824] ss:$16 sps:$4 sm:$0xff]   ;;  %v16604_v33 = vcombine.high %v8139_v28, %v8147_v16  ;;  %v19679_v31 = vld [vmem:[#allocation13 + $0x820] ss:$16 sps:$4 sm:$0xff]  }
 0x7fc   :  { %v23678_v40 = vpack.c.bf16 %v8117_v2, %v8113_v49  ;;  %v23680_v24 = vpack.c.bf16 %v8119_v36, %v8115_v61  ;;  %11843 = vmatprep.subr.bf16.mxu1 %v19657_v4  ;;  %12427 = vmatprep.subr.bf16.mxu0 %v19660_v9  ;;  %v19682_v38 = vld [vmem:[#allocation13 + $0x828] ss:$16 sps:$4 sm:$0xff]   ;;  %v19687_v34 = vld [vmem:[#allocation13 + $0x844] ss:$16 sps:$4 sm:$0xff]   ;;  %v19690_v27 = vld [vmem:[#allocation13 + $0x84c] ss:$16 sps:$4 sm:$0xff]   ;;  %v16603_v46 = vcombine.low %v8139_v28, %v8147_v16 }
 0x7fd   :  { %v8155_v8 = vld [vmem:[%s24272_s23 + $0x118] sm:$0xff]  ;;  %v19685_v53 = vld [vmem:[#allocation13 + $0x840] ss:$16 sps:$4 sm:$0xff]   ;;  %v19696_v26 = vld [vmem:[#allocation13 + $0x86c] ss:$16 sps:$4 sm:$0xff]  }
 0x7fe   :  { %v8163_v57 = vld [vmem:[%s24272_s23 + $0x158] sm:$0xff]  ;;  %v19691_v10 = vld [vmem:[#allocation13 + $0x860] ss:$16 sps:$4 sm:$0xff]   ;;  %v19702_v9 = vld [vmem:[#allocation13 + $0x88c] ss:$16 sps:$4 sm:$0xff]  }
 0x7ff   :  { %11844 = vmatpush1.bf16.msra.mxu1 %v19655_v25  ;;  %12428 = vmatpush1.bf16.msra.mxu0 %v19658_v19  ;;  %v19688_v29 = vld [vmem:[#allocation13 + $0x848] ss:$16 sps:$4 sm:$0xff]   ;;  %v19693_v50 = vld [vmem:[#allocation13 + $0x864] ss:$16 sps:$4 sm:$0xff]   ;;  %v16620_v42 = vcombine.high %v8155_v8, %v8163_v57  ;;  %v16619_v45 = vcombine.low %v8155_v8, %v8163_v57  ;;  %v19697_v30 = vld [vmem:[#allocation13 + $0x880] ss:$16 sps:$4 sm:$0xff]  }
 0x800   :  { %11845 = vmatprep.subr.bf16.mxu1 %v19663_v15  ;;  %12429 = vmatprep.subr.bf16.mxu0 %v19666_v60  ;;  %v19694_v41 = vld [vmem:[#allocation13 + $0x868] ss:$16 sps:$4 sm:$0xff]   ;;  %v19699_v4 = vld [vmem:[#allocation13 + $0x884] ss:$16 sps:$4 sm:$0xff]   ;;  %v19708_v2 = vld [vmem:[#allocation13 + $0x8ac] ss:$16 sps:$4 sm:$0xff]  }
 0x801   :  { %v8171_v5 = vld [vmem:[%s24272_s23 + $0x198] sm:$0xff]  ;;  %v19703_v25 = vld [vmem:[#allocation13 + $0x8a0] ss:$16 sps:$4 sm:$0xff]   ;;  %v19714_v60 = vld [vmem:[#allocation13 + $0x8cc] ss:$16 sps:$4 sm:$0xff]  }
 0x802   :  { %v8179_v59 = vld [vmem:[%s24272_s23 + $0x1d8] sm:$0xff] }
 0x803   :  { %11846 = vmatpush1.bf16.msra.mxu1 %v19661_v22  ;;  %12430 = vmatpush1.bf16.msra.mxu0 %v19664_v48  ;;  %v19700_v49 = vld [vmem:[#allocation13 + $0x888] ss:$16 sps:$4 sm:$0xff]   ;;  %v19705_v61 = vld [vmem:[#allocation13 + $0x8a4] ss:$16 sps:$4 sm:$0xff]   ;;  %v16636_v36 = vcombine.high %v8171_v5, %v8179_v59  ;;  %v16635_v22 = vcombine.low %v8171_v5, %v8179_v59  ;;  %v23705_v48 = vld [vmem:[%s24272_s23 + $0x20] sm:$0xff] }
 0x804   :  { %11847 = vmatprep.subr.bf16.mxu1 %v19669_v47  ;;  %12431 = vmatprep.subr.bf16.mxu0 %v19672_v7  ;;  %v19706_v19 = vld [vmem:[#allocation13 + $0x8a8] ss:$16 sps:$4 sm:$0xff]   ;;  %v19711_v15 = vld [vmem:[#allocation13 + $0x8c4] ss:$16 sps:$4 sm:$0xff]   ;;  %v23710_v47 = vld [vmem:[%s24272_s23 + $0x60] sm:$0xff] }
 0x805   :  { %v19709_v7 = vld [vmem:[#allocation13 + $0x8c0] ss:$16 sps:$4 sm:$0xff]   ;;  %v19718_v28 = vld [vmem:[#allocation13 + $0x8e8] ss:$16 sps:$4 sm:$0xff]   ;;  %v19723_v16 = vld [vmem:[#allocation13 + $0x904] ss:$16 sps:$4 sm:$0xff]  }
 0x806   :  { %v19736_v8 = vld [vmem:[#allocation13 + $0x948] ss:$16 sps:$4 sm:$0xff]   ;;  %v19741_v57 = vld [vmem:[#allocation13 + $0x964] ss:$16 sps:$4 sm:$0xff]  }
 0x807   :  { %11848 = vmatpush1.bf16.msra.mxu1 %v19667_v58  ;;  %12432 = vmatpush1.bf16.msra.mxu0 %v19670_v56  ;;  %v19712_v58 = vld [vmem:[#allocation13 + $0x8c8] ss:$16 sps:$4 sm:$0xff]   ;;  %v19717_v56 = vld [vmem:[#allocation13 + $0x8e4] ss:$16 sps:$4 sm:$0xff]  }
 0x808   :  { %11890 = vmatprep.subr.bf16.mxu1 %v19675_v32  ;;  %12474 = vmatprep.subr.bf16.mxu0 %v19678_v14  ;;  %v19720_v32 = vld [vmem:[#allocation13 + $0x8ec] ss:$16 sps:$4 sm:$0xff]   ;;  %v16590_v14 = vcombine.high %v23705_v48, %v23710_v47  ;;  %v19754_v5 = vld [vmem:[#allocation13 + $0x9a8] ss:$16 sps:$4 sm:$0xff]   ;;  %v19759_v59 = vld [vmem:[#allocation13 + $0x9c4] ss:$16 sps:$4 sm:$0xff]  }
 0x80a   :  { %11850 = vmatmul.mubr.bf16.vlgmr.msra.gmra.mrb[112].mxu1 %v16587_v35  ;;  %12434 = vmatmul.mubr.bf16.vlgmr.msra.gmra.mrb[128].mxu0 %v16587_v35  ;;  %v19715_v35 = vld [vmem:[#allocation13 + $0x8e0] ss:$16 sps:$4 sm:$0xff]  }
 0x80b   :  { %11891 = vmatpush1.bf16.msra.mxu1 %v19673_v51  ;;  %12475 = vmatpush1.bf16.msra.mxu0 %v19676_v17  ;;  %v19726_v51 = vld [vmem:[#allocation13 + $0x90c] ss:$16 sps:$4 sm:$0xff]   ;;  %v19721_v17 = vld [vmem:[#allocation13 + $0x900] ss:$16 sps:$4 sm:$0xff]  }
 0x80c   :  { %11892 = vmatprep.subr.bf16.mxu1 %v19681_v23  ;;  %12476 = vmatprep.subr.bf16.mxu0 %v19684_v0  ;;  %v19724_v23 = vld [vmem:[#allocation13 + $0x908] ss:$16 sps:$4 sm:$0xff]   ;;  %v19729_v0 = vld [vmem:[#allocation13 + $0x924] ss:$16 sps:$4 sm:$0xff]  }
 0x80d   :  { %11859 = vmatprep.mubr.bf16.mxu1 %v16604_v33  ;;  %12443 = vmatprep.mubr.bf16.mxu0 %v16604_v33  ;;  %v19732_v33 = vld [vmem:[#allocation13 + $0x92c] ss:$16 sps:$4 sm:$0xff]  }
 0x80f   :  { %11893 = vmatpush1.bf16.msra.mxu1 %v19679_v31  ;;  %12477 = vmatpush1.bf16.msra.mxu0 %v19682_v38  ;;  %v19727_v31 = vld [vmem:[#allocation13 + $0x920] ss:$16 sps:$4 sm:$0xff]   ;;  %v19730_v38 = vld [vmem:[#allocation13 + $0x928] ss:$16 sps:$4 sm:$0xff]  }
 0x810   :  { %11894 = vmatprep.subr.bf16.mxu1 %v19687_v34  ;;  %12478 = vmatprep.subr.bf16.mxu0 %v19690_v27  ;;  %v19735_v34 = vld [vmem:[#allocation13 + $0x944] ss:$16 sps:$4 sm:$0xff]   ;;  %v19738_v27 = vld [vmem:[#allocation13 + $0x94c] ss:$16 sps:$4 sm:$0xff]  }
 0x812   :  { %11860 = vmatmul.mubr.bf16.gmra.mrb[116].mxu1 %v16603_v46  ;;  %12444 = vmatmul.mubr.bf16.gmra.mrb[132].mxu0 %v16603_v46  ;;  %v19733_v46 = vld [vmem:[#allocation13 + $0x940] ss:$16 sps:$4 sm:$0xff]  }
 0x813   :  { %11895 = vmatpush1.bf16.msra.mxu1 %v19685_v53  ;;  %12479 = vmatpush1.bf16.msra.mxu0 %v19688_v29  ;;  %v19744_v53 = vld [vmem:[#allocation13 + $0x96c] ss:$16 sps:$4 sm:$0xff]   ;;  %v19739_v29 = vld [vmem:[#allocation13 + $0x960] ss:$16 sps:$4 sm:$0xff]  }
 0x814   :  { %11896 = vmatprep.subr.bf16.mxu1 %v19693_v50  ;;  %12480 = vmatprep.subr.bf16.mxu0 %v19696_v26  ;;  %v19742_v50 = vld [vmem:[#allocation13 + $0x968] ss:$16 sps:$4 sm:$0xff]   ;;  %v19747_v26 = vld [vmem:[#allocation13 + $0x984] ss:$16 sps:$4 sm:$0xff]  }
 0x815   :  { %11869 = vmatprep.mubr.bf16.mxu1 %v16620_v42  ;;  %12453 = vmatprep.mubr.bf16.mxu0 %v16620_v42  ;;  %v19750_v42 = vld [vmem:[#allocation13 + $0x98c] ss:$16 sps:$4 sm:$0xff]  }
 0x817   :  { %11897 = vmatpush1.bf16.msra.mxu1 %v19691_v10  ;;  %12481 = vmatpush1.bf16.msra.mxu0 %v19694_v41  ;;  %v19745_v10 = vld [vmem:[#allocation13 + $0x980] ss:$16 sps:$4 sm:$0xff]   ;;  %v19748_v41 = vld [vmem:[#allocation13 + $0x988] ss:$16 sps:$4 sm:$0xff]  }
 0x818   :  { %11898 = vmatprep.subr.bf16.mxu1 %v19699_v4  ;;  %12482 = vmatprep.subr.bf16.mxu0 %v19702_v9  ;;  %v19753_v4 = vld [vmem:[#allocation13 + $0x9a4] ss:$16 sps:$4 sm:$0xff]   ;;  %v19756_v9 = vld [vmem:[#allocation13 + $0x9ac] ss:$16 sps:$4 sm:$0xff]  }
 0x81a   :  { %11870 = vmatmul.mubr.bf16.gmra.mrb[120].mxu1 %v16619_v45  ;;  %12454 = vmatmul.mubr.bf16.gmra.mrb[136].mxu0 %v16619_v45  ;;  %v19751_v45 = vld [vmem:[#allocation13 + $0x9a0] ss:$16 sps:$4 sm:$0xff]  }
 0x81b   :  { %11899 = vmatpush1.bf16.msra.mxu1 %v19697_v30  ;;  %12483 = vmatpush1.bf16.msra.mxu0 %v19700_v49  ;;  %v19762_v30 = vld [vmem:[#allocation13 + $0x9cc] ss:$16 sps:$4 sm:$0xff]   ;;  %v19757_v49 = vld [vmem:[#allocation13 + $0x9c0] ss:$16 sps:$4 sm:$0xff]  }
 0x81c   :  { %11900 = vmatprep.subr.bf16.mxu1 %v19705_v61  ;;  %12484 = vmatprep.subr.bf16.mxu0 %v19708_v2  ;;  %v19760_v61 = vld [vmem:[#allocation13 + $0x9c8] ss:$16 sps:$4 sm:$0xff]   ;;  %v19765_v2 = vld [vmem:[#allocation13 + $0x9e4] ss:$16 sps:$4 sm:$0xff]  }
 0x81d   :  { %11879 = vmatprep.mubr.bf16.mxu1 %v16636_v36  ;;  %12463 = vmatprep.mubr.bf16.mxu0 %v16636_v36  ;;  %v19768_v36 = vld [vmem:[#allocation13 + $0x9ec] ss:$16 sps:$4 sm:$0xff]  }
 0x81f   :  { %11901 = vmatpush1.bf16.msra.mxu1 %v19703_v25  ;;  %12485 = vmatpush1.bf16.msra.mxu0 %v19706_v19  ;;  %v19763_v25 = vld [vmem:[#allocation13 + $0x9e0] ss:$16 sps:$4 sm:$0xff]   ;;  %v19766_v19 = vld [vmem:[#allocation13 + $0x9e8] ss:$16 sps:$4 sm:$0xff]  }
 0x820   :  { %11902 = vmatprep.subr.bf16.mxu1 %v19711_v15  ;;  %12486 = vmatprep.subr.bf16.mxu0 %v19714_v60  ;;  %v19771_v15 = vld [vmem:[#allocation13 + $0xa04] ss:$16 sps:$4 sm:$0xff]   ;;  %v19774_v60 = vld [vmem:[#allocation13 + $0xa0c] ss:$16 sps:$4 sm:$0xff]  }
 0x822   :  { %11880 = vmatmul.mubr.bf16.gmra.mrb[124].mxu1 %v16635_v22  ;;  %12464 = vmatmul.mubr.bf16.gmra.mrb[140].mxu0 %v16635_v22  ;;  %v16589_v22 = vcombine.low %v23705_v48, %v23710_v47  ;;  %v19775_v48 = vld [vmem:[#allocation13 + $0xa20] ss:$16 sps:$4 sm:$0xff]   ;;  %v19778_v47 = vld [vmem:[#allocation13 + $0xa28] ss:$16 sps:$4 sm:$0xff]  }
 0x823   :  { %11903 = vmatpush1.bf16.msra.mxu1 %v19709_v7  ;;  %12487 = vmatpush1.bf16.msra.mxu0 %v19712_v58  ;;  %v8140_v7 = vld [vmem:[%s24272_s23 + $0xa0] sm:$0xff] }
 0x824   :  { %11904 = vmatprep.subr.bf16.mxu1 %v19717_v56  ;;  %12488 = vmatprep.subr.bf16.mxu0 %v19720_v32  ;;  %v8148_v58 = vld [vmem:[%s24272_s23 + $0xe0] sm:$0xff]  ;;  %v19772_v32 = vld [vmem:[#allocation13 + $0xa08] ss:$16 sps:$4 sm:$0xff]  }
 0x825   :  { %11922 = vmatprep.mubr.bf16.mxu1 %v16590_v14  ;;  %12506 = vmatprep.mubr.bf16.mxu0 %v16590_v14  ;;  %v19769_v56 = vld [vmem:[#allocation13 + $0xa00] ss:$16 sps:$4 sm:$0xff]   ;;  %v19777_v14 = vld [vmem:[#allocation13 + $0xa24] ss:$16 sps:$4 sm:$0xff]  }
 0x827   :  { %11905 = vmatpush1.bf16.msra.mxu1 %v19715_v35  ;;  %12489 = vmatpush1.bf16.msra.mxu0 %v19718_v28  ;;  %v19780_v35 = vld [vmem:[#allocation13 + $0xa2c] ss:$16 sps:$4 sm:$0xff]   ;;  %v16606_v28 = vcombine.high %v8140_v7, %v8148_v58 }
 0x828   :  { %11906 = vmatprep.subr.bf16.mxu1 %v19723_v16  ;;  %12490 = vmatprep.subr.bf16.mxu0 %v19726_v51  ;;  %v19783_v16 = vld [vmem:[#allocation13 + $0xa44] ss:$16 sps:$4 sm:$0xff]   ;;  %v19786_v51 = vld [vmem:[#allocation13 + $0xa4c] ss:$16 sps:$4 sm:$0xff]  }
 0x82b   :  { %11907 = vmatpush1.bf16.msra.mxu1 %v19721_v17  ;;  %12491 = vmatpush1.bf16.msra.mxu0 %v19724_v23  ;;  %v16605_v17 = vcombine.low %v8140_v7, %v8148_v58  ;;  %v8156_v23 = vld [vmem:[%s24272_s23 + $0x120] sm:$0xff]  ;;  %v19814_v7 = vld [vmem:[#allocation13 + $0xae8] ss:$16 sps:$4 sm:$0xff]   ;;  %v19819_v58 = vld [vmem:[#allocation13 + $0xb04] ss:$16 sps:$4 sm:$0xff]  }
 0x82c   :  { %11908 = vmatprep.subr.bf16.mxu1 %v19729_v0  ;;  %12492 = vmatprep.subr.bf16.mxu0 %v19732_v33  ;;  %v8164_v0 = vld [vmem:[%s24272_s23 + $0x160] sm:$0xff] }
 0x82d   :  { %v19781_v33 = vld [vmem:[#allocation13 + $0xa40] ss:$16 sps:$4 sm:$0xff]  }
 0x82f   :  { %11909 = vmatpush1.bf16.msra.mxu1 %v19727_v31  ;;  %12493 = vmatpush1.bf16.msra.mxu0 %v19730_v38  ;;  %v19784_v31 = vld [vmem:[#allocation13 + $0xa48] ss:$16 sps:$4 sm:$0xff]   ;;  %v19789_v38 = vld [vmem:[#allocation13 + $0xa64] ss:$16 sps:$4 sm:$0xff]  }
 0x830   :  { %11910 = vmatprep.subr.bf16.mxu1 %v19735_v34  ;;  %12494 = vmatprep.subr.bf16.mxu0 %v19738_v27  ;;  %v19792_v34 = vld [vmem:[#allocation13 + $0xa6c] ss:$16 sps:$4 sm:$0xff]   ;;  %v16622_v27 = vcombine.high %v8156_v23, %v8164_v0 }
 0x833   :  { %11911 = vmatpush1.bf16.msra.mxu1 %v19733_v46  ;;  %12495 = vmatpush1.bf16.msra.mxu0 %v19736_v8  ;;  %v19787_v46 = vld [vmem:[#allocation13 + $0xa60] ss:$16 sps:$4 sm:$0xff]   ;;  %v19790_v8 = vld [vmem:[#allocation13 + $0xa68] ss:$16 sps:$4 sm:$0xff]  }
 0x834   :  { %11912 = vmatprep.subr.bf16.mxu1 %v19741_v57  ;;  %12496 = vmatprep.subr.bf16.mxu0 %v19744_v53  ;;  %v19795_v57 = vld [vmem:[#allocation13 + $0xa84] ss:$16 sps:$4 sm:$0xff]   ;;  %v19798_v53 = vld [vmem:[#allocation13 + $0xa8c] ss:$16 sps:$4 sm:$0xff]  }
 0x837   :  { %11913 = vmatpush1.bf16.msra.mxu1 %v19739_v29  ;;  %12497 = vmatpush1.bf16.msra.mxu0 %v19742_v50  ;;  %v16621_v29 = vcombine.low %v8156_v23, %v8164_v0  ;;  %v8172_v50 = vld [vmem:[%s24272_s23 + $0x1a0] sm:$0xff]  ;;  %v19832_v23 = vld [vmem:[#allocation13 + $0xb48] ss:$16 sps:$4 sm:$0xff]   ;;  %v19837_v0 = vld [vmem:[#allocation13 + $0xb64] ss:$16 sps:$4 sm:$0xff]  }
 0x838   :  { %11914 = vmatprep.subr.bf16.mxu1 %v19747_v26  ;;  %12498 = vmatprep.subr.bf16.mxu0 %v19750_v42  ;;  %v8180_v26 = vld [vmem:[%s24272_s23 + $0x1e0] sm:$0xff] }
 0x839   :  { %v19793_v42 = vld [vmem:[#allocation13 + $0xa80] ss:$16 sps:$4 sm:$0xff]  }
 0x83b   :  { %11915 = vmatpush1.bf16.msra.mxu1 %v19745_v10  ;;  %12499 = vmatpush1.bf16.msra.mxu0 %v19748_v41  ;;  %v19796_v10 = vld [vmem:[#allocation13 + $0xa88] ss:$16 sps:$4 sm:$0xff]   ;;  %v19801_v41 = vld [vmem:[#allocation13 + $0xaa4] ss:$16 sps:$4 sm:$0xff]  }
 0x83c   :  { %11916 = vmatprep.subr.bf16.mxu1 %v19753_v4  ;;  %12500 = vmatprep.subr.bf16.mxu0 %v19756_v9  ;;  %v19804_v4 = vld [vmem:[#allocation13 + $0xaac] ss:$16 sps:$4 sm:$0xff]   ;;  %v16638_v9 = vcombine.high %v8172_v50, %v8180_v26 }
 0x83f   :  { %11917 = vmatpush1.bf16.msra.mxu1 %v19751_v45  ;;  %12501 = vmatpush1.bf16.msra.mxu0 %v19754_v5  ;;  %v19799_v45 = vld [vmem:[#allocation13 + $0xaa0] ss:$16 sps:$4 sm:$0xff]   ;;  %v19802_v5 = vld [vmem:[#allocation13 + $0xaa8] ss:$16 sps:$4 sm:$0xff]  }
 0x840   :  { %11918 = vmatprep.subr.bf16.mxu1 %v19759_v59  ;;  %12502 = vmatprep.subr.bf16.mxu0 %v19762_v30  ;;  %v19807_v59 = vld [vmem:[#allocation13 + $0xac4] ss:$16 sps:$4 sm:$0xff]   ;;  %v19810_v30 = vld [vmem:[#allocation13 + $0xacc] ss:$16 sps:$4 sm:$0xff]  }
 0x843   :  { %11919 = vmatpush1.bf16.msra.mxu1 %v19757_v49  ;;  %12503 = vmatpush1.bf16.msra.mxu0 %v19760_v61  ;;  %v16637_v49 = vcombine.low %v8172_v50, %v8180_v26  ;;  %v23737_v61 = vld [vmem:[%s24272_s23 + $0x28] sm:$0xff] }
 0x844   :  { %11920 = vmatprep.subr.bf16.mxu1 %v19765_v2  ;;  %12504 = vmatprep.subr.bf16.mxu0 %v19768_v36  ;;  %v23742_v2 = vld [vmem:[%s24272_s23 + $0x68] sm:$0xff]  ;;  %v19805_v36 = vld [vmem:[#allocation13 + $0xac0] ss:$16 sps:$4 sm:$0xff]  }
 0x845   :  { %v19850_v50 = vld [vmem:[#allocation13 + $0xba8] ss:$16 sps:$4 sm:$0xff]   ;;  %v19855_v26 = vld [vmem:[#allocation13 + $0xbc4] ss:$16 sps:$4 sm:$0xff]  }
 0x847   :  { %11921 = vmatpush1.bf16.msra.mxu1 %v19763_v25  ;;  %12505 = vmatpush1.bf16.msra.mxu0 %v19766_v19  ;;  %v19808_v25 = vld [vmem:[#allocation13 + $0xac8] ss:$16 sps:$4 sm:$0xff]   ;;  %v19813_v19 = vld [vmem:[#allocation13 + $0xae4] ss:$16 sps:$4 sm:$0xff]  }
 0x848   :  { %11963 = vmatprep.subr.bf16.mxu1 %v19771_v15  ;;  %12547 = vmatprep.subr.bf16.mxu0 %v19774_v60  ;;  %v19816_v15 = vld [vmem:[#allocation13 + $0xaec] ss:$16 sps:$4 sm:$0xff]   ;;  %v16592_v60 = vcombine.high %v23737_v61, %v23742_v2 }
 0x84a   :  { %11923 = vmatmul.mubr.bf16.vlgmr.msra.gmra.mrb[112].mxu1 %v16589_v22  ;;  %12507 = vmatmul.mubr.bf16.vlgmr.msra.gmra.mrb[128].mxu0 %v16589_v22  ;;  %v19811_v22 = vld [vmem:[#allocation13 + $0xae0] ss:$16 sps:$4 sm:$0xff]  }
 0x84b   :  { %11964 = vmatpush1.bf16.msra.mxu1 %v19769_v56  ;;  %12548 = vmatpush1.bf16.msra.mxu0 %v19772_v32  ;;  %v19822_v56 = vld [vmem:[#allocation13 + $0xb0c] ss:$16 sps:$4 sm:$0xff]   ;;  %v19817_v32 = vld [vmem:[#allocation13 + $0xb00] ss:$16 sps:$4 sm:$0xff]  }
 0x84c   :  { %11965 = vmatprep.subr.bf16.mxu1 %v19777_v14  ;;  %12549 = vmatprep.subr.bf16.mxu0 %v19780_v35  ;;  %v19820_v14 = vld [vmem:[#allocation13 + $0xb08] ss:$16 sps:$4 sm:$0xff]   ;;  %v19825_v35 = vld [vmem:[#allocation13 + $0xb24] ss:$16 sps:$4 sm:$0xff]  }
 0x84d   :  { %11932 = vmatprep.mubr.bf16.mxu1 %v16606_v28  ;;  %12516 = vmatprep.mubr.bf16.mxu0 %v16606_v28  ;;  %v19828_v28 = vld [vmem:[#allocation13 + $0xb2c] ss:$16 sps:$4 sm:$0xff]  }
 0x84f   :  { %11966 = vmatpush1.bf16.msra.mxu1 %v19775_v48  ;;  %12550 = vmatpush1.bf16.msra.mxu0 %v19778_v47  ;;  %v19823_v48 = vld [vmem:[#allocation13 + $0xb20] ss:$16 sps:$4 sm:$0xff]   ;;  %v19826_v47 = vld [vmem:[#allocation13 + $0xb28] ss:$16 sps:$4 sm:$0xff]  }
 0x850   :  { %11967 = vmatprep.subr.bf16.mxu1 %v19783_v16  ;;  %12551 = vmatprep.subr.bf16.mxu0 %v19786_v51  ;;  %v19831_v16 = vld [vmem:[#allocation13 + $0xb44] ss:$16 sps:$4 sm:$0xff]   ;;  %v19834_v51 = vld [vmem:[#allocation13 + $0xb4c] ss:$16 sps:$4 sm:$0xff]  }
 0x852   :  { %11933 = vmatmul.mubr.bf16.gmra.mrb[116].mxu1 %v16605_v17  ;;  %12517 = vmatmul.mubr.bf16.gmra.mrb[132].mxu0 %v16605_v17  ;;  %v19829_v17 = vld [vmem:[#allocation13 + $0xb40] ss:$16 sps:$4 sm:$0xff]  }
 0x853   :  { %11968 = vmatpush1.bf16.msra.mxu1 %v19781_v33  ;;  %12552 = vmatpush1.bf16.msra.mxu0 %v19784_v31  ;;  %v19840_v33 = vld [vmem:[#allocation13 + $0xb6c] ss:$16 sps:$4 sm:$0xff]   ;;  %v19835_v31 = vld [vmem:[#allocation13 + $0xb60] ss:$16 sps:$4 sm:$0xff]  }
 0x854   :  { %11969 = vmatprep.subr.bf16.mxu1 %v19789_v38  ;;  %12553 = vmatprep.subr.bf16.mxu0 %v19792_v34  ;;  %v19838_v38 = vld [vmem:[#allocation13 + $0xb68] ss:$16 sps:$4 sm:$0xff]   ;;  %v19843_v34 = vld [vmem:[#allocation13 + $0xb84] ss:$16 sps:$4 sm:$0xff]  }
 0x855   :  { %11942 = vmatprep.mubr.bf16.mxu1 %v16622_v27  ;;  %12526 = vmatprep.mubr.bf16.mxu0 %v16622_v27  ;;  %v19846_v27 = vld [vmem:[#allocation13 + $0xb8c] ss:$16 sps:$4 sm:$0xff]  }
 0x857   :  { %11970 = vmatpush1.bf16.msra.mxu1 %v19787_v46  ;;  %12554 = vmatpush1.bf16.msra.mxu0 %v19790_v8  ;;  %v19841_v46 = vld [vmem:[#allocation13 + $0xb80] ss:$16 sps:$4 sm:$0xff]   ;;  %v19844_v8 = vld [vmem:[#allocation13 + $0xb88] ss:$16 sps:$4 sm:$0xff]  }
 0x858   :  { %11971 = vmatprep.subr.bf16.mxu1 %v19795_v57  ;;  %12555 = vmatprep.subr.bf16.mxu0 %v19798_v53  ;;  %v19849_v57 = vld [vmem:[#allocation13 + $0xba4] ss:$16 sps:$4 sm:$0xff]   ;;  %v19852_v53 = vld [vmem:[#allocation13 + $0xbac] ss:$16 sps:$4 sm:$0xff]  }
 0x85a   :  { %11943 = vmatmul.mubr.bf16.gmra.mrb[120].mxu1 %v16621_v29  ;;  %12527 = vmatmul.mubr.bf16.gmra.mrb[136].mxu0 %v16621_v29  ;;  %v19847_v29 = vld [vmem:[#allocation13 + $0xba0] ss:$16 sps:$4 sm:$0xff]  }
 0x85b   :  { %11972 = vmatpush1.bf16.msra.mxu1 %v19793_v42  ;;  %12556 = vmatpush1.bf16.msra.mxu0 %v19796_v10  ;;  %v19858_v42 = vld [vmem:[#allocation13 + $0xbcc] ss:$16 sps:$4 sm:$0xff]   ;;  %v19853_v10 = vld [vmem:[#allocation13 + $0xbc0] ss:$16 sps:$4 sm:$0xff]  }
 0x85c   :  { %11973 = vmatprep.subr.bf16.mxu1 %v19801_v41  ;;  %12557 = vmatprep.subr.bf16.mxu0 %v19804_v4  ;;  %v19856_v41 = vld [vmem:[#allocation13 + $0xbc8] ss:$16 sps:$4 sm:$0xff]   ;;  %v19861_v4 = vld [vmem:[#allocation13 + $0xbe4] ss:$16 sps:$4 sm:$0xff]  }
 0x85d   :  { %11952 = vmatprep.mubr.bf16.mxu1 %v16638_v9  ;;  %12536 = vmatprep.mubr.bf16.mxu0 %v16638_v9  ;;  %v19864_v9 = vld [vmem:[#allocation13 + $0xbec] ss:$16 sps:$4 sm:$0xff]  }
 0x85f   :  { %11974 = vmatpush1.bf16.msra.mxu1 %v19799_v45  ;;  %12558 = vmatpush1.bf16.msra.mxu0 %v19802_v5  ;;  %v19859_v45 = vld [vmem:[#allocation13 + $0xbe0] ss:$16 sps:$4 sm:$0xff]   ;;  %v19862_v5 = vld [vmem:[#allocation13 + $0xbe8] ss:$16 sps:$4 sm:$0xff]  }
 0x860   :  { %11975 = vmatprep.subr.bf16.mxu1 %v19807_v59  ;;  %12559 = vmatprep.subr.bf16.mxu0 %v19810_v30  ;;  %v19867_v59 = vld [vmem:[#allocation13 + $0xc04] ss:$16 sps:$4 sm:$0xff]   ;;  %v19870_v30 = vld [vmem:[#allocation13 + $0xc0c] ss:$16 sps:$4 sm:$0xff]  }
 0x862   :  { %11953 = vmatmul.mubr.bf16.gmra.mrb[124].mxu1 %v16637_v49  ;;  %12537 = vmatmul.mubr.bf16.gmra.mrb[140].mxu0 %v16637_v49  ;;  %v16591_v49 = vcombine.low %v23737_v61, %v23742_v2  ;;  %v19871_v61 = vld [vmem:[#allocation13 + $0xc20] ss:$16 sps:$4 sm:$0xff]   ;;  %v19874_v2 = vld [vmem:[#allocation13 + $0xc28] ss:$16 sps:$4 sm:$0xff]  }
 0x863   :  { %11976 = vmatpush1.bf16.msra.mxu1 %v19805_v36  ;;  %12560 = vmatpush1.bf16.msra.mxu0 %v19808_v25  ;;  %v8141_v36 = vld [vmem:[%s24272_s23 + $0xa8] sm:$0xff] }
 0x864   :  { %11977 = vmatprep.subr.bf16.mxu1 %v19813_v19  ;;  %12561 = vmatprep.subr.bf16.mxu0 %v19816_v15  ;;  %v8149_v25 = vld [vmem:[%s24272_s23 + $0xe8] sm:$0xff]  ;;  %v19865_v19 = vld [vmem:[#allocation13 + $0xc00] ss:$16 sps:$4 sm:$0xff]  }
 0x865   :  { %11995 = vmatprep.mubr.bf16.mxu1 %v16592_v60  ;;  %12579 = vmatprep.mubr.bf16.mxu0 %v16592_v60  ;;  %v19868_v15 = vld [vmem:[#allocation13 + $0xc08] ss:$16 sps:$4 sm:$0xff]   ;;  %v19873_v60 = vld [vmem:[#allocation13 + $0xc24] ss:$16 sps:$4 sm:$0xff]  }
 0x867   :  { %11978 = vmatpush1.bf16.msra.mxu1 %v19811_v22  ;;  %12562 = vmatpush1.bf16.msra.mxu0 %v19814_v7  ;;  %v19876_v22 = vld [vmem:[#allocation13 + $0xc2c] ss:$16 sps:$4 sm:$0xff]   ;;  %v16608_v7 = vcombine.high %v8141_v36, %v8149_v25 }
 0x868   :  { %11979 = vmatprep.subr.bf16.mxu1 %v19819_v58  ;;  %12563 = vmatprep.subr.bf16.mxu0 %v19822_v56  ;;  %v19879_v58 = vld [vmem:[#allocation13 + $0xc44] ss:$16 sps:$4 sm:$0xff]   ;;  %v19882_v56 = vld [vmem:[#allocation13 + $0xc4c] ss:$16 sps:$4 sm:$0xff]  }
 0x86b   :  { %11980 = vmatpush1.bf16.msra.mxu1 %v19817_v32  ;;  %12564 = vmatpush1.bf16.msra.mxu0 %v19820_v14  ;;  %v16607_v32 = vcombine.low %v8141_v36, %v8149_v25  ;;  %v8157_v14 = vld [vmem:[%s24272_s23 + $0x128] sm:$0xff] }
 0x86c   :  { %11981 = vmatprep.subr.bf16.mxu1 %v19825_v35  ;;  %12565 = vmatprep.subr.bf16.mxu0 %v19828_v28  ;;  %v8165_v35 = vld [vmem:[%s24272_s23 + $0x168] sm:$0xff]  ;;  %v19877_v28 = vld [vmem:[#allocation13 + $0xc40] ss:$16 sps:$4 sm:$0xff]  }
 0x86d   :  { %v19910_v36 = vld [vmem:[#allocation13 + $0xce8] ss:$16 sps:$4 sm:$0xff]   ;;  %v19915_v25 = vld [vmem:[#allocation13 + $0xd04] ss:$16 sps:$4 sm:$0xff]  }
 0x86f   :  { %11982 = vmatpush1.bf16.msra.mxu1 %v19823_v48  ;;  %12566 = vmatpush1.bf16.msra.mxu0 %v19826_v47  ;;  %v19880_v48 = vld [vmem:[#allocation13 + $0xc48] ss:$16 sps:$4 sm:$0xff]   ;;  %v19885_v47 = vld [vmem:[#allocation13 + $0xc64] ss:$16 sps:$4 sm:$0xff]  }
 0x870   :  { %11983 = vmatprep.subr.bf16.mxu1 %v19831_v16  ;;  %12567 = vmatprep.subr.bf16.mxu0 %v19834_v51  ;;  %v19888_v16 = vld [vmem:[#allocation13 + $0xc6c] ss:$16 sps:$4 sm:$0xff]   ;;  %v16624_v51 = vcombine.high %v8157_v14, %v8165_v35 }
 0x873   :  { %11984 = vmatpush1.bf16.msra.mxu1 %v19829_v17  ;;  %12568 = vmatpush1.bf16.msra.mxu0 %v19832_v23  ;;  %v19883_v17 = vld [vmem:[#allocation13 + $0xc60] ss:$16 sps:$4 sm:$0xff]   ;;  %v19886_v23 = vld [vmem:[#allocation13 + $0xc68] ss:$16 sps:$4 sm:$0xff]  }
 0x874   :  { %11985 = vmatprep.subr.bf16.mxu1 %v19837_v0  ;;  %12569 = vmatprep.subr.bf16.mxu0 %v19840_v33  ;;  %v19891_v0 = vld [vmem:[#allocation13 + $0xc84] ss:$16 sps:$4 sm:$0xff]   ;;  %v19894_v33 = vld [vmem:[#allocation13 + $0xc8c] ss:$16 sps:$4 sm:$0xff]  }
 0x877   :  { %11986 = vmatpush1.bf16.msra.mxu1 %v19835_v31  ;;  %12570 = vmatpush1.bf16.msra.mxu0 %v19838_v38  ;;  %v16623_v31 = vcombine.low %v8157_v14, %v8165_v35  ;;  %v8173_v38 = vld [vmem:[%s24272_s23 + $0x1a8] sm:$0xff] }
 0x878   :  { %11987 = vmatprep.subr.bf16.mxu1 %v19843_v34  ;;  %12571 = vmatprep.subr.bf16.mxu0 %v19846_v27  ;;  %v8181_v34 = vld [vmem:[%s24272_s23 + $0x1e8] sm:$0xff]  ;;  %v19889_v27 = vld [vmem:[#allocation13 + $0xc80] ss:$16 sps:$4 sm:$0xff]  }
 0x879   :  { %v19928_v14 = vld [vmem:[#allocation13 + $0xd48] ss:$16 sps:$4 sm:$0xff]   ;;  %v19933_v35 = vld [vmem:[#allocation13 + $0xd64] ss:$16 sps:$4 sm:$0xff]  }
 0x87b   :  { %11988 = vmatpush1.bf16.msra.mxu1 %v19841_v46  ;;  %12572 = vmatpush1.bf16.msra.mxu0 %v19844_v8  ;;  %v19892_v46 = vld [vmem:[#allocation13 + $0xc88] ss:$16 sps:$4 sm:$0xff]   ;;  %v19897_v8 = vld [vmem:[#allocation13 + $0xca4] ss:$16 sps:$4 sm:$0xff]  }
 0x87c   :  { %11989 = vmatprep.subr.bf16.mxu1 %v19849_v57  ;;  %12573 = vmatprep.subr.bf16.mxu0 %v19852_v53  ;;  %v19900_v57 = vld [vmem:[#allocation13 + $0xcac] ss:$16 sps:$4 sm:$0xff]   ;;  %v16640_v53 = vcombine.high %v8173_v38, %v8181_v34 }
 0x87f   :  { %11990 = vmatpush1.bf16.msra.mxu1 %v19847_v29  ;;  %12574 = vmatpush1.bf16.msra.mxu0 %v19850_v50  ;;  %v19895_v29 = vld [vmem:[#allocation13 + $0xca0] ss:$16 sps:$4 sm:$0xff]   ;;  %v19898_v50 = vld [vmem:[#allocation13 + $0xca8] ss:$16 sps:$4 sm:$0xff]  }
 0x880   :  { %11991 = vmatprep.subr.bf16.mxu1 %v19855_v26  ;;  %12575 = vmatprep.subr.bf16.mxu0 %v19858_v42  ;;  %v19903_v26 = vld [vmem:[#allocation13 + $0xcc4] ss:$16 sps:$4 sm:$0xff]   ;;  %v19906_v42 = vld [vmem:[#allocation13 + $0xccc] ss:$16 sps:$4 sm:$0xff]  }
 0x883   :  { %11992 = vmatpush1.bf16.msra.mxu1 %v19853_v10  ;;  %12576 = vmatpush1.bf16.msra.mxu0 %v19856_v41  ;;  %v16639_v10 = vcombine.low %v8173_v38, %v8181_v34  ;;  %v23769_v41 = vld [vmem:[%s24272_s23 + $0x30] sm:$0xff]  ;;  %v19946_v38 = vld [vmem:[#allocation13 + $0xda8] ss:$16 sps:$4 sm:$0xff]   ;;  %v19951_v34 = vld [vmem:[#allocation13 + $0xdc4] ss:$16 sps:$4 sm:$0xff]  }
 0x884   :  { %11993 = vmatprep.subr.bf16.mxu1 %v19861_v4  ;;  %12577 = vmatprep.subr.bf16.mxu0 %v19864_v9  ;;  %v23774_v4 = vld [vmem:[%s24272_s23 + $0x70] sm:$0xff] }
 0x885   :  { %v19901_v9 = vld [vmem:[#allocation13 + $0xcc0] ss:$16 sps:$4 sm:$0xff]  }
 0x887   :  { %11994 = vmatpush1.bf16.msra.mxu1 %v19859_v45  ;;  %12578 = vmatpush1.bf16.msra.mxu0 %v19862_v5  ;;  %v19904_v45 = vld [vmem:[#allocation13 + $0xcc8] ss:$16 sps:$4 sm:$0xff]   ;;  %v19909_v5 = vld [vmem:[#allocation13 + $0xce4] ss:$16 sps:$4 sm:$0xff]  }
 0x888   :  { %12036 = vmatprep.subr.bf16.mxu1 %v19867_v59  ;;  %12620 = vmatprep.subr.bf16.mxu0 %v19870_v30  ;;  %v19912_v59 = vld [vmem:[#allocation13 + $0xcec] ss:$16 sps:$4 sm:$0xff]   ;;  %v16594_v30 = vcombine.high %v23769_v41, %v23774_v4 }
 0x88a   :  { %11996 = vmatmul.mubr.bf16.vlgmr.msra.gmra.mrb[112].mxu1 %v16591_v49  ;;  %12580 = vmatmul.mubr.bf16.vlgmr.msra.gmra.mrb[128].mxu0 %v16591_v49  ;;  %v19907_v49 = vld [vmem:[#allocation13 + $0xce0] ss:$16 sps:$4 sm:$0xff]  }
 0x88b   :  { %12037 = vmatpush1.bf16.msra.mxu1 %v19865_v19  ;;  %12621 = vmatpush1.bf16.msra.mxu0 %v19868_v15  ;;  %v19918_v19 = vld [vmem:[#allocation13 + $0xd0c] ss:$16 sps:$4 sm:$0xff]   ;;  %v19913_v15 = vld [vmem:[#allocation13 + $0xd00] ss:$16 sps:$4 sm:$0xff]  }
 0x88c   :  { %12038 = vmatprep.subr.bf16.mxu1 %v19873_v60  ;;  %12622 = vmatprep.subr.bf16.mxu0 %v19876_v22  ;;  %v19916_v60 = vld [vmem:[#allocation13 + $0xd08] ss:$16 sps:$4 sm:$0xff]   ;;  %v19921_v22 = vld [vmem:[#allocation13 + $0xd24] ss:$16 sps:$4 sm:$0xff]  }
 0x88d   :  { %12005 = vmatprep.mubr.bf16.mxu1 %v16608_v7  ;;  %12589 = vmatprep.mubr.bf16.mxu0 %v16608_v7  ;;  %v19924_v7 = vld [vmem:[#allocation13 + $0xd2c] ss:$16 sps:$4 sm:$0xff]  }
 0x88f   :  { %12039 = vmatpush1.bf16.msra.mxu1 %v19871_v61  ;;  %12623 = vmatpush1.bf16.msra.mxu0 %v19874_v2  ;;  %v19919_v61 = vld [vmem:[#allocation13 + $0xd20] ss:$16 sps:$4 sm:$0xff]   ;;  %v19922_v2 = vld [vmem:[#allocation13 + $0xd28] ss:$16 sps:$4 sm:$0xff]  }
 0x890   :  { %12040 = vmatprep.subr.bf16.mxu1 %v19879_v58  ;;  %12624 = vmatprep.subr.bf16.mxu0 %v19882_v56  ;;  %v19927_v58 = vld [vmem:[#allocation13 + $0xd44] ss:$16 sps:$4 sm:$0xff]   ;;  %v19930_v56 = vld [vmem:[#allocation13 + $0xd4c] ss:$16 sps:$4 sm:$0xff]  }
 0x892   :  { %12006 = vmatmul.mubr.bf16.gmra.mrb[116].mxu1 %v16607_v32  ;;  %12590 = vmatmul.mubr.bf16.gmra.mrb[132].mxu0 %v16607_v32  ;;  %v19925_v32 = vld [vmem:[#allocation13 + $0xd40] ss:$16 sps:$4 sm:$0xff]  }
 0x893   :  { %12041 = vmatpush1.bf16.msra.mxu1 %v19877_v28  ;;  %12625 = vmatpush1.bf16.msra.mxu0 %v19880_v48  ;;  %v19936_v28 = vld [vmem:[#allocation13 + $0xd6c] ss:$16 sps:$4 sm:$0xff]   ;;  %v19931_v48 = vld [vmem:[#allocation13 + $0xd60] ss:$16 sps:$4 sm:$0xff]  }
 0x894   :  { %12042 = vmatprep.subr.bf16.mxu1 %v19885_v47  ;;  %12626 = vmatprep.subr.bf16.mxu0 %v19888_v16  ;;  %v19934_v47 = vld [vmem:[#allocation13 + $0xd68] ss:$16 sps:$4 sm:$0xff]   ;;  %v19939_v16 = vld [vmem:[#allocation13 + $0xd84] ss:$16 sps:$4 sm:$0xff]  }
 0x895   :  { %12015 = vmatprep.mubr.bf16.mxu1 %v16624_v51  ;;  %12599 = vmatprep.mubr.bf16.mxu0 %v16624_v51  ;;  %v19942_v51 = vld [vmem:[#allocation13 + $0xd8c] ss:$16 sps:$4 sm:$0xff]  }
 0x897   :  { %12043 = vmatpush1.bf16.msra.mxu1 %v19883_v17  ;;  %12627 = vmatpush1.bf16.msra.mxu0 %v19886_v23  ;;  %v19937_v17 = vld [vmem:[#allocation13 + $0xd80] ss:$16 sps:$4 sm:$0xff]   ;;  %v19940_v23 = vld [vmem:[#allocation13 + $0xd88] ss:$16 sps:$4 sm:$0xff]  }
 0x898   :  { %12044 = vmatprep.subr.bf16.mxu1 %v19891_v0  ;;  %12628 = vmatprep.subr.bf16.mxu0 %v19894_v33  ;;  %v19945_v0 = vld [vmem:[#allocation13 + $0xda4] ss:$16 sps:$4 sm:$0xff]   ;;  %v19948_v33 = vld [vmem:[#allocation13 + $0xdac] ss:$16 sps:$4 sm:$0xff]  }
 0x89a   :  { %12016 = vmatmul.mubr.bf16.gmra.mrb[120].mxu1 %v16623_v31  ;;  %12600 = vmatmul.mubr.bf16.gmra.mrb[136].mxu0 %v16623_v31  ;;  %v19943_v31 = vld [vmem:[#allocation13 + $0xda0] ss:$16 sps:$4 sm:$0xff]  }
 0x89b   :  { %12045 = vmatpush1.bf16.msra.mxu1 %v19889_v27  ;;  %12629 = vmatpush1.bf16.msra.mxu0 %v19892_v46  ;;  %v19954_v27 = vld [vmem:[#allocation13 + $0xdcc] ss:$16 sps:$4 sm:$0xff]   ;;  %v19949_v46 = vld [vmem:[#allocation13 + $0xdc0] ss:$16 sps:$4 sm:$0xff]  }
 0x89c   :  { %12046 = vmatprep.subr.bf16.mxu1 %v19897_v8  ;;  %12630 = vmatprep.subr.bf16.mxu0 %v19900_v57  ;;  %v19952_v8 = vld [vmem:[#allocation13 + $0xdc8] ss:$16 sps:$4 sm:$0xff]   ;;  %v19957_v57 = vld [vmem:[#allocation13 + $0xde4] ss:$16 sps:$4 sm:$0xff]  }
 0x89d   :  { %12025 = vmatprep.mubr.bf16.mxu1 %v16640_v53  ;;  %12609 = vmatprep.mubr.bf16.mxu0 %v16640_v53  ;;  %v19960_v53 = vld [vmem:[#allocation13 + $0xdec] ss:$16 sps:$4 sm:$0xff]  }
 0x89f   :  { %12047 = vmatpush1.bf16.msra.mxu1 %v19895_v29  ;;  %12631 = vmatpush1.bf16.msra.mxu0 %v19898_v50  ;;  %v19955_v29 = vld [vmem:[#allocation13 + $0xde0] ss:$16 sps:$4 sm:$0xff]   ;;  %v19958_v50 = vld [vmem:[#allocation13 + $0xde8] ss:$16 sps:$4 sm:$0xff]  }
 0x8a0   :  { %12048 = vmatprep.subr.bf16.mxu1 %v19903_v26  ;;  %12632 = vmatprep.subr.bf16.mxu0 %v19906_v42  ;;  %v19963_v26 = vld [vmem:[#allocation13 + $0xe04] ss:$16 sps:$4 sm:$0xff]   ;;  %v19966_v42 = vld [vmem:[#allocation13 + $0xe0c] ss:$16 sps:$4 sm:$0xff]  }
 0x8a2   :  { %12026 = vmatmul.mubr.bf16.gmra.mrb[124].mxu1 %v16639_v10  ;;  %12610 = vmatmul.mubr.bf16.gmra.mrb[140].mxu0 %v16639_v10  ;;  %v16593_v10 = vcombine.low %v23769_v41, %v23774_v4  ;;  %v19967_v41 = vld [vmem:[#allocation13 + $0xe20] ss:$16 sps:$4 sm:$0xff]   ;;  %v19970_v4 = vld [vmem:[#allocation13 + $0xe28] ss:$16 sps:$4 sm:$0xff]  }
 0x8a3   :  { %12049 = vmatpush1.bf16.msra.mxu1 %v19901_v9  ;;  %12633 = vmatpush1.bf16.msra.mxu0 %v19904_v45  ;;  %v8142_v9 = vld [vmem:[%s24272_s23 + $0xb0] sm:$0xff] }
 0x8a4   :  { %12050 = vmatprep.subr.bf16.mxu1 %v19909_v5  ;;  %12634 = vmatprep.subr.bf16.mxu0 %v19912_v59  ;;  %v8150_v45 = vld [vmem:[%s24272_s23 + $0xf0] sm:$0xff]  ;;  %v19964_v59 = vld [vmem:[#allocation13 + $0xe08] ss:$16 sps:$4 sm:$0xff]  }
 0x8a5   :  { %12068 = vmatprep.mubr.bf16.mxu1 %v16594_v30  ;;  %12652 = vmatprep.mubr.bf16.mxu0 %v16594_v30  ;;  %v19961_v5 = vld [vmem:[#allocation13 + $0xe00] ss:$16 sps:$4 sm:$0xff]   ;;  %v19969_v30 = vld [vmem:[#allocation13 + $0xe24] ss:$16 sps:$4 sm:$0xff]  }
 0x8a7   :  { %12051 = vmatpush1.bf16.msra.mxu1 %v19907_v49  ;;  %12635 = vmatpush1.bf16.msra.mxu0 %v19910_v36  ;;  %v19972_v49 = vld [vmem:[#allocation13 + $0xe2c] ss:$16 sps:$4 sm:$0xff]   ;;  %v16610_v36 = vcombine.high %v8142_v9, %v8150_v45 }
 0x8a8   :  { %12052 = vmatprep.subr.bf16.mxu1 %v19915_v25  ;;  %12636 = vmatprep.subr.bf16.mxu0 %v19918_v19  ;;  %v19975_v25 = vld [vmem:[#allocation13 + $0xe44] ss:$16 sps:$4 sm:$0xff]   ;;  %v19978_v19 = vld [vmem:[#allocation13 + $0xe4c] ss:$16 sps:$4 sm:$0xff]  }
 0x8ab   :  { %12053 = vmatpush1.bf16.msra.mxu1 %v19913_v15  ;;  %12637 = vmatpush1.bf16.msra.mxu0 %v19916_v60  ;;  %v16609_v15 = vcombine.low %v8142_v9, %v8150_v45  ;;  %v8158_v60 = vld [vmem:[%s24272_s23 + $0x130] sm:$0xff]  ;;  %v20006_v9 = vld [vmem:[#allocation13 + $0xee8] ss:$16 sps:$4 sm:$0xff]   ;;  %v20011_v45 = vld [vmem:[#allocation13 + $0xf04] ss:$16 sps:$4 sm:$0xff]  }
 0x8ac   :  { %12054 = vmatprep.subr.bf16.mxu1 %v19921_v22  ;;  %12638 = vmatprep.subr.bf16.mxu0 %v19924_v7  ;;  %v8166_v22 = vld [vmem:[%s24272_s23 + $0x170] sm:$0xff] }
 0x8ad   :  { %v19973_v7 = vld [vmem:[#allocation13 + $0xe40] ss:$16 sps:$4 sm:$0xff]  }
 0x8af   :  { %12055 = vmatpush1.bf16.msra.mxu1 %v19919_v61  ;;  %12639 = vmatpush1.bf16.msra.mxu0 %v19922_v2  ;;  %v19976_v61 = vld [vmem:[#allocation13 + $0xe48] ss:$16 sps:$4 sm:$0xff]   ;;  %v19981_v2 = vld [vmem:[#allocation13 + $0xe64] ss:$16 sps:$4 sm:$0xff]  }
 0x8b0   :  { %12056 = vmatprep.subr.bf16.mxu1 %v19927_v58  ;;  %12640 = vmatprep.subr.bf16.mxu0 %v19930_v56  ;;  %v19984_v58 = vld [vmem:[#allocation13 + $0xe6c] ss:$16 sps:$4 sm:$0xff]   ;;  %v16626_v56 = vcombine.high %v8158_v60, %v8166_v22 }
 0x8b3   :  { %12057 = vmatpush1.bf16.msra.mxu1 %v19925_v32  ;;  %12641 = vmatpush1.bf16.msra.mxu0 %v19928_v14  ;;  %v19979_v32 = vld [vmem:[#allocation13 + $0xe60] ss:$16 sps:$4 sm:$0xff]   ;;  %v19982_v14 = vld [vmem:[#allocation13 + $0xe68] ss:$16 sps:$4 sm:$0xff]  }
 0x8b4   :  { %12058 = vmatprep.subr.bf16.mxu1 %v19933_v35  ;;  %12642 = vmatprep.subr.bf16.mxu0 %v19936_v28  ;;  %v19987_v35 = vld [vmem:[#allocation13 + $0xe84] ss:$16 sps:$4 sm:$0xff]   ;;  %v19990_v28 = vld [vmem:[#allocation13 + $0xe8c] ss:$16 sps:$4 sm:$0xff]  }
 0x8b7   :  { %12059 = vmatpush1.bf16.msra.mxu1 %v19931_v48  ;;  %12643 = vmatpush1.bf16.msra.mxu0 %v19934_v47  ;;  %v16625_v48 = vcombine.low %v8158_v60, %v8166_v22  ;;  %v8174_v47 = vld [vmem:[%s24272_s23 + $0x1b0] sm:$0xff]  ;;  %v20024_v60 = vld [vmem:[#allocation13 + $0xf48] ss:$16 sps:$4 sm:$0xff]   ;;  %v20029_v22 = vld [vmem:[#allocation13 + $0xf64] ss:$16 sps:$4 sm:$0xff]  }
 0x8b8   :  { %12060 = vmatprep.subr.bf16.mxu1 %v19939_v16  ;;  %12644 = vmatprep.subr.bf16.mxu0 %v19942_v51  ;;  %v8182_v16 = vld [vmem:[%s24272_s23 + $0x1f0] sm:$0xff] }
 0x8b9   :  { %v19985_v51 = vld [vmem:[#allocation13 + $0xe80] ss:$16 sps:$4 sm:$0xff]  }
 0x8bb   :  { %12061 = vmatpush1.bf16.msra.mxu1 %v19937_v17  ;;  %12645 = vmatpush1.bf16.msra.mxu0 %v19940_v23  ;;  %v19988_v17 = vld [vmem:[#allocation13 + $0xe88] ss:$16 sps:$4 sm:$0xff]   ;;  %v19993_v23 = vld [vmem:[#allocation13 + $0xea4] ss:$16 sps:$4 sm:$0xff]  }
 0x8bc   :  { %12062 = vmatprep.subr.bf16.mxu1 %v19945_v0  ;;  %12646 = vmatprep.subr.bf16.mxu0 %v19948_v33  ;;  %v19996_v0 = vld [vmem:[#allocation13 + $0xeac] ss:$16 sps:$4 sm:$0xff]   ;;  %v16642_v33 = vcombine.high %v8174_v47, %v8182_v16 }
 0x8bf   :  { %12063 = vmatpush1.bf16.msra.mxu1 %v19943_v31  ;;  %12647 = vmatpush1.bf16.msra.mxu0 %v19946_v38  ;;  %v19991_v31 = vld [vmem:[#allocation13 + $0xea0] ss:$16 sps:$4 sm:$0xff]   ;;  %v19994_v38 = vld [vmem:[#allocation13 + $0xea8] ss:$16 sps:$4 sm:$0xff]  }
 0x8c0   :  { %12064 = vmatprep.subr.bf16.mxu1 %v19951_v34  ;;  %12648 = vmatprep.subr.bf16.mxu0 %v19954_v27  ;;  %v19999_v34 = vld [vmem:[#allocation13 + $0xec4] ss:$16 sps:$4 sm:$0xff]   ;;  %v20002_v27 = vld [vmem:[#allocation13 + $0xecc] ss:$16 sps:$4 sm:$0xff]  }
 0x8c3   :  { %12065 = vmatpush1.bf16.msra.mxu1 %v19949_v46  ;;  %12649 = vmatpush1.bf16.msra.mxu0 %v19952_v8  ;;  %v16641_v46 = vcombine.low %v8174_v47, %v8182_v16  ;;  %v23801_v8 = vld [vmem:[%s24272_s23 + $0x38] sm:$0xff] }
 0x8c4   :  { %12066 = vmatprep.subr.bf16.mxu1 %v19957_v57  ;;  %12650 = vmatprep.subr.bf16.mxu0 %v19960_v53  ;;  %v23806_v57 = vld [vmem:[%s24272_s23 + $0x78] sm:$0xff]  ;;  %v19997_v53 = vld [vmem:[#allocation13 + $0xec0] ss:$16 sps:$4 sm:$0xff]  }
 0x8c5   :  { %v20042_v47 = vld [vmem:[#allocation13 + $0xfa8] ss:$16 sps:$4 sm:$0xff]   ;;  %v20047_v16 = vld [vmem:[#allocation13 + $0xfc4] ss:$16 sps:$4 sm:$0xff]  }
 0x8c7   :  { %12067 = vmatpush1.bf16.msra.mxu1 %v19955_v29  ;;  %12651 = vmatpush1.bf16.msra.mxu0 %v19958_v50  ;;  %v20000_v29 = vld [vmem:[#allocation13 + $0xec8] ss:$16 sps:$4 sm:$0xff]   ;;  %v20005_v50 = vld [vmem:[#allocation13 + $0xee4] ss:$16 sps:$4 sm:$0xff]  }
 0x8c8   :  { %12109 = vmatprep.subr.bf16.mxu1 %v19963_v26  ;;  %12693 = vmatprep.subr.bf16.mxu0 %v19966_v42  ;;  %v20008_v26 = vld [vmem:[#allocation13 + $0xeec] ss:$16 sps:$4 sm:$0xff]   ;;  %v16596_v42 = vcombine.high %v23801_v8, %v23806_v57 }
 0x8ca   :  { %12069 = vmatmul.mubr.bf16.vlgmr.msra.gmra.mrb[112].mxu1 %v16593_v10  ;;  %12653 = vmatmul.mubr.bf16.vlgmr.msra.gmra.mrb[128].mxu0 %v16593_v10  ;;  %v20003_v10 = vld [vmem:[#allocation13 + $0xee0] ss:$16 sps:$4 sm:$0xff]  }
 0x8cb   :  { %12110 = vmatpush1.bf16.msra.mxu1 %v19961_v5  ;;  %12694 = vmatpush1.bf16.msra.mxu0 %v19964_v59  ;;  %v20014_v5 = vld [vmem:[#allocation13 + $0xf0c] ss:$16 sps:$4 sm:$0xff]   ;;  %v20009_v59 = vld [vmem:[#allocation13 + $0xf00] ss:$16 sps:$4 sm:$0xff]  }
 0x8cc   :  { %12111 = vmatprep.subr.bf16.mxu1 %v19969_v30  ;;  %12695 = vmatprep.subr.bf16.mxu0 %v19972_v49  ;;  %v20012_v30 = vld [vmem:[#allocation13 + $0xf08] ss:$16 sps:$4 sm:$0xff]   ;;  %v20017_v49 = vld [vmem:[#allocation13 + $0xf24] ss:$16 sps:$4 sm:$0xff]  }
 0x8cd   :  { %12078 = vmatprep.mubr.bf16.mxu1 %v16610_v36  ;;  %12662 = vmatprep.mubr.bf16.mxu0 %v16610_v36  ;;  %v20020_v36 = vld [vmem:[#allocation13 + $0xf2c] ss:$16 sps:$4 sm:$0xff]  }
 0x8cf   :  { %12112 = vmatpush1.bf16.msra.mxu1 %v19967_v41  ;;  %12696 = vmatpush1.bf16.msra.mxu0 %v19970_v4  ;;  %v20015_v41 = vld [vmem:[#allocation13 + $0xf20] ss:$16 sps:$4 sm:$0xff]   ;;  %v20018_v4 = vld [vmem:[#allocation13 + $0xf28] ss:$16 sps:$4 sm:$0xff]  }
 0x8d0   :  { %12113 = vmatprep.subr.bf16.mxu1 %v19975_v25  ;;  %12697 = vmatprep.subr.bf16.mxu0 %v19978_v19  ;;  %v20023_v25 = vld [vmem:[#allocation13 + $0xf44] ss:$16 sps:$4 sm:$0xff]   ;;  %v20026_v19 = vld [vmem:[#allocation13 + $0xf4c] ss:$16 sps:$4 sm:$0xff]  }
 0x8d2   :  { %12079 = vmatmul.mubr.bf16.gmra.mrb[116].mxu1 %v16609_v15  ;;  %12663 = vmatmul.mubr.bf16.gmra.mrb[132].mxu0 %v16609_v15  ;;  %v20021_v15 = vld [vmem:[#allocation13 + $0xf40] ss:$16 sps:$4 sm:$0xff]  }
 0x8d3   :  { %12114 = vmatpush1.bf16.msra.mxu1 %v19973_v7  ;;  %12698 = vmatpush1.bf16.msra.mxu0 %v19976_v61  ;;  %v20032_v7 = vld [vmem:[#allocation13 + $0xf6c] ss:$16 sps:$4 sm:$0xff]   ;;  %v20027_v61 = vld [vmem:[#allocation13 + $0xf60] ss:$16 sps:$4 sm:$0xff]  }
 0x8d4   :  { %12115 = vmatprep.subr.bf16.mxu1 %v19981_v2  ;;  %12699 = vmatprep.subr.bf16.mxu0 %v19984_v58  ;;  %v20030_v2 = vld [vmem:[#allocation13 + $0xf68] ss:$16 sps:$4 sm:$0xff]   ;;  %v20035_v58 = vld [vmem:[#allocation13 + $0xf84] ss:$16 sps:$4 sm:$0xff]  }
 0x8d5   :  { %12088 = vmatprep.mubr.bf16.mxu1 %v16626_v56  ;;  %12672 = vmatprep.mubr.bf16.mxu0 %v16626_v56  ;;  %v20038_v56 = vld [vmem:[#allocation13 + $0xf8c] ss:$16 sps:$4 sm:$0xff]  }
 0x8d7   :  { %12116 = vmatpush1.bf16.msra.mxu1 %v19979_v32  ;;  %12700 = vmatpush1.bf16.msra.mxu0 %v19982_v14  ;;  %v20033_v32 = vld [vmem:[#allocation13 + $0xf80] ss:$16 sps:$4 sm:$0xff]   ;;  %v20036_v14 = vld [vmem:[#allocation13 + $0xf88] ss:$16 sps:$4 sm:$0xff]  }
 0x8d8   :  { %12117 = vmatprep.subr.bf16.mxu1 %v19987_v35  ;;  %12701 = vmatprep.subr.bf16.mxu0 %v19990_v28  ;;  %v20041_v35 = vld [vmem:[#allocation13 + $0xfa4] ss:$16 sps:$4 sm:$0xff]   ;;  %v20044_v28 = vld [vmem:[#allocation13 + $0xfac] ss:$16 sps:$4 sm:$0xff]  }
 0x8da   :  { %12089 = vmatmul.mubr.bf16.gmra.mrb[120].mxu1 %v16625_v48  ;;  %12673 = vmatmul.mubr.bf16.gmra.mrb[136].mxu0 %v16625_v48  ;;  %v20039_v48 = vld [vmem:[#allocation13 + $0xfa0] ss:$16 sps:$4 sm:$0xff]  }
 0x8db   :  { %12118 = vmatpush1.bf16.msra.mxu1 %v19985_v51  ;;  %12702 = vmatpush1.bf16.msra.mxu0 %v19988_v17  ;;  %v20050_v51 = vld [vmem:[#allocation13 + $0xfcc] ss:$16 sps:$4 sm:$0xff]   ;;  %v20045_v17 = vld [vmem:[#allocation13 + $0xfc0] ss:$16 sps:$4 sm:$0xff]  }
 0x8dc   :  { %12119 = vmatprep.subr.bf16.mxu1 %v19993_v23  ;;  %12703 = vmatprep.subr.bf16.mxu0 %v19996_v0  ;;  %v20048_v23 = vld [vmem:[#allocation13 + $0xfc8] ss:$16 sps:$4 sm:$0xff]   ;;  %v20053_v0 = vld [vmem:[#allocation13 + $0xfe4] ss:$16 sps:$4 sm:$0xff]  }
 0x8dd   :  { %12098 = vmatprep.mubr.bf16.mxu1 %v16642_v33  ;;  %12682 = vmatprep.mubr.bf16.mxu0 %v16642_v33  ;;  %v20056_v33 = vld [vmem:[#allocation13 + $0xfec] ss:$16 sps:$4 sm:$0xff]  }
 0x8df   :  { %12120 = vmatpush1.bf16.msra.mxu1 %v19991_v31  ;;  %12704 = vmatpush1.bf16.msra.mxu0 %v19994_v38  ;;  %v20051_v31 = vld [vmem:[#allocation13 + $0xfe0] ss:$16 sps:$4 sm:$0xff]   ;;  %v20054_v38 = vld [vmem:[#allocation13 + $0xfe8] ss:$16 sps:$4 sm:$0xff]  }
 0x8e0   :  { %12121 = vmatprep.subr.bf16.mxu1 %v19999_v34  ;;  %12705 = vmatprep.subr.bf16.mxu0 %v20002_v27  ;;  %v8143_v34 = vld [vmem:[%s24272_s23 + $0xb8] sm:$0xff] }
 0x8e1   :  { %v8151_v27 = vld [vmem:[%s24272_s23 + $0xf8] sm:$0xff] }
 0x8e2   :  { %12099 = vmatmul.mubr.bf16.gmra.mrb[124].mxu1 %v16641_v46  ;;  %12683 = vmatmul.mubr.bf16.gmra.mrb[140].mxu0 %v16641_v46  ;;  %v20059_v46 = vld [vmem:[#allocation18 + $0x4] ss:$16 sps:$4 sm:$0xff]  }
 0x8e3   :  { %12122 = vmatpush1.bf16.msra.mxu1 %v19997_v53  ;;  %12706 = vmatpush1.bf16.msra.mxu0 %v20000_v29  ;;  %v20062_v53 = vld [vmem:[#allocation18 + $0xc] ss:$16 sps:$4 sm:$0xff]   ;;  %v16595_v29 = vcombine.low %v23801_v8, %v23806_v57  ;;  %v8167_v8 = vld [vmem:[%s24272_s23 + $0x178] sm:$0xff] }
 0x8e4   :  { %12123 = vmatprep.subr.bf16.mxu1 %v20005_v50  ;;  %12707 = vmatprep.subr.bf16.mxu0 %v20008_v26  ;;  %v16612_v50 = vcombine.high %v8143_v34, %v8151_v27  ;;  %v20057_v26 = vld [vmem:[#allocation18] ss:$16 sps:$4 sm:$0xff]  }
 0x8e5   :  { %12141 = vmatprep.mubr.bf16.mxu1 %v16596_v42  ;;  %12725 = vmatprep.mubr.bf16.mxu0 %v16596_v42  ;;  %v20060_v42 = vld [vmem:[#allocation18 + $0x8] ss:$16 sps:$4 sm:$0xff]   ;;  %v20063_v57 = vld [vmem:[#allocation18 + $0x20] ss:$16 sps:$4 sm:$0xff]  }
 0x8e7   :  { %12124 = vmatpush1.bf16.msra.mxu1 %v20003_v10  ;;  %12708 = vmatpush1.bf16.msra.mxu0 %v20006_v9  ;;  %v20065_v10 = vld [vmem:[#allocation18 + $0x24] ss:$16 sps:$4 sm:$0xff]   ;;  %v20068_v9 = vld [vmem:[#allocation18 + $0x2c] ss:$16 sps:$4 sm:$0xff]  }
 0x8e8   :  { %12125 = vmatprep.subr.bf16.mxu1 %v20011_v45  ;;  %12709 = vmatprep.subr.bf16.mxu0 %v20014_v5  ;;  %v8159_v45 = vld [vmem:[%s24272_s23 + $0x138] sm:$0xff]  ;;  %v20066_v5 = vld [vmem:[#allocation18 + $0x28] ss:$16 sps:$4 sm:$0xff]  }
 0x8eb   :  { %12126 = vmatpush1.bf16.msra.mxu1 %v20009_v59  ;;  %12710 = vmatpush1.bf16.msra.mxu0 %v20012_v30  ;;  %v20071_v59 = vld [vmem:[#allocation18 + $0x44] ss:$16 sps:$4 sm:$0xff]   ;;  %v20074_v30 = vld [vmem:[#allocation18 + $0x4c] ss:$16 sps:$4 sm:$0xff]  }
 0x8ec   :  { %12127 = vmatprep.subr.bf16.mxu1 %v20017_v49  ;;  %12711 = vmatprep.subr.bf16.mxu0 %v20020_v36  ;;  %v16611_v49 = vcombine.low %v8143_v34, %v8151_v27  ;;  %v16628_v36 = vcombine.high %v8159_v45, %v8167_v8  ;;  %v20102_v34 = vld [vmem:[#allocation18 + $0xe8] ss:$16 sps:$4 sm:$0xff]   ;;  %v20107_v27 = vld [vmem:[#allocation18 + $0x104] ss:$16 sps:$4 sm:$0xff]  }
 0x8ef   :  { %12128 = vmatpush1.bf16.msra.mxu1 %v20015_v41  ;;  %12712 = vmatpush1.bf16.msra.mxu0 %v20018_v4  ;;  %v20069_v41 = vld [vmem:[#allocation18 + $0x40] ss:$16 sps:$4 sm:$0xff]   ;;  %v20072_v4 = vld [vmem:[#allocation18 + $0x48] ss:$16 sps:$4 sm:$0xff]  }
 0x8f0   :  { %12129 = vmatprep.subr.bf16.mxu1 %v20023_v25  ;;  %12713 = vmatprep.subr.bf16.mxu0 %v20026_v19  ;;  %v20077_v25 = vld [vmem:[#allocation18 + $0x64] ss:$16 sps:$4 sm:$0xff]   ;;  %v20080_v19 = vld [vmem:[#allocation18 + $0x6c] ss:$16 sps:$4 sm:$0xff]  }
 0x8f3   :  { %12130 = vmatpush1.bf16.msra.mxu1 %v20021_v15  ;;  %12714 = vmatpush1.bf16.msra.mxu0 %v20024_v60  ;;  %v8175_v15 = vld [vmem:[%s24272_s23 + $0x1b8] sm:$0xff] }
 0x8f4   :  { %12131 = vmatprep.subr.bf16.mxu1 %v20029_v22  ;;  %12715 = vmatprep.subr.bf16.mxu0 %v20032_v7  ;;  %v8183_v60 = vld [vmem:[%s24272_s23 + $0x1f8] sm:$0xff]  ;;  %v20078_v7 = vld [vmem:[#allocation18 + $0x68] ss:$16 sps:$4 sm:$0xff]  }
 0x8f5   :  { %v20075_v22 = vld [vmem:[#allocation18 + $0x60] ss:$16 sps:$4 sm:$0xff]  }
 0x8f7   :  { %12132 = vmatpush1.bf16.msra.mxu1 %v20027_v61  ;;  %12716 = vmatpush1.bf16.msra.mxu0 %v20030_v2  ;;  %v20083_v61 = vld [vmem:[#allocation18 + $0x84] ss:$16 sps:$4 sm:$0xff]   ;;  %v20086_v2 = vld [vmem:[#allocation18 + $0x8c] ss:$16 sps:$4 sm:$0xff]  }
 0x8f8   :  { %12133 = vmatprep.subr.bf16.mxu1 %v20035_v58  ;;  %12717 = vmatprep.subr.bf16.mxu0 %v20038_v56  ;;  %v16627_v58 = vcombine.low %v8159_v45, %v8167_v8  ;;  %v16644_v56 = vcombine.high %v8175_v15, %v8183_v60  ;;  %v20122_v45 = vld [vmem:[#allocation18 + $0x14c] ss:$16 sps:$4 sm:$0xff]   ;;  %v20117_v8 = vld [vmem:[#allocation18 + $0x140] ss:$16 sps:$4 sm:$0xff]  }
 0x8fb   :  { %12134 = vmatpush1.bf16.msra.mxu1 %v20033_v32  ;;  %12718 = vmatpush1.bf16.msra.mxu0 %v20036_v14  ;;  %v20081_v32 = vld [vmem:[#allocation18 + $0x80] ss:$16 sps:$4 sm:$0xff]   ;;  %v20084_v14 = vld [vmem:[#allocation18 + $0x88] ss:$16 sps:$4 sm:$0xff]  }
 0x8fc   :  { %12135 = vmatprep.subr.bf16.mxu1 %v20041_v35  ;;  %12719 = vmatprep.subr.bf16.mxu0 %v20044_v28  ;;  %v20089_v35 = vld [vmem:[#allocation18 + $0xa4] ss:$16 sps:$4 sm:$0xff]   ;;  %v20092_v28 = vld [vmem:[#allocation18 + $0xac] ss:$16 sps:$4 sm:$0xff]  }
 0x8ff   :  { %12136 = vmatpush1.bf16.msra.mxu1 %v20039_v48  ;;  %12720 = vmatpush1.bf16.msra.mxu0 %v20042_v47  ;;  %v20087_v48 = vld [vmem:[#allocation18 + $0xa0] ss:$16 sps:$4 sm:$0xff]   ;;  %v20090_v47 = vld [vmem:[#allocation18 + $0xa8] ss:$16 sps:$4 sm:$0xff]  }
 0x900   :  { %12137 = vmatprep.subr.bf16.mxu1 %v20047_v16  ;;  %12721 = vmatprep.subr.bf16.mxu0 %v20050_v51  ;;  %v20095_v16 = vld [vmem:[#allocation18 + $0xc4] ss:$16 sps:$4 sm:$0xff]   ;;  %v20098_v51 = vld [vmem:[#allocation18 + $0xcc] ss:$16 sps:$4 sm:$0xff]  }
 0x903   :  { %12138 = vmatpush1.bf16.msra.mxu1 %v20045_v17  ;;  %12722 = vmatpush1.bf16.msra.mxu0 %v20048_v23  ;;  %v16643_v17 = vcombine.low %v8175_v15, %v8183_v60  ;;  %v20093_v23 = vld [vmem:[#allocation18 + $0xc0] ss:$16 sps:$4 sm:$0xff]   ;;  %v20140_v15 = vld [vmem:[#allocation18 + $0x1ac] ss:$16 sps:$4 sm:$0xff]  }
 0x904   :  { %12139 = vmatprep.subr.bf16.mxu1 %v20053_v0  ;;  %12723 = vmatprep.subr.bf16.mxu0 %v20056_v33  ;;  %v20096_v0 = vld [vmem:[#allocation18 + $0xc8] ss:$16 sps:$4 sm:$0xff]   ;;  %v20101_v33 = vld [vmem:[#allocation18 + $0xe4] ss:$16 sps:$4 sm:$0xff]   ;;  %v20135_v60 = vld [vmem:[#allocation18 + $0x1a0] ss:$16 sps:$4 sm:$0xff]  }
 0x907   :  { %12140 = vmatpush1.bf16.msra.mxu1 %v20051_v31  ;;  %12724 = vmatpush1.bf16.msra.mxu0 %v20054_v38  ;;  %v20104_v31 = vld [vmem:[#allocation18 + $0xec] ss:$16 sps:$4 sm:$0xff]   ;;  %v20099_v38 = vld [vmem:[#allocation18 + $0xe0] ss:$16 sps:$4 sm:$0xff]  }
 0x908   :  { %13726 = vmatprep.subr.bf16.mxu1 %v20059_v46  ;;  %13872 = vmatprep.subr.bf16.mxu0 %v20062_v53  ;;  %v20110_v46 = vld [vmem:[#allocation18 + $0x10c] ss:$16 sps:$4 sm:$0xff]   ;;  %v20105_v53 = vld [vmem:[#allocation18 + $0x100] ss:$16 sps:$4 sm:$0xff]  }
 0x90a   :  { %12142 = vmatmul.mubr.bf16.vlgmr.msra.gmra.mrb[112].mxu1 %v16595_v29  ;;  %12726 = vmatmul.mubr.bf16.vlgmr.msra.gmra.mrb[128].mxu0 %v16595_v29  ;;  %v20108_v29 = vld [vmem:[#allocation18 + $0x108] ss:$16 sps:$4 sm:$0xff]  }
 0x90b   :  { %12151 = vmatprep.mubr.bf16.mxu1 %v16612_v50  ;;  %12735 = vmatprep.mubr.bf16.mxu0 %v16612_v50  ;;  %v20113_v50 = vld [vmem:[#allocation18 + $0x124] ss:$16 sps:$4 sm:$0xff]  }
 0x90c   :  { %13727 = vmatpush1.bf16.msra.mxu1 %v20057_v26  ;;  %13873 = vmatpush1.bf16.msra.mxu0 %v20060_v42  ;;  %v20116_v26 = vld [vmem:[#allocation18 + $0x12c] ss:$16 sps:$4 sm:$0xff]   ;;  %v20111_v42 = vld [vmem:[#allocation18 + $0x120] ss:$16 sps:$4 sm:$0xff]  }
 0x90d   :  { %13728 = vmatprep.subr.bf16.mxu1 %v20065_v10  ;;  %13874 = vmatprep.subr.bf16.mxu0 %v20068_v9  ;;  %v20114_v10 = vld [vmem:[#allocation18 + $0x128] ss:$16 sps:$4 sm:$0xff]   ;;  %v20119_v9 = vld [vmem:[#allocation18 + $0x144] ss:$16 sps:$4 sm:$0xff]  }
 0x910   :  { %13729 = vmatpush1.bf16.msra.mxu1 %v20063_v57  ;;  %13875 = vmatpush1.bf16.msra.mxu0 %v20066_v5  ;;  %v20120_v57 = vld [vmem:[#allocation18 + $0x148] ss:$16 sps:$4 sm:$0xff]   ;;  %v20125_v5 = vld [vmem:[#allocation18 + $0x164] ss:$16 sps:$4 sm:$0xff]  }
 0x911   :  { %13730 = vmatprep.subr.bf16.mxu1 %v20071_v59  ;;  %13876 = vmatprep.subr.bf16.mxu0 %v20074_v30  ;;  %v20128_v59 = vld [vmem:[#allocation18 + $0x16c] ss:$16 sps:$4 sm:$0xff]   ;;  %v20123_v30 = vld [vmem:[#allocation18 + $0x160] ss:$16 sps:$4 sm:$0xff]  }
 0x912   :  { %12152 = vmatmul.mubr.bf16.gmra.mrb[116].mxu1 %v16611_v49  ;;  %12736 = vmatmul.mubr.bf16.gmra.mrb[132].mxu0 %v16611_v49  ;;  %v20126_v49 = vld [vmem:[#allocation18 + $0x168] ss:$16 sps:$4 sm:$0xff]  }
 0x913   :  { %12161 = vmatprep.mubr.bf16.mxu1 %v16628_v36  ;;  %12745 = vmatprep.mubr.bf16.mxu0 %v16628_v36  ;;  %v20131_v36 = vld [vmem:[#allocation18 + $0x184] ss:$16 sps:$4 sm:$0xff]  }
 0x914   :  { %13731 = vmatpush1.bf16.msra.mxu1 %v20069_v41  ;;  %13877 = vmatpush1.bf16.msra.mxu0 %v20072_v4  ;;  %v20134_v41 = vld [vmem:[#allocation18 + $0x18c] ss:$16 sps:$4 sm:$0xff]   ;;  %v20129_v4 = vld [vmem:[#allocation18 + $0x180] ss:$16 sps:$4 sm:$0xff]  }
 0x915   :  { %13732 = vmatprep.subr.bf16.mxu1 %v20077_v25  ;;  %13878 = vmatprep.subr.bf16.mxu0 %v20080_v19  ;;  %v20132_v25 = vld [vmem:[#allocation18 + $0x188] ss:$16 sps:$4 sm:$0xff]   ;;  %v20137_v19 = vld [vmem:[#allocation18 + $0x1a4] ss:$16 sps:$4 sm:$0xff]  }
 0x918   :  { %13733 = vmatpush1.bf16.msra.mxu1 %v20075_v22  ;;  %13879 = vmatpush1.bf16.msra.mxu0 %v20078_v7  ;;  %v20138_v22 = vld [vmem:[#allocation18 + $0x1a8] ss:$16 sps:$4 sm:$0xff]   ;;  %v20143_v7 = vld [vmem:[#allocation18 + $0x1c4] ss:$16 sps:$4 sm:$0xff]  }
 0x919   :  { %13734 = vmatprep.subr.bf16.mxu1 %v20083_v61  ;;  %13880 = vmatprep.subr.bf16.mxu0 %v20086_v2  ;;  %v20146_v61 = vld [vmem:[#allocation18 + $0x1cc] ss:$16 sps:$4 sm:$0xff]   ;;  %v20141_v2 = vld [vmem:[#allocation18 + $0x1c0] ss:$16 sps:$4 sm:$0xff]  }
 0x91a   :  { %12162 = vmatmul.mubr.bf16.gmra.mrb[120].mxu1 %v16627_v58  ;;  %12746 = vmatmul.mubr.bf16.gmra.mrb[136].mxu0 %v16627_v58  ;;  %v20144_v58 = vld [vmem:[#allocation18 + $0x1c8] ss:$16 sps:$4 sm:$0xff]  }
 0x91b   :  { %12171 = vmatprep.mubr.bf16.mxu1 %v16644_v56  ;;  %12755 = vmatprep.mubr.bf16.mxu0 %v16644_v56  ;;  %v20149_v56 = vld [vmem:[#allocation18 + $0x1e4] ss:$16 sps:$4 sm:$0xff]  }
 0x91c   :  { %13735 = vmatpush1.bf16.msra.mxu1 %v20081_v32  ;;  %13881 = vmatpush1.bf16.msra.mxu0 %v20084_v14  ;;  %v20152_v32 = vld [vmem:[#allocation18 + $0x1ec] ss:$16 sps:$4 sm:$0xff]   ;;  %v20147_v14 = vld [vmem:[#allocation18 + $0x1e0] ss:$16 sps:$4 sm:$0xff]  }
 0x91d   :  { %13736 = vmatprep.subr.bf16.mxu1 %v20089_v35  ;;  %13882 = vmatprep.subr.bf16.mxu0 %v20092_v28  ;;  %v20150_v35 = vld [vmem:[#allocation18 + $0x1e8] ss:$16 sps:$4 sm:$0xff]   ;;  %v20155_v28 = vld [vmem:[#allocation18 + $0x204] ss:$16 sps:$4 sm:$0xff]  }
 0x920   :  { %13737 = vmatpush1.bf16.msra.mxu1 %v20087_v48  ;;  %13883 = vmatpush1.bf16.msra.mxu0 %v20090_v47  ;;  %v20158_v48 = vld [vmem:[#allocation18 + $0x20c] ss:$16 sps:$4 sm:$0xff]  }
 0x921   :  { %13738 = vmatprep.subr.bf16.mxu1 %v20095_v16  ;;  %13884 = vmatprep.subr.bf16.mxu0 %v20098_v51  ;;  %v8696_v47 = vld [vmem:[#allocation15] sm:$0xf] }
 0x922   :  { %12172 = vmatmul.mubr.bf16.gmra.mrb[124].mxu1 %v16643_v17  ;;  %12756 = vmatmul.mubr.bf16.gmra.mrb[140].mxu0 %v16643_v17  ;;  %v23831_v16 = vrot.slane %v8696_v47, %v24268_v20  ;;  %v23834_v51 = vrot.slane %v8696_v47, %v24269_v11  ;;  %v23837_v17 = vrot.slane %v8696_v47, %v24270_v6 }
 0x924   :  { %13739 = vmatpush1.bf16.msra.mxu1 %v20093_v23  ;;  %13885 = vmatpush1.bf16.msra.mxu0 %v20096_v0  ;;  %v23840_v23 = vrot.slane %v8696_v47, %v24271_v44 }
 0x925   :  { %13740 = vmatprep.subr.bf16.mxu1 %v20101_v33  ;;  %13886 = vmatprep.subr.bf16.mxu0 %v20104_v31 }
 0x928   :  { %13741 = vmatpush1.bf16.msra.mxu1 %v20099_v38  ;;  %13887 = vmatpush1.bf16.msra.mxu0 %v20102_v34 }
 0x929   :  { %13742 = vmatprep.subr.bf16.mxu1 %v20107_v27  ;;  %13888 = vmatprep.subr.bf16.mxu0 %v20110_v46 }
 0x92c   :  { %13743 = vmatpush1.bf16.msra.mxu1 %v20105_v53  ;;  %13889 = vmatpush1.bf16.msra.mxu0 %v20108_v29 }
 0x92d   :  { %13744 = vmatprep.subr.bf16.mxu1 %v20113_v50  ;;  %13890 = vmatprep.subr.bf16.mxu0 %v20116_v26 }
 0x930   :  { %13745 = vmatpush1.bf16.msra.mxu1 %v20111_v42  ;;  %13891 = vmatpush1.bf16.msra.mxu0 %v20114_v10 }
 0x931   :  { %13746 = vmatprep.subr.bf16.mxu1 %v20119_v9  ;;  %13892 = vmatprep.subr.bf16.mxu0 %v20122_v45 }
 0x934   :  { %13747 = vmatpush1.bf16.msra.mxu1 %v20117_v8  ;;  %13893 = vmatpush1.bf16.msra.mxu0 %v20120_v57 }
 0x935   :  { %13748 = vmatprep.subr.bf16.mxu1 %v20125_v5  ;;  %13894 = vmatprep.subr.bf16.mxu0 %v20128_v59 }
 0x938   :  { %13749 = vmatpush1.bf16.msra.mxu1 %v20123_v30  ;;  %13895 = vmatpush1.bf16.msra.mxu0 %v20126_v49 }
 0x939   :  { %13750 = vmatprep.subr.bf16.mxu1 %v20131_v36  ;;  %13896 = vmatprep.subr.bf16.mxu0 %v20134_v41 }
 0x93c   :  { %13751 = vmatpush1.bf16.msra.mxu1 %v20129_v4  ;;  %13897 = vmatpush1.bf16.msra.mxu0 %v20132_v25 }
 0x93d   :  { %13752 = vmatprep.subr.bf16.mxu1 %v20137_v19  ;;  %13898 = vmatprep.subr.bf16.mxu0 %v20140_v15 }
 0x940   :  { %13753 = vmatpush1.bf16.msra.mxu1 %v20135_v60  ;;  %13899 = vmatpush1.bf16.msra.mxu0 %v20138_v22 }
 0x941   :  { %13754 = vmatprep.subr.bf16.mxu1 %v20143_v7  ;;  %13900 = vmatprep.subr.bf16.mxu0 %v20146_v61  ;;  %v20153_v61 = vld [vmem:[#allocation18 + $0x200] ss:$16 sps:$4 sm:$0xff]  }
 0x944   :  { %13755 = vmatpush1.bf16.msra.mxu1 %v20141_v2  ;;  %13901 = vmatpush1.bf16.msra.mxu0 %v20144_v58  ;;  %v20156_v2 = vld [vmem:[#allocation18 + $0x208] ss:$16 sps:$4 sm:$0xff]  }
 0x945   :  { %13756 = vmatprep.subr.bf16.mxu1 %v20149_v56  ;;  %13902 = vmatprep.subr.bf16.mxu0 %v20152_v32 }
 0x948   :  { %13757 = vmatpush1.bf16.msra.mxu1 %v20147_v14  ;;  %13903 = vmatpush1.bf16.msra.mxu0 %v20150_v35  ;;  %v20161_v35 = vld [vmem:[#allocation18 + $0x224] ss:$16 sps:$4 sm:$0xff]  }
 0x949   :  { %13799 = vmatprep.subr.bf16.mxu1 %v20155_v28  ;;  %13945 = vmatprep.subr.bf16.mxu0 %v20158_v48  ;;  %v20164_v28 = vld [vmem:[#allocation18 + $0x22c] ss:$16 sps:$4 sm:$0xff]  }
 0x9dd   :  { %v12143_v0 = vpop.f32.mrb[112].mxu1  ;;  %v12727_v33 = vpop.f32.mrb[128].mxu0 }
 0x9de   :  { %v17598_v31 = vadd.f32 %v12143_v0, %v23831_v16  ;;  %v17614_v38 = vadd.f32 %v12727_v33, %v23834_v51  ;;  %v12145_v34 = vpop.f32.mrb[113].mxu1  ;;  %v12729_v27 = vpop.f32.mrb[129].mxu0 }
 0x9df   :  { %v17599_v46 = vadd.f32 %v12145_v34, %v23837_v17  ;;  %v17615_v53 = vadd.f32 %v12729_v27, %v23840_v23  ;;  %v12147_v29 = vpop.f32.mrb[114].mxu1  ;;  %v12731_v50 = vpop.f32.mrb[130].mxu0 }
 0x9e0   :  { %v17600_v26 = vadd.f32 %v12147_v29, %v23831_v16  ;;  %v17616_v42 = vadd.f32 %v12731_v50, %v23834_v51  ;;  %v12149_v10 = vpop.f32.mrb[115].mxu1  ;;  %v12733_v9 = vpop.f32.mrb[131].mxu0  ;;  %v12766_v57 = vmax.f32 %v17598_v31, 0.0  ;;  %v12768_v5 = vmax.f32 %v17614_v38, 0.0  ;;  %v20159_v29 = vld [vmem:[#allocation18 + $0x220] ss:$16 sps:$4 sm:$0xff]  }
 0x9e1   :  { %v17601_v45 = vadd.f32 %v12149_v10, %v23837_v17  ;;  %v17617_v8 = vadd.f32 %v12733_v9, %v23840_v23  ;;  %v12767_v49 = vmax.f32 %v17599_v46, 0.0  ;;  %v12769_v36 = vmax.f32 %v17615_v53, 0.0  ;;  %v20162_v50 = vld [vmem:[#allocation18 + $0x228] ss:$16 sps:$4 sm:$0xff]  }
 0x9e2   :  { %v12770_v59 = vmax.f32 %v17600_v26, 0.0  ;;  %v12772_v30 = vmax.f32 %v17616_v42, 0.0  ;;  %v20167_v26 = vld [vmem:[#allocation18 + $0x244] ss:$16 sps:$4 sm:$0xff]  }
 0x9e3   :  { %v12771_v41 = vmax.f32 %v17601_v45, 0.0  ;;  %v12773_v4 = vmax.f32 %v17617_v8, 0.0  ;;  %v20170_v8 = vld [vmem:[#allocation18 + $0x24c] ss:$16 sps:$4 sm:$0xff]  }
 0x9e4   :  { %v12942_v25 = vpack.c.bf16 %v12770_v59, %v12766_v57  ;;  %v23850_v19 = vpack.c.bf16 %v12772_v30, %v12768_v5 }
 0x9e5   :  { %v12943_v15 = vpack.c.bf16 %v12771_v41, %v12767_v49  ;;  %v23852_v60 = vpack.c.bf16 %v12773_v4, %v12769_v36  ;;  %v12153_v22 = vpop.f32.mrb[116].mxu1  ;;  %v12737_v7 = vpop.f32.mrb[132].mxu0 }
 0x9e6   :  { %v17602_v58 = vadd.f32 %v12153_v22, %v23831_v16  ;;  %v17618_v56 = vadd.f32 %v12737_v7, %v23834_v51  ;;  %v12155_v32 = vpop.f32.mrb[117].mxu1  ;;  %v12739_v14 = vpop.f32.mrb[133].mxu0  ;;  %v20165_v22 = vld [vmem:[#allocation18 + $0x240] ss:$16 sps:$4 sm:$0xff]   ;;  %v20168_v7 = vld [vmem:[#allocation18 + $0x248] ss:$16 sps:$4 sm:$0xff]  }
 0x9e7   :  { %v17603_v48 = vadd.f32 %v12155_v32, %v23837_v17  ;;  %v17619_v47 = vadd.f32 %v12739_v14, %v23840_v23  ;;  %v12157_v0 = vpop.f32.mrb[118].mxu1  ;;  %v12741_v33 = vpop.f32.mrb[134].mxu0  ;;  %13758 = vmatprep.mubr.bf16.mxu1 %v12943_v15  ;;  %13904 = vmatprep.mubr.bf16.mxu0 %v12943_v15  ;;  %v20173_v32 = vld [vmem:[#allocation18 + $0x264] ss:$16 sps:$4 sm:$0xff]   ;;  %v20176_v14 = vld [vmem:[#allocation18 + $0x26c] ss:$16 sps:$4 sm:$0xff]  }
 0x9e8   :  { %v17604_v31 = vadd.f32 %v12157_v0, %v23831_v16  ;;  %v17620_v38 = vadd.f32 %v12741_v33, %v23834_v51  ;;  %v12159_v34 = vpop.f32.mrb[119].mxu1  ;;  %v12743_v27 = vpop.f32.mrb[135].mxu0  ;;  %13759 = vmatmul.mubr.bf16.vlgmr.msra.gmra.mrb[128].mxu1 %v12942_v25  ;;  %13905 = vmatmul.mubr.bf16.vlgmr.msra.gmra.mrb[144].mxu0 %v12942_v25  ;;  %v12774_v42 = vmax.f32 %v17602_v58, 0.0  ;;  %v12776_v10 = vmax.f32 %v17618_v56, 0.0 }
 0x9e9   :  { %v17605_v46 = vadd.f32 %v12159_v34, %v23837_v17  ;;  %v17621_v53 = vadd.f32 %v12743_v27, %v23840_v23  ;;  %13800 = vmatpush1.bf16.msra.mxu1 %v20153_v61  ;;  %13946 = vmatpush1.bf16.msra.mxu0 %v20156_v2  ;;  %v12775_v57 = vmax.f32 %v17603_v48, 0.0  ;;  %v12777_v5 = vmax.f32 %v17619_v47, 0.0 }
 0x9ea   :  { %v12778_v9 = vmax.f32 %v17604_v31, 0.0  ;;  %v12780_v45 = vmax.f32 %v17620_v38, 0.0  ;;  %13801 = vmatprep.subr.bf16.mxu1 %v20161_v35  ;;  %13947 = vmatprep.subr.bf16.mxu0 %v20164_v28 }
 0x9eb   :  { %v12779_v59 = vmax.f32 %v17605_v46, 0.0  ;;  %v12781_v30 = vmax.f32 %v17621_v53, 0.0  ;;  %v20171_v46 = vld [vmem:[#allocation18 + $0x260] ss:$16 sps:$4 sm:$0xff]   ;;  %v20174_v53 = vld [vmem:[#allocation18 + $0x268] ss:$16 sps:$4 sm:$0xff]  }
 0x9ec   :  { %v12946_v49 = vpack.c.bf16 %v12778_v9, %v12774_v42  ;;  %v23862_v36 = vpack.c.bf16 %v12780_v45, %v12776_v10  ;;  %v20182_v9 = vld [vmem:[#allocation18 + $0x28c] ss:$16 sps:$4 sm:$0xff]  }
 0x9ed   :  { %v12947_v41 = vpack.c.bf16 %v12779_v59, %v12775_v57  ;;  %v23864_v4 = vpack.c.bf16 %v12781_v30, %v12777_v5  ;;  %13802 = vmatpush1.bf16.msra.mxu1 %v20159_v29  ;;  %13948 = vmatpush1.bf16.msra.mxu0 %v20162_v50  ;;  %v12163_v25 = vpop.f32.mrb[120].mxu1  ;;  %v12747_v15 = vpop.f32.mrb[136].mxu0  ;;  %v20179_v29 = vld [vmem:[#allocation18 + $0x284] ss:$16 sps:$4 sm:$0xff]  }
 0x9ee   :  { %v17606_v61 = vadd.f32 %v12163_v25, %v23831_v16  ;;  %v17622_v2 = vadd.f32 %v12747_v15, %v23834_v51  ;;  %v12165_v58 = vpop.f32.mrb[121].mxu1  ;;  %v12749_v56 = vpop.f32.mrb[137].mxu0  ;;  %13803 = vmatprep.subr.bf16.mxu1 %v20167_v26  ;;  %13949 = vmatprep.subr.bf16.mxu0 %v20170_v8 }
 0x9ef   :  { %v17607_v35 = vadd.f32 %v12165_v58, %v23837_v17  ;;  %v17623_v28 = vadd.f32 %v12749_v56, %v23840_v23  ;;  %v12167_v48 = vpop.f32.mrb[122].mxu1  ;;  %v12751_v47 = vpop.f32.mrb[138].mxu0  ;;  %13768 = vmatprep.mubr.bf16.mxu1 %v12947_v41  ;;  %13914 = vmatprep.mubr.bf16.mxu0 %v12947_v41 }
 0x9f0   :  { %v17608_v0 = vadd.f32 %v12167_v48, %v23831_v16  ;;  %v17624_v33 = vadd.f32 %v12751_v47, %v23834_v51  ;;  %v12169_v31 = vpop.f32.mrb[123].mxu1  ;;  %v12753_v38 = vpop.f32.mrb[139].mxu0  ;;  %13769 = vmatmul.mubr.bf16.gmra.mrb[132].mxu1 %v12946_v49  ;;  %13915 = vmatmul.mubr.bf16.gmra.mrb[148].mxu0 %v12946_v49  ;;  %v12782_v50 = vmax.f32 %v17606_v61, 0.0  ;;  %v12784_v26 = vmax.f32 %v17622_v2, 0.0 }
 0x9f1   :  { %v17609_v34 = vadd.f32 %v12169_v31, %v23837_v17  ;;  %v17625_v27 = vadd.f32 %v12753_v38, %v23840_v23  ;;  %13804 = vmatpush1.bf16.msra.mxu1 %v20165_v22  ;;  %13950 = vmatpush1.bf16.msra.mxu0 %v20168_v7  ;;  %v12783_v45 = vmax.f32 %v17607_v35, 0.0  ;;  %v12785_v8 = vmax.f32 %v17623_v28, 0.0  ;;  %v20177_v22 = vld [vmem:[#allocation18 + $0x280] ss:$16 sps:$4 sm:$0xff]   ;;  %v20180_v7 = vld [vmem:[#allocation18 + $0x288] ss:$16 sps:$4 sm:$0xff]  }
 0x9f2   :  { %v12786_v42 = vmax.f32 %v17608_v0, 0.0  ;;  %v12788_v10 = vmax.f32 %v17624_v33, 0.0  ;;  %13805 = vmatprep.subr.bf16.mxu1 %v20173_v32  ;;  %13951 = vmatprep.subr.bf16.mxu0 %v20176_v14  ;;  %v20185_v32 = vld [vmem:[#allocation18 + $0x2a4] ss:$16 sps:$4 sm:$0xff]   ;;  %v20188_v14 = vld [vmem:[#allocation18 + $0x2ac] ss:$16 sps:$4 sm:$0xff]  }
 0x9f3   :  { %v12787_v57 = vmax.f32 %v17609_v34, 0.0  ;;  %v12789_v5 = vmax.f32 %v17625_v27, 0.0 }
 0x9f4   :  { %v12950_v59 = vpack.c.bf16 %v12786_v42, %v12782_v50  ;;  %v23874_v30 = vpack.c.bf16 %v12788_v10, %v12784_v26 }
 0x9f5   :  { %v12951_v49 = vpack.c.bf16 %v12787_v57, %v12783_v45  ;;  %v23876_v41 = vpack.c.bf16 %v12789_v5, %v12785_v8  ;;  %13806 = vmatpush1.bf16.msra.mxu1 %v20171_v46  ;;  %13952 = vmatpush1.bf16.msra.mxu0 %v20174_v53  ;;  %v12173_v25 = vpop.f32.mrb[124].mxu1  ;;  %v12757_v15 = vpop.f32.mrb[140].mxu0  ;;  %v20183_v46 = vld [vmem:[#allocation18 + $0x2a0] ss:$16 sps:$4 sm:$0xff]   ;;  %v20186_v53 = vld [vmem:[#allocation18 + $0x2a8] ss:$16 sps:$4 sm:$0xff]  }
 0x9f6   :  { %v17610_v61 = vadd.f32 %v12173_v25, %v23831_v16  ;;  %v17626_v2 = vadd.f32 %v12757_v15, %v23834_v51  ;;  %v12175_v58 = vpop.f32.mrb[125].mxu1  ;;  %v12759_v56 = vpop.f32.mrb[141].mxu0  ;;  %13807 = vmatprep.subr.bf16.mxu1 %v20179_v29  ;;  %13953 = vmatprep.subr.bf16.mxu0 %v20182_v9  ;;  %v20191_v29 = vld [vmem:[#allocation18 + $0x2c4] ss:$16 sps:$4 sm:$0xff]   ;;  %v20200_v15 = vld [vmem:[#allocation18 + $0x2ec] ss:$16 sps:$4 sm:$0xff]  }
 0x9f7   :  { %v17611_v35 = vadd.f32 %v12175_v58, %v23837_v17  ;;  %v17627_v28 = vadd.f32 %v12759_v56, %v23840_v23  ;;  %v12177_v48 = vpop.f32.mrb[126].mxu1  ;;  %v12761_v47 = vpop.f32.mrb[142].mxu0  ;;  %13778 = vmatprep.mubr.bf16.mxu1 %v12951_v49  ;;  %13924 = vmatprep.mubr.bf16.mxu0 %v12951_v49  ;;  %v20192_v49 = vld [vmem:[#allocation18 + $0x2c8] ss:$16 sps:$4 sm:$0xff]   ;;  %v20197_v25 = vld [vmem:[#allocation18 + $0x2e4] ss:$16 sps:$4 sm:$0xff]  }
 0x9f8   :  { %v17612_v0 = vadd.f32 %v12177_v48, %v23831_v16  ;;  %v17628_v33 = vadd.f32 %v12761_v47, %v23834_v51  ;;  %v12179_v31 = vpop.f32.mrb[127].mxu1  ;;  %v12763_v38 = vpop.f32.mrb[143].mxu0  ;;  %13779 = vmatmul.mubr.bf16.gmra.mrb[136].mxu1 %v12950_v59  ;;  %13925 = vmatmul.mubr.bf16.gmra.mrb[152].mxu0 %v12950_v59  ;;  %v12790_v50 = vmax.f32 %v17610_v61, 0.0  ;;  %v12792_v26 = vmax.f32 %v17626_v2, 0.0  ;;  %v20194_v16 = vld [vmem:[#allocation18 + $0x2cc] ss:$16 sps:$4 sm:$0xff]  }
 0x9f9   :  { %v17613_v34 = vadd.f32 %v12179_v31, %v23837_v17  ;;  %v17629_v27 = vadd.f32 %v12763_v38, %v23840_v23  ;;  %13808 = vmatpush1.bf16.msra.mxu1 %v20177_v22  ;;  %13954 = vmatpush1.bf16.msra.mxu0 %v20180_v7  ;;  %v12791_v51 = vmax.f32 %v17611_v35, 0.0  ;;  %v12793_v9 = vmax.f32 %v17627_v28, 0.0  ;;  %v20189_v59 = vld [vmem:[#allocation18 + $0x2c0] ss:$16 sps:$4 sm:$0xff]   ;;  %v20198_v7 = vld [vmem:[#allocation18 + $0x2e8] ss:$16 sps:$4 sm:$0xff]  }
 0x9fa   :  { %v12794_v42 = vmax.f32 %v17612_v0, 0.0  ;;  %v12796_v10 = vmax.f32 %v17628_v33, 0.0  ;;  %13809 = vmatprep.subr.bf16.mxu1 %v20185_v32  ;;  %13955 = vmatprep.subr.bf16.mxu0 %v20188_v14  ;;  %v20195_v22 = vld [vmem:[#allocation18 + $0x2e0] ss:$16 sps:$4 sm:$0xff]   ;;  %v20203_v61 = vld [vmem:[#allocation18 + $0x304] ss:$16 sps:$4 sm:$0xff]  }
 0x9fb   :  { %v12795_v45 = vmax.f32 %v17613_v34, 0.0  ;;  %v12797_v8 = vmax.f32 %v17629_v27, 0.0  ;;  %v20206_v2 = vld [vmem:[#allocation18 + $0x30c] ss:$16 sps:$4 sm:$0xff]   ;;  %v20201_v58 = vld [vmem:[#allocation18 + $0x300] ss:$16 sps:$4 sm:$0xff]  }
 0x9fc   :  { %v12954_v57 = vpack.c.bf16 %v12794_v42, %v12790_v50  ;;  %v23886_v17 = vpack.c.bf16 %v12796_v10, %v12792_v26  ;;  %v20204_v56 = vld [vmem:[#allocation18 + $0x308] ss:$16 sps:$4 sm:$0xff]   ;;  %v20209_v32 = vld [vmem:[#allocation18 + $0x324] ss:$16 sps:$4 sm:$0xff]   ;;  %v20212_v14 = vld [vmem:[#allocation18 + $0x32c] ss:$16 sps:$4 sm:$0xff]  }
 0x9fd   :  { %v12955_v23 = vpack.c.bf16 %v12795_v45, %v12791_v51  ;;  %v23888_v5 = vpack.c.bf16 %v12797_v8, %v12793_v9  ;;  %13810 = vmatpush1.bf16.msra.mxu1 %v20183_v46  ;;  %13956 = vmatpush1.bf16.msra.mxu0 %v20186_v53  ;;  %v20207_v35 = vld [vmem:[#allocation18 + $0x320] ss:$16 sps:$4 sm:$0xff]   ;;  %v20210_v28 = vld [vmem:[#allocation18 + $0x328] ss:$16 sps:$4 sm:$0xff]   ;;  %v20215_v48 = vld [vmem:[#allocation18 + $0x344] ss:$16 sps:$4 sm:$0xff]  }
 0x9fe   :  { %13811 = vmatprep.subr.bf16.mxu1 %v20191_v29  ;;  %13957 = vmatprep.subr.bf16.mxu0 %v20194_v16  ;;  %v20213_v47 = vld [vmem:[#allocation18 + $0x340] ss:$16 sps:$4 sm:$0xff]   ;;  %v20216_v0 = vld [vmem:[#allocation18 + $0x348] ss:$16 sps:$4 sm:$0xff]   ;;  %v20221_v33 = vld [vmem:[#allocation18 + $0x364] ss:$16 sps:$4 sm:$0xff]  }
 0x9ff   :  { %13788 = vmatprep.mubr.bf16.mxu1 %v12955_v23  ;;  %13934 = vmatprep.mubr.bf16.mxu0 %v12955_v23  ;;  %v20224_v31 = vld [vmem:[#allocation18 + $0x36c] ss:$16 sps:$4 sm:$0xff]   ;;  %v20219_v38 = vld [vmem:[#allocation18 + $0x360] ss:$16 sps:$4 sm:$0xff]   ;;  %v20222_v34 = vld [vmem:[#allocation18 + $0x368] ss:$16 sps:$4 sm:$0xff]  }
 0xa00   :  { %13789 = vmatmul.mubr.bf16.gmra.mrb[140].mxu1 %v12954_v57  ;;  %13935 = vmatmul.mubr.bf16.gmra.mrb[156].mxu0 %v12954_v57  ;;  %v20227_v27 = vld [vmem:[#allocation18 + $0x384] ss:$16 sps:$4 sm:$0xff]   ;;  %v20230_v46 = vld [vmem:[#allocation18 + $0x38c] ss:$16 sps:$4 sm:$0xff]   ;;  %v20225_v53 = vld [vmem:[#allocation18 + $0x380] ss:$16 sps:$4 sm:$0xff]  }
 0xa01   :  { %13812 = vmatpush1.bf16.msra.mxu1 %v20189_v59  ;;  %13958 = vmatpush1.bf16.msra.mxu0 %v20192_v49  ;;  %v20228_v29 = vld [vmem:[#allocation18 + $0x388] ss:$16 sps:$4 sm:$0xff]   ;;  %v20233_v50 = vld [vmem:[#allocation18 + $0x3a4] ss:$16 sps:$4 sm:$0xff]   ;;  %v20236_v26 = vld [vmem:[#allocation18 + $0x3ac] ss:$16 sps:$4 sm:$0xff]  }
 0xa02   :  { %13831 = vmatprep.mubr.bf16.mxu1 %v23852_v60  ;;  %13977 = vmatprep.mubr.bf16.mxu0 %v23852_v60  ;;  %v20218_v60 = vld [vmem:[#allocation18 + $0x34c] ss:$16 sps:$4 sm:$0xff]   ;;  %v20231_v42 = vld [vmem:[#allocation18 + $0x3a0] ss:$16 sps:$4 sm:$0xff]   ;;  %v20234_v10 = vld [vmem:[#allocation18 + $0x3a8] ss:$16 sps:$4 sm:$0xff]  }
 0xa03   :  { %13813 = vmatprep.subr.bf16.mxu1 %v20197_v25  ;;  %13959 = vmatprep.subr.bf16.mxu0 %v20200_v15  ;;  %v20239_v16 = vld [vmem:[#allocation18 + $0x3c4] ss:$16 sps:$4 sm:$0xff]   ;;  %v20242_v51 = vld [vmem:[#allocation18 + $0x3cc] ss:$16 sps:$4 sm:$0xff]   ;;  %v20237_v9 = vld [vmem:[#allocation18 + $0x3c0] ss:$16 sps:$4 sm:$0xff]  }
 0xa04   :  { %v20240_v45 = vld [vmem:[#allocation18 + $0x3c8] ss:$16 sps:$4 sm:$0xff]   ;;  %v20245_v8 = vld [vmem:[#allocation18 + $0x3e4] ss:$16 sps:$4 sm:$0xff]   ;;  %v20248_v57 = vld [vmem:[#allocation18 + $0x3ec] ss:$16 sps:$4 sm:$0xff]  }
 0xa05   :  { %13814 = vmatpush1.bf16.msra.mxu1 %v20195_v22  ;;  %13960 = vmatpush1.bf16.msra.mxu0 %v20198_v7  ;;  %v20243_v23 = vld [vmem:[#allocation18 + $0x3e0] ss:$16 sps:$4 sm:$0xff]   ;;  %v20246_v59 = vld [vmem:[#allocation18 + $0x3e8] ss:$16 sps:$4 sm:$0xff]   ;;  %v20251_v49 = vld [vmem:[#allocation16 + $0x4] ss:$16 sps:$4 sm:$0xff]  }
 0xa06   :  { %13815 = vmatprep.subr.bf16.mxu1 %v20203_v61  ;;  %13961 = vmatprep.subr.bf16.mxu0 %v20206_v2  ;;  %v20254_v25 = vld [vmem:[#allocation16 + $0xc] ss:$16 sps:$4 sm:$0xff]   ;;  %v20249_v15 = vld [vmem:[#allocation16] ss:$16 sps:$4 sm:$0xff]   ;;  %v20252_v22 = vld [vmem:[#allocation16 + $0x8] ss:$16 sps:$4 sm:$0xff]  }
 0xa07   :  { %v20257_v7 = vld [vmem:[#allocation16 + $0x24] ss:$16 sps:$4 sm:$0xff]   ;;  %v20260_v61 = vld [vmem:[#allocation16 + $0x2c] ss:$16 sps:$4 sm:$0xff]   ;;  %v20255_v2 = vld [vmem:[#allocation16 + $0x20] ss:$16 sps:$4 sm:$0xff]  }
 0xa09   :  { %13816 = vmatpush1.bf16.msra.mxu1 %v20201_v58  ;;  %13962 = vmatpush1.bf16.msra.mxu0 %v20204_v56  ;;  %v20258_v58 = vld [vmem:[#allocation16 + $0x28] ss:$16 sps:$4 sm:$0xff]   ;;  %v20263_v56 = vld [vmem:[#allocation16 + $0x44] ss:$16 sps:$4 sm:$0xff]  }
 0xa0a   :  { %13817 = vmatprep.subr.bf16.mxu1 %v20209_v32  ;;  %13963 = vmatprep.subr.bf16.mxu0 %v20212_v14  ;;  %v20266_v32 = vld [vmem:[#allocation16 + $0x4c] ss:$16 sps:$4 sm:$0xff]   ;;  %v20261_v14 = vld [vmem:[#allocation16 + $0x40] ss:$16 sps:$4 sm:$0xff]  }
 0xa0d   :  { %13818 = vmatpush1.bf16.msra.mxu1 %v20207_v35  ;;  %13964 = vmatpush1.bf16.msra.mxu0 %v20210_v28  ;;  %v20264_v35 = vld [vmem:[#allocation16 + $0x48] ss:$16 sps:$4 sm:$0xff]   ;;  %v20269_v28 = vld [vmem:[#allocation16 + $0x64] ss:$16 sps:$4 sm:$0xff]  }
 0xa0e   :  { %13819 = vmatprep.subr.bf16.mxu1 %v20215_v48  ;;  %13965 = vmatprep.subr.bf16.mxu0 %v20218_v60  ;;  %v20270_v48 = vld [vmem:[#allocation16 + $0x68] ss:$16 sps:$4 sm:$0xff]   ;;  %v20275_v60 = vld [vmem:[#allocation16 + $0x84] ss:$16 sps:$4 sm:$0xff]  }
 0xa11   :  { %13820 = vmatpush1.bf16.msra.mxu1 %v20213_v47  ;;  %13966 = vmatpush1.bf16.msra.mxu0 %v20216_v0  ;;  %v20278_v47 = vld [vmem:[#allocation16 + $0x8c] ss:$16 sps:$4 sm:$0xff]   ;;  %v20273_v0 = vld [vmem:[#allocation16 + $0x80] ss:$16 sps:$4 sm:$0xff]  }
 0xa12   :  { %13821 = vmatprep.subr.bf16.mxu1 %v20221_v33  ;;  %13967 = vmatprep.subr.bf16.mxu0 %v20224_v31  ;;  %v20276_v33 = vld [vmem:[#allocation16 + $0x88] ss:$16 sps:$4 sm:$0xff]   ;;  %v20281_v31 = vld [vmem:[#allocation16 + $0xa4] ss:$16 sps:$4 sm:$0xff]  }
 0xa15   :  { %13822 = vmatpush1.bf16.msra.mxu1 %v20219_v38  ;;  %13968 = vmatpush1.bf16.msra.mxu0 %v20222_v34  ;;  %v20282_v38 = vld [vmem:[#allocation16 + $0xa8] ss:$16 sps:$4 sm:$0xff]   ;;  %v20287_v34 = vld [vmem:[#allocation16 + $0xc4] ss:$16 sps:$4 sm:$0xff]  }
 0xa16   :  { %13823 = vmatprep.subr.bf16.mxu1 %v20227_v27  ;;  %13969 = vmatprep.subr.bf16.mxu0 %v20230_v46  ;;  %v20290_v27 = vld [vmem:[#allocation16 + $0xcc] ss:$16 sps:$4 sm:$0xff]   ;;  %v20285_v46 = vld [vmem:[#allocation16 + $0xc0] ss:$16 sps:$4 sm:$0xff]  }
 0xa19   :  { %13824 = vmatpush1.bf16.msra.mxu1 %v20225_v53  ;;  %13970 = vmatpush1.bf16.msra.mxu0 %v20228_v29  ;;  %v20288_v53 = vld [vmem:[#allocation16 + $0xc8] ss:$16 sps:$4 sm:$0xff]   ;;  %v20293_v29 = vld [vmem:[#allocation16 + $0xe4] ss:$16 sps:$4 sm:$0xff]  }
 0xa1a   :  { %13825 = vmatprep.subr.bf16.mxu1 %v20233_v50  ;;  %13971 = vmatprep.subr.bf16.mxu0 %v20236_v26  ;;  %v20294_v50 = vld [vmem:[#allocation16 + $0xe8] ss:$16 sps:$4 sm:$0xff]   ;;  %v20299_v26 = vld [vmem:[#allocation16 + $0x104] ss:$16 sps:$4 sm:$0xff]  }
 0xa1d   :  { %13826 = vmatpush1.bf16.msra.mxu1 %v20231_v42  ;;  %13972 = vmatpush1.bf16.msra.mxu0 %v20234_v10  ;;  %v20302_v42 = vld [vmem:[#allocation16 + $0x10c] ss:$16 sps:$4 sm:$0xff]   ;;  %v20297_v10 = vld [vmem:[#allocation16 + $0x100] ss:$16 sps:$4 sm:$0xff]  }
 0xa1e   :  { %13827 = vmatprep.subr.bf16.mxu1 %v20239_v16  ;;  %13973 = vmatprep.subr.bf16.mxu0 %v20242_v51  ;;  %v20300_v16 = vld [vmem:[#allocation16 + $0x108] ss:$16 sps:$4 sm:$0xff]   ;;  %v20305_v51 = vld [vmem:[#allocation16 + $0x124] ss:$16 sps:$4 sm:$0xff]  }
 0xa21   :  { %13828 = vmatpush1.bf16.msra.mxu1 %v20237_v9  ;;  %13974 = vmatpush1.bf16.msra.mxu0 %v20240_v45  ;;  %v20303_v9 = vld [vmem:[#allocation16 + $0x120] ss:$16 sps:$4 sm:$0xff]   ;;  %v20311_v45 = vld [vmem:[#allocation16 + $0x144] ss:$16 sps:$4 sm:$0xff]  }
 0xa22   :  { %13829 = vmatprep.subr.bf16.mxu1 %v20245_v8  ;;  %13975 = vmatprep.subr.bf16.mxu0 %v20248_v57  ;;  %v20314_v8 = vld [vmem:[#allocation16 + $0x14c] ss:$16 sps:$4 sm:$0xff]   ;;  %v20309_v57 = vld [vmem:[#allocation16 + $0x140] ss:$16 sps:$4 sm:$0xff]  }
 0xa25   :  { %13830 = vmatpush1.bf16.msra.mxu1 %v20243_v23  ;;  %13976 = vmatpush1.bf16.msra.mxu0 %v20246_v59  ;;  %v20312_v23 = vld [vmem:[#allocation16 + $0x148] ss:$16 sps:$4 sm:$0xff]   ;;  %v20317_v59 = vld [vmem:[#allocation16 + $0x164] ss:$16 sps:$4 sm:$0xff]  }
 0xa26   :  { %14658 = vmatprep.subr.bf16.mxu1 %v20251_v49  ;;  %14804 = vmatprep.subr.bf16.mxu0 %v20254_v25  ;;  %v20320_v49 = vld [vmem:[#allocation16 + $0x16c] ss:$16 sps:$4 sm:$0xff]   ;;  %v20315_v25 = vld [vmem:[#allocation16 + $0x160] ss:$16 sps:$4 sm:$0xff]  }
 0xa28   :  { %13832 = vmatmul.mubr.bf16.vlgmr.msra.gmra.mrb[128].mxu1 %v23850_v19  ;;  %13978 = vmatmul.mubr.bf16.vlgmr.msra.gmra.mrb[144].mxu0 %v23850_v19  ;;  %v20272_v19 = vld [vmem:[#allocation16 + $0x6c] ss:$16 sps:$4 sm:$0xff]  }
 0xa29   :  { %13841 = vmatprep.mubr.bf16.mxu1 %v23864_v4  ;;  %13987 = vmatprep.mubr.bf16.mxu0 %v23864_v4  ;;  %v20267_v4 = vld [vmem:[#allocation16 + $0x60] ss:$16 sps:$4 sm:$0xff]  }
 0xa2a   :  { %14659 = vmatpush1.bf16.msra.mxu1 %v20249_v15  ;;  %14805 = vmatpush1.bf16.msra.mxu0 %v20252_v22  ;;  %v20318_v15 = vld [vmem:[#allocation16 + $0x168] ss:$16 sps:$4 sm:$0xff]   ;;  %v20323_v22 = vld [vmem:[#allocation16 + $0x184] ss:$16 sps:$4 sm:$0xff]  }
 0xa2b   :  { %14660 = vmatprep.subr.bf16.mxu1 %v20257_v7  ;;  %14806 = vmatprep.subr.bf16.mxu0 %v20260_v61  ;;  %v20326_v7 = vld [vmem:[#allocation16 + $0x18c] ss:$16 sps:$4 sm:$0xff]   ;;  %v20321_v61 = vld [vmem:[#allocation16 + $0x180] ss:$16 sps:$4 sm:$0xff]  }
 0xa2e   :  { %14661 = vmatpush1.bf16.msra.mxu1 %v20255_v2  ;;  %14807 = vmatpush1.bf16.msra.mxu0 %v20258_v58  ;;  %v20324_v2 = vld [vmem:[#allocation16 + $0x188] ss:$16 sps:$4 sm:$0xff]   ;;  %v20329_v58 = vld [vmem:[#allocation16 + $0x1a4] ss:$16 sps:$4 sm:$0xff]  }
 0xa2f   :  { %14662 = vmatprep.subr.bf16.mxu1 %v20263_v56  ;;  %14808 = vmatprep.subr.bf16.mxu0 %v20266_v32  ;;  %v20332_v56 = vld [vmem:[#allocation16 + $0x1ac] ss:$16 sps:$4 sm:$0xff]   ;;  %v20327_v32 = vld [vmem:[#allocation16 + $0x1a0] ss:$16 sps:$4 sm:$0xff]  }
 0xa30   :  { %13842 = vmatmul.mubr.bf16.gmra.mrb[132].mxu1 %v23862_v36  ;;  %13988 = vmatmul.mubr.bf16.gmra.mrb[148].mxu0 %v23862_v36  ;;  %v20284_v36 = vld [vmem:[#allocation16 + $0xac] ss:$16 sps:$4 sm:$0xff]  }
 0xa31   :  { %13851 = vmatprep.mubr.bf16.mxu1 %v23876_v41  ;;  %13997 = vmatprep.mubr.bf16.mxu0 %v23876_v41  ;;  %v20279_v41 = vld [vmem:[#allocation16 + $0xa0] ss:$16 sps:$4 sm:$0xff]  }
 0xa32   :  { %14663 = vmatpush1.bf16.msra.mxu1 %v20261_v14  ;;  %14809 = vmatpush1.bf16.msra.mxu0 %v20264_v35  ;;  %v20330_v14 = vld [vmem:[#allocation16 + $0x1a8] ss:$16 sps:$4 sm:$0xff]   ;;  %v20335_v35 = vld [vmem:[#allocation16 + $0x1c4] ss:$16 sps:$4 sm:$0xff]  }
 0xa33   :  { %14664 = vmatprep.subr.bf16.mxu1 %v20269_v28  ;;  %14810 = vmatprep.subr.bf16.mxu0 %v20272_v19  ;;  %v20338_v28 = vld [vmem:[#allocation16 + $0x1cc] ss:$16 sps:$4 sm:$0xff]   ;;  %v20333_v19 = vld [vmem:[#allocation16 + $0x1c0] ss:$16 sps:$4 sm:$0xff]  }
 0xa36   :  { %14665 = vmatpush1.bf16.msra.mxu1 %v20267_v4  ;;  %14811 = vmatpush1.bf16.msra.mxu0 %v20270_v48  ;;  %v20336_v4 = vld [vmem:[#allocation16 + $0x1c8] ss:$16 sps:$4 sm:$0xff]   ;;  %v20341_v48 = vld [vmem:[#allocation16 + $0x1e4] ss:$16 sps:$4 sm:$0xff]  }
 0xa37   :  { %14666 = vmatprep.subr.bf16.mxu1 %v20275_v60  ;;  %14812 = vmatprep.subr.bf16.mxu0 %v20278_v47  ;;  %v20344_v60 = vld [vmem:[#allocation16 + $0x1ec] ss:$16 sps:$4 sm:$0xff]   ;;  %v20339_v47 = vld [vmem:[#allocation16 + $0x1e0] ss:$16 sps:$4 sm:$0xff]  }
 0xa38   :  { %13852 = vmatmul.mubr.bf16.gmra.mrb[136].mxu1 %v23874_v30  ;;  %13998 = vmatmul.mubr.bf16.gmra.mrb[152].mxu0 %v23874_v30  ;;  %v20296_v30 = vld [vmem:[#allocation16 + $0xec] ss:$16 sps:$4 sm:$0xff]  }
 0xa39   :  { %13861 = vmatprep.mubr.bf16.mxu1 %v23888_v5  ;;  %14007 = vmatprep.mubr.bf16.mxu0 %v23888_v5  ;;  %v20291_v5 = vld [vmem:[#allocation16 + $0xe0] ss:$16 sps:$4 sm:$0xff]  }
 0xa3a   :  { %14667 = vmatpush1.bf16.msra.mxu1 %v20273_v0  ;;  %14813 = vmatpush1.bf16.msra.mxu0 %v20276_v33  ;;  %v20342_v0 = vld [vmem:[#allocation16 + $0x1e8] ss:$16 sps:$4 sm:$0xff]   ;;  %v20347_v33 = vld [vmem:[#allocation16 + $0x204] ss:$16 sps:$4 sm:$0xff]  }
 0xa3b   :  { %14668 = vmatprep.subr.bf16.mxu1 %v20281_v31  ;;  %14814 = vmatprep.subr.bf16.mxu0 %v20284_v36  ;;  %v20350_v31 = vld [vmem:[#allocation16 + $0x20c] ss:$16 sps:$4 sm:$0xff]   ;;  %v20345_v36 = vld [vmem:[#allocation16 + $0x200] ss:$16 sps:$4 sm:$0xff]  }
 0xa3e   :  { %14669 = vmatpush1.bf16.msra.mxu1 %v20279_v41  ;;  %14815 = vmatpush1.bf16.msra.mxu0 %v20282_v38  ;;  %v20348_v41 = vld [vmem:[#allocation16 + $0x208] ss:$16 sps:$4 sm:$0xff]   ;;  %v20353_v38 = vld [vmem:[#allocation16 + $0x224] ss:$16 sps:$4 sm:$0xff]  }
 0xa3f   :  { %14670 = vmatprep.subr.bf16.mxu1 %v20287_v34  ;;  %14816 = vmatprep.subr.bf16.mxu0 %v20290_v27  ;;  %v20356_v34 = vld [vmem:[#allocation16 + $0x22c] ss:$16 sps:$4 sm:$0xff]   ;;  %v20351_v27 = vld [vmem:[#allocation16 + $0x220] ss:$16 sps:$4 sm:$0xff]  }
 0xa40   :  { %13862 = vmatmul.mubr.bf16.gmra.mrb[140].mxu1 %v23886_v17  ;;  %14008 = vmatmul.mubr.bf16.gmra.mrb[156].mxu0 %v23886_v17  ;;  %v20308_v17 = vld [vmem:[#allocation16 + $0x12c] ss:$16 sps:$4 sm:$0xff]  }
 0xa41   :  { %14690 = vmatprep.mubr.bf16.mxu1 %v23630_v63  ;;  %14836 = vmatprep.mubr.bf16.mxu0 %v23630_v63  ;;  %v20306_v63 = vld [vmem:[#allocation16 + $0x128] ss:$16 sps:$4 sm:$0xff]  }
 0xa42   :  { %14671 = vmatpush1.bf16.msra.mxu1 %v20285_v46  ;;  %14817 = vmatpush1.bf16.msra.mxu0 %v20288_v53  ;;  %v20354_v46 = vld [vmem:[#allocation16 + $0x228] ss:$16 sps:$4 sm:$0xff]   ;;  %v20359_v53 = vld [vmem:[#allocation16 + $0x244] ss:$16 sps:$4 sm:$0xff]  }
 0xa43   :  { %14672 = vmatprep.subr.bf16.mxu1 %v20293_v29  ;;  %14818 = vmatprep.subr.bf16.mxu0 %v20296_v30  ;;  %v20362_v29 = vld [vmem:[#allocation16 + $0x24c] ss:$16 sps:$4 sm:$0xff]   ;;  %v20357_v30 = vld [vmem:[#allocation16 + $0x240] ss:$16 sps:$4 sm:$0xff]  }
 0xa46   :  { %14673 = vmatpush1.bf16.msra.mxu1 %v20291_v5  ;;  %14819 = vmatpush1.bf16.msra.mxu0 %v20294_v50  ;;  %v20360_v5 = vld [vmem:[#allocation16 + $0x248] ss:$16 sps:$4 sm:$0xff]   ;;  %v20365_v50 = vld [vmem:[#allocation16 + $0x264] ss:$16 sps:$4 sm:$0xff]  }
 0xa47   :  { %14674 = vmatprep.subr.bf16.mxu1 %v20299_v26  ;;  %14820 = vmatprep.subr.bf16.mxu0 %v20302_v42  ;;  %v20366_v26 = vld [vmem:[#allocation16 + $0x268] ss:$16 sps:$4 sm:$0xff]   ;;  %v20371_v42 = vld [vmem:[#allocation16 + $0x284] ss:$16 sps:$4 sm:$0xff]  }
 0xa4a   :  { %14675 = vmatpush1.bf16.msra.mxu1 %v20297_v10  ;;  %14821 = vmatpush1.bf16.msra.mxu0 %v20300_v16  ;;  %v20374_v10 = vld [vmem:[#allocation16 + $0x28c] ss:$16 sps:$4 sm:$0xff]   ;;  %v20369_v16 = vld [vmem:[#allocation16 + $0x280] ss:$16 sps:$4 sm:$0xff]  }
 0xa4b   :  { %14676 = vmatprep.subr.bf16.mxu1 %v20305_v51  ;;  %14822 = vmatprep.subr.bf16.mxu0 %v20308_v17  ;;  %v20372_v51 = vld [vmem:[#allocation16 + $0x288] ss:$16 sps:$4 sm:$0xff]   ;;  %v20377_v17 = vld [vmem:[#allocation16 + $0x2a4] ss:$16 sps:$4 sm:$0xff]  }
 0xa4e   :  { %14677 = vmatpush1.bf16.msra.mxu1 %v20303_v9  ;;  %14823 = vmatpush1.bf16.msra.mxu0 %v20306_v63  ;;  %v20378_v9 = vld [vmem:[#allocation16 + $0x2a8] ss:$16 sps:$4 sm:$0xff]   ;;  %v20383_v63 = vld [vmem:[#allocation16 + $0x2c4] ss:$16 sps:$4 sm:$0xff]  }
 0xa4f   :  { %14678 = vmatprep.subr.bf16.mxu1 %v20311_v45  ;;  %14824 = vmatprep.subr.bf16.mxu0 %v20314_v8  ;;  %v20386_v45 = vld [vmem:[#allocation16 + $0x2cc] ss:$16 sps:$4 sm:$0xff]   ;;  %v20381_v8 = vld [vmem:[#allocation16 + $0x2c0] ss:$16 sps:$4 sm:$0xff]  }
 0xa52   :  { %14679 = vmatpush1.bf16.msra.mxu1 %v20309_v57  ;;  %14825 = vmatpush1.bf16.msra.mxu0 %v20312_v23  ;;  %v20384_v57 = vld [vmem:[#allocation16 + $0x2c8] ss:$16 sps:$4 sm:$0xff]   ;;  %v20389_v23 = vld [vmem:[#allocation16 + $0x2e4] ss:$16 sps:$4 sm:$0xff]  }
 0xa53   :  { %14680 = vmatprep.subr.bf16.mxu1 %v20317_v59  ;;  %14826 = vmatprep.subr.bf16.mxu0 %v20320_v49  ;;  %v20390_v59 = vld [vmem:[#allocation16 + $0x2e8] ss:$16 sps:$4 sm:$0xff]   ;;  %v20395_v49 = vld [vmem:[#allocation16 + $0x304] ss:$16 sps:$4 sm:$0xff]  }
 0xa56   :  { %14681 = vmatpush1.bf16.msra.mxu1 %v20315_v25  ;;  %14827 = vmatpush1.bf16.msra.mxu0 %v20318_v15  ;;  %v20398_v25 = vld [vmem:[#allocation16 + $0x30c] ss:$16 sps:$4 sm:$0xff]   ;;  %v20393_v15 = vld [vmem:[#allocation16 + $0x300] ss:$16 sps:$4 sm:$0xff]  }
 0xa57   :  { %14682 = vmatprep.subr.bf16.mxu1 %v20323_v22  ;;  %14828 = vmatprep.subr.bf16.mxu0 %v20326_v7  ;;  %v20396_v22 = vld [vmem:[#allocation16 + $0x308] ss:$16 sps:$4 sm:$0xff]   ;;  %v20401_v7 = vld [vmem:[#allocation16 + $0x324] ss:$16 sps:$4 sm:$0xff]  }
 0xa5a   :  { %14683 = vmatpush1.bf16.msra.mxu1 %v20321_v61  ;;  %14829 = vmatpush1.bf16.msra.mxu0 %v20324_v2  ;;  %v20399_v61 = vld [vmem:[#allocation16 + $0x320] ss:$16 sps:$4 sm:$0xff]   ;;  %v20402_v2 = vld [vmem:[#allocation16 + $0x328] ss:$16 sps:$4 sm:$0xff]  }
 0xa5b   :  { %14684 = vmatprep.subr.bf16.mxu1 %v20329_v58  ;;  %14830 = vmatprep.subr.bf16.mxu0 %v20332_v56  ;;  %v20407_v58 = vld [vmem:[#allocation16 + $0x344] ss:$16 sps:$4 sm:$0xff]   ;;  %v20405_v56 = vld [vmem:[#allocation16 + $0x340] ss:$16 sps:$4 sm:$0xff]  }
 0xa5e   :  { %14685 = vmatpush1.bf16.msra.mxu1 %v20327_v32  ;;  %14831 = vmatpush1.bf16.msra.mxu0 %v20330_v14  ;;  %v20408_v32 = vld [vmem:[#allocation16 + $0x348] ss:$16 sps:$4 sm:$0xff]   ;;  %v20413_v14 = vld [vmem:[#allocation16 + $0x364] ss:$16 sps:$4 sm:$0xff]  }
 0xa5f   :  { %14686 = vmatprep.subr.bf16.mxu1 %v20335_v35  ;;  %14832 = vmatprep.subr.bf16.mxu0 %v20338_v28  ;;  %v20416_v35 = vld [vmem:[#allocation16 + $0x36c] ss:$16 sps:$4 sm:$0xff]   ;;  %v20411_v28 = vld [vmem:[#allocation16 + $0x360] ss:$16 sps:$4 sm:$0xff]  }
 0xa62   :  { %14687 = vmatpush1.bf16.msra.mxu1 %v20333_v19  ;;  %14833 = vmatpush1.bf16.msra.mxu0 %v20336_v4  ;;  %v20414_v19 = vld [vmem:[#allocation16 + $0x368] ss:$16 sps:$4 sm:$0xff]   ;;  %v20419_v4 = vld [vmem:[#allocation16 + $0x384] ss:$16 sps:$4 sm:$0xff]  }
 0xa63   :  { %14688 = vmatprep.subr.bf16.mxu1 %v20341_v48  ;;  %14834 = vmatprep.subr.bf16.mxu0 %v20344_v60  ;;  %v20422_v48 = vld [vmem:[#allocation16 + $0x38c] ss:$16 sps:$4 sm:$0xff]   ;;  %v20417_v60 = vld [vmem:[#allocation16 + $0x380] ss:$16 sps:$4 sm:$0xff]  }
 0xa66   :  { %14689 = vmatpush1.bf16.msra.mxu1 %v20339_v47  ;;  %14835 = vmatpush1.bf16.msra.mxu0 %v20342_v0  ;;  %v20420_v47 = vld [vmem:[#allocation16 + $0x388] ss:$16 sps:$4 sm:$0xff]   ;;  %v20425_v0 = vld [vmem:[#allocation16 + $0x3a4] ss:$16 sps:$4 sm:$0xff]  }
 0xa67   :  { %14731 = vmatprep.subr.bf16.mxu1 %v20347_v33  ;;  %14877 = vmatprep.subr.bf16.mxu0 %v20350_v31  ;;  %v20428_v33 = vld [vmem:[#allocation16 + $0x3ac] ss:$16 sps:$4 sm:$0xff]   ;;  %v20423_v31 = vld [vmem:[#allocation16 + $0x3a0] ss:$16 sps:$4 sm:$0xff]  }
 0xa69   :  { %14691 = vmatmul.mubr.bf16.vlgmr.msra.gmra.mrb[128].mxu1 %v23626_v62  ;;  %14837 = vmatmul.mubr.bf16.vlgmr.msra.gmra.mrb[144].mxu0 %v23626_v62  ;;  %v20368_v62 = vld [vmem:[#allocation16 + $0x26c] ss:$16 sps:$4 sm:$0xff]  }
 0xa6a   :  { %14700 = vmatprep.mubr.bf16.mxu1 %v23646_v54  ;;  %14732 = vmatpush1.bf16.msra.mxu1 %v20345_v36  ;;  %v20426_v36 = vld [vmem:[#allocation16 + $0x3a8] ss:$16 sps:$4 sm:$0xff]  }
 0xa6b   :  { %14846 = vmatprep.mubr.bf16.mxu0 %v23646_v54  ;;  %14878 = vmatpush1.bf16.msra.mxu0 %v20348_v41  ;;  %v20363_v54 = vld [vmem:[#allocation16 + $0x260] ss:$16 sps:$4 sm:$0xff]   ;;  %v20431_v41 = vld [vmem:[#allocation16 + $0x3c4] ss:$16 sps:$4 sm:$0xff]  }
 0xa6c   :  { %14733 = vmatprep.subr.bf16.mxu1 %v20353_v38  ;;  %14879 = vmatprep.subr.bf16.mxu0 %v20356_v34  ;;  %v20434_v38 = vld [vmem:[#allocation16 + $0x3cc] ss:$16 sps:$4 sm:$0xff]   ;;  %v20429_v34 = vld [vmem:[#allocation16 + $0x3c0] ss:$16 sps:$4 sm:$0xff]  }
 0xa6e   :  { %14734 = vmatpush1.bf16.msra.mxu1 %v20351_v27  ;;  %v20432_v27 = vld [vmem:[#allocation16 + $0x3c8] ss:$16 sps:$4 sm:$0xff]  }
 0xa6f   :  { %14880 = vmatpush1.bf16.msra.mxu0 %v20354_v46  ;;  %14735 = vmatprep.subr.bf16.mxu1 %v20359_v53  ;;  %v20437_v46 = vld [vmem:[#allocation16 + $0x3e4] ss:$16 sps:$4 sm:$0xff]   ;;  %v20440_v53 = vld [vmem:[#allocation16 + $0x3ec] ss:$16 sps:$4 sm:$0xff]  }
 0xa70   :  { %14881 = vmatprep.subr.bf16.mxu0 %v20362_v29  ;;  %v20435_v29 = vld [vmem:[#allocation16 + $0x3e0] ss:$16 sps:$4 sm:$0xff]  }
 0xa71   :  { %14701 = vmatmul.mubr.bf16.gmra.mrb[132].mxu1 %v23642_v18  ;;  %14847 = vmatmul.mubr.bf16.gmra.mrb[148].mxu0 %v23642_v18  ;;  %v20380_v18 = vld [vmem:[#allocation16 + $0x2ac] ss:$16 sps:$4 sm:$0xff]  }
 0xa72   :  { %14710 = vmatprep.mubr.bf16.mxu1 %v23662_v1  ;;  %14736 = vmatpush1.bf16.msra.mxu1 %v20357_v30  ;;  %v20438_v30 = vld [vmem:[#allocation16 + $0x3e8] ss:$16 sps:$4 sm:$0xff]  }
 0xa73   :  { %14856 = vmatprep.mubr.bf16.mxu0 %v23662_v1  ;;  %14882 = vmatpush1.bf16.msra.mxu0 %v20360_v5  ;;  %v20375_v1 = vld [vmem:[#allocation16 + $0x2a0] ss:$16 sps:$4 sm:$0xff]   ;;  %v20441_v5 = vld [vmem:[#allocation21 + $0x40] sm:$0xff]  }
 0xa74   :  { %14737 = vmatprep.subr.bf16.mxu1 %v20365_v50  ;;  %14883 = vmatprep.subr.bf16.mxu0 %v20368_v62  ;;  %v20442_v50 = vld [vmem:[#allocation21] sm:$0xff]   ;;  %v20443_v62 = vld [vmem:[#allocation21 + $0x48] sm:$0xff]  }
 0xa76   :  { %14738 = vmatpush1.bf16.msra.mxu1 %v20363_v54  ;;  %v20444_v54 = vld [vmem:[#allocation21 + $0x8] sm:$0xff]  }
 0xa77   :  { %14884 = vmatpush1.bf16.msra.mxu0 %v20366_v26  ;;  %14739 = vmatprep.subr.bf16.mxu1 %v20371_v42  ;;  %v20445_v26 = vld [vmem:[#allocation21 + $0x50] sm:$0xff]  }
 0xa78   :  { %14885 = vmatprep.subr.bf16.mxu0 %v20374_v10  ;;  %v20446_v42 = vld [vmem:[#allocation21 + $0x10] sm:$0xff]   ;;  %v20447_v10 = vld [vmem:[#allocation21 + $0x58] sm:$0xff]  }
 0xa79   :  { %14711 = vmatmul.mubr.bf16.gmra.mrb[136].mxu1 %v23658_v37  ;;  %14857 = vmatmul.mubr.bf16.gmra.mrb[152].mxu0 %v23658_v37  ;;  %v20392_v37 = vld [vmem:[#allocation16 + $0x2ec] ss:$16 sps:$4 sm:$0xff]  }
 0xa7a   :  { %14720 = vmatprep.mubr.bf16.mxu1 %v23678_v40  ;;  %14740 = vmatpush1.bf16.msra.mxu1 %v20369_v16  ;;  %v20450_v16 = vld [vmem:[#allocation21 + $0x20] sm:$0xff]  }
 0xa7b   :  { %14866 = vmatprep.mubr.bf16.mxu0 %v23678_v40  ;;  %14886 = vmatpush1.bf16.msra.mxu0 %v20372_v51  ;;  %v20387_v40 = vld [vmem:[#allocation16 + $0x2e0] ss:$16 sps:$4 sm:$0xff]  }
 0xa7c   :  { %14741 = vmatprep.subr.bf16.mxu1 %v20377_v17  ;;  %14887 = vmatprep.subr.bf16.mxu0 %v20380_v18  ;;  %v20451_v51 = vld [vmem:[#allocation21 + $0x68] sm:$0xff]   ;;  %v20454_v17 = vld [vmem:[#allocation21 + $0x30] sm:$0xff]   ;;  %v20455_v18 = vld [vmem:[#allocation21 + $0x78] sm:$0xff]  }
 0xa7e   :  { %14742 = vmatpush1.bf16.msra.mxu1 %v20375_v1  ;;  %v20456_v1 = vld [vmem:[#allocation21 + $0x38] sm:$0xff]  }
 0xa7f   :  { %14888 = vmatpush1.bf16.msra.mxu0 %v20378_v9  ;;  %14743 = vmatprep.subr.bf16.mxu1 %v20383_v63  ;;  %v14950_v9 = vld [vmem:[#allocation19] sm:$0xf] }
 0xa80   :  { %14889 = vmatprep.subr.bf16.mxu0 %v20386_v45  ;;  %v23942_v63 = vrot.slane %v14950_v9, %v24269_v11  ;;  %v23945_v45 = vrot.slane %v14950_v9, %v24270_v6 }
 0xa81   :  { %14721 = vmatmul.mubr.bf16.gmra.mrb[140].mxu1 %v23674_v55  ;;  %14867 = vmatmul.mubr.bf16.gmra.mrb[156].mxu0 %v23674_v55  ;;  %v20404_v55 = vld [vmem:[#allocation16 + $0x32c] ss:$16 sps:$4 sm:$0xff]  }
 0xa82   :  { %14744 = vmatpush1.bf16.msra.mxu1 %v20381_v8  ;;  %14763 = vmatprep.mubr.bf16.mxu1 %v23632_v13 }
 0xa83   :  { %14890 = vmatpush1.bf16.msra.mxu0 %v20384_v57  ;;  %14909 = vmatprep.mubr.bf16.mxu0 %v23632_v13  ;;  %v20410_v13 = vld [vmem:[#allocation16 + $0x34c] ss:$16 sps:$4 sm:$0xff]  }
 0xa84   :  { %14745 = vmatprep.subr.bf16.mxu1 %v20389_v23  ;;  %14891 = vmatprep.subr.bf16.mxu0 %v20392_v37 }
 0xa86   :  { %14746 = vmatpush1.bf16.msra.mxu1 %v20387_v40 }
 0xa87   :  { %14892 = vmatpush1.bf16.msra.mxu0 %v20390_v59  ;;  %14747 = vmatprep.subr.bf16.mxu1 %v20395_v49 }
 0xa88   :  { %14893 = vmatprep.subr.bf16.mxu0 %v20398_v25 }
 0xa8a   :  { %14748 = vmatpush1.bf16.msra.mxu1 %v20393_v15 }
 0xa8b   :  { %14894 = vmatpush1.bf16.msra.mxu0 %v20396_v22  ;;  %14749 = vmatprep.subr.bf16.mxu1 %v20401_v7 }
 0xa8c   :  { %14895 = vmatprep.subr.bf16.mxu0 %v20404_v55 }
 0xa8e   :  { %14750 = vmatpush1.bf16.msra.mxu1 %v20399_v61 }
 0xa8f   :  { %14896 = vmatpush1.bf16.msra.mxu0 %v20402_v2  ;;  %14751 = vmatprep.subr.bf16.mxu1 %v20407_v58 }
 0xa90   :  { %14897 = vmatprep.subr.bf16.mxu0 %v20410_v13 }
 0xa92   :  { %14752 = vmatpush1.bf16.msra.mxu1 %v20405_v56 }
 0xa93   :  { %14898 = vmatpush1.bf16.msra.mxu0 %v20408_v32  ;;  %14753 = vmatprep.subr.bf16.mxu1 %v20413_v14 }
 0xa94   :  { %14899 = vmatprep.subr.bf16.mxu0 %v20416_v35 }
 0xa96   :  { %14754 = vmatpush1.bf16.msra.mxu1 %v20411_v28 }
 0xa97   :  { %14900 = vmatpush1.bf16.msra.mxu0 %v20414_v19  ;;  %14755 = vmatprep.subr.bf16.mxu1 %v20419_v4 }
 0xa98   :  { %14901 = vmatprep.subr.bf16.mxu0 %v20422_v48 }
 0xa9a   :  { %14756 = vmatpush1.bf16.msra.mxu1 %v20417_v60  ;;  %v20458_v60 = vld [vmem:[#allocation21 + $0x80] sm:$0xff]  }
 0xa9b   :  { %14902 = vmatpush1.bf16.msra.mxu0 %v20420_v47  ;;  %14757 = vmatprep.subr.bf16.mxu1 %v20425_v0 }
 0xa9c   :  { %14903 = vmatprep.subr.bf16.mxu0 %v20428_v33 }
 0xa9e   :  { %14758 = vmatpush1.bf16.msra.mxu1 %v20423_v31 }
 0xa9f   :  { %14904 = vmatpush1.bf16.msra.mxu0 %v20426_v36  ;;  %14759 = vmatprep.subr.bf16.mxu1 %v20431_v41  ;;  %v20459_v36 = vld [vmem:[#allocation21 + $0xc8] sm:$0xff]  }
 0xaa0   :  { %14905 = vmatprep.subr.bf16.mxu0 %v20434_v38 }
 0xaa2   :  { %14760 = vmatpush1.bf16.msra.mxu1 %v20429_v34 }
 0xaa3   :  { %14906 = vmatpush1.bf16.msra.mxu0 %v20432_v27  ;;  %14761 = vmatprep.subr.bf16.mxu1 %v20437_v46 }
 0xaa4   :  { %14907 = vmatprep.subr.bf16.mxu0 %v20440_v53 }
 0xaa6   :  { %14762 = vmatpush1.bf16.msra.mxu1 %v20435_v29 }
 0xaa7   :  { %14908 = vmatpush1.bf16.msra.mxu0 %v20438_v30  ;;  %17454 = vmatprep.subr.bf16.mxu1 %v20441_v5 }
 0xaa9   :  { %14764 = vmatmul.mubr.bf16.vlgmr.msra.gmra.mrb[128].mxu1 %v23628_v43 }
 0xaaa   :  { %14910 = vmatmul.mubr.bf16.vlgmr.msra.gmra.mrb[144].mxu0 %v23628_v43  ;;  %14773 = vmatprep.mubr.bf16.mxu1 %v23648_v3  ;;  %v20448_v43 = vld [vmem:[#allocation21 + $0x18] sm:$0xff]  }
 0xaab   :  { %14919 = vmatprep.mubr.bf16.mxu0 %v23648_v3  ;;  %17455 = vmatpush3.bf16.msra.mxu1 %v20442_v50  ;;  %v20449_v3 = vld [vmem:[#allocation21 + $0x60] sm:$0xff]  }
 0xaac   :  { %17456 = vmatprep.subr.bf16.mxu1 %v20443_v62 }
 0xaaf   :  { %17457 = vmatpush3.bf16.msra.mxu1 %v20444_v54 }
 0xab0   :  { %17458 = vmatprep.subr.bf16.mxu1 %v20445_v26 }
 0xab1   :  { %14774 = vmatmul.mubr.bf16.gmra.mrb[132].mxu1 %v23644_v39 }
 0xab2   :  { %14920 = vmatmul.mubr.bf16.gmra.mrb[148].mxu0 %v23644_v39  ;;  %14783 = vmatprep.mubr.bf16.mxu1 %v23664_v12  ;;  %v20452_v39 = vld [vmem:[#allocation21 + $0x28] sm:$0xff]  }
 0xab3   :  { %14929 = vmatprep.mubr.bf16.mxu0 %v23664_v12  ;;  %17459 = vmatpush3.bf16.msra.mxu1 %v20446_v42  ;;  %v20453_v12 = vld [vmem:[#allocation21 + $0x70] sm:$0xff]  }
 0xab4   :  { %17460 = vmatprep.subr.bf16.mxu1 %v20447_v10  ;;  %v20460_v10 = vld [vmem:[#allocation21 + $0x88] sm:$0xff]  }
 0xab7   :  { %17461 = vmatpush3.bf16.msra.mxu1 %v20448_v43 }
 0xab8   :  { %17462 = vmatprep.subr.bf16.mxu1 %v20449_v3 }
 0xab9   :  { %14784 = vmatmul.mubr.bf16.gmra.mrb[136].mxu1 %v23660_v52 }
 0xaba   :  { %14930 = vmatmul.mubr.bf16.gmra.mrb[152].mxu0 %v23660_v52  ;;  %14793 = vmatprep.mubr.bf16.mxu1 %v23680_v24  ;;  %v20457_v52 = vld [vmem:[#allocation21 + $0xc0] sm:$0xff]  }
 0xabb   :  { %14939 = vmatprep.mubr.bf16.mxu0 %v23680_v24  ;;  %17463 = vmatpush3.bf16.msra.mxu1 %v20450_v16  ;;  %v23939_v24 = vrot.slane %v14950_v9, %v24268_v20 }
 0xabc   :  { %17464 = vmatprep.subr.bf16.mxu1 %v20451_v51  ;;  %v20461_v51 = vld [vmem:[#allocation21 + $0xd0] sm:$0xff]  }
 0xabf   :  { %17465 = vmatpush3.bf16.msra.mxu1 %v20452_v39 }
 0xac0   :  { %17466 = vmatprep.subr.bf16.mxu1 %v20453_v12 }
 0xac1   :  { %14794 = vmatmul.mubr.bf16.gmra.mrb[140].mxu1 %v23676_v21 }
 0xac2   :  { %14940 = vmatmul.mubr.bf16.gmra.mrb[156].mxu0 %v23676_v21  ;;  %v23948_v21 = vrot.slane %v14950_v9, %v24271_v44 }
 0xac3   :  { %17467 = vmatpush3.bf16.msra.mxu1 %v20454_v17 }
 0xac4   :  { %17468 = vmatprep.subr.bf16.mxu1 %v20455_v18 }
 0xac7   :  { %17469 = vmatpush3.bf16.msra.mxu1 %v20456_v1 }
 0xac8   :  { %17494 = vmatprep.subr.bf16.mxu1 %v20457_v52 }
 0xb7c   :  { %v14765_v8 = vpop.f32.mrb[128].mxu1 }
 0xb7d   :  { %v14972_v57 = vadd.f32 %v23939_v24, %v14765_v8  ;;  %v14911_v23 = vpop.f32.mrb[144].mxu0  ;;  %v14767_v37 = vpop.f32.mrb[129].mxu1  ;;  %v20462_v8 = vld [vmem:[#allocation21 + $0x90] sm:$0xff]  }
 0xb7e   :  { %v14974_v40 = vadd.f32 %v23942_v63, %v14911_v23  ;;  %v14973_v59 = vadd.f32 %v23945_v45, %v14767_v37  ;;  %v14913_v20 = vpop.f32.mrb[145].mxu0  ;;  %v14769_v49 = vpop.f32.mrb[130].mxu1 }
 0xb7f   :  { %v15004_v25 = vmax.f32 %v14972_v57, 0.0  ;;  %v14975_v11 = vadd.f32 %v23948_v21, %v14913_v20  ;;  %v14976_v6 = vadd.f32 %v23939_v24, %v14769_v49  ;;  %v14915_v15 = vpop.f32.mrb[146].mxu0  ;;  %v14771_v22 = vpop.f32.mrb[131].mxu1 }
 0xb80   :  { %v15006_v44 = vmax.f32 %v14974_v40, 0.0  ;;  %v15005_v7 = vmax.f32 %v14973_v59, 0.0  ;;  %v14978_v55 = vadd.f32 %v23942_v63, %v14915_v15  ;;  %v14977_v61 = vadd.f32 %v23945_v45, %v14771_v22  ;;  %v14917_v2 = vpop.f32.mrb[147].mxu0  ;;  %v20463_v59 = vld [vmem:[#allocation21 + $0xd8] sm:$0xff]  }
 0xb81   :  { %15493 = vst [vmem:[%s24134_s17] sm:$0xff] %v15004_v25  ;;  %v15007_v58 = vmax.f32 %v14975_v11, 0.0  ;;  %v15008_v13 = vmax.f32 %v14976_v6, 0.0  ;;  %v14979_v56 = vadd.f32 %v23948_v21, %v14917_v2 }
 0xb82   :  { %15495 = vst [vmem:[%s24134_s17 + $0x10] sm:$0xff] %v15006_v44  ;;  %15494 = vst [vmem:[%s24134_s17 + $0x8] sm:$0xff] %v15005_v7  ;;  %v15010_v32 = vmax.f32 %v14978_v55, 0.0  ;;  %v15009_v14 = vmax.f32 %v14977_v61, 0.0 }
 0xb83   :  { %15496 = vst [vmem:[%s24134_s17 + $0x18] sm:$0xff] %v15007_v58  ;;  %v15036_v35 = vpack.c.bf16 %v15008_v13, %v15004_v25  ;;  %15497 = vst [vmem:[%s24134_s17 + $0x20] sm:$0xff] %v15008_v13  ;;  %v15011_v28 = vmax.f32 %v14979_v56, 0.0  ;;  %v20464_v56 = vld [vmem:[#allocation21 + $0x98] sm:$0xff]  }
 0xb84   :  { %v23973_v19 = vpack.c.bf16 %v15010_v32, %v15006_v44  ;;  %15499 = vst [vmem:[%s24134_s17 + $0x30] sm:$0xff] %v15010_v32  ;;  %v15037_v4 = vpack.c.bf16 %v15009_v14, %v15005_v7  ;;  %15498 = vst [vmem:[%s24134_s17 + $0x28] sm:$0xff] %v15009_v14  ;;  %v14775_v48 = vpop.f32.mrb[132].mxu1 }
 0xb85   :  { %v23981_v47 = vpack.c.bf16 %v15011_v28, %v15007_v58  ;;  %15500 = vst [vmem:[%s24134_s17 + $0x38] sm:$0xff] %v15011_v28  ;;  %v14980_v0 = vadd.f32 %v23939_v24, %v14775_v48  ;;  %v14921_v33 = vpop.f32.mrb[148].mxu0  ;;  %v14777_v31 = vpop.f32.mrb[133].mxu1  ;;  %v20465_v28 = vld [vmem:[#allocation21 + $0xe0] sm:$0xff]  }
 0xb86   :  { %v14982_v41 = vadd.f32 %v23942_v63, %v14921_v33  ;;  %v14981_v38 = vadd.f32 %v23945_v45, %v14777_v31  ;;  %v14923_v34 = vpop.f32.mrb[149].mxu0  ;;  %v14779_v27 = vpop.f32.mrb[134].mxu1  ;;  %15347 = vmatprep.mubr.bf16.mxu1 %v15037_v4 }
 0xb87   :  { %v15012_v46 = vmax.f32 %v14980_v0, 0.0  ;;  %v14983_v53 = vadd.f32 %v23948_v21, %v14923_v34  ;;  %v14984_v29 = vadd.f32 %v23939_v24, %v14779_v27  ;;  %v14925_v30 = vpop.f32.mrb[150].mxu0  ;;  %v14781_v5 = vpop.f32.mrb[135].mxu1  ;;  %15348 = vmatmul.mubr.bf16.vlgmr.msra.gmra.mrb[144].mxu1 %v15036_v35 }
 0xb88   :  { %v15014_v50 = vmax.f32 %v14982_v41, 0.0  ;;  %v15013_v62 = vmax.f32 %v14981_v38, 0.0  ;;  %v14986_v54 = vadd.f32 %v23942_v63, %v14925_v30  ;;  %v14985_v26 = vadd.f32 %v23945_v45, %v14781_v5  ;;  %v14927_v42 = vpop.f32.mrb[151].mxu0  ;;  %17495 = vmatpush3.bf16.msra.mxu1 %v20458_v60  ;;  %v20466_v41 = vld [vmem:[#allocation21 + $0xa0] sm:$0xff]  }
 0xb89   :  { %15501 = vst [vmem:[%s24134_s17 + $0x40] sm:$0xff] %v15012_v46  ;;  %v15015_v43 = vmax.f32 %v14983_v53, 0.0  ;;  %v15016_v3 = vmax.f32 %v14984_v29, 0.0  ;;  %v14987_v16 = vadd.f32 %v23948_v21, %v14927_v42  ;;  %17496 = vmatprep.subr.bf16.mxu1 %v20459_v36  ;;  %v20467_v53 = vld [vmem:[#allocation21 + $0xe8] sm:$0xff]  }
 0xb8a   :  { %15503 = vst [vmem:[%s24134_s17 + $0x50] sm:$0xff] %v15014_v50  ;;  %15502 = vst [vmem:[%s24134_s17 + $0x48] sm:$0xff] %v15013_v62  ;;  %v15018_v39 = vmax.f32 %v14986_v54, 0.0  ;;  %v15017_v12 = vmax.f32 %v14985_v26, 0.0 }
 0xb8b   :  { %15504 = vst [vmem:[%s24134_s17 + $0x58] sm:$0xff] %v15015_v43  ;;  %v15040_v17 = vpack.c.bf16 %v15016_v3, %v15012_v46  ;;  %15505 = vst [vmem:[%s24134_s17 + $0x60] sm:$0xff] %v15016_v3  ;;  %v15019_v18 = vmax.f32 %v14987_v16, 0.0 }
 0xb8c   :  { %v24009_v1 = vpack.c.bf16 %v15018_v39, %v15014_v50  ;;  %15507 = vst [vmem:[%s24134_s17 + $0x70] sm:$0xff] %v15018_v39  ;;  %v15041_v52 = vpack.c.bf16 %v15017_v12, %v15013_v62  ;;  %15506 = vst [vmem:[%s24134_s17 + $0x68] sm:$0xff] %v15017_v12  ;;  %17497 = vmatpush3.bf16.msra.mxu1 %v20460_v10  ;;  %v14785_v9 = vpop.f32.mrb[136].mxu1  ;;  %v20468_v12 = vld [vmem:[#allocation21 + $0xa8] sm:$0xff]  }
 0xb8d   :  { %v24017_v57 = vpack.c.bf16 %v15019_v18, %v15015_v43  ;;  %15508 = vst [vmem:[%s24134_s17 + $0x78] sm:$0xff] %v15019_v18  ;;  %v14988_v23 = vadd.f32 %v23939_v24, %v14785_v9  ;;  %v14931_v37 = vpop.f32.mrb[152].mxu0  ;;  %v14787_v40 = vpop.f32.mrb[137].mxu1  ;;  %17498 = vmatprep.subr.bf16.mxu1 %v20461_v51 }
 0xb8e   :  { %v14990_v20 = vadd.f32 %v23942_v63, %v14931_v37  ;;  %v14989_v49 = vadd.f32 %v23945_v45, %v14787_v40  ;;  %v14933_v25 = vpop.f32.mrb[153].mxu0  ;;  %v14789_v11 = vpop.f32.mrb[138].mxu1  ;;  %15355 = vmatprep.mubr.bf16.mxu1 %v15041_v52  ;;  %v20469_v52 = vld [vmem:[#allocation21 + $0xf0] sm:$0xff]  }
 0xb8f   :  { %v15020_v6 = vmax.f32 %v14988_v23, 0.0  ;;  %v14991_v15 = vadd.f32 %v23948_v21, %v14933_v25  ;;  %v14992_v22 = vadd.f32 %v23939_v24, %v14789_v11  ;;  %v14935_v44 = vpop.f32.mrb[154].mxu0  ;;  %v14791_v7 = vpop.f32.mrb[139].mxu1  ;;  %15356 = vmatmul.mubr.bf16.gmra.mrb[148].mxu1 %v15040_v17  ;;  %v20470_v37 = vld [vmem:[#allocation21 + $0xb0] sm:$0xff]  }
 0xb90   :  { %v15022_v55 = vmax.f32 %v14990_v20, 0.0  ;;  %v15021_v61 = vmax.f32 %v14989_v49, 0.0  ;;  %v14994_v2 = vadd.f32 %v23942_v63, %v14935_v44  ;;  %v14993_v58 = vadd.f32 %v23945_v45, %v14791_v7  ;;  %v14937_v13 = vpop.f32.mrb[155].mxu0  ;;  %17499 = vmatpush3.bf16.msra.mxu1 %v20462_v8  ;;  %v20472_v20 = vld [vmem:[#allocation21 + $0xb8] sm:$0xff]  }
 0xb91   :  { %15509 = vst [vmem:[%s24134_s17 + $0x80] sm:$0xff] %v15020_v6  ;;  %v15023_v32 = vmax.f32 %v14991_v15, 0.0  ;;  %v15024_v14 = vmax.f32 %v14992_v22, 0.0  ;;  %v14995_v35 = vadd.f32 %v23948_v21, %v14937_v13  ;;  %17500 = vmatprep.subr.bf16.mxu1 %v20463_v59  ;;  %v20471_v59 = vld [vmem:[#allocation21 + $0xf8] sm:$0xff]  }
 0xb92   :  { %15511 = vst [vmem:[%s24134_s17 + $0x90] sm:$0xff] %v15022_v55  ;;  %15510 = vst [vmem:[%s24134_s17 + $0x88] sm:$0xff] %v15021_v61  ;;  %v15026_v4 = vmax.f32 %v14994_v2, 0.0  ;;  %v15025_v48 = vmax.f32 %v14993_v58, 0.0 }
 0xb93   :  { %15512 = vst [vmem:[%s24134_s17 + $0x98] sm:$0xff] %v15023_v32  ;;  %v15044_v60 = vpack.c.bf16 %v15024_v14, %v15020_v6  ;;  %15513 = vst [vmem:[%s24134_s17 + $0xa0] sm:$0xff] %v15024_v14  ;;  %v15027_v0 = vmax.f32 %v14995_v35, 0.0 }
 0xb94   :  { %v24045_v33 = vpack.c.bf16 %v15026_v4, %v15022_v55  ;;  %15515 = vst [vmem:[%s24134_s17 + $0xb0] sm:$0xff] %v15026_v4  ;;  %v15045_v31 = vpack.c.bf16 %v15025_v48, %v15021_v61  ;;  %15514 = vst [vmem:[%s24134_s17 + $0xa8] sm:$0xff] %v15025_v48  ;;  %17501 = vmatpush3.bf16.msra.mxu1 %v20464_v56  ;;  %v14795_v36 = vpop.f32.mrb[140].mxu1 }
 0xb95   :  { %v15047_v38 = vpack.c.bf16 %v15027_v0, %v15023_v32  ;;  %15516 = vst [vmem:[%s24134_s17 + $0xb8] sm:$0xff] %v15027_v0  ;;  %v14996_v34 = vadd.f32 %v23939_v24, %v14795_v36  ;;  %v14941_v27 = vpop.f32.mrb[156].mxu0  ;;  %v14797_v46 = vpop.f32.mrb[141].mxu1  ;;  %17502 = vmatprep.subr.bf16.mxu1 %v20465_v28 }
 0xb96   :  { %v14998_v29 = vadd.f32 %v23942_v63, %v14941_v27  ;;  %v14997_v30 = vadd.f32 %v23945_v45, %v14797_v46  ;;  %v14943_v5 = vpop.f32.mrb[157].mxu0  ;;  %v14799_v50 = vpop.f32.mrb[142].mxu1  ;;  %15363 = vmatprep.mubr.bf16.mxu1 %v15045_v31 }
 0xb97   :  { %v15028_v62 = vmax.f32 %v14996_v34, 0.0  ;;  %v14999_v54 = vadd.f32 %v23948_v21, %v14943_v5  ;;  %v15000_v26 = vadd.f32 %v23939_v24, %v14799_v50  ;;  %v14945_v42 = vpop.f32.mrb[158].mxu0  ;;  %v14801_v10 = vpop.f32.mrb[143].mxu1  ;;  %15364 = vmatmul.mubr.bf16.gmra.mrb[152].mxu1 %v15044_v60  ;;  %v17413_v60 = vld [vmem:[#allocation22] ss:$0 sm:$0xff] }
 0xb98   :  { %v15030_v43 = vmax.f32 %v14998_v29, 0.0  ;;  %v15029_v3 = vmax.f32 %v14997_v30, 0.0  ;;  %v15002_v16 = vadd.f32 %v23942_v63, %v14945_v42  ;;  %v15001_v51 = vadd.f32 %v23945_v45, %v14801_v10  ;;  %v14947_v39 = vpop.f32.mrb[159].mxu0  ;;  %17503 = vmatpush3.bf16.msra.mxu1 %v20466_v41 }
 0xb99   :  { %15517 = vst [vmem:[%s24134_s17 + $0xc0] sm:$0xff] %v15028_v62  ;;  %v15031_v17 = vmax.f32 %v14999_v54, 0.0  ;;  %v15032_v18 = vmax.f32 %v15000_v26, 0.0  ;;  %v15003_v24 = vadd.f32 %v23948_v21, %v14947_v39  ;;  %17504 = vmatprep.subr.bf16.mxu1 %v20467_v53 }
 0xb9a   :  { %15519 = vst [vmem:[%s24134_s17 + $0xd0] sm:$0xff] %v15030_v43  ;;  %15518 = vst [vmem:[%s24134_s17 + $0xc8] sm:$0xff] %v15029_v3  ;;  %v15034_v63 = vmax.f32 %v15002_v16, 0.0  ;;  %v15033_v45 = vmax.f32 %v15001_v51, 0.0 }
 0xb9b   :  { %15520 = vst [vmem:[%s24134_s17 + $0xd8] sm:$0xff] %v15031_v17  ;;  %v15048_v9 = vpack.c.bf16 %v15032_v18, %v15028_v62  ;;  %15521 = vst [vmem:[%s24134_s17 + $0xe0] sm:$0xff] %v15032_v18  ;;  %v15035_v21 = vmax.f32 %v15003_v24, 0.0 }
 0xb9c   :  { %v15050_v8 = vpack.c.bf16 %v15034_v63, %v15030_v43  ;;  %15523 = vst [vmem:[%s24134_s17 + $0xf0] sm:$0xff] %v15034_v63  ;;  %v15049_v23 = vpack.c.bf16 %v15033_v45, %v15029_v3  ;;  %15522 = vst [vmem:[%s24134_s17 + $0xe8] sm:$0xff] %v15033_v45  ;;  %17505 = vmatpush3.bf16.msra.mxu1 %v20468_v12 }
 0xb9d   :  { %v15051_v40 = vpack.c.bf16 %v15035_v21, %v15031_v17  ;;  %15524 = vst [vmem:[%s24134_s17 + $0xf8] sm:$0xff] %v15035_v21  ;;  %17506 = vmatprep.subr.bf16.mxu1 %v20469_v52 }
 0xb9e   :  { %15371 = vmatprep.mubr.bf16.mxu1 %v15049_v23 }
 0xb9f   :  { %15372 = vmatmul.mubr.bf16.gmra.mrb[156].mxu1 %v15048_v9 }
 0xba0   :  { %17507 = vmatpush3.bf16.msra.mxu1 %v20470_v37  ;;  %15412 = vmatprep.mubr.bf16.mxu1 %v23981_v47 }
 0xba1   :  { %17508 = vmatprep.subr.bf16.mxu1 %v20471_v59 }
 0xba4   :  { %17509 = vmatpush3.bf16.msra.mxu1 %v20472_v20 }
 0xba7   :  { %15413 = vmatmul.mubr.bf16.vlgmr.msra.gmra.mrb[160].mxu1 %v23973_v19 }
 0xba8   :  { %15420 = vmatprep.mubr.bf16.mxu1 %v24017_v57 }
 0xbaf   :  { %15421 = vmatmul.mubr.bf16.gmra.mrb[164].mxu1 %v24009_v1 }
 0xbb0   :  { %15428 = vmatprep.mubr.bf16.mxu1 %v15047_v38 }
 0xbb7   :  { %15429 = vmatmul.mubr.bf16.gmra.mrb[168].mxu1 %v24045_v33 }
 0xbb8   :  { %15436 = vmatprep.mubr.bf16.mxu1 %v15051_v40 }
 0xbbf   :  { %15437 = vmatmul.mubr.bf16.gmra.mrb[172].mxu1 %v15050_v8 }
 0xc5a   :  { %v17470_v49 = vpop.f32.mrb[144].mxu1 }
 0xc5b   :  { %v17471_v25 = vpop.f32.mrb[145].mxu1 }
 0xc5c   :  { %v17472_v11 = vadd.f32 %v17471_v25, %v17470_v49  ;;  %v17473_v6 = vpop.f32.mrb[146].mxu1 }
 0xc5d   :  { %v17474_v15 = vpop.f32.mrb[147].mxu1 }
 0xc5e   :  { %v17475_v47 = vadd.f32 %v17474_v15, %v17473_v6  ;;  %v15350_v31 = vadd.f32 %v17472_v11, %v17413_v60 }
 0xc60   :  { %v15353_v34 = vadd.f32 %v17475_v47, %v17413_v60 }
 0xc62   :  { %v17476_v22 = vpop.f32.mrb[148].mxu1 }
 0xc63   :  { %v17477_v44 = vpop.f32.mrb[149].mxu1 }
 0xc64   :  { %v17478_v7 = vadd.f32 %v17477_v44, %v17476_v22  ;;  %v17479_v55 = vpop.f32.mrb[150].mxu1 }
 0xc65   :  { %v17480_v19 = vpop.f32.mrb[151].mxu1 }
 0xc66   :  { %v17481_v61 = vadd.f32 %v17480_v19, %v17479_v55  ;;  %v15358_v62 = vadd.f32 %v17478_v7, %v17413_v60 }
 0xc68   :  { %v15361_v10 = vadd.f32 %v17481_v61, %v17413_v60 }
 0xc6a   :  { %v17482_v57 = vpop.f32.mrb[152].mxu1 }
 0xc6b   :  { %v17483_v2 = vpop.f32.mrb[153].mxu1 }
 0xc6c   :  { %v17484_v1 = vadd.f32 %v17483_v2, %v17482_v57  ;;  %v17485_v58 = vpop.f32.mrb[154].mxu1 }
 0xc6d   :  { %v17486_v13 = vpop.f32.mrb[155].mxu1 }
 0xc6e   :  { %v17487_v56 = vadd.f32 %v17486_v13, %v17485_v58  ;;  %v15366_v24 = vadd.f32 %v17484_v1, %v17413_v60 }
 0xc70   :  { %v15369_v8 = vadd.f32 %v17487_v56, %v17413_v60 }
 0xc72   :  { %v17488_v32 = vpop.f32.mrb[156].mxu1 }
 0xc73   :  { %v17489_v14 = vpop.f32.mrb[157].mxu1 }
 0xc74   :  { %v17490_v35 = vadd.f32 %v17489_v14, %v17488_v32  ;;  %v17491_v28 = vpop.f32.mrb[158].mxu1 }
 0xc75   :  { %v17492_v4 = vpop.f32.mrb[159].mxu1 }
 0xc76   :  { %v17493_v48 = vadd.f32 %v17492_v4, %v17491_v28  ;;  %v15374_v15 = vadd.f32 %v17490_v35, %v17413_v60 }
 0xc78   :  { %v15377_v19 = vadd.f32 %v17493_v48, %v17413_v60 }
 0xc7a   :  { %v17510_v0 = vpop.f32.mrb[160].mxu1 }
 0xc7b   :  { %v17511_v33 = vpop.f32.mrb[161].mxu1 }
 0xc7c   :  { %v17512_v36 = vadd.f32 %v17511_v33, %v17510_v0  ;;  %v17513_v41 = vpop.f32.mrb[162].mxu1 }
 0xc7d   :  { %v17514_v38 = vpop.f32.mrb[163].mxu1 }
 0xc7e   :  { %v15415_v27 = vadd.f32 %v17512_v36, %v15350_v31  ;;  %v17515_v46 = vadd.f32 %v17514_v38, %v17513_v41 }
 0xc80   :  { %v17446_v53 = vmul.f32 -1.442695, %v15415_v27  ;;  %v15418_v29 = vadd.f32 %v17515_v46, %v15353_v34 }
 0xc82   :  { %21145 = vpow2.f32 %v17446_v53  ;;  %v17447_v30 = vmul.f32 -1.442695, %v15418_v29  ;;  %v17516_v5 = vpop.f32.mrb[164].mxu1 }
 0xc83   :  { %v17517_v50 = vpop.f32.mrb[165].mxu1 }
 0xc84   :  { %21147 = vpow2.f32 %v17447_v30  ;;  %v17518_v54 = vadd.f32 %v17517_v50, %v17516_v5  ;;  %v17519_v26 = vpop.f32.mrb[166].mxu1 }
 0xc85   :  { %v17520_v42 = vpop.f32.mrb[167].mxu1 }
 0xc86   :  { %v15423_v43 = vadd.f32 %v17518_v54, %v15358_v62  ;;  %v17521_v3 = vadd.f32 %v17520_v42, %v17519_v26 }
 0xc88   :  { %v17448_v16 = vmul.f32 -1.442695, %v15423_v43  ;;  %v15426_v51 = vadd.f32 %v17521_v3, %v15361_v10 }
 0xc8a   :  { %21149 = vpow2.f32 %v17448_v16  ;;  %v17449_v39 = vmul.f32 -1.442695, %v15426_v51  ;;  %v17522_v12 = vpop.f32.mrb[168].mxu1 }
 0xc8b   :  { %v17523_v17 = vpop.f32.mrb[169].mxu1 }
 0xc8c   :  { %v21146_v18 = vpop.eup %21145  ;;  %21151 = vpow2.f32 %v17449_v39  ;;  %v17524_v52 = vadd.f32 %v17523_v17, %v17522_v12  ;;  %v17525_v63 = vpop.f32.mrb[170].mxu1 }
 0xc8d   :  { %v15469_v45 = vadd.f32 1.0, %v21146_v18  ;;  %v17526_v9 = vpop.f32.mrb[171].mxu1 }
 0xc8e   :  { %v21148_v21 = vpop.eup %21147  ;;  %v15431_v23 = vadd.f32 %v17524_v52, %v15366_v24  ;;  %v17527_v37 = vadd.f32 %v17526_v9, %v17525_v63 }
 0xc8f   :  { %21153 = vrcp.f32 %v15469_v45  ;;  %v15470_v40 = vadd.f32 1.0, %v21148_v21 }
 0xc90   :  { %v17450_v59 = vmul.f32 -1.442695, %v15431_v23  ;;  %v15434_v20 = vadd.f32 %v17527_v37, %v15369_v8 }
 0xc91   :  { %21155 = vrcp.f32 %v15470_v40 }
 0xc92   :  { %21157 = vpow2.f32 %v17450_v59  ;;  %v17451_v49 = vmul.f32 -1.442695, %v15434_v20  ;;  %v17528_v25 = vpop.f32.mrb[172].mxu1 }
 0xc93   :  { %v17529_v11 = vpop.f32.mrb[173].mxu1 }
 0xc94   :  { %v21150_v6 = vpop.eup %21149  ;;  %21159 = vpow2.f32 %v17451_v49  ;;  %v17530_v47 = vadd.f32 %v17529_v11, %v17528_v25  ;;  %v17531_v22 = vpop.f32.mrb[174].mxu1 }
 0xc95   :  { %v15471_v44 = vadd.f32 1.0, %v21150_v6  ;;  %v17532_v7 = vpop.f32.mrb[175].mxu1 }
 0xc96   :  { %v21152_v55 = vpop.eup %21151  ;;  %v15439_v61 = vadd.f32 %v17530_v47, %v15374_v15  ;;  %v17533_v57 = vadd.f32 %v17532_v7, %v17531_v22 }
 0xc97   :  { %21161 = vrcp.f32 %v15471_v44  ;;  %v15472_v2 = vadd.f32 1.0, %v21152_v55 }
 0xc98   :  { %v17452_v1 = vmul.f32 -1.442695, %v15439_v61  ;;  %v15442_v58 = vadd.f32 %v17533_v57, %v15377_v19 }
 0xc99   :  { %v21154_v13 = vpop.eup %21153  ;;  %21163 = vrcp.f32 %v15472_v2 }
 0xc9a   :  { %15525 = vst [vmem:[%s24133_s16] sm:$0xff] %v21154_v13  ;;  %21165 = vpow2.f32 %v17452_v1  ;;  %v17453_v56 = vmul.f32 -1.442695, %v15442_v58 }
 0xc9b   :  { %v21156_v32 = vpop.eup %21155 }
 0xc9c   :  { %v21158_v14 = vpop.eup %21157  ;;  %15526 = vst [vmem:[%s24133_s16 + $0x8] sm:$0xff] %v21156_v32  ;;  %21167 = vpow2.f32 %v17453_v56 }
 0xc9d   :  { %v15473_v35 = vadd.f32 1.0, %v21158_v14 }
 0xc9e   :  { %v21160_v28 = vpop.eup %21159 }
 0xc9f   :  { %21169 = vrcp.f32 %v15473_v35  ;;  %v15474_v4 = vadd.f32 1.0, %v21160_v28 }
 0xca1   :  { %v21162_v48 = vpop.eup %21161  ;;  %21171 = vrcp.f32 %v15474_v4 }
 0xca2   :  { %15527 = vst [vmem:[%s24133_s16 + $0x10] sm:$0xff] %v21162_v48 }
 0xca3   :  { %v21164_v60 = vpop.eup %21163 }
 0xca4   :  { %v21166_v0 = vpop.eup %21165  ;;  %15528 = vst [vmem:[%s24133_s16 + $0x18] sm:$0xff] %v21164_v60 }
 0xca5   :  { %v15475_v33 = vadd.f32 1.0, %v21166_v0 }
 0xca6   :  { %v21168_v31 = vpop.eup %21167 }
 0xca7   :  { %21173 = vrcp.f32 %v15475_v33  ;;  %v15476_v36 = vadd.f32 1.0, %v21168_v31 }
 0xca9   :  { %v21170_v41 = vpop.eup %21169  ;;  %21175 = vrcp.f32 %v15476_v36 }
 0xcaa   :  { %15529 = vst [vmem:[%s24133_s16 + $0x20] sm:$0xff] %v21170_v41 }
 0xcab   :  { %v21172_v38 = vpop.eup %21171 }
 0xcac   :  { %15530 = vst [vmem:[%s24133_s16 + $0x28] sm:$0xff] %v21172_v38 }
 0xcb1   :  { %v21174_v34 = vpop.eup %21173 }
 0xcb2   :  { %15531 = vst [vmem:[%s24133_s16 + $0x30] sm:$0xff] %v21174_v34 }
 0xcb3   :  { %v21176_v27 = vpop.eup %21175 }
 0xcb4   :  { %15532 = vst [vmem:[%s24133_s16 + $0x38] sm:$0xff] %v21176_v27 }
 0xcb5   :  { %15541 = vsyncpa [#allocation3], 1 }
 0xcb6   :  { %15542 = vsyncpa [#allocation5], 1 }
 0xcb7   :  { %15543 = vsyncpa [#allocation8], 1 }
 0xcb8   :  { %15544 = vsyncpa [#allocation11], 1 }
 0xcb9   :  { %15545 = vsyncpa [#allocation14], 1 }
 0xcba   :  { %15546 = vsyncpa [#allocation17], 1 }
 0xcbb   :  { %15547 = vsyncpa [#allocation20], 1 }
 0xcbc   :  { %15548 = vsyncpa [#allocation23], 1 }

</bundles_post_ra>
